<compile_context>
chip_gen: v6e
topology: v6e:2x2x1
jax: 0.10.0
libtpu: 0.0.40
codegen_flags: <defaults>
</compile_context>

<pallas_src>
import functools

import jax
import jax.numpy as jnp
from jax.experimental import pallas as pl
from jax.experimental.pallas import tpu as pltpu

# conv stack config: (name, kernel, stride) — Nature-DQN / RND trunk.
_CONV_CFG = (("c1", 8, 4), ("c2", 4, 2), ("c3", 3, 1))
_LEAKY_SLOPE = 0.01


def _conv_out(n, k, s):
    return (n - k) // s + 1


# ----------------------------------------------------------------------------
# In-kernel building blocks (all static slices / copies / 2-D dots)
# ----------------------------------------------------------------------------
def _conv_layer(src_ref, p_ref, w_ref, b_ref, *, k, s, oh, ow, cin, slope):
    """LeakyReLU(conv2d) of a (IH, IW, cin) VMEM ref -> (oh*ow, cout) bf16 value.

    Patches: oh*ow small VMEM block copies into the patch scratch ref.
    Conv:    k*k accumulated MXU matmuls (cin-deep) against row-slices of the
             VMEM-resident weight.  Nothing leaves VMEM.
    """
    cout = w_ref.shape[-1]
    for r in range(oh * ow):
        i, j = divmod(r, ow)
        p_ref[r] = src_ref[pl.ds(i * s, k), pl.ds(j * s, k), :]
    acc = jnp.zeros((oh * ow, cout), jnp.float32)
    for di in range(k):
        for dj in range(k):
            acc = acc + jnp.dot(
                p_ref[:, di, dj, :],
                w_ref[pl.ds((di * k + dj) * cin, cin), :],
                preferred_element_type=jnp.float32)
    acc = acc + b_ref[...]
    acc = jnp.where(acc >= 0.0, acc, slope * acc)
    return acc.astype(jnp.bfloat16)


def _store_rows(dst_ref, y, oh, ow):
    # (oh*ow, c) value -> (oh, ow, c) activation scratch, row by row (no reshape).
    for i in range(oh):
        dst_ref[i] = y[i * ow:(i + 1) * ow, :]


def _fused_kernel(x_ref, w1, b1, w2, b2, w3, b3, f1w, f1b, f2w, f2b,
                  o_ref, p1, a1, p2, a2, p3, *, dims, slope):
    (k1, oh1, ow1, c1in,
     k2, s2, oh2, ow2, c2in,
     k3, s3, oh3, ow3, c3in) = dims

    # conv1 (stride already folded into the space-to-depth input => s=1)
    y1 = _conv_layer(x_ref, p1, w1, b1, k=k1, s=1, oh=oh1, ow=ow1,
                     cin=c1in, slope=slope)
    _store_rows(a1, y1, oh1, ow1)

    # conv2
    y2 = _conv_layer(a1, p2, w2, b2, k=k2, s=s2, oh=oh2, ow=ow2,
                     cin=c2in, slope=slope)
    _store_rows(a2, y2, oh2, ow2)

    # conv3
    y3 = _conv_layer(a2, p3, w3, b3, k=k3, s=s3, oh=oh3, ow=ow3,
                     cin=c3in, slope=slope)

    # flatten (NHWC order; f1w rows pre-permuted to match) + Linear/ReLU/Linear
    c3out = w3.shape[-1]
    hidden = f1w.shape[-1]
    h = jnp.zeros((1, hidden), jnp.float32)
    for r in range(oh3 * ow3):
        h = h + jnp.dot(y3[r:r + 1, :], f1w[pl.ds(r * c3out, c3out), :],
                        preferred_element_type=jnp.float32)
    h = jnp.maximum(h + f1b[...], 0.0).astype(jnp.bfloat16)
    out = jnp.dot(h, f2w[...], preferred_element_type=jnp.float32) + f2b[...]
    o_ref[...] = out.astype(o_ref.dtype)


# ----------------------------------------------------------------------------
# Fused forward wrapper: one pallas_call over the whole network
# ----------------------------------------------------------------------------
@jax.jit
def atari_feature_model(obs_nchw, prepped):
    """obs (B, C, H, W) float32 -> (B, feature_dim) float32."""
    B, C, H, W = obs_nchw.shape
    (_, k1, s1), (_, k2, s2), (_, k3, s3) = _CONV_CFG
    assert H % s1 == 0 and W % s1 == 0, (
        "fused kernel folds conv1's stride into a space-to-depth input "
        "packing; H and W must be multiples of the conv1 stride")

    oh1, ow1 = _conv_out(H, k1, s1), _conv_out(W, k1, s1)
    oh2, ow2 = _conv_out(oh1, k2, s2), _conv_out(ow1, k2, s2)
    oh3, ow3 = _conv_out(oh2, k3, s3), _conv_out(ow2, k3, s3)

    c1in = s1 * s1 * C                     # space-to-depth channels
    c2in = prepped["c1_b"].shape[-1]       # conv1 out channels (32)
    c3in = prepped["c2_b"].shape[-1]       # conv2 out channels (64)
    feat = prepped["f2_w"].shape[-1]
    k1s = k1 // s1                         # conv1 kernel in s2d domain (2)

    # NCHW -> NHWC -> space-to-depth(conv1 stride) -> bf16 : one XLA copy.
    HS, WS = H // s1, W // s1
    x = jnp.transpose(obs_nchw, (0, 2, 3, 1))
    x = x.reshape(B, HS, s1, WS, s1, C).transpose(0, 1, 3, 2, 4, 5)
    x = x.reshape(B, HS, WS, c1in).astype(jnp.bfloat16)

    dims = (k1s, oh1, ow1, c1in,
            k2, s2, oh2, ow2, c2in,
            k3, s3, oh3, ow3, c3in)
    kernel = functools.partial(_fused_kernel, dims=dims, slope=_LEAKY_SLOPE)

    def resident(arr):
        return pl.BlockSpec(arr.shape, lambda i, _nd=arr.ndim: (0,) * _nd)

    out = pl.pallas_call(
        kernel,
        out_shape=jax.ShapeDtypeStruct((B, 1, feat), jnp.float32),
        grid=(B,),
        in_specs=[
            pl.BlockSpec((None, HS, WS, c1in), lambda i: (i, 0, 0, 0)),
            resident(prepped["c1_w"]), resident(prepped["c1_b"]),
            resident(prepped["c2_w"]), resident(prepped["c2_b"]),
            resident(prepped["c3_w"]), resident(prepped["c3_b"]),
            resident(prepped["f1_w"]), resident(prepped["f1_b"]),
            resident(prepped["f2_w"]), resident(prepped["f2_b"]),
        ],
        out_specs=pl.BlockSpec((None, 1, feat), lambda i: (i, 0, 0)),
        scratch_shapes=[
            pltpu.VMEM((oh1 * ow1, k1s, k1s, c1in), jnp.bfloat16),  # conv1 patches
            pltpu.VMEM((oh1, ow1, c2in), jnp.bfloat16),             # conv1 act
            pltpu.VMEM((oh2 * ow2, k2, k2, c2in), jnp.bfloat16),    # conv2 patches
            pltpu.VMEM((oh2, ow2, c3in), jnp.bfloat16),             # conv2 act
            pltpu.VMEM((oh3 * ow3, k3, k3, c3in), jnp.bfloat16),    # conv3 patches
        ],
        compiler_params=pltpu.CompilerParams(
            dimension_semantics=("parallel",),
            vmem_limit_bytes=64 * 1024 * 1024),
    )(x, prepped["c1_w"], prepped["c1_b"], prepped["c2_w"], prepped["c2_b"],
      prepped["c3_w"], prepped["c3_b"], prepped["f1_w"], prepped["f1_b"],
      prepped["f2_w"], prepped["f2_b"])
    return out.reshape(B, feat)


# ----------------------------------------------------------------------------
# Parameter init (torch layout) + one-time prep into kernel-friendly layout
# ----------------------------------------------------------------------------
def _init_conv(key, cout, cin, kh, kw):
    kw_, kb = jax.random.split(key)
    bound = 1.0 / float(cin * kh * kw) ** 0.5
    w = jax.random.uniform(kw_, (cout, cin, kh, kw), jnp.float32, -bound, bound)
    b = jax.random.uniform(kb, (cout,), jnp.float32, -bound, bound)
    return w, b


def _init_linear(key, din, dout):
    kw_, kb = jax.random.split(key)
    bound = 1.0 / float(din) ** 0.5
    w = jax.random.uniform(kw_, (din, dout), jnp.float32, -bound, bound)
    b = jax.random.uniform(kb, (dout,), jnp.float32, -bound, bound)
    return w, b


def init_params(key, in_channels, h, w, feature_dim=256, hidden_dim=256):
    k1, k2, k3, k4, k5 = jax.random.split(key, 5)
    c1_w, c1_b = _init_conv(k1, 32, in_channels, 8, 8)
    c2_w, c2_b = _init_conv(k2, 64, 32, 4, 4)
    c3_w, c3_b = _init_conv(k3, 64, 64, 3, 3)
    oh, ow = h, w
    for _, k, s in _CONV_CFG:
        oh, ow = _conv_out(oh, k, s), _conv_out(ow, k, s)
    conv_output_dim = 64 * oh * ow
    f1_w, f1_b = _init_linear(k4, conv_output_dim, hidden_dim)
    f2_w, f2_b = _init_linear(k5, hidden_dim, feature_dim)
    params = dict(c1_w=c1_w, c1_b=c1_b, c2_w=c2_w, c2_b=c2_b,
                  c3_w=c3_w, c3_b=c3_b, f1_w=f1_w, f1_b=f1_b,
                  f2_w=f2_w, f2_b=f2_b)
    return params, (64, oh, ow)   # (C, OH, OW) of conv3 output


def prepare_params(params, conv_out_shape):
    """One-time, outside the hot path: fold conv1's stride into a
    space-to-depth weight layout, put conv weights in (kh,kw,cin,cout) matmul
    layout, permute f1 rows to NHWC flatten order, cast to bf16."""
    C3, OH3, OW3 = conv_out_shape
    s1 = _CONV_CFG[0][2]
    prepped = {}

    # conv1: rows ordered (DI, DJ, hi, wi, cin) to match the space-to-depth
    # input channel order (hi, wi, cin) and the kernel's per-(DI,DJ) slices.
    w = params["c1_w"]                                      # (cout, cin, 8, 8)
    cout, cin, kh, kw = w.shape
    w = w.reshape(cout, cin, kh // s1, s1, kw // s1, s1)    # (cout,cin,DI,hi,DJ,wi)
    w = jnp.transpose(w, (2, 4, 3, 5, 1, 0))                # (DI,DJ,hi,wi,cin,cout)
    prepped["c1_w"] = w.reshape(kh * kw * cin, cout).astype(jnp.bfloat16)
    prepped["c1_b"] = params["c1_b"].astype(jnp.float32).reshape(1, -1)

    for name in ("c2", "c3"):
        w = params[name + "_w"]                             # (cout, cin, kh, kw)
        cout, cin, kh, kw = w.shape
        w = jnp.transpose(w, (2, 3, 1, 0)).reshape(kh * kw * cin, cout)
        prepped[name + "_w"] = w.astype(jnp.bfloat16)
        prepped[name + "_b"] = params[name + "_b"].astype(jnp.float32).reshape(1, -1)

    # f1: torch flattens conv output in NCHW (c, oh, ow) order; the kernel
    # produces (oh, ow, c) order, so permute the rows once here.
    f1_w = params["f1_w"]
    hidden = f1_w.shape[1]
    f1_w = jnp.transpose(f1_w.reshape(C3, OH3, OW3, hidden), (1, 2, 0, 3))
    prepped["f1_w"] = f1_w.reshape(C3 * OH3 * OW3, hidden).astype(jnp.bfloat16)
    prepped["f1_b"] = params["f1_b"].astype(jnp.float32).reshape(1, -1)
    prepped["f2_w"] = params["f2_w"].astype(jnp.bfloat16)
    prepped["f2_b"] = params["f2_b"].astype(jnp.float32).reshape(1, -1)
    return prepped


# ----------------------------------------------------------------------------
# Pure-JAX reference (same bf16/f32 math, torch weight layout + NCHW flatten)
# ----------------------------------------------------------------------------
def _im2col(x_nhwc, kh, kw, stride):
    B, H, W, C = x_nhwc.shape
    OH = _conv_out(H, kh, stride)
    OW = _conv_out(W, kw, stride)
    cols = []
    for i in range(kh):
        for j in range(kw):
            cols.append(x_nhwc[:, i:i + OH * stride:stride,
                               j:j + OW * stride:stride, :])
    p = jnp.stack(cols, axis=3)  # (B, OH, OW, kh*kw, C)
    return p.reshape(B * OH * OW, kh * kw * C), OH, OW


def _ref_model(obs_nchw, params):
    x = jnp.transpose(obs_nchw, (0, 2, 3, 1)).astype(jnp.bfloat16)
    for name, k, s in _CONV_CFG:
        w = params[name + "_w"]
        b = params[name + "_b"].astype(jnp.float32)
        cout, cin, kh, kw = w.shape
        patches, OH, OW = _im2col(x, kh, kw, s)
        w2 = jnp.transpose(w, (2, 3, 1, 0)).reshape(kh * kw * cin, cout)
        y = jnp.dot(patches, w2.astype(jnp.bfloat16),
                    preferred_element_type=jnp.float32) + b
        y = jnp.where(y >= 0.0, y, _LEAKY_SLOPE * y)
        x = y.astype(jnp.bfloat16).reshape(x.shape[0], OH, OW, cout)
    # Torch semantics: NCHW flatten, then MLP with torch-order f1_w.
    x = jnp.transpose(x, (0, 3, 1, 2)).reshape(x.shape[0], -1)
    h = jnp.dot(x, params["f1_w"].astype(jnp.bfloat16),
                preferred_element_type=jnp.float32) + params["f1_b"]
    h = jnp.maximum(h, 0.0).astype(jnp.bfloat16)
    return jnp.dot(h, params["f2_w"].astype(jnp.bfloat16),
                   preferred_element_type=jnp.float32) + params["f2_b"]


if __name__ == "__main__":
    key = jax.random.PRNGKey(0)
    k_obs, k_par = jax.random.split(key)

    B, C, H, W = 2, 4, 36, 36          # small Atari-like stacked frames
    feature_dim = 256
    obs = jax.random.uniform(k_obs, (B, C, H, W), jnp.float32)

    params, conv_out_shape = init_params(k_par, C, H, W, feature_dim=feature_dim)
    prepped = prepare_params(params, conv_out_shape)

    out = jax.block_until_ready(atari_feature_model(obs, prepped))
    assert out.shape == (B, feature_dim), out.shape

    ref = jax.block_until_ready(_ref_model(obs, params))
    assert jnp.allclose(out, ref, atol=1e-2, rtol=1e-2), "mismatch vs JAX reference"

    print("KERNEL_OK")
</pallas_src>

<mosaic_0001>
module attributes {stable_mosaic.version = 11 : i64} {
  func.func @_fused_kernel(%arg0: i32, %arg1: memref<1x9x9x64xbf16, #tpu.memory_space<vmem>>, %arg2: memref<256x32xbf16, #tpu.memory_space<vmem>>, %arg3: memref<1x32xf32, #tpu.memory_space<vmem>>, %arg4: memref<512x64xbf16, #tpu.memory_space<vmem>>, %arg5: memref<1x64xf32, #tpu.memory_space<vmem>>, %arg6: memref<576x64xbf16, #tpu.memory_space<vmem>>, %arg7: memref<1x64xf32, #tpu.memory_space<vmem>>, %arg8: memref<64x256xbf16, #tpu.memory_space<vmem>>, %arg9: memref<1x256xf32, #tpu.memory_space<vmem>>, %arg10: memref<256x256xbf16, #tpu.memory_space<vmem>>, %arg11: memref<1x256xf32, #tpu.memory_space<vmem>>, %arg12: memref<1x1x256xf32, #tpu.memory_space<vmem>>, %arg13: memref<64x2x2x64xbf16, #tpu.memory_space<vmem>>, %arg14: memref<8x8x32xbf16, #tpu.memory_space<vmem>>, %arg15: memref<9x4x4x32xbf16, #tpu.memory_space<vmem>>, %arg16: memref<3x3x64xbf16, #tpu.memory_space<vmem>>, %arg17: memref<1x3x3x64xbf16, #tpu.memory_space<vmem>>) attributes {dimension_semantics = [#tpu.dimension_semantics<parallel>], iteration_bounds = array<i64: 2>, scalar_prefetch = 0 : i64, scratch_operands = 5 : i64, tpu.core_type = #tpu.core_type<tc>, window_params = [{transform_indices = @transform_0, window_bounds = array<i64: 1, 9, 9, 64>}, {pipeline_mode = #tpu.pipeline_mode<synchronous>, transform_indices = @transform_1, window_bounds = array<i64: 256, 32>}, {pipeline_mode = #tpu.pipeline_mode<synchronous>, transform_indices = @transform_2, window_bounds = array<i64: 1, 32>}, {pipeline_mode = #tpu.pipeline_mode<synchronous>, transform_indices = @transform_3, window_bounds = array<i64: 512, 64>}, {pipeline_mode = #tpu.pipeline_mode<synchronous>, transform_indices = @transform_4, window_bounds = array<i64: 1, 64>}, {pipeline_mode = #tpu.pipeline_mode<synchronous>, transform_indices = @transform_5, window_bounds = array<i64: 576, 64>}, {pipeline_mode = #tpu.pipeline_mode<synchronous>, transform_indices = @transform_6, window_bounds = array<i64: 1, 64>}, {pipeline_mode = #tpu.pipeline_mode<synchronous>, transform_indices = @transform_7, window_bounds = array<i64: 64, 256>}, {pipeline_mode = #tpu.pipeline_mode<synchronous>, transform_indices = @transform_8, window_bounds = array<i64: 1, 256>}, {pipeline_mode = #tpu.pipeline_mode<synchronous>, transform_indices = @transform_9, window_bounds = array<i64: 256, 256>}, {pipeline_mode = #tpu.pipeline_mode<synchronous>, transform_indices = @transform_10, window_bounds = array<i64: 1, 256>}, {transform_indices = @transform_11, window_bounds = array<i64: 1, 1, 256>}]} {
    %c0 = arith.constant 0 : index
    %c0_0 = arith.constant 0 : index
    %c0_1 = arith.constant 0 : index
    %c0_2 = arith.constant 0 : index
    %0 = vector.load %arg1[%c0, %c0_0, %c0_1, %c0_2] : memref<1x9x9x64xbf16, #tpu.memory_space<vmem>>, vector<1x2x2x64xbf16>
    %1 = vector.shape_cast %0 : vector<1x2x2x64xbf16> to vector<2x2x64xbf16>
    %c0_3 = arith.constant 0 : index
    %c0_4 = arith.constant 0 : index
    %c0_5 = arith.constant 0 : index
    %c0_6 = arith.constant 0 : index
    %2 = vector.load %arg13[%c0_3, %c0_4, %c0_5, %c0_6] : memref<64x2x2x64xbf16, #tpu.memory_space<vmem>>, vector<1x2x2x64xbf16>
    %3 = vector.shape_cast %2 : vector<1x2x2x64xbf16> to vector<2x2x64xbf16>
    %4 = vector.shape_cast %1 : vector<2x2x64xbf16> to vector<1x2x2x64xbf16>
    tpu.vector_store %arg13[%c0_3, %c0_4, %c0_5, %c0_6], %4 {strides = array<i32>} : memref<64x2x2x64xbf16, #tpu.memory_space<vmem>>, vector<1x2x2x64xbf16>,
    %c0_7 = arith.constant 0 : index
    %c0_8 = arith.constant 0 : index
    %c1 = arith.constant 1 : index
    %c0_9 = arith.constant 0 : index
    %5 = vector.load %arg1[%c0_7, %c0_8, %c1, %c0_9] : memref<1x9x9x64xbf16, #tpu.memory_space<vmem>>, vector<1x2x2x64xbf16>
    %6 = vector.shape_cast %5 : vector<1x2x2x64xbf16> to vector<2x2x64xbf16>
    %c1_10 = arith.constant 1 : index
    %c0_11 = arith.constant 0 : index
    %c0_12 = arith.constant 0 : index
    %c0_13 = arith.constant 0 : index
    %7 = vector.load %arg13[%c1_10, %c0_11, %c0_12, %c0_13] : memref<64x2x2x64xbf16, #tpu.memory_space<vmem>>, vector<1x2x2x64xbf16>
    %8 = vector.shape_cast %7 : vector<1x2x2x64xbf16> to vector<2x2x64xbf16>
    %9 = vector.shape_cast %6 : vector<2x2x64xbf16> to vector<1x2x2x64xbf16>
    tpu.vector_store %arg13[%c1_10, %c0_11, %c0_12, %c0_13], %9 {strides = array<i32>} : memref<64x2x2x64xbf16, #tpu.memory_space<vmem>>, vector<1x2x2x64xbf16>,
    %c0_14 = arith.constant 0 : index
    %c0_15 = arith.constant 0 : index
    %c2 = arith.constant 2 : index
    %c0_16 = arith.constant 0 : index
    %10 = vector.load %arg1[%c0_14, %c0_15, %c2, %c0_16] : memref<1x9x9x64xbf16, #tpu.memory_space<vmem>>, vector<1x2x2x64xbf16>
    %11 = vector.shape_cast %10 : vector<1x2x2x64xbf16> to vector<2x2x64xbf16>
    %c2_17 = arith.constant 2 : index
    %c0_18 = arith.constant 0 : index
    %c0_19 = arith.constant 0 : index
    %c0_20 = arith.constant 0 : index
    %12 = vector.load %arg13[%c2_17, %c0_18, %c0_19, %c0_20] : memref<64x2x2x64xbf16, #tpu.memory_space<vmem>>, vector<1x2x2x64xbf16>
    %13 = vector.shape_cast %12 : vector<1x2x2x64xbf16> to vector<2x2x64xbf16>
    %14 = vector.shape_cast %11 : vector<2x2x64xbf16> to vector<1x2x2x64xbf16>
    tpu.vector_store %arg13[%c2_17, %c0_18, %c0_19, %c0_20], %14 {strides = array<i32>} : memref<64x2x2x64xbf16, #tpu.memory_space<vmem>>, vector<1x2x2x64xbf16>,
    %c0_21 = arith.constant 0 : index
    %c0_22 = arith.constant 0 : index
    %c3 = arith.constant 3 : index
    %c0_23 = arith.constant 0 : index
    %15 = vector.load %arg1[%c0_21, %c0_22, %c3, %c0_23] : memref<1x9x9x64xbf16, #tpu.memory_space<vmem>>, vector<1x2x2x64xbf16>
    %16 = vector.shape_cast %15 : vector<1x2x2x64xbf16> to vector<2x2x64xbf16>
    %c3_24 = arith.constant 3 : index
    %c0_25 = arith.constant 0 : index
    %c0_26 = arith.constant 0 : index
    %c0_27 = arith.constant 0 : index
    %17 = vector.load %arg13[%c3_24, %c0_25, %c0_26, %c0_27] : memref<64x2x2x64xbf16, #tpu.memory_space<vmem>>, vector<1x2x2x64xbf16>
    %18 = vector.shape_cast %17 : vector<1x2x2x64xbf16> to vector<2x2x64xbf16>
    %19 = vector.shape_cast %16 : vector<2x2x64xbf16> to vector<1x2x2x64xbf16>
    tpu.vector_store %arg13[%c3_24, %c0_25, %c0_26, %c0_27], %19 {strides = array<i32>} : memref<64x2x2x64xbf16, #tpu.memory_space<vmem>>, vector<1x2x2x64xbf16>,
    %c0_28 = arith.constant 0 : index
    %c0_29 = arith.constant 0 : index
    %c4 = arith.constant 4 : index
    %c0_30 = arith.constant 0 : index
    %20 = vector.load %arg1[%c0_28, %c0_29, %c4, %c0_30] : memref<1x9x9x64xbf16, #tpu.memory_space<vmem>>, vector<1x2x2x64xbf16>
    %21 = vector.shape_cast %20 : vector<1x2x2x64xbf16> to vector<2x2x64xbf16>
    %c4_31 = arith.constant 4 : index
    %c0_32 = arith.constant 0 : index
    %c0_33 = arith.constant 0 : index
    %c0_34 = arith.constant 0 : index
    %22 = vector.load %arg13[%c4_31, %c0_32, %c0_33, %c0_34] : memref<64x2x2x64xbf16, #tpu.memory_space<vmem>>, vector<1x2x2x64xbf16>
    %23 = vector.shape_cast %22 : vector<1x2x2x64xbf16> to vector<2x2x64xbf16>
    %24 = vector.shape_cast %21 : vector<2x2x64xbf16> to vector<1x2x2x64xbf16>
    tpu.vector_store %arg13[%c4_31, %c0_32, %c0_33, %c0_34], %24 {strides = array<i32>} : memref<64x2x2x64xbf16, #tpu.memory_space<vmem>>, vector<1x2x2x64xbf16>,
    %c0_35 = arith.constant 0 : index
    %c0_36 = arith.constant 0 : index
    %c5 = arith.constant 5 : index
    %c0_37 = arith.constant 0 : index
    %25 = vector.load %arg1[%c0_35, %c0_36, %c5, %c0_37] : memref<1x9x9x64xbf16, #tpu.memory_space<vmem>>, vector<1x2x2x64xbf16>
    %26 = vector.shape_cast %25 : vector<1x2x2x64xbf16> to vector<2x2x64xbf16>
    %c5_38 = arith.constant 5 : index
    %c0_39 = arith.constant 0 : index
    %c0_40 = arith.constant 0 : index
    %c0_41 = arith.constant 0 : index
    %27 = vector.load %arg13[%c5_38, %c0_39, %c0_40, %c0_41] : memref<64x2x2x64xbf16, #tpu.memory_space<vmem>>, vector<1x2x2x64xbf16>
    %28 = vector.shape_cast %27 : vector<1x2x2x64xbf16> to vector<2x2x64xbf16>
    %29 = vector.shape_cast %26 : vector<2x2x64xbf16> to vector<1x2x2x64xbf16>
    tpu.vector_store %arg13[%c5_38, %c0_39, %c0_40, %c0_41], %29 {strides = array<i32>} : memref<64x2x2x64xbf16, #tpu.memory_space<vmem>>, vector<1x2x2x64xbf16>,
    %c0_42 = arith.constant 0 : index
    %c0_43 = arith.constant 0 : index
    %c6 = arith.constant 6 : index
    %c0_44 = arith.constant 0 : index
    %30 = vector.load %arg1[%c0_42, %c0_43, %c6, %c0_44] : memref<1x9x9x64xbf16, #tpu.memory_space<vmem>>, vector<1x2x2x64xbf16>
    %31 = vector.shape_cast %30 : vector<1x2x2x64xbf16> to vector<2x2x64xbf16>
    %c6_45 = arith.constant 6 : index
    %c0_46 = arith.constant 0 : index
    %c0_47 = arith.constant 0 : index
    %c0_48 = arith.constant 0 : index
    %32 = vector.load %arg13[%c6_45, %c0_46, %c0_47, %c0_48] : memref<64x2x2x64xbf16, #tpu.memory_space<vmem>>, vector<1x2x2x64xbf16>
    %33 = vector.shape_cast %32 : vector<1x2x2x64xbf16> to vector<2x2x64xbf16>
    %34 = vector.shape_cast %31 : vector<2x2x64xbf16> to vector<1x2x2x64xbf16>
    tpu.vector_store %arg13[%c6_45, %c0_46, %c0_47, %c0_48], %34 {strides = array<i32>} : memref<64x2x2x64xbf16, #tpu.memory_space<vmem>>, vector<1x2x2x64xbf16>,
    %c0_49 = arith.constant 0 : index
    %c0_50 = arith.constant 0 : index
    %c7 = arith.constant 7 : index
    %c0_51 = arith.constant 0 : index
    %35 = vector.load %arg1[%c0_49, %c0_50, %c7, %c0_51] : memref<1x9x9x64xbf16, #tpu.memory_space<vmem>>, vector<1x2x2x64xbf16>
    %36 = vector.shape_cast %35 : vector<1x2x2x64xbf16> to vector<2x2x64xbf16>
    %c7_52 = arith.constant 7 : index
    %c0_53 = arith.constant 0 : index
    %c0_54 = arith.constant 0 : index
    %c0_55 = arith.constant 0 : index
    %37 = vector.load %arg13[%c7_52, %c0_53, %c0_54, %c0_55] : memref<64x2x2x64xbf16, #tpu.memory_space<vmem>>, vector<1x2x2x64xbf16>
    %38 = vector.shape_cast %37 : vector<1x2x2x64xbf16> to vector<2x2x64xbf16>
    %39 = vector.shape_cast %36 : vector<2x2x64xbf16> to vector<1x2x2x64xbf16>
    tpu.vector_store %arg13[%c7_52, %c0_53, %c0_54, %c0_55], %39 {strides = array<i32>} : memref<64x2x2x64xbf16, #tpu.memory_space<vmem>>, vector<1x2x2x64xbf16>,
    %c0_56 = arith.constant 0 : index
    %c1_57 = arith.constant 1 : index
    %c0_58 = arith.constant 0 : index
    %c0_59 = arith.constant 0 : index
    %40 = vector.load %arg1[%c0_56, %c1_57, %c0_58, %c0_59] : memref<1x9x9x64xbf16, #tpu.memory_space<vmem>>, vector<1x2x2x64xbf16>
    %41 = vector.shape_cast %40 : vector<1x2x2x64xbf16> to vector<2x2x64xbf16>
    %c8 = arith.constant 8 : index
    %c0_60 = arith.constant 0 : index
    %c0_61 = arith.constant 0 : index
    %c0_62 = arith.constant 0 : index
    %42 = vector.load %arg13[%c8, %c0_60, %c0_61, %c0_62] : memref<64x2x2x64xbf16, #tpu.memory_space<vmem>>, vector<1x2x2x64xbf16>
    %43 = vector.shape_cast %42 : vector<1x2x2x64xbf16> to vector<2x2x64xbf16>
    %44 = vector.shape_cast %41 : vector<2x2x64xbf16> to vector<1x2x2x64xbf16>
    tpu.vector_store %arg13[%c8, %c0_60, %c0_61, %c0_62], %44 {strides = array<i32>} : memref<64x2x2x64xbf16, #tpu.memory_space<vmem>>, vector<1x2x2x64xbf16>,
    %c0_63 = arith.constant 0 : index
    %c1_64 = arith.constant 1 : index
    %c1_65 = arith.constant 1 : index
    %c0_66 = arith.constant 0 : index
    %45 = vector.load %arg1[%c0_63, %c1_64, %c1_65, %c0_66] : memref<1x9x9x64xbf16, #tpu.memory_space<vmem>>, vector<1x2x2x64xbf16>
    %46 = vector.shape_cast %45 : vector<1x2x2x64xbf16> to vector<2x2x64xbf16>
    %c9 = arith.constant 9 : index
    %c0_67 = arith.constant 0 : index
    %c0_68 = arith.constant 0 : index
    %c0_69 = arith.constant 0 : index
    %47 = vector.load %arg13[%c9, %c0_67, %c0_68, %c0_69] : memref<64x2x2x64xbf16, #tpu.memory_space<vmem>>, vector<1x2x2x64xbf16>
    %48 = vector.shape_cast %47 : vector<1x2x2x64xbf16> to vector<2x2x64xbf16>
    %49 = vector.shape_cast %46 : vector<2x2x64xbf16> to vector<1x2x2x64xbf16>
    tpu.vector_store %arg13[%c9, %c0_67, %c0_68, %c0_69], %49 {strides = array<i32>} : memref<64x2x2x64xbf16, #tpu.memory_space<vmem>>, vector<1x2x2x64xbf16>,
    %c0_70 = arith.constant 0 : index
    %c1_71 = arith.constant 1 : index
    %c2_72 = arith.constant 2 : index
    %c0_73 = arith.constant 0 : index
    %50 = vector.load %arg1[%c0_70, %c1_71, %c2_72, %c0_73] : memref<1x9x9x64xbf16, #tpu.memory_space<vmem>>, vector<1x2x2x64xbf16>
    %51 = vector.shape_cast %50 : vector<1x2x2x64xbf16> to vector<2x2x64xbf16>
    %c10 = arith.constant 10 : index
    %c0_74 = arith.constant 0 : index
    %c0_75 = arith.constant 0 : index
    %c0_76 = arith.constant 0 : index
    %52 = vector.load %arg13[%c10, %c0_74, %c0_75, %c0_76] : memref<64x2x2x64xbf16, #tpu.memory_space<vmem>>, vector<1x2x2x64xbf16>
    %53 = vector.shape_cast %52 : vector<1x2x2x64xbf16> to vector<2x2x64xbf16>
    %54 = vector.shape_cast %51 : vector<2x2x64xbf16> to vector<1x2x2x64xbf16>
    tpu.vector_store %arg13[%c10, %c0_74, %c0_75, %c0_76], %54 {strides = array<i32>} : memref<64x2x2x64xbf16, #tpu.memory_space<vmem>>, vector<1x2x2x64xbf16>,
    %c0_77 = arith.constant 0 : index
    %c1_78 = arith.constant 1 : index
    %c3_79 = arith.constant 3 : index
    %c0_80 = arith.constant 0 : index
    %55 = vector.load %arg1[%c0_77, %c1_78, %c3_79, %c0_80] : memref<1x9x9x64xbf16, #tpu.memory_space<vmem>>, vector<1x2x2x64xbf16>
    %56 = vector.shape_cast %55 : vector<1x2x2x64xbf16> to vector<2x2x64xbf16>
    %c11 = arith.constant 11 : index
    %c0_81 = arith.constant 0 : index
    %c0_82 = arith.constant 0 : index
    %c0_83 = arith.constant 0 : index
    %57 = vector.load %arg13[%c11, %c0_81, %c0_82, %c0_83] : memref<64x2x2x64xbf16, #tpu.memory_space<vmem>>, vector<1x2x2x64xbf16>
    %58 = vector.shape_cast %57 : vector<1x2x2x64xbf16> to vector<2x2x64xbf16>
    %59 = vector.shape_cast %56 : vector<2x2x64xbf16> to vector<1x2x2x64xbf16>
    tpu.vector_store %arg13[%c11, %c0_81, %c0_82, %c0_83], %59 {strides = array<i32>} : memref<64x2x2x64xbf16, #tpu.memory_space<vmem>>, vector<1x2x2x64xbf16>,
    %c0_84 = arith.constant 0 : index
    %c1_85 = arith.constant 1 : index
    %c4_86 = arith.constant 4 : index
    %c0_87 = arith.constant 0 : index
    %60 = vector.load %arg1[%c0_84, %c1_85, %c4_86, %c0_87] : memref<1x9x9x64xbf16, #tpu.memory_space<vmem>>, vector<1x2x2x64xbf16>
    %61 = vector.shape_cast %60 : vector<1x2x2x64xbf16> to vector<2x2x64xbf16>
    %c12 = arith.constant 12 : index
    %c0_88 = arith.constant 0 : index
    %c0_89 = arith.constant 0 : index
    %c0_90 = arith.constant 0 : index
    %62 = vector.load %arg13[%c12, %c0_88, %c0_89, %c0_90] : memref<64x2x2x64xbf16, #tpu.memory_space<vmem>>, vector<1x2x2x64xbf16>
    %63 = vector.shape_cast %62 : vector<1x2x2x64xbf16> to vector<2x2x64xbf16>
    %64 = vector.shape_cast %61 : vector<2x2x64xbf16> to vector<1x2x2x64xbf16>
    tpu.vector_store %arg13[%c12, %c0_88, %c0_89, %c0_90], %64 {strides = array<i32>} : memref<64x2x2x64xbf16, #tpu.memory_space<vmem>>, vector<1x2x2x64xbf16>,
    %c0_91 = arith.constant 0 : index
    %c1_92 = arith.constant 1 : index
    %c5_93 = arith.constant 5 : index
    %c0_94 = arith.constant 0 : index
    %65 = vector.load %arg1[%c0_91, %c1_92, %c5_93, %c0_94] : memref<1x9x9x64xbf16, #tpu.memory_space<vmem>>, vector<1x2x2x64xbf16>
    %66 = vector.shape_cast %65 : vector<1x2x2x64xbf16> to vector<2x2x64xbf16>
    %c13 = arith.constant 13 : index
    %c0_95 = arith.constant 0 : index
    %c0_96 = arith.constant 0 : index
    %c0_97 = arith.constant 0 : index
    %67 = vector.load %arg13[%c13, %c0_95, %c0_96, %c0_97] : memref<64x2x2x64xbf16, #tpu.memory_space<vmem>>, vector<1x2x2x64xbf16>
    %68 = vector.shape_cast %67 : vector<1x2x2x64xbf16> to vector<2x2x64xbf16>
    %69 = vector.shape_cast %66 : vector<2x2x64xbf16> to vector<1x2x2x64xbf16>
    tpu.vector_store %arg13[%c13, %c0_95, %c0_96, %c0_97], %69 {strides = array<i32>} : memref<64x2x2x64xbf16, #tpu.memory_space<vmem>>, vector<1x2x2x64xbf16>,
    %c0_98 = arith.constant 0 : index
    %c1_99 = arith.constant 1 : index
    %c6_100 = arith.constant 6 : index
    %c0_101 = arith.constant 0 : index
    %70 = vector.load %arg1[%c0_98, %c1_99, %c6_100, %c0_101] : memref<1x9x9x64xbf16, #tpu.memory_space<vmem>>, vector<1x2x2x64xbf16>
    %71 = vector.shape_cast %70 : vector<1x2x2x64xbf16> to vector<2x2x64xbf16>
    %c14 = arith.constant 14 : index
    %c0_102 = arith.constant 0 : index
    %c0_103 = arith.constant 0 : index
    %c0_104 = arith.constant 0 : index
    %72 = vector.load %arg13[%c14, %c0_102, %c0_103, %c0_104] : memref<64x2x2x64xbf16, #tpu.memory_space<vmem>>, vector<1x2x2x64xbf16>
    %73 = vector.shape_cast %72 : vector<1x2x2x64xbf16> to vector<2x2x64xbf16>
    %74 = vector.shape_cast %71 : vector<2x2x64xbf16> to vector<1x2x2x64xbf16>
    tpu.vector_store %arg13[%c14, %c0_102, %c0_103, %c0_104], %74 {strides = array<i32>} : memref<64x2x2x64xbf16, #tpu.memory_space<vmem>>, vector<1x2x2x64xbf16>,
    %c0_105 = arith.constant 0 : index
    %c1_106 = arith.constant 1 : index
    %c7_107 = arith.constant 7 : index
    %c0_108 = arith.constant 0 : index
    %75 = vector.load %arg1[%c0_105, %c1_106, %c7_107, %c0_108] : memref<1x9x9x64xbf16, #tpu.memory_space<vmem>>, vector<1x2x2x64xbf16>
    %76 = vector.shape_cast %75 : vector<1x2x2x64xbf16> to vector<2x2x64xbf16>
    %c15 = arith.constant 15 : index
    %c0_109 = arith.constant 0 : index
    %c0_110 = arith.constant 0 : index
    %c0_111 = arith.constant 0 : index
    %77 = vector.load %arg13[%c15, %c0_109, %c0_110, %c0_111] : memref<64x2x2x64xbf16, #tpu.memory_space<vmem>>, vector<1x2x2x64xbf16>
    %78 = vector.shape_cast %77 : vector<1x2x2x64xbf16> to vector<2x2x64xbf16>
    %79 = vector.shape_cast %76 : vector<2x2x64xbf16> to vector<1x2x2x64xbf16>
    tpu.vector_store %arg13[%c15, %c0_109, %c0_110, %c0_111], %79 {strides = array<i32>} : memref<64x2x2x64xbf16, #tpu.memory_space<vmem>>, vector<1x2x2x64xbf16>,
    %c0_112 = arith.constant 0 : index
    %c2_113 = arith.constant 2 : index
    %c0_114 = arith.constant 0 : index
    %c0_115 = arith.constant 0 : index
    %80 = vector.load %arg1[%c0_112, %c2_113, %c0_114, %c0_115] : memref<1x9x9x64xbf16, #tpu.memory_space<vmem>>, vector<1x2x2x64xbf16>
    %81 = vector.shape_cast %80 : vector<1x2x2x64xbf16> to vector<2x2x64xbf16>
    %c16 = arith.constant 16 : index
    %c0_116 = arith.constant 0 : index
    %c0_117 = arith.constant 0 : index
    %c0_118 = arith.constant 0 : index
    %82 = vector.load %arg13[%c16, %c0_116, %c0_117, %c0_118] : memref<64x2x2x64xbf16, #tpu.memory_space<vmem>>, vector<1x2x2x64xbf16>
    %83 = vector.shape_cast %82 : vector<1x2x2x64xbf16> to vector<2x2x64xbf16>
    %84 = vector.shape_cast %81 : vector<2x2x64xbf16> to vector<1x2x2x64xbf16>
    tpu.vector_store %arg13[%c16, %c0_116, %c0_117, %c0_118], %84 {strides = array<i32>} : memref<64x2x2x64xbf16, #tpu.memory_space<vmem>>, vector<1x2x2x64xbf16>,
    %c0_119 = arith.constant 0 : index
    %c2_120 = arith.constant 2 : index
    %c1_121 = arith.constant 1 : index
    %c0_122 = arith.constant 0 : index
    %85 = vector.load %arg1[%c0_119, %c2_120, %c1_121, %c0_122] : memref<1x9x9x64xbf16, #tpu.memory_space<vmem>>, vector<1x2x2x64xbf16>
    %86 = vector.shape_cast %85 : vector<1x2x2x64xbf16> to vector<2x2x64xbf16>
    %c17 = arith.constant 17 : index
    %c0_123 = arith.constant 0 : index
    %c0_124 = arith.constant 0 : index
    %c0_125 = arith.constant 0 : index
    %87 = vector.load %arg13[%c17, %c0_123, %c0_124, %c0_125] : memref<64x2x2x64xbf16, #tpu.memory_space<vmem>>, vector<1x2x2x64xbf16>
    %88 = vector.shape_cast %87 : vector<1x2x2x64xbf16> to vector<2x2x64xbf16>
    %89 = vector.shape_cast %86 : vector<2x2x64xbf16> to vector<1x2x2x64xbf16>
    tpu.vector_store %arg13[%c17, %c0_123, %c0_124, %c0_125], %89 {strides = array<i32>} : memref<64x2x2x64xbf16, #tpu.memory_space<vmem>>, vector<1x2x2x64xbf16>,
    %c0_126 = arith.constant 0 : index
    %c2_127 = arith.constant 2 : index
    %c2_128 = arith.constant 2 : index
    %c0_129 = arith.constant 0 : index
    %90 = vector.load %arg1[%c0_126, %c2_127, %c2_128, %c0_129] : memref<1x9x9x64xbf16, #tpu.memory_space<vmem>>, vector<1x2x2x64xbf16>
    %91 = vector.shape_cast %90 : vector<1x2x2x64xbf16> to vector<2x2x64xbf16>
    %c18 = arith.constant 18 : index
    %c0_130 = arith.constant 0 : index
    %c0_131 = arith.constant 0 : index
    %c0_132 = arith.constant 0 : index
    %92 = vector.load %arg13[%c18, %c0_130, %c0_131, %c0_132] : memref<64x2x2x64xbf16, #tpu.memory_space<vmem>>, vector<1x2x2x64xbf16>
    %93 = vector.shape_cast %92 : vector<1x2x2x64xbf16> to vector<2x2x64xbf16>
    %94 = vector.shape_cast %91 : vector<2x2x64xbf16> to vector<1x2x2x64xbf16>
    tpu.vector_store %arg13[%c18, %c0_130, %c0_131, %c0_132], %94 {strides = array<i32>} : memref<64x2x2x64xbf16, #tpu.memory_space<vmem>>, vector<1x2x2x64xbf16>,
    %c0_133 = arith.constant 0 : index
    %c2_134 = arith.constant 2 : index
    %c3_135 = arith.constant 3 : index
    %c0_136 = arith.constant 0 : index
    %95 = vector.load %arg1[%c0_133, %c2_134, %c3_135, %c0_136] : memref<1x9x9x64xbf16, #tpu.memory_space<vmem>>, vector<1x2x2x64xbf16>
    %96 = vector.shape_cast %95 : vector<1x2x2x64xbf16> to vector<2x2x64xbf16>
    %c19 = arith.constant 19 : index
    %c0_137 = arith.constant 0 : index
    %c0_138 = arith.constant 0 : index
    %c0_139 = arith.constant 0 : index
    %97 = vector.load %arg13[%c19, %c0_137, %c0_138, %c0_139] : memref<64x2x2x64xbf16, #tpu.memory_space<vmem>>, vector<1x2x2x64xbf16>
    %98 = vector.shape_cast %97 : vector<1x2x2x64xbf16> to vector<2x2x64xbf16>
    %99 = vector.shape_cast %96 : vector<2x2x64xbf16> to vector<1x2x2x64xbf16>
    tpu.vector_store %arg13[%c19, %c0_137, %c0_138, %c0_139], %99 {strides = array<i32>} : memref<64x2x2x64xbf16, #tpu.memory_space<vmem>>, vector<1x2x2x64xbf16>,
    %c0_140 = arith.constant 0 : index
    %c2_141 = arith.constant 2 : index
    %c4_142 = arith.constant 4 : index
    %c0_143 = arith.constant 0 : index
    %100 = vector.load %arg1[%c0_140, %c2_141, %c4_142, %c0_143] : memref<1x9x9x64xbf16, #tpu.memory_space<vmem>>, vector<1x2x2x64xbf16>
    %101 = vector.shape_cast %100 : vector<1x2x2x64xbf16> to vector<2x2x64xbf16>
    %c20 = arith.constant 20 : index
    %c0_144 = arith.constant 0 : index
    %c0_145 = arith.constant 0 : index
    %c0_146 = arith.constant 0 : index
    %102 = vector.load %arg13[%c20, %c0_144, %c0_145, %c0_146] : memref<64x2x2x64xbf16, #tpu.memory_space<vmem>>, vector<1x2x2x64xbf16>
    %103 = vector.shape_cast %102 : vector<1x2x2x64xbf16> to vector<2x2x64xbf16>
    %104 = vector.shape_cast %101 : vector<2x2x64xbf16> to vector<1x2x2x64xbf16>
    tpu.vector_store %arg13[%c20, %c0_144, %c0_145, %c0_146], %104 {strides = array<i32>} : memref<64x2x2x64xbf16, #tpu.memory_space<vmem>>, vector<1x2x2x64xbf16>,
    %c0_147 = arith.constant 0 : index
    %c2_148 = arith.constant 2 : index
    %c5_149 = arith.constant 5 : index
    %c0_150 = arith.constant 0 : index
    %105 = vector.load %arg1[%c0_147, %c2_148, %c5_149, %c0_150] : memref<1x9x9x64xbf16, #tpu.memory_space<vmem>>, vector<1x2x2x64xbf16>
    %106 = vector.shape_cast %105 : vector<1x2x2x64xbf16> to vector<2x2x64xbf16>
    %c21 = arith.constant 21 : index
    %c0_151 = arith.constant 0 : index
    %c0_152 = arith.constant 0 : index
    %c0_153 = arith.constant 0 : index
    %107 = vector.load %arg13[%c21, %c0_151, %c0_152, %c0_153] : memref<64x2x2x64xbf16, #tpu.memory_space<vmem>>, vector<1x2x2x64xbf16>
    %108 = vector.shape_cast %107 : vector<1x2x2x64xbf16> to vector<2x2x64xbf16>
    %109 = vector.shape_cast %106 : vector<2x2x64xbf16> to vector<1x2x2x64xbf16>
    tpu.vector_store %arg13[%c21, %c0_151, %c0_152, %c0_153], %109 {strides = array<i32>} : memref<64x2x2x64xbf16, #tpu.memory_space<vmem>>, vector<1x2x2x64xbf16>,
    %c0_154 = arith.constant 0 : index
    %c2_155 = arith.constant 2 : index
    %c6_156 = arith.constant 6 : index
    %c0_157 = arith.constant 0 : index
    %110 = vector.load %arg1[%c0_154, %c2_155, %c6_156, %c0_157] : memref<1x9x9x64xbf16, #tpu.memory_space<vmem>>, vector<1x2x2x64xbf16>
    %111 = vector.shape_cast %110 : vector<1x2x2x64xbf16> to vector<2x2x64xbf16>
    %c22 = arith.constant 22 : index
    %c0_158 = arith.constant 0 : index
    %c0_159 = arith.constant 0 : index
    %c0_160 = arith.constant 0 : index
    %112 = vector.load %arg13[%c22, %c0_158, %c0_159, %c0_160] : memref<64x2x2x64xbf16, #tpu.memory_space<vmem>>, vector<1x2x2x64xbf16>
    %113 = vector.shape_cast %112 : vector<1x2x2x64xbf16> to vector<2x2x64xbf16>
    %114 = vector.shape_cast %111 : vector<2x2x64xbf16> to vector<1x2x2x64xbf16>
    tpu.vector_store %arg13[%c22, %c0_158, %c0_159, %c0_160], %114 {strides = array<i32>} : memref<64x2x2x64xbf16, #tpu.memory_space<vmem>>, vector<1x2x2x64xbf16>,
    %c0_161 = arith.constant 0 : index
    %c2_162 = arith.constant 2 : index
    %c7_163 = arith.constant 7 : index
    %c0_164 = arith.constant 0 : index
    %115 = vector.load %arg1[%c0_161, %c2_162, %c7_163, %c0_164] : memref<1x9x9x64xbf16, #tpu.memory_space<vmem>>, vector<1x2x2x64xbf16>
    %116 = vector.shape_cast %115 : vector<1x2x2x64xbf16> to vector<2x2x64xbf16>
    %c23 = arith.constant 23 : index
    %c0_165 = arith.constant 0 : index
    %c0_166 = arith.constant 0 : index
    %c0_167 = arith.constant 0 : index
    %117 = vector.load %arg13[%c23, %c0_165, %c0_166, %c0_167] : memref<64x2x2x64xbf16, #tpu.memory_space<vmem>>, vector<1x2x2x64xbf16>
    %118 = vector.shape_cast %117 : vector<1x2x2x64xbf16> to vector<2x2x64xbf16>
    %119 = vector.shape_cast %116 : vector<2x2x64xbf16> to vector<1x2x2x64xbf16>
    tpu.vector_store %arg13[%c23, %c0_165, %c0_166, %c0_167], %119 {strides = array<i32>} : memref<64x2x2x64xbf16, #tpu.memory_space<vmem>>, vector<1x2x2x64xbf16>,
    %c0_168 = arith.constant 0 : index
    %c3_169 = arith.constant 3 : index
    %c0_170 = arith.constant 0 : index
    %c0_171 = arith.constant 0 : index
    %120 = vector.load %arg1[%c0_168, %c3_169, %c0_170, %c0_171] : memref<1x9x9x64xbf16, #tpu.memory_space<vmem>>, vector<1x2x2x64xbf16>
    %121 = vector.shape_cast %120 : vector<1x2x2x64xbf16> to vector<2x2x64xbf16>
    %c24 = arith.constant 24 : index
    %c0_172 = arith.constant 0 : index
    %c0_173 = arith.constant 0 : index
    %c0_174 = arith.constant 0 : index
    %122 = vector.load %arg13[%c24, %c0_172, %c0_173, %c0_174] : memref<64x2x2x64xbf16, #tpu.memory_space<vmem>>, vector<1x2x2x64xbf16>
    %123 = vector.shape_cast %122 : vector<1x2x2x64xbf16> to vector<2x2x64xbf16>
    %124 = vector.shape_cast %121 : vector<2x2x64xbf16> to vector<1x2x2x64xbf16>
    tpu.vector_store %arg13[%c24, %c0_172, %c0_173, %c0_174], %124 {strides = array<i32>} : memref<64x2x2x64xbf16, #tpu.memory_space<vmem>>, vector<1x2x2x64xbf16>,
    %c0_175 = arith.constant 0 : index
    %c3_176 = arith.constant 3 : index
    %c1_177 = arith.constant 1 : index
    %c0_178 = arith.constant 0 : index
    %125 = vector.load %arg1[%c0_175, %c3_176, %c1_177, %c0_178] : memref<1x9x9x64xbf16, #tpu.memory_space<vmem>>, vector<1x2x2x64xbf16>
    %126 = vector.shape_cast %125 : vector<1x2x2x64xbf16> to vector<2x2x64xbf16>
    %c25 = arith.constant 25 : index
    %c0_179 = arith.constant 0 : index
    %c0_180 = arith.constant 0 : index
    %c0_181 = arith.constant 0 : index
    %127 = vector.load %arg13[%c25, %c0_179, %c0_180, %c0_181] : memref<64x2x2x64xbf16, #tpu.memory_space<vmem>>, vector<1x2x2x64xbf16>
    %128 = vector.shape_cast %127 : vector<1x2x2x64xbf16> to vector<2x2x64xbf16>
    %129 = vector.shape_cast %126 : vector<2x2x64xbf16> to vector<1x2x2x64xbf16>
    tpu.vector_store %arg13[%c25, %c0_179, %c0_180, %c0_181], %129 {strides = array<i32>} : memref<64x2x2x64xbf16, #tpu.memory_space<vmem>>, vector<1x2x2x64xbf16>,
    %c0_182 = arith.constant 0 : index
    %c3_183 = arith.constant 3 : index
    %c2_184 = arith.constant 2 : index
    %c0_185 = arith.constant 0 : index
    %130 = vector.load %arg1[%c0_182, %c3_183, %c2_184, %c0_185] : memref<1x9x9x64xbf16, #tpu.memory_space<vmem>>, vector<1x2x2x64xbf16>
    %131 = vector.shape_cast %130 : vector<1x2x2x64xbf16> to vector<2x2x64xbf16>
    %c26 = arith.constant 26 : index
    %c0_186 = arith.constant 0 : index
    %c0_187 = arith.constant 0 : index
    %c0_188 = arith.constant 0 : index
    %132 = vector.load %arg13[%c26, %c0_186, %c0_187, %c0_188] : memref<64x2x2x64xbf16, #tpu.memory_space<vmem>>, vector<1x2x2x64xbf16>
    %133 = vector.shape_cast %132 : vector<1x2x2x64xbf16> to vector<2x2x64xbf16>
    %134 = vector.shape_cast %131 : vector<2x2x64xbf16> to vector<1x2x2x64xbf16>
    tpu.vector_store %arg13[%c26, %c0_186, %c0_187, %c0_188], %134 {strides = array<i32>} : memref<64x2x2x64xbf16, #tpu.memory_space<vmem>>, vector<1x2x2x64xbf16>,
    %c0_189 = arith.constant 0 : index
    %c3_190 = arith.constant 3 : index
    %c3_191 = arith.constant 3 : index
    %c0_192 = arith.constant 0 : index
    %135 = vector.load %arg1[%c0_189, %c3_190, %c3_191, %c0_192] : memref<1x9x9x64xbf16, #tpu.memory_space<vmem>>, vector<1x2x2x64xbf16>
    %136 = vector.shape_cast %135 : vector<1x2x2x64xbf16> to vector<2x2x64xbf16>
    %c27 = arith.constant 27 : index
    %c0_193 = arith.constant 0 : index
    %c0_194 = arith.constant 0 : index
    %c0_195 = arith.constant 0 : index
    %137 = vector.load %arg13[%c27, %c0_193, %c0_194, %c0_195] : memref<64x2x2x64xbf16, #tpu.memory_space<vmem>>, vector<1x2x2x64xbf16>
    %138 = vector.shape_cast %137 : vector<1x2x2x64xbf16> to vector<2x2x64xbf16>
    %139 = vector.shape_cast %136 : vector<2x2x64xbf16> to vector<1x2x2x64xbf16>
    tpu.vector_store %arg13[%c27, %c0_193, %c0_194, %c0_195], %139 {strides = array<i32>} : memref<64x2x2x64xbf16, #tpu.memory_space<vmem>>, vector<1x2x2x64xbf16>,
    %c0_196 = arith.constant 0 : index
    %c3_197 = arith.constant 3 : index
    %c4_198 = arith.constant 4 : index
    %c0_199 = arith.constant 0 : index
    %140 = vector.load %arg1[%c0_196, %c3_197, %c4_198, %c0_199] : memref<1x9x9x64xbf16, #tpu.memory_space<vmem>>, vector<1x2x2x64xbf16>
    %141 = vector.shape_cast %140 : vector<1x2x2x64xbf16> to vector<2x2x64xbf16>
    %c28 = arith.constant 28 : index
    %c0_200 = arith.constant 0 : index
    %c0_201 = arith.constant 0 : index
    %c0_202 = arith.constant 0 : index
    %142 = vector.load %arg13[%c28, %c0_200, %c0_201, %c0_202] : memref<64x2x2x64xbf16, #tpu.memory_space<vmem>>, vector<1x2x2x64xbf16>
    %143 = vector.shape_cast %142 : vector<1x2x2x64xbf16> to vector<2x2x64xbf16>
    %144 = vector.shape_cast %141 : vector<2x2x64xbf16> to vector<1x2x2x64xbf16>
    tpu.vector_store %arg13[%c28, %c0_200, %c0_201, %c0_202], %144 {strides = array<i32>} : memref<64x2x2x64xbf16, #tpu.memory_space<vmem>>, vector<1x2x2x64xbf16>,
    %c0_203 = arith.constant 0 : index
    %c3_204 = arith.constant 3 : index
    %c5_205 = arith.constant 5 : index
    %c0_206 = arith.constant 0 : index
    %145 = vector.load %arg1[%c0_203, %c3_204, %c5_205, %c0_206] : memref<1x9x9x64xbf16, #tpu.memory_space<vmem>>, vector<1x2x2x64xbf16>
    %146 = vector.shape_cast %145 : vector<1x2x2x64xbf16> to vector<2x2x64xbf16>
    %c29 = arith.constant 29 : index
    %c0_207 = arith.constant 0 : index
    %c0_208 = arith.constant 0 : index
    %c0_209 = arith.constant 0 : index
    %147 = vector.load %arg13[%c29, %c0_207, %c0_208, %c0_209] : memref<64x2x2x64xbf16, #tpu.memory_space<vmem>>, vector<1x2x2x64xbf16>
    %148 = vector.shape_cast %147 : vector<1x2x2x64xbf16> to vector<2x2x64xbf16>
    %149 = vector.shape_cast %146 : vector<2x2x64xbf16> to vector<1x2x2x64xbf16>
    tpu.vector_store %arg13[%c29, %c0_207, %c0_208, %c0_209], %149 {strides = array<i32>} : memref<64x2x2x64xbf16, #tpu.memory_space<vmem>>, vector<1x2x2x64xbf16>,
    %c0_210 = arith.constant 0 : index
    %c3_211 = arith.constant 3 : index
    %c6_212 = arith.constant 6 : index
    %c0_213 = arith.constant 0 : index
    %150 = vector.load %arg1[%c0_210, %c3_211, %c6_212, %c0_213] : memref<1x9x9x64xbf16, #tpu.memory_space<vmem>>, vector<1x2x2x64xbf16>
    %151 = vector.shape_cast %150 : vector<1x2x2x64xbf16> to vector<2x2x64xbf16>
    %c30 = arith.constant 30 : index
    %c0_214 = arith.constant 0 : index
    %c0_215 = arith.constant 0 : index
    %c0_216 = arith.constant 0 : index
    %152 = vector.load %arg13[%c30, %c0_214, %c0_215, %c0_216] : memref<64x2x2x64xbf16, #tpu.memory_space<vmem>>, vector<1x2x2x64xbf16>
    %153 = vector.shape_cast %152 : vector<1x2x2x64xbf16> to vector<2x2x64xbf16>
    %154 = vector.shape_cast %151 : vector<2x2x64xbf16> to vector<1x2x2x64xbf16>
    tpu.vector_store %arg13[%c30, %c0_214, %c0_215, %c0_216], %154 {strides = array<i32>} : memref<64x2x2x64xbf16, #tpu.memory_space<vmem>>, vector<1x2x2x64xbf16>,
    %c0_217 = arith.constant 0 : index
    %c3_218 = arith.constant 3 : index
    %c7_219 = arith.constant 7 : index
    %c0_220 = arith.constant 0 : index
    %155 = vector.load %arg1[%c0_217, %c3_218, %c7_219, %c0_220] : memref<1x9x9x64xbf16, #tpu.memory_space<vmem>>, vector<1x2x2x64xbf16>
    %156 = vector.shape_cast %155 : vector<1x2x2x64xbf16> to vector<2x2x64xbf16>
    %c31 = arith.constant 31 : index
    %c0_221 = arith.constant 0 : index
    %c0_222 = arith.constant 0 : index
    %c0_223 = arith.constant 0 : index
    %157 = vector.load %arg13[%c31, %c0_221, %c0_222, %c0_223] : memref<64x2x2x64xbf16, #tpu.memory_space<vmem>>, vector<1x2x2x64xbf16>
    %158 = vector.shape_cast %157 : vector<1x2x2x64xbf16> to vector<2x2x64xbf16>
    %159 = vector.shape_cast %156 : vector<2x2x64xbf16> to vector<1x2x2x64xbf16>
    tpu.vector_store %arg13[%c31, %c0_221, %c0_222, %c0_223], %159 {strides = array<i32>} : memref<64x2x2x64xbf16, #tpu.memory_space<vmem>>, vector<1x2x2x64xbf16>,
    %c0_224 = arith.constant 0 : index
    %c4_225 = arith.constant 4 : index
    %c0_226 = arith.constant 0 : index
    %c0_227 = arith.constant 0 : index
    %160 = vector.load %arg1[%c0_224, %c4_225, %c0_226, %c0_227] : memref<1x9x9x64xbf16, #tpu.memory_space<vmem>>, vector<1x2x2x64xbf16>
    %161 = vector.shape_cast %160 : vector<1x2x2x64xbf16> to vector<2x2x64xbf16>
    %c32 = arith.constant 32 : index
    %c0_228 = arith.constant 0 : index
    %c0_229 = arith.constant 0 : index
    %c0_230 = arith.constant 0 : index
    %162 = vector.load %arg13[%c32, %c0_228, %c0_229, %c0_230] : memref<64x2x2x64xbf16, #tpu.memory_space<vmem>>, vector<1x2x2x64xbf16>
    %163 = vector.shape_cast %162 : vector<1x2x2x64xbf16> to vector<2x2x64xbf16>
    %164 = vector.shape_cast %161 : vector<2x2x64xbf16> to vector<1x2x2x64xbf16>
    tpu.vector_store %arg13[%c32, %c0_228, %c0_229, %c0_230], %164 {strides = array<i32>} : memref<64x2x2x64xbf16, #tpu.memory_space<vmem>>, vector<1x2x2x64xbf16>,
    %c0_231 = arith.constant 0 : index
    %c4_232 = arith.constant 4 : index
    %c1_233 = arith.constant 1 : index
    %c0_234 = arith.constant 0 : index
    %165 = vector.load %arg1[%c0_231, %c4_232, %c1_233, %c0_234] : memref<1x9x9x64xbf16, #tpu.memory_space<vmem>>, vector<1x2x2x64xbf16>
    %166 = vector.shape_cast %165 : vector<1x2x2x64xbf16> to vector<2x2x64xbf16>
    %c33 = arith.constant 33 : index
    %c0_235 = arith.constant 0 : index
    %c0_236 = arith.constant 0 : index
    %c0_237 = arith.constant 0 : index
    %167 = vector.load %arg13[%c33, %c0_235, %c0_236, %c0_237] : memref<64x2x2x64xbf16, #tpu.memory_space<vmem>>, vector<1x2x2x64xbf16>
    %168 = vector.shape_cast %167 : vector<1x2x2x64xbf16> to vector<2x2x64xbf16>
    %169 = vector.shape_cast %166 : vector<2x2x64xbf16> to vector<1x2x2x64xbf16>
    tpu.vector_store %arg13[%c33, %c0_235, %c0_236, %c0_237], %169 {strides = array<i32>} : memref<64x2x2x64xbf16, #tpu.memory_space<vmem>>, vector<1x2x2x64xbf16>,
    %c0_238 = arith.constant 0 : index
    %c4_239 = arith.constant 4 : index
    %c2_240 = arith.constant 2 : index
    %c0_241 = arith.constant 0 : index
    %170 = vector.load %arg1[%c0_238, %c4_239, %c2_240, %c0_241] : memref<1x9x9x64xbf16, #tpu.memory_space<vmem>>, vector<1x2x2x64xbf16>
    %171 = vector.shape_cast %170 : vector<1x2x2x64xbf16> to vector<2x2x64xbf16>
    %c34 = arith.constant 34 : index
    %c0_242 = arith.constant 0 : index
    %c0_243 = arith.constant 0 : index
    %c0_244 = arith.constant 0 : index
    %172 = vector.load %arg13[%c34, %c0_242, %c0_243, %c0_244] : memref<64x2x2x64xbf16, #tpu.memory_space<vmem>>, vector<1x2x2x64xbf16>
    %173 = vector.shape_cast %172 : vector<1x2x2x64xbf16> to vector<2x2x64xbf16>
    %174 = vector.shape_cast %171 : vector<2x2x64xbf16> to vector<1x2x2x64xbf16>
    tpu.vector_store %arg13[%c34, %c0_242, %c0_243, %c0_244], %174 {strides = array<i32>} : memref<64x2x2x64xbf16, #tpu.memory_space<vmem>>, vector<1x2x2x64xbf16>,
    %c0_245 = arith.constant 0 : index
    %c4_246 = arith.constant 4 : index
    %c3_247 = arith.constant 3 : index
    %c0_248 = arith.constant 0 : index
    %175 = vector.load %arg1[%c0_245, %c4_246, %c3_247, %c0_248] : memref<1x9x9x64xbf16, #tpu.memory_space<vmem>>, vector<1x2x2x64xbf16>
    %176 = vector.shape_cast %175 : vector<1x2x2x64xbf16> to vector<2x2x64xbf16>
    %c35 = arith.constant 35 : index
    %c0_249 = arith.constant 0 : index
    %c0_250 = arith.constant 0 : index
    %c0_251 = arith.constant 0 : index
    %177 = vector.load %arg13[%c35, %c0_249, %c0_250, %c0_251] : memref<64x2x2x64xbf16, #tpu.memory_space<vmem>>, vector<1x2x2x64xbf16>
    %178 = vector.shape_cast %177 : vector<1x2x2x64xbf16> to vector<2x2x64xbf16>
    %179 = vector.shape_cast %176 : vector<2x2x64xbf16> to vector<1x2x2x64xbf16>
    tpu.vector_store %arg13[%c35, %c0_249, %c0_250, %c0_251], %179 {strides = array<i32>} : memref<64x2x2x64xbf16, #tpu.memory_space<vmem>>, vector<1x2x2x64xbf16>,
    %c0_252 = arith.constant 0 : index
    %c4_253 = arith.constant 4 : index
    %c4_254 = arith.constant 4 : index
    %c0_255 = arith.constant 0 : index
    %180 = vector.load %arg1[%c0_252, %c4_253, %c4_254, %c0_255] : memref<1x9x9x64xbf16, #tpu.memory_space<vmem>>, vector<1x2x2x64xbf16>
    %181 = vector.shape_cast %180 : vector<1x2x2x64xbf16> to vector<2x2x64xbf16>
    %c36 = arith.constant 36 : index
    %c0_256 = arith.constant 0 : index
    %c0_257 = arith.constant 0 : index
    %c0_258 = arith.constant 0 : index
    %182 = vector.load %arg13[%c36, %c0_256, %c0_257, %c0_258] : memref<64x2x2x64xbf16, #tpu.memory_space<vmem>>, vector<1x2x2x64xbf16>
    %183 = vector.shape_cast %182 : vector<1x2x2x64xbf16> to vector<2x2x64xbf16>
    %184 = vector.shape_cast %181 : vector<2x2x64xbf16> to vector<1x2x2x64xbf16>
    tpu.vector_store %arg13[%c36, %c0_256, %c0_257, %c0_258], %184 {strides = array<i32>} : memref<64x2x2x64xbf16, #tpu.memory_space<vmem>>, vector<1x2x2x64xbf16>,
    %c0_259 = arith.constant 0 : index
    %c4_260 = arith.constant 4 : index
    %c5_261 = arith.constant 5 : index
    %c0_262 = arith.constant 0 : index
    %185 = vector.load %arg1[%c0_259, %c4_260, %c5_261, %c0_262] : memref<1x9x9x64xbf16, #tpu.memory_space<vmem>>, vector<1x2x2x64xbf16>
    %186 = vector.shape_cast %185 : vector<1x2x2x64xbf16> to vector<2x2x64xbf16>
    %c37 = arith.constant 37 : index
    %c0_263 = arith.constant 0 : index
    %c0_264 = arith.constant 0 : index
    %c0_265 = arith.constant 0 : index
    %187 = vector.load %arg13[%c37, %c0_263, %c0_264, %c0_265] : memref<64x2x2x64xbf16, #tpu.memory_space<vmem>>, vector<1x2x2x64xbf16>
    %188 = vector.shape_cast %187 : vector<1x2x2x64xbf16> to vector<2x2x64xbf16>
    %189 = vector.shape_cast %186 : vector<2x2x64xbf16> to vector<1x2x2x64xbf16>
    tpu.vector_store %arg13[%c37, %c0_263, %c0_264, %c0_265], %189 {strides = array<i32>} : memref<64x2x2x64xbf16, #tpu.memory_space<vmem>>, vector<1x2x2x64xbf16>,
    %c0_266 = arith.constant 0 : index
    %c4_267 = arith.constant 4 : index
    %c6_268 = arith.constant 6 : index
    %c0_269 = arith.constant 0 : index
    %190 = vector.load %arg1[%c0_266, %c4_267, %c6_268, %c0_269] : memref<1x9x9x64xbf16, #tpu.memory_space<vmem>>, vector<1x2x2x64xbf16>
    %191 = vector.shape_cast %190 : vector<1x2x2x64xbf16> to vector<2x2x64xbf16>
    %c38 = arith.constant 38 : index
    %c0_270 = arith.constant 0 : index
    %c0_271 = arith.constant 0 : index
    %c0_272 = arith.constant 0 : index
    %192 = vector.load %arg13[%c38, %c0_270, %c0_271, %c0_272] : memref<64x2x2x64xbf16, #tpu.memory_space<vmem>>, vector<1x2x2x64xbf16>
    %193 = vector.shape_cast %192 : vector<1x2x2x64xbf16> to vector<2x2x64xbf16>
    %194 = vector.shape_cast %191 : vector<2x2x64xbf16> to vector<1x2x2x64xbf16>
    tpu.vector_store %arg13[%c38, %c0_270, %c0_271, %c0_272], %194 {strides = array<i32>} : memref<64x2x2x64xbf16, #tpu.memory_space<vmem>>, vector<1x2x2x64xbf16>,
    %c0_273 = arith.constant 0 : index
    %c4_274 = arith.constant 4 : index
    %c7_275 = arith.constant 7 : index
    %c0_276 = arith.constant 0 : index
    %195 = vector.load %arg1[%c0_273, %c4_274, %c7_275, %c0_276] : memref<1x9x9x64xbf16, #tpu.memory_space<vmem>>, vector<1x2x2x64xbf16>
    %196 = vector.shape_cast %195 : vector<1x2x2x64xbf16> to vector<2x2x64xbf16>
    %c39 = arith.constant 39 : index
    %c0_277 = arith.constant 0 : index
    %c0_278 = arith.constant 0 : index
    %c0_279 = arith.constant 0 : index
    %197 = vector.load %arg13[%c39, %c0_277, %c0_278, %c0_279] : memref<64x2x2x64xbf16, #tpu.memory_space<vmem>>, vector<1x2x2x64xbf16>
    %198 = vector.shape_cast %197 : vector<1x2x2x64xbf16> to vector<2x2x64xbf16>
    %199 = vector.shape_cast %196 : vector<2x2x64xbf16> to vector<1x2x2x64xbf16>
    tpu.vector_store %arg13[%c39, %c0_277, %c0_278, %c0_279], %199 {strides = array<i32>} : memref<64x2x2x64xbf16, #tpu.memory_space<vmem>>, vector<1x2x2x64xbf16>,
    %c0_280 = arith.constant 0 : index
    %c5_281 = arith.constant 5 : index
    %c0_282 = arith.constant 0 : index
    %c0_283 = arith.constant 0 : index
    %200 = vector.load %arg1[%c0_280, %c5_281, %c0_282, %c0_283] : memref<1x9x9x64xbf16, #tpu.memory_space<vmem>>, vector<1x2x2x64xbf16>
    %201 = vector.shape_cast %200 : vector<1x2x2x64xbf16> to vector<2x2x64xbf16>
    %c40 = arith.constant 40 : index
    %c0_284 = arith.constant 0 : index
    %c0_285 = arith.constant 0 : index
    %c0_286 = arith.constant 0 : index
    %202 = vector.load %arg13[%c40, %c0_284, %c0_285, %c0_286] : memref<64x2x2x64xbf16, #tpu.memory_space<vmem>>, vector<1x2x2x64xbf16>
    %203 = vector.shape_cast %202 : vector<1x2x2x64xbf16> to vector<2x2x64xbf16>
    %204 = vector.shape_cast %201 : vector<2x2x64xbf16> to vector<1x2x2x64xbf16>
    tpu.vector_store %arg13[%c40, %c0_284, %c0_285, %c0_286], %204 {strides = array<i32>} : memref<64x2x2x64xbf16, #tpu.memory_space<vmem>>, vector<1x2x2x64xbf16>,
    %c0_287 = arith.constant 0 : index
    %c5_288 = arith.constant 5 : index
    %c1_289 = arith.constant 1 : index
    %c0_290 = arith.constant 0 : index
    %205 = vector.load %arg1[%c0_287, %c5_288, %c1_289, %c0_290] : memref<1x9x9x64xbf16, #tpu.memory_space<vmem>>, vector<1x2x2x64xbf16>
    %206 = vector.shape_cast %205 : vector<1x2x2x64xbf16> to vector<2x2x64xbf16>
    %c41 = arith.constant 41 : index
    %c0_291 = arith.constant 0 : index
    %c0_292 = arith.constant 0 : index
    %c0_293 = arith.constant 0 : index
    %207 = vector.load %arg13[%c41, %c0_291, %c0_292, %c0_293] : memref<64x2x2x64xbf16, #tpu.memory_space<vmem>>, vector<1x2x2x64xbf16>
    %208 = vector.shape_cast %207 : vector<1x2x2x64xbf16> to vector<2x2x64xbf16>
    %209 = vector.shape_cast %206 : vector<2x2x64xbf16> to vector<1x2x2x64xbf16>
    tpu.vector_store %arg13[%c41, %c0_291, %c0_292, %c0_293], %209 {strides = array<i32>} : memref<64x2x2x64xbf16, #tpu.memory_space<vmem>>, vector<1x2x2x64xbf16>,
    %c0_294 = arith.constant 0 : index
    %c5_295 = arith.constant 5 : index
    %c2_296 = arith.constant 2 : index
    %c0_297 = arith.constant 0 : index
    %210 = vector.load %arg1[%c0_294, %c5_295, %c2_296, %c0_297] : memref<1x9x9x64xbf16, #tpu.memory_space<vmem>>, vector<1x2x2x64xbf16>
    %211 = vector.shape_cast %210 : vector<1x2x2x64xbf16> to vector<2x2x64xbf16>
    %c42 = arith.constant 42 : index
    %c0_298 = arith.constant 0 : index
    %c0_299 = arith.constant 0 : index
    %c0_300 = arith.constant 0 : index
    %212 = vector.load %arg13[%c42, %c0_298, %c0_299, %c0_300] : memref<64x2x2x64xbf16, #tpu.memory_space<vmem>>, vector<1x2x2x64xbf16>
    %213 = vector.shape_cast %212 : vector<1x2x2x64xbf16> to vector<2x2x64xbf16>
    %214 = vector.shape_cast %211 : vector<2x2x64xbf16> to vector<1x2x2x64xbf16>
    tpu.vector_store %arg13[%c42, %c0_298, %c0_299, %c0_300], %214 {strides = array<i32>} : memref<64x2x2x64xbf16, #tpu.memory_space<vmem>>, vector<1x2x2x64xbf16>,
    %c0_301 = arith.constant 0 : index
    %c5_302 = arith.constant 5 : index
    %c3_303 = arith.constant 3 : index
    %c0_304 = arith.constant 0 : index
    %215 = vector.load %arg1[%c0_301, %c5_302, %c3_303, %c0_304] : memref<1x9x9x64xbf16, #tpu.memory_space<vmem>>, vector<1x2x2x64xbf16>
    %216 = vector.shape_cast %215 : vector<1x2x2x64xbf16> to vector<2x2x64xbf16>
    %c43 = arith.constant 43 : index
    %c0_305 = arith.constant 0 : index
    %c0_306 = arith.constant 0 : index
    %c0_307 = arith.constant 0 : index
    %217 = vector.load %arg13[%c43, %c0_305, %c0_306, %c0_307] : memref<64x2x2x64xbf16, #tpu.memory_space<vmem>>, vector<1x2x2x64xbf16>
    %218 = vector.shape_cast %217 : vector<1x2x2x64xbf16> to vector<2x2x64xbf16>
    %219 = vector.shape_cast %216 : vector<2x2x64xbf16> to vector<1x2x2x64xbf16>
    tpu.vector_store %arg13[%c43, %c0_305, %c0_306, %c0_307], %219 {strides = array<i32>} : memref<64x2x2x64xbf16, #tpu.memory_space<vmem>>, vector<1x2x2x64xbf16>,
    %c0_308 = arith.constant 0 : index
    %c5_309 = arith.constant 5 : index
    %c4_310 = arith.constant 4 : index
    %c0_311 = arith.constant 0 : index
    %220 = vector.load %arg1[%c0_308, %c5_309, %c4_310, %c0_311] : memref<1x9x9x64xbf16, #tpu.memory_space<vmem>>, vector<1x2x2x64xbf16>
    %221 = vector.shape_cast %220 : vector<1x2x2x64xbf16> to vector<2x2x64xbf16>
    %c44 = arith.constant 44 : index
    %c0_312 = arith.constant 0 : index
    %c0_313 = arith.constant 0 : index
    %c0_314 = arith.constant 0 : index
    %222 = vector.load %arg13[%c44, %c0_312, %c0_313, %c0_314] : memref<64x2x2x64xbf16, #tpu.memory_space<vmem>>, vector<1x2x2x64xbf16>
    %223 = vector.shape_cast %222 : vector<1x2x2x64xbf16> to vector<2x2x64xbf16>
    %224 = vector.shape_cast %221 : vector<2x2x64xbf16> to vector<1x2x2x64xbf16>
    tpu.vector_store %arg13[%c44, %c0_312, %c0_313, %c0_314], %224 {strides = array<i32>} : memref<64x2x2x64xbf16, #tpu.memory_space<vmem>>, vector<1x2x2x64xbf16>,
    %c0_315 = arith.constant 0 : index
    %c5_316 = arith.constant 5 : index
    %c5_317 = arith.constant 5 : index
    %c0_318 = arith.constant 0 : index
    %225 = vector.load %arg1[%c0_315, %c5_316, %c5_317, %c0_318] : memref<1x9x9x64xbf16, #tpu.memory_space<vmem>>, vector<1x2x2x64xbf16>
    %226 = vector.shape_cast %225 : vector<1x2x2x64xbf16> to vector<2x2x64xbf16>
    %c45 = arith.constant 45 : index
    %c0_319 = arith.constant 0 : index
    %c0_320 = arith.constant 0 : index
    %c0_321 = arith.constant 0 : index
    %227 = vector.load %arg13[%c45, %c0_319, %c0_320, %c0_321] : memref<64x2x2x64xbf16, #tpu.memory_space<vmem>>, vector<1x2x2x64xbf16>
    %228 = vector.shape_cast %227 : vector<1x2x2x64xbf16> to vector<2x2x64xbf16>
    %229 = vector.shape_cast %226 : vector<2x2x64xbf16> to vector<1x2x2x64xbf16>
    tpu.vector_store %arg13[%c45, %c0_319, %c0_320, %c0_321], %229 {strides = array<i32>} : memref<64x2x2x64xbf16, #tpu.memory_space<vmem>>, vector<1x2x2x64xbf16>,
    %c0_322 = arith.constant 0 : index
    %c5_323 = arith.constant 5 : index
    %c6_324 = arith.constant 6 : index
    %c0_325 = arith.constant 0 : index
    %230 = vector.load %arg1[%c0_322, %c5_323, %c6_324, %c0_325] : memref<1x9x9x64xbf16, #tpu.memory_space<vmem>>, vector<1x2x2x64xbf16>
    %231 = vector.shape_cast %230 : vector<1x2x2x64xbf16> to vector<2x2x64xbf16>
    %c46 = arith.constant 46 : index
    %c0_326 = arith.constant 0 : index
    %c0_327 = arith.constant 0 : index
    %c0_328 = arith.constant 0 : index
    %232 = vector.load %arg13[%c46, %c0_326, %c0_327, %c0_328] : memref<64x2x2x64xbf16, #tpu.memory_space<vmem>>, vector<1x2x2x64xbf16>
    %233 = vector.shape_cast %232 : vector<1x2x2x64xbf16> to vector<2x2x64xbf16>
    %234 = vector.shape_cast %231 : vector<2x2x64xbf16> to vector<1x2x2x64xbf16>
    tpu.vector_store %arg13[%c46, %c0_326, %c0_327, %c0_328], %234 {strides = array<i32>} : memref<64x2x2x64xbf16, #tpu.memory_space<vmem>>, vector<1x2x2x64xbf16>,
    %c0_329 = arith.constant 0 : index
    %c5_330 = arith.constant 5 : index
    %c7_331 = arith.constant 7 : index
    %c0_332 = arith.constant 0 : index
    %235 = vector.load %arg1[%c0_329, %c5_330, %c7_331, %c0_332] : memref<1x9x9x64xbf16, #tpu.memory_space<vmem>>, vector<1x2x2x64xbf16>
    %236 = vector.shape_cast %235 : vector<1x2x2x64xbf16> to vector<2x2x64xbf16>
    %c47 = arith.constant 47 : index
    %c0_333 = arith.constant 0 : index
    %c0_334 = arith.constant 0 : index
    %c0_335 = arith.constant 0 : index
    %237 = vector.load %arg13[%c47, %c0_333, %c0_334, %c0_335] : memref<64x2x2x64xbf16, #tpu.memory_space<vmem>>, vector<1x2x2x64xbf16>
    %238 = vector.shape_cast %237 : vector<1x2x2x64xbf16> to vector<2x2x64xbf16>
    %239 = vector.shape_cast %236 : vector<2x2x64xbf16> to vector<1x2x2x64xbf16>
    tpu.vector_store %arg13[%c47, %c0_333, %c0_334, %c0_335], %239 {strides = array<i32>} : memref<64x2x2x64xbf16, #tpu.memory_space<vmem>>, vector<1x2x2x64xbf16>,
    %c0_336 = arith.constant 0 : index
    %c6_337 = arith.constant 6 : index
    %c0_338 = arith.constant 0 : index
    %c0_339 = arith.constant 0 : index
    %240 = vector.load %arg1[%c0_336, %c6_337, %c0_338, %c0_339] : memref<1x9x9x64xbf16, #tpu.memory_space<vmem>>, vector<1x2x2x64xbf16>
    %241 = vector.shape_cast %240 : vector<1x2x2x64xbf16> to vector<2x2x64xbf16>
    %c48 = arith.constant 48 : index
    %c0_340 = arith.constant 0 : index
    %c0_341 = arith.constant 0 : index
    %c0_342 = arith.constant 0 : index
    %242 = vector.load %arg13[%c48, %c0_340, %c0_341, %c0_342] : memref<64x2x2x64xbf16, #tpu.memory_space<vmem>>, vector<1x2x2x64xbf16>
    %243 = vector.shape_cast %242 : vector<1x2x2x64xbf16> to vector<2x2x64xbf16>
    %244 = vector.shape_cast %241 : vector<2x2x64xbf16> to vector<1x2x2x64xbf16>
    tpu.vector_store %arg13[%c48, %c0_340, %c0_341, %c0_342], %244 {strides = array<i32>} : memref<64x2x2x64xbf16, #tpu.memory_space<vmem>>, vector<1x2x2x64xbf16>,
    %c0_343 = arith.constant 0 : index
    %c6_344 = arith.constant 6 : index
    %c1_345 = arith.constant 1 : index
    %c0_346 = arith.constant 0 : index
    %245 = vector.load %arg1[%c0_343, %c6_344, %c1_345, %c0_346] : memref<1x9x9x64xbf16, #tpu.memory_space<vmem>>, vector<1x2x2x64xbf16>
    %246 = vector.shape_cast %245 : vector<1x2x2x64xbf16> to vector<2x2x64xbf16>
    %c49 = arith.constant 49 : index
    %c0_347 = arith.constant 0 : index
    %c0_348 = arith.constant 0 : index
    %c0_349 = arith.constant 0 : index
    %247 = vector.load %arg13[%c49, %c0_347, %c0_348, %c0_349] : memref<64x2x2x64xbf16, #tpu.memory_space<vmem>>, vector<1x2x2x64xbf16>
    %248 = vector.shape_cast %247 : vector<1x2x2x64xbf16> to vector<2x2x64xbf16>
    %249 = vector.shape_cast %246 : vector<2x2x64xbf16> to vector<1x2x2x64xbf16>
    tpu.vector_store %arg13[%c49, %c0_347, %c0_348, %c0_349], %249 {strides = array<i32>} : memref<64x2x2x64xbf16, #tpu.memory_space<vmem>>, vector<1x2x2x64xbf16>,
    %c0_350 = arith.constant 0 : index
    %c6_351 = arith.constant 6 : index
    %c2_352 = arith.constant 2 : index
    %c0_353 = arith.constant 0 : index
    %250 = vector.load %arg1[%c0_350, %c6_351, %c2_352, %c0_353] : memref<1x9x9x64xbf16, #tpu.memory_space<vmem>>, vector<1x2x2x64xbf16>
    %251 = vector.shape_cast %250 : vector<1x2x2x64xbf16> to vector<2x2x64xbf16>
    %c50 = arith.constant 50 : index
    %c0_354 = arith.constant 0 : index
    %c0_355 = arith.constant 0 : index
    %c0_356 = arith.constant 0 : index
    %252 = vector.load %arg13[%c50, %c0_354, %c0_355, %c0_356] : memref<64x2x2x64xbf16, #tpu.memory_space<vmem>>, vector<1x2x2x64xbf16>
    %253 = vector.shape_cast %252 : vector<1x2x2x64xbf16> to vector<2x2x64xbf16>
    %254 = vector.shape_cast %251 : vector<2x2x64xbf16> to vector<1x2x2x64xbf16>
    tpu.vector_store %arg13[%c50, %c0_354, %c0_355, %c0_356], %254 {strides = array<i32>} : memref<64x2x2x64xbf16, #tpu.memory_space<vmem>>, vector<1x2x2x64xbf16>,
    %c0_357 = arith.constant 0 : index
    %c6_358 = arith.constant 6 : index
    %c3_359 = arith.constant 3 : index
    %c0_360 = arith.constant 0 : index
    %255 = vector.load %arg1[%c0_357, %c6_358, %c3_359, %c0_360] : memref<1x9x9x64xbf16, #tpu.memory_space<vmem>>, vector<1x2x2x64xbf16>
    %256 = vector.shape_cast %255 : vector<1x2x2x64xbf16> to vector<2x2x64xbf16>
    %c51 = arith.constant 51 : index
    %c0_361 = arith.constant 0 : index
    %c0_362 = arith.constant 0 : index
    %c0_363 = arith.constant 0 : index
    %257 = vector.load %arg13[%c51, %c0_361, %c0_362, %c0_363] : memref<64x2x2x64xbf16, #tpu.memory_space<vmem>>, vector<1x2x2x64xbf16>
    %258 = vector.shape_cast %257 : vector<1x2x2x64xbf16> to vector<2x2x64xbf16>
    %259 = vector.shape_cast %256 : vector<2x2x64xbf16> to vector<1x2x2x64xbf16>
    tpu.vector_store %arg13[%c51, %c0_361, %c0_362, %c0_363], %259 {strides = array<i32>} : memref<64x2x2x64xbf16, #tpu.memory_space<vmem>>, vector<1x2x2x64xbf16>,
    %c0_364 = arith.constant 0 : index
    %c6_365 = arith.constant 6 : index
    %c4_366 = arith.constant 4 : index
    %c0_367 = arith.constant 0 : index
    %260 = vector.load %arg1[%c0_364, %c6_365, %c4_366, %c0_367] : memref<1x9x9x64xbf16, #tpu.memory_space<vmem>>, vector<1x2x2x64xbf16>
    %261 = vector.shape_cast %260 : vector<1x2x2x64xbf16> to vector<2x2x64xbf16>
    %c52 = arith.constant 52 : index
    %c0_368 = arith.constant 0 : index
    %c0_369 = arith.constant 0 : index
    %c0_370 = arith.constant 0 : index
    %262 = vector.load %arg13[%c52, %c0_368, %c0_369, %c0_370] : memref<64x2x2x64xbf16, #tpu.memory_space<vmem>>, vector<1x2x2x64xbf16>
    %263 = vector.shape_cast %262 : vector<1x2x2x64xbf16> to vector<2x2x64xbf16>
    %264 = vector.shape_cast %261 : vector<2x2x64xbf16> to vector<1x2x2x64xbf16>
    tpu.vector_store %arg13[%c52, %c0_368, %c0_369, %c0_370], %264 {strides = array<i32>} : memref<64x2x2x64xbf16, #tpu.memory_space<vmem>>, vector<1x2x2x64xbf16>,
    %c0_371 = arith.constant 0 : index
    %c6_372 = arith.constant 6 : index
    %c5_373 = arith.constant 5 : index
    %c0_374 = arith.constant 0 : index
    %265 = vector.load %arg1[%c0_371, %c6_372, %c5_373, %c0_374] : memref<1x9x9x64xbf16, #tpu.memory_space<vmem>>, vector<1x2x2x64xbf16>
    %266 = vector.shape_cast %265 : vector<1x2x2x64xbf16> to vector<2x2x64xbf16>
    %c53 = arith.constant 53 : index
    %c0_375 = arith.constant 0 : index
    %c0_376 = arith.constant 0 : index
    %c0_377 = arith.constant 0 : index
    %267 = vector.load %arg13[%c53, %c0_375, %c0_376, %c0_377] : memref<64x2x2x64xbf16, #tpu.memory_space<vmem>>, vector<1x2x2x64xbf16>
    %268 = vector.shape_cast %267 : vector<1x2x2x64xbf16> to vector<2x2x64xbf16>
    %269 = vector.shape_cast %266 : vector<2x2x64xbf16> to vector<1x2x2x64xbf16>
    tpu.vector_store %arg13[%c53, %c0_375, %c0_376, %c0_377], %269 {strides = array<i32>} : memref<64x2x2x64xbf16, #tpu.memory_space<vmem>>, vector<1x2x2x64xbf16>,
    %c0_378 = arith.constant 0 : index
    %c6_379 = arith.constant 6 : index
    %c6_380 = arith.constant 6 : index
    %c0_381 = arith.constant 0 : index
    %270 = vector.load %arg1[%c0_378, %c6_379, %c6_380, %c0_381] : memref<1x9x9x64xbf16, #tpu.memory_space<vmem>>, vector<1x2x2x64xbf16>
    %271 = vector.shape_cast %270 : vector<1x2x2x64xbf16> to vector<2x2x64xbf16>
    %c54 = arith.constant 54 : index
    %c0_382 = arith.constant 0 : index
    %c0_383 = arith.constant 0 : index
    %c0_384 = arith.constant 0 : index
    %272 = vector.load %arg13[%c54, %c0_382, %c0_383, %c0_384] : memref<64x2x2x64xbf16, #tpu.memory_space<vmem>>, vector<1x2x2x64xbf16>
    %273 = vector.shape_cast %272 : vector<1x2x2x64xbf16> to vector<2x2x64xbf16>
    %274 = vector.shape_cast %271 : vector<2x2x64xbf16> to vector<1x2x2x64xbf16>
    tpu.vector_store %arg13[%c54, %c0_382, %c0_383, %c0_384], %274 {strides = array<i32>} : memref<64x2x2x64xbf16, #tpu.memory_space<vmem>>, vector<1x2x2x64xbf16>,
    %c0_385 = arith.constant 0 : index
    %c6_386 = arith.constant 6 : index
    %c7_387 = arith.constant 7 : index
    %c0_388 = arith.constant 0 : index
    %275 = vector.load %arg1[%c0_385, %c6_386, %c7_387, %c0_388] : memref<1x9x9x64xbf16, #tpu.memory_space<vmem>>, vector<1x2x2x64xbf16>
    %276 = vector.shape_cast %275 : vector<1x2x2x64xbf16> to vector<2x2x64xbf16>
    %c55 = arith.constant 55 : index
    %c0_389 = arith.constant 0 : index
    %c0_390 = arith.constant 0 : index
    %c0_391 = arith.constant 0 : index
    %277 = vector.load %arg13[%c55, %c0_389, %c0_390, %c0_391] : memref<64x2x2x64xbf16, #tpu.memory_space<vmem>>, vector<1x2x2x64xbf16>
    %278 = vector.shape_cast %277 : vector<1x2x2x64xbf16> to vector<2x2x64xbf16>
    %279 = vector.shape_cast %276 : vector<2x2x64xbf16> to vector<1x2x2x64xbf16>
    tpu.vector_store %arg13[%c55, %c0_389, %c0_390, %c0_391], %279 {strides = array<i32>} : memref<64x2x2x64xbf16, #tpu.memory_space<vmem>>, vector<1x2x2x64xbf16>,
    %c0_392 = arith.constant 0 : index
    %c7_393 = arith.constant 7 : index
    %c0_394 = arith.constant 0 : index
    %c0_395 = arith.constant 0 : index
    %280 = vector.load %arg1[%c0_392, %c7_393, %c0_394, %c0_395] : memref<1x9x9x64xbf16, #tpu.memory_space<vmem>>, vector<1x2x2x64xbf16>
    %281 = vector.shape_cast %280 : vector<1x2x2x64xbf16> to vector<2x2x64xbf16>
    %c56 = arith.constant 56 : index
    %c0_396 = arith.constant 0 : index
    %c0_397 = arith.constant 0 : index
    %c0_398 = arith.constant 0 : index
    %282 = vector.load %arg13[%c56, %c0_396, %c0_397, %c0_398] : memref<64x2x2x64xbf16, #tpu.memory_space<vmem>>, vector<1x2x2x64xbf16>
    %283 = vector.shape_cast %282 : vector<1x2x2x64xbf16> to vector<2x2x64xbf16>
    %284 = vector.shape_cast %281 : vector<2x2x64xbf16> to vector<1x2x2x64xbf16>
    tpu.vector_store %arg13[%c56, %c0_396, %c0_397, %c0_398], %284 {strides = array<i32>} : memref<64x2x2x64xbf16, #tpu.memory_space<vmem>>, vector<1x2x2x64xbf16>,
    %c0_399 = arith.constant 0 : index
    %c7_400 = arith.constant 7 : index
    %c1_401 = arith.constant 1 : index
    %c0_402 = arith.constant 0 : index
    %285 = vector.load %arg1[%c0_399, %c7_400, %c1_401, %c0_402] : memref<1x9x9x64xbf16, #tpu.memory_space<vmem>>, vector<1x2x2x64xbf16>
    %286 = vector.shape_cast %285 : vector<1x2x2x64xbf16> to vector<2x2x64xbf16>
    %c57 = arith.constant 57 : index
    %c0_403 = arith.constant 0 : index
    %c0_404 = arith.constant 0 : index
    %c0_405 = arith.constant 0 : index
    %287 = vector.load %arg13[%c57, %c0_403, %c0_404, %c0_405] : memref<64x2x2x64xbf16, #tpu.memory_space<vmem>>, vector<1x2x2x64xbf16>
    %288 = vector.shape_cast %287 : vector<1x2x2x64xbf16> to vector<2x2x64xbf16>
    %289 = vector.shape_cast %286 : vector<2x2x64xbf16> to vector<1x2x2x64xbf16>
    tpu.vector_store %arg13[%c57, %c0_403, %c0_404, %c0_405], %289 {strides = array<i32>} : memref<64x2x2x64xbf16, #tpu.memory_space<vmem>>, vector<1x2x2x64xbf16>,
    %c0_406 = arith.constant 0 : index
    %c7_407 = arith.constant 7 : index
    %c2_408 = arith.constant 2 : index
    %c0_409 = arith.constant 0 : index
    %290 = vector.load %arg1[%c0_406, %c7_407, %c2_408, %c0_409] : memref<1x9x9x64xbf16, #tpu.memory_space<vmem>>, vector<1x2x2x64xbf16>
    %291 = vector.shape_cast %290 : vector<1x2x2x64xbf16> to vector<2x2x64xbf16>
    %c58 = arith.constant 58 : index
    %c0_410 = arith.constant 0 : index
    %c0_411 = arith.constant 0 : index
    %c0_412 = arith.constant 0 : index
    %292 = vector.load %arg13[%c58, %c0_410, %c0_411, %c0_412] : memref<64x2x2x64xbf16, #tpu.memory_space<vmem>>, vector<1x2x2x64xbf16>
    %293 = vector.shape_cast %292 : vector<1x2x2x64xbf16> to vector<2x2x64xbf16>
    %294 = vector.shape_cast %291 : vector<2x2x64xbf16> to vector<1x2x2x64xbf16>
    tpu.vector_store %arg13[%c58, %c0_410, %c0_411, %c0_412], %294 {strides = array<i32>} : memref<64x2x2x64xbf16, #tpu.memory_space<vmem>>, vector<1x2x2x64xbf16>,
    %c0_413 = arith.constant 0 : index
    %c7_414 = arith.constant 7 : index
    %c3_415 = arith.constant 3 : index
    %c0_416 = arith.constant 0 : index
    %295 = vector.load %arg1[%c0_413, %c7_414, %c3_415, %c0_416] : memref<1x9x9x64xbf16, #tpu.memory_space<vmem>>, vector<1x2x2x64xbf16>
    %296 = vector.shape_cast %295 : vector<1x2x2x64xbf16> to vector<2x2x64xbf16>
    %c59 = arith.constant 59 : index
    %c0_417 = arith.constant 0 : index
    %c0_418 = arith.constant 0 : index
    %c0_419 = arith.constant 0 : index
    %297 = vector.load %arg13[%c59, %c0_417, %c0_418, %c0_419] : memref<64x2x2x64xbf16, #tpu.memory_space<vmem>>, vector<1x2x2x64xbf16>
    %298 = vector.shape_cast %297 : vector<1x2x2x64xbf16> to vector<2x2x64xbf16>
    %299 = vector.shape_cast %296 : vector<2x2x64xbf16> to vector<1x2x2x64xbf16>
    tpu.vector_store %arg13[%c59, %c0_417, %c0_418, %c0_419], %299 {strides = array<i32>} : memref<64x2x2x64xbf16, #tpu.memory_space<vmem>>, vector<1x2x2x64xbf16>,
    %c0_420 = arith.constant 0 : index
    %c7_421 = arith.constant 7 : index
    %c4_422 = arith.constant 4 : index
    %c0_423 = arith.constant 0 : index
    %300 = vector.load %arg1[%c0_420, %c7_421, %c4_422, %c0_423] : memref<1x9x9x64xbf16, #tpu.memory_space<vmem>>, vector<1x2x2x64xbf16>
    %301 = vector.shape_cast %300 : vector<1x2x2x64xbf16> to vector<2x2x64xbf16>
    %c60 = arith.constant 60 : index
    %c0_424 = arith.constant 0 : index
    %c0_425 = arith.constant 0 : index
    %c0_426 = arith.constant 0 : index
    %302 = vector.load %arg13[%c60, %c0_424, %c0_425, %c0_426] : memref<64x2x2x64xbf16, #tpu.memory_space<vmem>>, vector<1x2x2x64xbf16>
    %303 = vector.shape_cast %302 : vector<1x2x2x64xbf16> to vector<2x2x64xbf16>
    %304 = vector.shape_cast %301 : vector<2x2x64xbf16> to vector<1x2x2x64xbf16>
    tpu.vector_store %arg13[%c60, %c0_424, %c0_425, %c0_426], %304 {strides = array<i32>} : memref<64x2x2x64xbf16, #tpu.memory_space<vmem>>, vector<1x2x2x64xbf16>,
    %c0_427 = arith.constant 0 : index
    %c7_428 = arith.constant 7 : index
    %c5_429 = arith.constant 5 : index
    %c0_430 = arith.constant 0 : index
    %305 = vector.load %arg1[%c0_427, %c7_428, %c5_429, %c0_430] : memref<1x9x9x64xbf16, #tpu.memory_space<vmem>>, vector<1x2x2x64xbf16>
    %306 = vector.shape_cast %305 : vector<1x2x2x64xbf16> to vector<2x2x64xbf16>
    %c61 = arith.constant 61 : index
    %c0_431 = arith.constant 0 : index
    %c0_432 = arith.constant 0 : index
    %c0_433 = arith.constant 0 : index
    %307 = vector.load %arg13[%c61, %c0_431, %c0_432, %c0_433] : memref<64x2x2x64xbf16, #tpu.memory_space<vmem>>, vector<1x2x2x64xbf16>
    %308 = vector.shape_cast %307 : vector<1x2x2x64xbf16> to vector<2x2x64xbf16>
    %309 = vector.shape_cast %306 : vector<2x2x64xbf16> to vector<1x2x2x64xbf16>
    tpu.vector_store %arg13[%c61, %c0_431, %c0_432, %c0_433], %309 {strides = array<i32>} : memref<64x2x2x64xbf16, #tpu.memory_space<vmem>>, vector<1x2x2x64xbf16>,
    %c0_434 = arith.constant 0 : index
    %c7_435 = arith.constant 7 : index
    %c6_436 = arith.constant 6 : index
    %c0_437 = arith.constant 0 : index
    %310 = vector.load %arg1[%c0_434, %c7_435, %c6_436, %c0_437] : memref<1x9x9x64xbf16, #tpu.memory_space<vmem>>, vector<1x2x2x64xbf16>
    %311 = vector.shape_cast %310 : vector<1x2x2x64xbf16> to vector<2x2x64xbf16>
    %c62 = arith.constant 62 : index
    %c0_438 = arith.constant 0 : index
    %c0_439 = arith.constant 0 : index
    %c0_440 = arith.constant 0 : index
    %312 = vector.load %arg13[%c62, %c0_438, %c0_439, %c0_440] : memref<64x2x2x64xbf16, #tpu.memory_space<vmem>>, vector<1x2x2x64xbf16>
    %313 = vector.shape_cast %312 : vector<1x2x2x64xbf16> to vector<2x2x64xbf16>
    %314 = vector.shape_cast %311 : vector<2x2x64xbf16> to vector<1x2x2x64xbf16>
    tpu.vector_store %arg13[%c62, %c0_438, %c0_439, %c0_440], %314 {strides = array<i32>} : memref<64x2x2x64xbf16, #tpu.memory_space<vmem>>, vector<1x2x2x64xbf16>,
    %c0_441 = arith.constant 0 : index
    %c7_442 = arith.constant 7 : index
    %c7_443 = arith.constant 7 : index
    %c0_444 = arith.constant 0 : index
    %315 = vector.load %arg1[%c0_441, %c7_442, %c7_443, %c0_444] : memref<1x9x9x64xbf16, #tpu.memory_space<vmem>>, vector<1x2x2x64xbf16>
    %316 = vector.shape_cast %315 : vector<1x2x2x64xbf16> to vector<2x2x64xbf16>
    %c63 = arith.constant 63 : index
    %c0_445 = arith.constant 0 : index
    %c0_446 = arith.constant 0 : index
    %c0_447 = arith.constant 0 : index
    %317 = vector.load %arg13[%c63, %c0_445, %c0_446, %c0_447] : memref<64x2x2x64xbf16, #tpu.memory_space<vmem>>, vector<1x2x2x64xbf16>
    %318 = vector.shape_cast %317 : vector<1x2x2x64xbf16> to vector<2x2x64xbf16>
    %319 = vector.shape_cast %316 : vector<2x2x64xbf16> to vector<1x2x2x64xbf16>
    tpu.vector_store %arg13[%c63, %c0_445, %c0_446, %c0_447], %319 {strides = array<i32>} : memref<64x2x2x64xbf16, #tpu.memory_space<vmem>>, vector<1x2x2x64xbf16>,
    %cst = arith.constant 0.000000e+00 : f32
    %320 = vector.broadcast %cst : f32 to vector<64x32xf32>
    %c0_448 = arith.constant 0 : index
    %c0_449 = arith.constant 0 : index
    %c0_450 = arith.constant 0 : index
    %c0_451 = arith.constant 0 : index
    %321 = vector.load %arg13[%c0_448, %c0_449, %c0_450, %c0_451] : memref<64x2x2x64xbf16, #tpu.memory_space<vmem>>, vector<64x1x1x64xbf16>
    %322 = vector.shape_cast %321 : vector<64x1x1x64xbf16> to vector<64x64xbf16>
    %c0_452 = arith.constant 0 : index
    %c0_453 = arith.constant 0 : index
    %323 = vector.load %arg2[%c0_452, %c0_453] : memref<256x32xbf16, #tpu.memory_space<vmem>>, vector<64x32xbf16>
    %cst_454 = arith.constant dense<0.000000e+00> : vector<64x32xf32>
    %324 = tpu.matmul %322, %323, %cst_454 {dimension_numbers = #tpu.dot_dimension_numbers<[1], [0], [0], [1], [0, 0, 1, 1], [], []>} : vector<64x64xbf16>, vector<64x32xbf16>, vector<64x32xf32> -> vector<64x32xf32>
    %325 = arith.addf %320, %324 : vector<64x32xf32>
    %c0_455 = arith.constant 0 : index
    %c0_456 = arith.constant 0 : index
    %c1_457 = arith.constant 1 : index
    %c0_458 = arith.constant 0 : index
    %326 = vector.load %arg13[%c0_455, %c0_456, %c1_457, %c0_458] : memref<64x2x2x64xbf16, #tpu.memory_space<vmem>>, vector<64x1x1x64xbf16>
    %327 = vector.shape_cast %326 : vector<64x1x1x64xbf16> to vector<64x64xbf16>
    %c64 = arith.constant 64 : index
    %c0_459 = arith.constant 0 : index
    %328 = vector.load %arg2[%c64, %c0_459] : memref<256x32xbf16, #tpu.memory_space<vmem>>, vector<64x32xbf16>
    %cst_460 = arith.constant dense<0.000000e+00> : vector<64x32xf32>
    %329 = tpu.matmul %327, %328, %cst_460 {dimension_numbers = #tpu.dot_dimension_numbers<[1], [0], [0], [1], [0, 0, 1, 1], [], []>} : vector<64x64xbf16>, vector<64x32xbf16>, vector<64x32xf32> -> vector<64x32xf32>
    %330 = arith.addf %325, %329 : vector<64x32xf32>
    %c0_461 = arith.constant 0 : index
    %c1_462 = arith.constant 1 : index
    %c0_463 = arith.constant 0 : index
    %c0_464 = arith.constant 0 : index
    %331 = vector.load %arg13[%c0_461, %c1_462, %c0_463, %c0_464] : memref<64x2x2x64xbf16, #tpu.memory_space<vmem>>, vector<64x1x1x64xbf16>
    %332 = vector.shape_cast %331 : vector<64x1x1x64xbf16> to vector<64x64xbf16>
    %c128 = arith.constant 128 : index
    %c0_465 = arith.constant 0 : index
    %333 = vector.load %arg2[%c128, %c0_465] : memref<256x32xbf16, #tpu.memory_space<vmem>>, vector<64x32xbf16>
    %cst_466 = arith.constant dense<0.000000e+00> : vector<64x32xf32>
    %334 = tpu.matmul %332, %333, %cst_466 {dimension_numbers = #tpu.dot_dimension_numbers<[1], [0], [0], [1], [0, 0, 1, 1], [], []>} : vector<64x64xbf16>, vector<64x32xbf16>, vector<64x32xf32> -> vector<64x32xf32>
    %335 = arith.addf %330, %334 : vector<64x32xf32>
    %c0_467 = arith.constant 0 : index
    %c1_468 = arith.constant 1 : index
    %c1_469 = arith.constant 1 : index
    %c0_470 = arith.constant 0 : index
    %336 = vector.load %arg13[%c0_467, %c1_468, %c1_469, %c0_470] : memref<64x2x2x64xbf16, #tpu.memory_space<vmem>>, vector<64x1x1x64xbf16>
    %337 = vector.shape_cast %336 : vector<64x1x1x64xbf16> to vector<64x64xbf16>
    %c192 = arith.constant 192 : index
    %c0_471 = arith.constant 0 : index
    %338 = vector.load %arg2[%c192, %c0_471] : memref<256x32xbf16, #tpu.memory_space<vmem>>, vector<64x32xbf16>
    %cst_472 = arith.constant dense<0.000000e+00> : vector<64x32xf32>
    %339 = tpu.matmul %337, %338, %cst_472 {dimension_numbers = #tpu.dot_dimension_numbers<[1], [0], [0], [1], [0, 0, 1, 1], [], []>} : vector<64x64xbf16>, vector<64x32xbf16>, vector<64x32xf32> -> vector<64x32xf32>
    %340 = arith.addf %335, %339 : vector<64x32xf32>
    %c0_473 = arith.constant 0 : index
    %c0_474 = arith.constant 0 : index
    %341 = vector.load %arg3[%c0_473, %c0_474] : memref<1x32xf32, #tpu.memory_space<vmem>>, vector<1x32xf32>
    %342 = vector.broadcast %341 : vector<1x32xf32> to vector<64x32xf32>
    %343 = arith.addf %340, %342 : vector<64x32xf32>
    %cst_475 = arith.constant 0.000000e+00 : f32
    %344 = vector.broadcast %cst_475 : f32 to vector<64x32xf32>
    %345 = arith.cmpf oge, %343, %344 : vector<64x32xf32>
    %cst_476 = arith.constant 0.00999999977 : f32
    %346 = vector.broadcast %cst_476 : f32 to vector<64x32xf32>
    %347 = arith.mulf %346, %343 : vector<64x32xf32>
    %348 = arith.select %345, %343, %347 : vector<64x32xi1>, vector<64x32xf32>
    %349 = arith.truncf %348 : vector<64x32xf32> to vector<64x32xbf16>
    %350 = vector.extract_strided_slice %349 {offsets = [0, 0], sizes = [8, 32], strides = [1, 1]} : vector<64x32xbf16> to vector<8x32xbf16>
    %c0_477 = arith.constant 0 : index
    %c0_478 = arith.constant 0 : index
    %c0_479 = arith.constant 0 : index
    %351 = vector.load %arg14[%c0_477, %c0_478, %c0_479] : memref<8x8x32xbf16, #tpu.memory_space<vmem>>, vector<1x8x32xbf16>
    %352 = vector.shape_cast %351 : vector<1x8x32xbf16> to vector<8x32xbf16>
    %353 = vector.shape_cast %350 : vector<8x32xbf16> to vector<1x8x32xbf16>
    tpu.vector_store %arg14[%c0_477, %c0_478, %c0_479], %353 {strides = array<i32>} : memref<8x8x32xbf16, #tpu.memory_space<vmem>>, vector<1x8x32xbf16>,
    %354 = vector.extract_strided_slice %349 {offsets = [8, 0], sizes = [8, 32], strides = [1, 1]} : vector<64x32xbf16> to vector<8x32xbf16>
    %c1_480 = arith.constant 1 : index
    %c0_481 = arith.constant 0 : index
    %c0_482 = arith.constant 0 : index
    %355 = vector.load %arg14[%c1_480, %c0_481, %c0_482] : memref<8x8x32xbf16, #tpu.memory_space<vmem>>, vector<1x8x32xbf16>
    %356 = vector.shape_cast %355 : vector<1x8x32xbf16> to vector<8x32xbf16>
    %357 = vector.shape_cast %354 : vector<8x32xbf16> to vector<1x8x32xbf16>
    tpu.vector_store %arg14[%c1_480, %c0_481, %c0_482], %357 {strides = array<i32>} : memref<8x8x32xbf16, #tpu.memory_space<vmem>>, vector<1x8x32xbf16>,
    %358 = vector.extract_strided_slice %349 {offsets = [16, 0], sizes = [8, 32], strides = [1, 1]} : vector<64x32xbf16> to vector<8x32xbf16>
    %c2_483 = arith.constant 2 : index
    %c0_484 = arith.constant 0 : index
    %c0_485 = arith.constant 0 : index
    %359 = vector.load %arg14[%c2_483, %c0_484, %c0_485] : memref<8x8x32xbf16, #tpu.memory_space<vmem>>, vector<1x8x32xbf16>
    %360 = vector.shape_cast %359 : vector<1x8x32xbf16> to vector<8x32xbf16>
    %361 = vector.shape_cast %358 : vector<8x32xbf16> to vector<1x8x32xbf16>
    tpu.vector_store %arg14[%c2_483, %c0_484, %c0_485], %361 {strides = array<i32>} : memref<8x8x32xbf16, #tpu.memory_space<vmem>>, vector<1x8x32xbf16>,
    %362 = vector.extract_strided_slice %349 {offsets = [24, 0], sizes = [8, 32], strides = [1, 1]} : vector<64x32xbf16> to vector<8x32xbf16>
    %c3_486 = arith.constant 3 : index
    %c0_487 = arith.constant 0 : index
    %c0_488 = arith.constant 0 : index
    %363 = vector.load %arg14[%c3_486, %c0_487, %c0_488] : memref<8x8x32xbf16, #tpu.memory_space<vmem>>, vector<1x8x32xbf16>
    %364 = vector.shape_cast %363 : vector<1x8x32xbf16> to vector<8x32xbf16>
    %365 = vector.shape_cast %362 : vector<8x32xbf16> to vector<1x8x32xbf16>
    tpu.vector_store %arg14[%c3_486, %c0_487, %c0_488], %365 {strides = array<i32>} : memref<8x8x32xbf16, #tpu.memory_space<vmem>>, vector<1x8x32xbf16>,
    %366 = vector.extract_strided_slice %349 {offsets = [32, 0], sizes = [8, 32], strides = [1, 1]} : vector<64x32xbf16> to vector<8x32xbf16>
    %c4_489 = arith.constant 4 : index
    %c0_490 = arith.constant 0 : index
    %c0_491 = arith.constant 0 : index
    %367 = vector.load %arg14[%c4_489, %c0_490, %c0_491] : memref<8x8x32xbf16, #tpu.memory_space<vmem>>, vector<1x8x32xbf16>
    %368 = vector.shape_cast %367 : vector<1x8x32xbf16> to vector<8x32xbf16>
    %369 = vector.shape_cast %366 : vector<8x32xbf16> to vector<1x8x32xbf16>
    tpu.vector_store %arg14[%c4_489, %c0_490, %c0_491], %369 {strides = array<i32>} : memref<8x8x32xbf16, #tpu.memory_space<vmem>>, vector<1x8x32xbf16>,
    %370 = vector.extract_strided_slice %349 {offsets = [40, 0], sizes = [8, 32], strides = [1, 1]} : vector<64x32xbf16> to vector<8x32xbf16>
    %c5_492 = arith.constant 5 : index
    %c0_493 = arith.constant 0 : index
    %c0_494 = arith.constant 0 : index
    %371 = vector.load %arg14[%c5_492, %c0_493, %c0_494] : memref<8x8x32xbf16, #tpu.memory_space<vmem>>, vector<1x8x32xbf16>
    %372 = vector.shape_cast %371 : vector<1x8x32xbf16> to vector<8x32xbf16>
    %373 = vector.shape_cast %370 : vector<8x32xbf16> to vector<1x8x32xbf16>
    tpu.vector_store %arg14[%c5_492, %c0_493, %c0_494], %373 {strides = array<i32>} : memref<8x8x32xbf16, #tpu.memory_space<vmem>>, vector<1x8x32xbf16>,
    %374 = vector.extract_strided_slice %349 {offsets = [48, 0], sizes = [8, 32], strides = [1, 1]} : vector<64x32xbf16> to vector<8x32xbf16>
    %c6_495 = arith.constant 6 : index
    %c0_496 = arith.constant 0 : index
    %c0_497 = arith.constant 0 : index
    %375 = vector.load %arg14[%c6_495, %c0_496, %c0_497] : memref<8x8x32xbf16, #tpu.memory_space<vmem>>, vector<1x8x32xbf16>
    %376 = vector.shape_cast %375 : vector<1x8x32xbf16> to vector<8x32xbf16>
    %377 = vector.shape_cast %374 : vector<8x32xbf16> to vector<1x8x32xbf16>
    tpu.vector_store %arg14[%c6_495, %c0_496, %c0_497], %377 {strides = array<i32>} : memref<8x8x32xbf16, #tpu.memory_space<vmem>>, vector<1x8x32xbf16>,
    %378 = vector.extract_strided_slice %349 {offsets = [56, 0], sizes = [8, 32], strides = [1, 1]} : vector<64x32xbf16> to vector<8x32xbf16>
    %c7_498 = arith.constant 7 : index
    %c0_499 = arith.constant 0 : index
    %c0_500 = arith.constant 0 : index
    %379 = vector.load %arg14[%c7_498, %c0_499, %c0_500] : memref<8x8x32xbf16, #tpu.memory_space<vmem>>, vector<1x8x32xbf16>
    %380 = vector.shape_cast %379 : vector<1x8x32xbf16> to vector<8x32xbf16>
    %381 = vector.shape_cast %378 : vector<8x32xbf16> to vector<1x8x32xbf16>
    tpu.vector_store %arg14[%c7_498, %c0_499, %c0_500], %381 {strides = array<i32>} : memref<8x8x32xbf16, #tpu.memory_space<vmem>>, vector<1x8x32xbf16>,
    %c0_501 = arith.constant 0 : index
    %c0_502 = arith.constant 0 : index
    %c0_503 = arith.constant 0 : index
    %382 = vector.load %arg14[%c0_501, %c0_502, %c0_503] : memref<8x8x32xbf16, #tpu.memory_space<vmem>>, vector<4x4x32xbf16>
    %c0_504 = arith.constant 0 : index
    %c0_505 = arith.constant 0 : index
    %c0_506 = arith.constant 0 : index
    %c0_507 = arith.constant 0 : index
    %383 = vector.load %arg15[%c0_504, %c0_505, %c0_506, %c0_507] : memref<9x4x4x32xbf16, #tpu.memory_space<vmem>>, vector<1x4x4x32xbf16>
    %384 = vector.shape_cast %383 : vector<1x4x4x32xbf16> to vector<4x4x32xbf16>
    %385 = vector.shape_cast %382 : vector<4x4x32xbf16> to vector<1x4x4x32xbf16>
    tpu.vector_store %arg15[%c0_504, %c0_505, %c0_506, %c0_507], %385 {strides = array<i32>} : memref<9x4x4x32xbf16, #tpu.memory_space<vmem>>, vector<1x4x4x32xbf16>,
    %c0_508 = arith.constant 0 : index
    %c2_509 = arith.constant 2 : index
    %c0_510 = arith.constant 0 : index
    %386 = vector.load %arg14[%c0_508, %c2_509, %c0_510] : memref<8x8x32xbf16, #tpu.memory_space<vmem>>, vector<4x4x32xbf16>
    %c1_511 = arith.constant 1 : index
    %c0_512 = arith.constant 0 : index
    %c0_513 = arith.constant 0 : index
    %c0_514 = arith.constant 0 : index
    %387 = vector.load %arg15[%c1_511, %c0_512, %c0_513, %c0_514] : memref<9x4x4x32xbf16, #tpu.memory_space<vmem>>, vector<1x4x4x32xbf16>
    %388 = vector.shape_cast %387 : vector<1x4x4x32xbf16> to vector<4x4x32xbf16>
    %389 = vector.shape_cast %386 : vector<4x4x32xbf16> to vector<1x4x4x32xbf16>
    tpu.vector_store %arg15[%c1_511, %c0_512, %c0_513, %c0_514], %389 {strides = array<i32>} : memref<9x4x4x32xbf16, #tpu.memory_space<vmem>>, vector<1x4x4x32xbf16>,
    %c0_515 = arith.constant 0 : index
    %c4_516 = arith.constant 4 : index
    %c0_517 = arith.constant 0 : index
    %390 = vector.load %arg14[%c0_515, %c4_516, %c0_517] : memref<8x8x32xbf16, #tpu.memory_space<vmem>>, vector<4x4x32xbf16>
    %c2_518 = arith.constant 2 : index
    %c0_519 = arith.constant 0 : index
    %c0_520 = arith.constant 0 : index
    %c0_521 = arith.constant 0 : index
    %391 = vector.load %arg15[%c2_518, %c0_519, %c0_520, %c0_521] : memref<9x4x4x32xbf16, #tpu.memory_space<vmem>>, vector<1x4x4x32xbf16>
    %392 = vector.shape_cast %391 : vector<1x4x4x32xbf16> to vector<4x4x32xbf16>
    %393 = vector.shape_cast %390 : vector<4x4x32xbf16> to vector<1x4x4x32xbf16>
    tpu.vector_store %arg15[%c2_518, %c0_519, %c0_520, %c0_521], %393 {strides = array<i32>} : memref<9x4x4x32xbf16, #tpu.memory_space<vmem>>, vector<1x4x4x32xbf16>,
    %c2_522 = arith.constant 2 : index
    %c0_523 = arith.constant 0 : index
    %c0_524 = arith.constant 0 : index
    %394 = vector.load %arg14[%c2_522, %c0_523, %c0_524] : memref<8x8x32xbf16, #tpu.memory_space<vmem>>, vector<4x4x32xbf16>
    %c3_525 = arith.constant 3 : index
    %c0_526 = arith.constant 0 : index
    %c0_527 = arith.constant 0 : index
    %c0_528 = arith.constant 0 : index
    %395 = vector.load %arg15[%c3_525, %c0_526, %c0_527, %c0_528] : memref<9x4x4x32xbf16, #tpu.memory_space<vmem>>, vector<1x4x4x32xbf16>
    %396 = vector.shape_cast %395 : vector<1x4x4x32xbf16> to vector<4x4x32xbf16>
    %397 = vector.shape_cast %394 : vector<4x4x32xbf16> to vector<1x4x4x32xbf16>
    tpu.vector_store %arg15[%c3_525, %c0_526, %c0_527, %c0_528], %397 {strides = array<i32>} : memref<9x4x4x32xbf16, #tpu.memory_space<vmem>>, vector<1x4x4x32xbf16>,
    %c2_529 = arith.constant 2 : index
    %c2_530 = arith.constant 2 : index
    %c0_531 = arith.constant 0 : index
    %398 = vector.load %arg14[%c2_529, %c2_530, %c0_531] : memref<8x8x32xbf16, #tpu.memory_space<vmem>>, vector<4x4x32xbf16>
    %c4_532 = arith.constant 4 : index
    %c0_533 = arith.constant 0 : index
    %c0_534 = arith.constant 0 : index
    %c0_535 = arith.constant 0 : index
    %399 = vector.load %arg15[%c4_532, %c0_533, %c0_534, %c0_535] : memref<9x4x4x32xbf16, #tpu.memory_space<vmem>>, vector<1x4x4x32xbf16>
    %400 = vector.shape_cast %399 : vector<1x4x4x32xbf16> to vector<4x4x32xbf16>
    %401 = vector.shape_cast %398 : vector<4x4x32xbf16> to vector<1x4x4x32xbf16>
    tpu.vector_store %arg15[%c4_532, %c0_533, %c0_534, %c0_535], %401 {strides = array<i32>} : memref<9x4x4x32xbf16, #tpu.memory_space<vmem>>, vector<1x4x4x32xbf16>,
    %c2_536 = arith.constant 2 : index
    %c4_537 = arith.constant 4 : index
    %c0_538 = arith.constant 0 : index
    %402 = vector.load %arg14[%c2_536, %c4_537, %c0_538] : memref<8x8x32xbf16, #tpu.memory_space<vmem>>, vector<4x4x32xbf16>
    %c5_539 = arith.constant 5 : index
    %c0_540 = arith.constant 0 : index
    %c0_541 = arith.constant 0 : index
    %c0_542 = arith.constant 0 : index
    %403 = vector.load %arg15[%c5_539, %c0_540, %c0_541, %c0_542] : memref<9x4x4x32xbf16, #tpu.memory_space<vmem>>, vector<1x4x4x32xbf16>
    %404 = vector.shape_cast %403 : vector<1x4x4x32xbf16> to vector<4x4x32xbf16>
    %405 = vector.shape_cast %402 : vector<4x4x32xbf16> to vector<1x4x4x32xbf16>
    tpu.vector_store %arg15[%c5_539, %c0_540, %c0_541, %c0_542], %405 {strides = array<i32>} : memref<9x4x4x32xbf16, #tpu.memory_space<vmem>>, vector<1x4x4x32xbf16>,
    %c4_543 = arith.constant 4 : index
    %c0_544 = arith.constant 0 : index
    %c0_545 = arith.constant 0 : index
    %406 = vector.load %arg14[%c4_543, %c0_544, %c0_545] : memref<8x8x32xbf16, #tpu.memory_space<vmem>>, vector<4x4x32xbf16>
    %c6_546 = arith.constant 6 : index
    %c0_547 = arith.constant 0 : index
    %c0_548 = arith.constant 0 : index
    %c0_549 = arith.constant 0 : index
    %407 = vector.load %arg15[%c6_546, %c0_547, %c0_548, %c0_549] : memref<9x4x4x32xbf16, #tpu.memory_space<vmem>>, vector<1x4x4x32xbf16>
    %408 = vector.shape_cast %407 : vector<1x4x4x32xbf16> to vector<4x4x32xbf16>
    %409 = vector.shape_cast %406 : vector<4x4x32xbf16> to vector<1x4x4x32xbf16>
    tpu.vector_store %arg15[%c6_546, %c0_547, %c0_548, %c0_549], %409 {strides = array<i32>} : memref<9x4x4x32xbf16, #tpu.memory_space<vmem>>, vector<1x4x4x32xbf16>,
    %c4_550 = arith.constant 4 : index
    %c2_551 = arith.constant 2 : index
    %c0_552 = arith.constant 0 : index
    %410 = vector.load %arg14[%c4_550, %c2_551, %c0_552] : memref<8x8x32xbf16, #tpu.memory_space<vmem>>, vector<4x4x32xbf16>
    %c7_553 = arith.constant 7 : index
    %c0_554 = arith.constant 0 : index
    %c0_555 = arith.constant 0 : index
    %c0_556 = arith.constant 0 : index
    %411 = vector.load %arg15[%c7_553, %c0_554, %c0_555, %c0_556] : memref<9x4x4x32xbf16, #tpu.memory_space<vmem>>, vector<1x4x4x32xbf16>
    %412 = vector.shape_cast %411 : vector<1x4x4x32xbf16> to vector<4x4x32xbf16>
    %413 = vector.shape_cast %410 : vector<4x4x32xbf16> to vector<1x4x4x32xbf16>
    tpu.vector_store %arg15[%c7_553, %c0_554, %c0_555, %c0_556], %413 {strides = array<i32>} : memref<9x4x4x32xbf16, #tpu.memory_space<vmem>>, vector<1x4x4x32xbf16>,
    %c4_557 = arith.constant 4 : index
    %c4_558 = arith.constant 4 : index
    %c0_559 = arith.constant 0 : index
    %414 = vector.load %arg14[%c4_557, %c4_558, %c0_559] : memref<8x8x32xbf16, #tpu.memory_space<vmem>>, vector<4x4x32xbf16>
    %c8_560 = arith.constant 8 : index
    %c0_561 = arith.constant 0 : index
    %c0_562 = arith.constant 0 : index
    %c0_563 = arith.constant 0 : index
    %415 = vector.load %arg15[%c8_560, %c0_561, %c0_562, %c0_563] : memref<9x4x4x32xbf16, #tpu.memory_space<vmem>>, vector<1x4x4x32xbf16>
    %416 = vector.shape_cast %415 : vector<1x4x4x32xbf16> to vector<4x4x32xbf16>
    %417 = vector.shape_cast %414 : vector<4x4x32xbf16> to vector<1x4x4x32xbf16>
    tpu.vector_store %arg15[%c8_560, %c0_561, %c0_562, %c0_563], %417 {strides = array<i32>} : memref<9x4x4x32xbf16, #tpu.memory_space<vmem>>, vector<1x4x4x32xbf16>,
    %cst_564 = arith.constant 0.000000e+00 : f32
    %418 = vector.broadcast %cst_564 : f32 to vector<9x64xf32>
    %c0_565 = arith.constant 0 : index
    %c0_566 = arith.constant 0 : index
    %c0_567 = arith.constant 0 : index
    %c0_568 = arith.constant 0 : index
    %419 = vector.load %arg15[%c0_565, %c0_566, %c0_567, %c0_568] : memref<9x4x4x32xbf16, #tpu.memory_space<vmem>>, vector<9x1x1x32xbf16>
    %420 = vector.shape_cast %419 : vector<9x1x1x32xbf16> to vector<9x32xbf16>
    %c0_569 = arith.constant 0 : index
    %c0_570 = arith.constant 0 : index
    %421 = vector.load %arg4[%c0_569, %c0_570] : memref<512x64xbf16, #tpu.memory_space<vmem>>, vector<32x64xbf16>
    %cst_571 = arith.constant dense<0.000000e+00> : vector<9x64xf32>
    %422 = tpu.matmul %420, %421, %cst_571 {dimension_numbers = #tpu.dot_dimension_numbers<[1], [0], [0], [1], [0, 0, 1, 1], [], []>} : vector<9x32xbf16>, vector<32x64xbf16>, vector<9x64xf32> -> vector<9x64xf32>
    %423 = arith.addf %418, %422 : vector<9x64xf32>
    %c0_572 = arith.constant 0 : index
    %c0_573 = arith.constant 0 : index
    %c1_574 = arith.constant 1 : index
    %c0_575 = arith.constant 0 : index
    %424 = vector.load %arg15[%c0_572, %c0_573, %c1_574, %c0_575] : memref<9x4x4x32xbf16, #tpu.memory_space<vmem>>, vector<9x1x1x32xbf16>
    %425 = vector.shape_cast %424 : vector<9x1x1x32xbf16> to vector<9x32xbf16>
    %c32_576 = arith.constant 32 : index
    %c0_577 = arith.constant 0 : index
    %426 = vector.load %arg4[%c32_576, %c0_577] : memref<512x64xbf16, #tpu.memory_space<vmem>>, vector<32x64xbf16>
    %cst_578 = arith.constant dense<0.000000e+00> : vector<9x64xf32>
    %427 = tpu.matmul %425, %426, %cst_578 {dimension_numbers = #tpu.dot_dimension_numbers<[1], [0], [0], [1], [0, 0, 1, 1], [], []>} : vector<9x32xbf16>, vector<32x64xbf16>, vector<9x64xf32> -> vector<9x64xf32>
    %428 = arith.addf %423, %427 : vector<9x64xf32>
    %c0_579 = arith.constant 0 : index
    %c0_580 = arith.constant 0 : index
    %c2_581 = arith.constant 2 : index
    %c0_582 = arith.constant 0 : index
    %429 = vector.load %arg15[%c0_579, %c0_580, %c2_581, %c0_582] : memref<9x4x4x32xbf16, #tpu.memory_space<vmem>>, vector<9x1x1x32xbf16>
    %430 = vector.shape_cast %429 : vector<9x1x1x32xbf16> to vector<9x32xbf16>
    %c64_583 = arith.constant 64 : index
    %c0_584 = arith.constant 0 : index
    %431 = vector.load %arg4[%c64_583, %c0_584] : memref<512x64xbf16, #tpu.memory_space<vmem>>, vector<32x64xbf16>
    %cst_585 = arith.constant dense<0.000000e+00> : vector<9x64xf32>
    %432 = tpu.matmul %430, %431, %cst_585 {dimension_numbers = #tpu.dot_dimension_numbers<[1], [0], [0], [1], [0, 0, 1, 1], [], []>} : vector<9x32xbf16>, vector<32x64xbf16>, vector<9x64xf32> -> vector<9x64xf32>
    %433 = arith.addf %428, %432 : vector<9x64xf32>
    %c0_586 = arith.constant 0 : index
    %c0_587 = arith.constant 0 : index
    %c3_588 = arith.constant 3 : index
    %c0_589 = arith.constant 0 : index
    %434 = vector.load %arg15[%c0_586, %c0_587, %c3_588, %c0_589] : memref<9x4x4x32xbf16, #tpu.memory_space<vmem>>, vector<9x1x1x32xbf16>
    %435 = vector.shape_cast %434 : vector<9x1x1x32xbf16> to vector<9x32xbf16>
    %c96 = arith.constant 96 : index
    %c0_590 = arith.constant 0 : index
    %436 = vector.load %arg4[%c96, %c0_590] : memref<512x64xbf16, #tpu.memory_space<vmem>>, vector<32x64xbf16>
    %cst_591 = arith.constant dense<0.000000e+00> : vector<9x64xf32>
    %437 = tpu.matmul %435, %436, %cst_591 {dimension_numbers = #tpu.dot_dimension_numbers<[1], [0], [0], [1], [0, 0, 1, 1], [], []>} : vector<9x32xbf16>, vector<32x64xbf16>, vector<9x64xf32> -> vector<9x64xf32>
    %438 = arith.addf %433, %437 : vector<9x64xf32>
    %c0_592 = arith.constant 0 : index
    %c1_593 = arith.constant 1 : index
    %c0_594 = arith.constant 0 : index
    %c0_595 = arith.constant 0 : index
    %439 = vector.load %arg15[%c0_592, %c1_593, %c0_594, %c0_595] : memref<9x4x4x32xbf16, #tpu.memory_space<vmem>>, vector<9x1x1x32xbf16>
    %440 = vector.shape_cast %439 : vector<9x1x1x32xbf16> to vector<9x32xbf16>
    %c128_596 = arith.constant 128 : index
    %c0_597 = arith.constant 0 : index
    %441 = vector.load %arg4[%c128_596, %c0_597] : memref<512x64xbf16, #tpu.memory_space<vmem>>, vector<32x64xbf16>
    %cst_598 = arith.constant dense<0.000000e+00> : vector<9x64xf32>
    %442 = tpu.matmul %440, %441, %cst_598 {dimension_numbers = #tpu.dot_dimension_numbers<[1], [0], [0], [1], [0, 0, 1, 1], [], []>} : vector<9x32xbf16>, vector<32x64xbf16>, vector<9x64xf32> -> vector<9x64xf32>
    %443 = arith.addf %438, %442 : vector<9x64xf32>
    %c0_599 = arith.constant 0 : index
    %c1_600 = arith.constant 1 : index
    %c1_601 = arith.constant 1 : index
    %c0_602 = arith.constant 0 : index
    %444 = vector.load %arg15[%c0_599, %c1_600, %c1_601, %c0_602] : memref<9x4x4x32xbf16, #tpu.memory_space<vmem>>, vector<9x1x1x32xbf16>
    %445 = vector.shape_cast %444 : vector<9x1x1x32xbf16> to vector<9x32xbf16>
    %c160 = arith.constant 160 : index
    %c0_603 = arith.constant 0 : index
    %446 = vector.load %arg4[%c160, %c0_603] : memref<512x64xbf16, #tpu.memory_space<vmem>>, vector<32x64xbf16>
    %cst_604 = arith.constant dense<0.000000e+00> : vector<9x64xf32>
    %447 = tpu.matmul %445, %446, %cst_604 {dimension_numbers = #tpu.dot_dimension_numbers<[1], [0], [0], [1], [0, 0, 1, 1], [], []>} : vector<9x32xbf16>, vector<32x64xbf16>, vector<9x64xf32> -> vector<9x64xf32>
    %448 = arith.addf %443, %447 : vector<9x64xf32>
    %c0_605 = arith.constant 0 : index
    %c1_606 = arith.constant 1 : index
    %c2_607 = arith.constant 2 : index
    %c0_608 = arith.constant 0 : index
    %449 = vector.load %arg15[%c0_605, %c1_606, %c2_607, %c0_608] : memref<9x4x4x32xbf16, #tpu.memory_space<vmem>>, vector<9x1x1x32xbf16>
    %450 = vector.shape_cast %449 : vector<9x1x1x32xbf16> to vector<9x32xbf16>
    %c192_609 = arith.constant 192 : index
    %c0_610 = arith.constant 0 : index
    %451 = vector.load %arg4[%c192_609, %c0_610] : memref<512x64xbf16, #tpu.memory_space<vmem>>, vector<32x64xbf16>
    %cst_611 = arith.constant dense<0.000000e+00> : vector<9x64xf32>
    %452 = tpu.matmul %450, %451, %cst_611 {dimension_numbers = #tpu.dot_dimension_numbers<[1], [0], [0], [1], [0, 0, 1, 1], [], []>} : vector<9x32xbf16>, vector<32x64xbf16>, vector<9x64xf32> -> vector<9x64xf32>
    %453 = arith.addf %448, %452 : vector<9x64xf32>
    %c0_612 = arith.constant 0 : index
    %c1_613 = arith.constant 1 : index
    %c3_614 = arith.constant 3 : index
    %c0_615 = arith.constant 0 : index
    %454 = vector.load %arg15[%c0_612, %c1_613, %c3_614, %c0_615] : memref<9x4x4x32xbf16, #tpu.memory_space<vmem>>, vector<9x1x1x32xbf16>
    %455 = vector.shape_cast %454 : vector<9x1x1x32xbf16> to vector<9x32xbf16>
    %c224 = arith.constant 224 : index
    %c0_616 = arith.constant 0 : index
    %456 = vector.load %arg4[%c224, %c0_616] : memref<512x64xbf16, #tpu.memory_space<vmem>>, vector<32x64xbf16>
    %cst_617 = arith.constant dense<0.000000e+00> : vector<9x64xf32>
    %457 = tpu.matmul %455, %456, %cst_617 {dimension_numbers = #tpu.dot_dimension_numbers<[1], [0], [0], [1], [0, 0, 1, 1], [], []>} : vector<9x32xbf16>, vector<32x64xbf16>, vector<9x64xf32> -> vector<9x64xf32>
    %458 = arith.addf %453, %457 : vector<9x64xf32>
    %c0_618 = arith.constant 0 : index
    %c2_619 = arith.constant 2 : index
    %c0_620 = arith.constant 0 : index
    %c0_621 = arith.constant 0 : index
    %459 = vector.load %arg15[%c0_618, %c2_619, %c0_620, %c0_621] : memref<9x4x4x32xbf16, #tpu.memory_space<vmem>>, vector<9x1x1x32xbf16>
    %460 = vector.shape_cast %459 : vector<9x1x1x32xbf16> to vector<9x32xbf16>
    %c256 = arith.constant 256 : index
    %c0_622 = arith.constant 0 : index
    %461 = vector.load %arg4[%c256, %c0_622] : memref<512x64xbf16, #tpu.memory_space<vmem>>, vector<32x64xbf16>
    %cst_623 = arith.constant dense<0.000000e+00> : vector<9x64xf32>
    %462 = tpu.matmul %460, %461, %cst_623 {dimension_numbers = #tpu.dot_dimension_numbers<[1], [0], [0], [1], [0, 0, 1, 1], [], []>} : vector<9x32xbf16>, vector<32x64xbf16>, vector<9x64xf32> -> vector<9x64xf32>
    %463 = arith.addf %458, %462 : vector<9x64xf32>
    %c0_624 = arith.constant 0 : index
    %c2_625 = arith.constant 2 : index
    %c1_626 = arith.constant 1 : index
    %c0_627 = arith.constant 0 : index
    %464 = vector.load %arg15[%c0_624, %c2_625, %c1_626, %c0_627] : memref<9x4x4x32xbf16, #tpu.memory_space<vmem>>, vector<9x1x1x32xbf16>
    %465 = vector.shape_cast %464 : vector<9x1x1x32xbf16> to vector<9x32xbf16>
    %c288 = arith.constant 288 : index
    %c0_628 = arith.constant 0 : index
    %466 = vector.load %arg4[%c288, %c0_628] : memref<512x64xbf16, #tpu.memory_space<vmem>>, vector<32x64xbf16>
    %cst_629 = arith.constant dense<0.000000e+00> : vector<9x64xf32>
    %467 = tpu.matmul %465, %466, %cst_629 {dimension_numbers = #tpu.dot_dimension_numbers<[1], [0], [0], [1], [0, 0, 1, 1], [], []>} : vector<9x32xbf16>, vector<32x64xbf16>, vector<9x64xf32> -> vector<9x64xf32>
    %468 = arith.addf %463, %467 : vector<9x64xf32>
    %c0_630 = arith.constant 0 : index
    %c2_631 = arith.constant 2 : index
    %c2_632 = arith.constant 2 : index
    %c0_633 = arith.constant 0 : index
    %469 = vector.load %arg15[%c0_630, %c2_631, %c2_632, %c0_633] : memref<9x4x4x32xbf16, #tpu.memory_space<vmem>>, vector<9x1x1x32xbf16>
    %470 = vector.shape_cast %469 : vector<9x1x1x32xbf16> to vector<9x32xbf16>
    %c320 = arith.constant 320 : index
    %c0_634 = arith.constant 0 : index
    %471 = vector.load %arg4[%c320, %c0_634] : memref<512x64xbf16, #tpu.memory_space<vmem>>, vector<32x64xbf16>
    %cst_635 = arith.constant dense<0.000000e+00> : vector<9x64xf32>
    %472 = tpu.matmul %470, %471, %cst_635 {dimension_numbers = #tpu.dot_dimension_numbers<[1], [0], [0], [1], [0, 0, 1, 1], [], []>} : vector<9x32xbf16>, vector<32x64xbf16>, vector<9x64xf32> -> vector<9x64xf32>
    %473 = arith.addf %468, %472 : vector<9x64xf32>
    %c0_636 = arith.constant 0 : index
    %c2_637 = arith.constant 2 : index
    %c3_638 = arith.constant 3 : index
    %c0_639 = arith.constant 0 : index
    %474 = vector.load %arg15[%c0_636, %c2_637, %c3_638, %c0_639] : memref<9x4x4x32xbf16, #tpu.memory_space<vmem>>, vector<9x1x1x32xbf16>
    %475 = vector.shape_cast %474 : vector<9x1x1x32xbf16> to vector<9x32xbf16>
    %c352 = arith.constant 352 : index
    %c0_640 = arith.constant 0 : index
    %476 = vector.load %arg4[%c352, %c0_640] : memref<512x64xbf16, #tpu.memory_space<vmem>>, vector<32x64xbf16>
    %cst_641 = arith.constant dense<0.000000e+00> : vector<9x64xf32>
    %477 = tpu.matmul %475, %476, %cst_641 {dimension_numbers = #tpu.dot_dimension_numbers<[1], [0], [0], [1], [0, 0, 1, 1], [], []>} : vector<9x32xbf16>, vector<32x64xbf16>, vector<9x64xf32> -> vector<9x64xf32>
    %478 = arith.addf %473, %477 : vector<9x64xf32>
    %c0_642 = arith.constant 0 : index
    %c3_643 = arith.constant 3 : index
    %c0_644 = arith.constant 0 : index
    %c0_645 = arith.constant 0 : index
    %479 = vector.load %arg15[%c0_642, %c3_643, %c0_644, %c0_645] : memref<9x4x4x32xbf16, #tpu.memory_space<vmem>>, vector<9x1x1x32xbf16>
    %480 = vector.shape_cast %479 : vector<9x1x1x32xbf16> to vector<9x32xbf16>
    %c384 = arith.constant 384 : index
    %c0_646 = arith.constant 0 : index
    %481 = vector.load %arg4[%c384, %c0_646] : memref<512x64xbf16, #tpu.memory_space<vmem>>, vector<32x64xbf16>
    %cst_647 = arith.constant dense<0.000000e+00> : vector<9x64xf32>
    %482 = tpu.matmul %480, %481, %cst_647 {dimension_numbers = #tpu.dot_dimension_numbers<[1], [0], [0], [1], [0, 0, 1, 1], [], []>} : vector<9x32xbf16>, vector<32x64xbf16>, vector<9x64xf32> -> vector<9x64xf32>
    %483 = arith.addf %478, %482 : vector<9x64xf32>
    %c0_648 = arith.constant 0 : index
    %c3_649 = arith.constant 3 : index
    %c1_650 = arith.constant 1 : index
    %c0_651 = arith.constant 0 : index
    %484 = vector.load %arg15[%c0_648, %c3_649, %c1_650, %c0_651] : memref<9x4x4x32xbf16, #tpu.memory_space<vmem>>, vector<9x1x1x32xbf16>
    %485 = vector.shape_cast %484 : vector<9x1x1x32xbf16> to vector<9x32xbf16>
    %c416 = arith.constant 416 : index
    %c0_652 = arith.constant 0 : index
    %486 = vector.load %arg4[%c416, %c0_652] : memref<512x64xbf16, #tpu.memory_space<vmem>>, vector<32x64xbf16>
    %cst_653 = arith.constant dense<0.000000e+00> : vector<9x64xf32>
    %487 = tpu.matmul %485, %486, %cst_653 {dimension_numbers = #tpu.dot_dimension_numbers<[1], [0], [0], [1], [0, 0, 1, 1], [], []>} : vector<9x32xbf16>, vector<32x64xbf16>, vector<9x64xf32> -> vector<9x64xf32>
    %488 = arith.addf %483, %487 : vector<9x64xf32>
    %c0_654 = arith.constant 0 : index
    %c3_655 = arith.constant 3 : index
    %c2_656 = arith.constant 2 : index
    %c0_657 = arith.constant 0 : index
    %489 = vector.load %arg15[%c0_654, %c3_655, %c2_656, %c0_657] : memref<9x4x4x32xbf16, #tpu.memory_space<vmem>>, vector<9x1x1x32xbf16>
    %490 = vector.shape_cast %489 : vector<9x1x1x32xbf16> to vector<9x32xbf16>
    %c448 = arith.constant 448 : index
    %c0_658 = arith.constant 0 : index
    %491 = vector.load %arg4[%c448, %c0_658] : memref<512x64xbf16, #tpu.memory_space<vmem>>, vector<32x64xbf16>
    %cst_659 = arith.constant dense<0.000000e+00> : vector<9x64xf32>
    %492 = tpu.matmul %490, %491, %cst_659 {dimension_numbers = #tpu.dot_dimension_numbers<[1], [0], [0], [1], [0, 0, 1, 1], [], []>} : vector<9x32xbf16>, vector<32x64xbf16>, vector<9x64xf32> -> vector<9x64xf32>
    %493 = arith.addf %488, %492 : vector<9x64xf32>
    %c0_660 = arith.constant 0 : index
    %c3_661 = arith.constant 3 : index
    %c3_662 = arith.constant 3 : index
    %c0_663 = arith.constant 0 : index
    %494 = vector.load %arg15[%c0_660, %c3_661, %c3_662, %c0_663] : memref<9x4x4x32xbf16, #tpu.memory_space<vmem>>, vector<9x1x1x32xbf16>
    %495 = vector.shape_cast %494 : vector<9x1x1x32xbf16> to vector<9x32xbf16>
    %c480 = arith.constant 480 : index
    %c0_664 = arith.constant 0 : index
    %496 = vector.load %arg4[%c480, %c0_664] : memref<512x64xbf16, #tpu.memory_space<vmem>>, vector<32x64xbf16>
    %cst_665 = arith.constant dense<0.000000e+00> : vector<9x64xf32>
    %497 = tpu.matmul %495, %496, %cst_665 {dimension_numbers = #tpu.dot_dimension_numbers<[1], [0], [0], [1], [0, 0, 1, 1], [], []>} : vector<9x32xbf16>, vector<32x64xbf16>, vector<9x64xf32> -> vector<9x64xf32>
    %498 = arith.addf %493, %497 : vector<9x64xf32>
    %c0_666 = arith.constant 0 : index
    %c0_667 = arith.constant 0 : index
    %499 = vector.load %arg5[%c0_666, %c0_667] : memref<1x64xf32, #tpu.memory_space<vmem>>, vector<1x64xf32>
    %500 = vector.broadcast %499 : vector<1x64xf32> to vector<9x64xf32>
    %501 = arith.addf %498, %500 : vector<9x64xf32>
    %cst_668 = arith.constant 0.000000e+00 : f32
    %502 = vector.broadcast %cst_668 : f32 to vector<9x64xf32>
    %503 = arith.cmpf oge, %501, %502 : vector<9x64xf32>
    %cst_669 = arith.constant 0.00999999977 : f32
    %504 = vector.broadcast %cst_669 : f32 to vector<9x64xf32>
    %505 = arith.mulf %504, %501 : vector<9x64xf32>
    %506 = arith.select %503, %501, %505 : vector<9x64xi1>, vector<9x64xf32>
    %507 = arith.truncf %506 : vector<9x64xf32> to vector<9x64xbf16>
    %508 = vector.extract_strided_slice %507 {offsets = [0, 0], sizes = [3, 64], strides = [1, 1]} : vector<9x64xbf16> to vector<3x64xbf16>
    %c0_670 = arith.constant 0 : index
    %c0_671 = arith.constant 0 : index
    %c0_672 = arith.constant 0 : index
    %509 = vector.load %arg16[%c0_670, %c0_671, %c0_672] : memref<3x3x64xbf16, #tpu.memory_space<vmem>>, vector<1x3x64xbf16>
    %510 = vector.shape_cast %509 : vector<1x3x64xbf16> to vector<3x64xbf16>
    %511 = vector.shape_cast %508 : vector<3x64xbf16> to vector<1x3x64xbf16>
    tpu.vector_store %arg16[%c0_670, %c0_671, %c0_672], %511 {strides = array<i32>} : memref<3x3x64xbf16, #tpu.memory_space<vmem>>, vector<1x3x64xbf16>,
    %512 = vector.extract_strided_slice %507 {offsets = [3, 0], sizes = [3, 64], strides = [1, 1]} : vector<9x64xbf16> to vector<3x64xbf16>
    %c1_673 = arith.constant 1 : index
    %c0_674 = arith.constant 0 : index
    %c0_675 = arith.constant 0 : index
    %513 = vector.load %arg16[%c1_673, %c0_674, %c0_675] : memref<3x3x64xbf16, #tpu.memory_space<vmem>>, vector<1x3x64xbf16>
    %514 = vector.shape_cast %513 : vector<1x3x64xbf16> to vector<3x64xbf16>
    %515 = vector.shape_cast %512 : vector<3x64xbf16> to vector<1x3x64xbf16>
    tpu.vector_store %arg16[%c1_673, %c0_674, %c0_675], %515 {strides = array<i32>} : memref<3x3x64xbf16, #tpu.memory_space<vmem>>, vector<1x3x64xbf16>,
    %516 = vector.extract_strided_slice %507 {offsets = [6, 0], sizes = [3, 64], strides = [1, 1]} : vector<9x64xbf16> to vector<3x64xbf16>
    %c2_676 = arith.constant 2 : index
    %c0_677 = arith.constant 0 : index
    %c0_678 = arith.constant 0 : index
    %517 = vector.load %arg16[%c2_676, %c0_677, %c0_678] : memref<3x3x64xbf16, #tpu.memory_space<vmem>>, vector<1x3x64xbf16>
    %518 = vector.shape_cast %517 : vector<1x3x64xbf16> to vector<3x64xbf16>
    %519 = vector.shape_cast %516 : vector<3x64xbf16> to vector<1x3x64xbf16>
    tpu.vector_store %arg16[%c2_676, %c0_677, %c0_678], %519 {strides = array<i32>} : memref<3x3x64xbf16, #tpu.memory_space<vmem>>, vector<1x3x64xbf16>,
    %c0_679 = arith.constant 0 : index
    %c0_680 = arith.constant 0 : index
    %c0_681 = arith.constant 0 : index
    %520 = vector.load %arg16[%c0_679, %c0_680, %c0_681] : memref<3x3x64xbf16, #tpu.memory_space<vmem>>, vector<3x3x64xbf16>
    %c0_682 = arith.constant 0 : index
    %c0_683 = arith.constant 0 : index
    %c0_684 = arith.constant 0 : index
    %c0_685 = arith.constant 0 : index
    %521 = vector.load %arg17[%c0_682, %c0_683, %c0_684, %c0_685] : memref<1x3x3x64xbf16, #tpu.memory_space<vmem>>, vector<1x3x3x64xbf16>
    %522 = vector.shape_cast %521 : vector<1x3x3x64xbf16> to vector<3x3x64xbf16>
    %523 = vector.shape_cast %520 : vector<3x3x64xbf16> to vector<1x3x3x64xbf16>
    tpu.vector_store %arg17[%c0_682, %c0_683, %c0_684, %c0_685], %523 {strides = array<i32>} : memref<1x3x3x64xbf16, #tpu.memory_space<vmem>>, vector<1x3x3x64xbf16>,
    %cst_686 = arith.constant 0.000000e+00 : f32
    %524 = vector.broadcast %cst_686 : f32 to vector<1x64xf32>
    %c0_687 = arith.constant 0 : index
    %c0_688 = arith.constant 0 : index
    %c0_689 = arith.constant 0 : index
    %c0_690 = arith.constant 0 : index
    %525 = vector.load %arg17[%c0_687, %c0_688, %c0_689, %c0_690] : memref<1x3x3x64xbf16, #tpu.memory_space<vmem>>, vector<1x1x1x64xbf16>
    %526 = vector.shape_cast %525 : vector<1x1x1x64xbf16> to vector<1x64xbf16>
    %c0_691 = arith.constant 0 : index
    %c0_692 = arith.constant 0 : index
    %527 = vector.load %arg6[%c0_691, %c0_692] : memref<576x64xbf16, #tpu.memory_space<vmem>>, vector<64x64xbf16>
    %cst_693 = arith.constant dense<0.000000e+00> : vector<1x64xf32>
    %528 = tpu.matmul %526, %527, %cst_693 {dimension_numbers = #tpu.dot_dimension_numbers<[1], [0], [0], [1], [0, 0, 1, 1], [], []>} : vector<1x64xbf16>, vector<64x64xbf16>, vector<1x64xf32> -> vector<1x64xf32>
    %529 = arith.addf %524, %528 : vector<1x64xf32>
    %c0_694 = arith.constant 0 : index
    %c0_695 = arith.constant 0 : index
    %c1_696 = arith.constant 1 : index
    %c0_697 = arith.constant 0 : index
    %530 = vector.load %arg17[%c0_694, %c0_695, %c1_696, %c0_697] : memref<1x3x3x64xbf16, #tpu.memory_space<vmem>>, vector<1x1x1x64xbf16>
    %531 = vector.shape_cast %530 : vector<1x1x1x64xbf16> to vector<1x64xbf16>
    %c64_698 = arith.constant 64 : index
    %c0_699 = arith.constant 0 : index
    %532 = vector.load %arg6[%c64_698, %c0_699] : memref<576x64xbf16, #tpu.memory_space<vmem>>, vector<64x64xbf16>
    %cst_700 = arith.constant dense<0.000000e+00> : vector<1x64xf32>
    %533 = tpu.matmul %531, %532, %cst_700 {dimension_numbers = #tpu.dot_dimension_numbers<[1], [0], [0], [1], [0, 0, 1, 1], [], []>} : vector<1x64xbf16>, vector<64x64xbf16>, vector<1x64xf32> -> vector<1x64xf32>
    %534 = arith.addf %529, %533 : vector<1x64xf32>
    %c0_701 = arith.constant 0 : index
    %c0_702 = arith.constant 0 : index
    %c2_703 = arith.constant 2 : index
    %c0_704 = arith.constant 0 : index
    %535 = vector.load %arg17[%c0_701, %c0_702, %c2_703, %c0_704] : memref<1x3x3x64xbf16, #tpu.memory_space<vmem>>, vector<1x1x1x64xbf16>
    %536 = vector.shape_cast %535 : vector<1x1x1x64xbf16> to vector<1x64xbf16>
    %c128_705 = arith.constant 128 : index
    %c0_706 = arith.constant 0 : index
    %537 = vector.load %arg6[%c128_705, %c0_706] : memref<576x64xbf16, #tpu.memory_space<vmem>>, vector<64x64xbf16>
    %cst_707 = arith.constant dense<0.000000e+00> : vector<1x64xf32>
    %538 = tpu.matmul %536, %537, %cst_707 {dimension_numbers = #tpu.dot_dimension_numbers<[1], [0], [0], [1], [0, 0, 1, 1], [], []>} : vector<1x64xbf16>, vector<64x64xbf16>, vector<1x64xf32> -> vector<1x64xf32>
    %539 = arith.addf %534, %538 : vector<1x64xf32>
    %c0_708 = arith.constant 0 : index
    %c1_709 = arith.constant 1 : index
    %c0_710 = arith.constant 0 : index
    %c0_711 = arith.constant 0 : index
    %540 = vector.load %arg17[%c0_708, %c1_709, %c0_710, %c0_711] : memref<1x3x3x64xbf16, #tpu.memory_space<vmem>>, vector<1x1x1x64xbf16>
    %541 = vector.shape_cast %540 : vector<1x1x1x64xbf16> to vector<1x64xbf16>
    %c192_712 = arith.constant 192 : index
    %c0_713 = arith.constant 0 : index
    %542 = vector.load %arg6[%c192_712, %c0_713] : memref<576x64xbf16, #tpu.memory_space<vmem>>, vector<64x64xbf16>
    %cst_714 = arith.constant dense<0.000000e+00> : vector<1x64xf32>
    %543 = tpu.matmul %541, %542, %cst_714 {dimension_numbers = #tpu.dot_dimension_numbers<[1], [0], [0], [1], [0, 0, 1, 1], [], []>} : vector<1x64xbf16>, vector<64x64xbf16>, vector<1x64xf32> -> vector<1x64xf32>
    %544 = arith.addf %539, %543 : vector<1x64xf32>
    %c0_715 = arith.constant 0 : index
    %c1_716 = arith.constant 1 : index
    %c1_717 = arith.constant 1 : index
    %c0_718 = arith.constant 0 : index
    %545 = vector.load %arg17[%c0_715, %c1_716, %c1_717, %c0_718] : memref<1x3x3x64xbf16, #tpu.memory_space<vmem>>, vector<1x1x1x64xbf16>
    %546 = vector.shape_cast %545 : vector<1x1x1x64xbf16> to vector<1x64xbf16>
    %c256_719 = arith.constant 256 : index
    %c0_720 = arith.constant 0 : index
    %547 = vector.load %arg6[%c256_719, %c0_720] : memref<576x64xbf16, #tpu.memory_space<vmem>>, vector<64x64xbf16>
    %cst_721 = arith.constant dense<0.000000e+00> : vector<1x64xf32>
    %548 = tpu.matmul %546, %547, %cst_721 {dimension_numbers = #tpu.dot_dimension_numbers<[1], [0], [0], [1], [0, 0, 1, 1], [], []>} : vector<1x64xbf16>, vector<64x64xbf16>, vector<1x64xf32> -> vector<1x64xf32>
    %549 = arith.addf %544, %548 : vector<1x64xf32>
    %c0_722 = arith.constant 0 : index
    %c1_723 = arith.constant 1 : index
    %c2_724 = arith.constant 2 : index
    %c0_725 = arith.constant 0 : index
    %550 = vector.load %arg17[%c0_722, %c1_723, %c2_724, %c0_725] : memref<1x3x3x64xbf16, #tpu.memory_space<vmem>>, vector<1x1x1x64xbf16>
    %551 = vector.shape_cast %550 : vector<1x1x1x64xbf16> to vector<1x64xbf16>
    %c320_726 = arith.constant 320 : index
    %c0_727 = arith.constant 0 : index
    %552 = vector.load %arg6[%c320_726, %c0_727] : memref<576x64xbf16, #tpu.memory_space<vmem>>, vector<64x64xbf16>
    %cst_728 = arith.constant dense<0.000000e+00> : vector<1x64xf32>
    %553 = tpu.matmul %551, %552, %cst_728 {dimension_numbers = #tpu.dot_dimension_numbers<[1], [0], [0], [1], [0, 0, 1, 1], [], []>} : vector<1x64xbf16>, vector<64x64xbf16>, vector<1x64xf32> -> vector<1x64xf32>
    %554 = arith.addf %549, %553 : vector<1x64xf32>
    %c0_729 = arith.constant 0 : index
    %c2_730 = arith.constant 2 : index
    %c0_731 = arith.constant 0 : index
    %c0_732 = arith.constant 0 : index
    %555 = vector.load %arg17[%c0_729, %c2_730, %c0_731, %c0_732] : memref<1x3x3x64xbf16, #tpu.memory_space<vmem>>, vector<1x1x1x64xbf16>
    %556 = vector.shape_cast %555 : vector<1x1x1x64xbf16> to vector<1x64xbf16>
    %c384_733 = arith.constant 384 : index
    %c0_734 = arith.constant 0 : index
    %557 = vector.load %arg6[%c384_733, %c0_734] : memref<576x64xbf16, #tpu.memory_space<vmem>>, vector<64x64xbf16>
    %cst_735 = arith.constant dense<0.000000e+00> : vector<1x64xf32>
    %558 = tpu.matmul %556, %557, %cst_735 {dimension_numbers = #tpu.dot_dimension_numbers<[1], [0], [0], [1], [0, 0, 1, 1], [], []>} : vector<1x64xbf16>, vector<64x64xbf16>, vector<1x64xf32> -> vector<1x64xf32>
    %559 = arith.addf %554, %558 : vector<1x64xf32>
    %c0_736 = arith.constant 0 : index
    %c2_737 = arith.constant 2 : index
    %c1_738 = arith.constant 1 : index
    %c0_739 = arith.constant 0 : index
    %560 = vector.load %arg17[%c0_736, %c2_737, %c1_738, %c0_739] : memref<1x3x3x64xbf16, #tpu.memory_space<vmem>>, vector<1x1x1x64xbf16>
    %561 = vector.shape_cast %560 : vector<1x1x1x64xbf16> to vector<1x64xbf16>
    %c448_740 = arith.constant 448 : index
    %c0_741 = arith.constant 0 : index
    %562 = vector.load %arg6[%c448_740, %c0_741] : memref<576x64xbf16, #tpu.memory_space<vmem>>, vector<64x64xbf16>
    %cst_742 = arith.constant dense<0.000000e+00> : vector<1x64xf32>
    %563 = tpu.matmul %561, %562, %cst_742 {dimension_numbers = #tpu.dot_dimension_numbers<[1], [0], [0], [1], [0, 0, 1, 1], [], []>} : vector<1x64xbf16>, vector<64x64xbf16>, vector<1x64xf32> -> vector<1x64xf32>
    %564 = arith.addf %559, %563 : vector<1x64xf32>
    %c0_743 = arith.constant 0 : index
    %c2_744 = arith.constant 2 : index
    %c2_745 = arith.constant 2 : index
    %c0_746 = arith.constant 0 : index
    %565 = vector.load %arg17[%c0_743, %c2_744, %c2_745, %c0_746] : memref<1x3x3x64xbf16, #tpu.memory_space<vmem>>, vector<1x1x1x64xbf16>
    %566 = vector.shape_cast %565 : vector<1x1x1x64xbf16> to vector<1x64xbf16>
    %c512 = arith.constant 512 : index
    %c0_747 = arith.constant 0 : index
    %567 = vector.load %arg6[%c512, %c0_747] : memref<576x64xbf16, #tpu.memory_space<vmem>>, vector<64x64xbf16>
    %cst_748 = arith.constant dense<0.000000e+00> : vector<1x64xf32>
    %568 = tpu.matmul %566, %567, %cst_748 {dimension_numbers = #tpu.dot_dimension_numbers<[1], [0], [0], [1], [0, 0, 1, 1], [], []>} : vector<1x64xbf16>, vector<64x64xbf16>, vector<1x64xf32> -> vector<1x64xf32>
    %569 = arith.addf %564, %568 : vector<1x64xf32>
    %c0_749 = arith.constant 0 : index
    %c0_750 = arith.constant 0 : index
    %570 = vector.load %arg7[%c0_749, %c0_750] : memref<1x64xf32, #tpu.memory_space<vmem>>, vector<1x64xf32>
    %571 = arith.addf %569, %570 : vector<1x64xf32>
    %cst_751 = arith.constant 0.000000e+00 : f32
    %572 = vector.broadcast %cst_751 : f32 to vector<1x64xf32>
    %573 = arith.cmpf oge, %571, %572 : vector<1x64xf32>
    %cst_752 = arith.constant 0.00999999977 : f32
    %574 = vector.broadcast %cst_752 : f32 to vector<1x64xf32>
    %575 = arith.mulf %574, %571 : vector<1x64xf32>
    %576 = arith.select %573, %571, %575 : vector<1x64xi1>, vector<1x64xf32>
    %577 = arith.truncf %576 : vector<1x64xf32> to vector<1x64xbf16>
    %cst_753 = arith.constant 0.000000e+00 : f32
    %578 = vector.broadcast %cst_753 : f32 to vector<1x256xf32>
    %c0_754 = arith.constant 0 : index
    %c0_755 = arith.constant 0 : index
    %579 = vector.load %arg8[%c0_754, %c0_755] : memref<64x256xbf16, #tpu.memory_space<vmem>>, vector<64x256xbf16>
    %cst_756 = arith.constant dense<0.000000e+00> : vector<1x256xf32>
    %580 = tpu.matmul %577, %579, %cst_756 {dimension_numbers = #tpu.dot_dimension_numbers<[1], [0], [0], [1], [0, 0, 1, 1], [], []>} : vector<1x64xbf16>, vector<64x256xbf16>, vector<1x256xf32> -> vector<1x256xf32>
    %581 = arith.addf %578, %580 : vector<1x256xf32>
    %c0_757 = arith.constant 0 : index
    %c0_758 = arith.constant 0 : index
    %582 = vector.load %arg9[%c0_757, %c0_758] : memref<1x256xf32, #tpu.memory_space<vmem>>, vector<1x256xf32>
    %583 = arith.addf %581, %582 : vector<1x256xf32>
    %cst_759 = arith.constant 0.000000e+00 : f32
    %584 = vector.broadcast %cst_759 : f32 to vector<1x256xf32>
    %585 = arith.maximumf %583, %584 : vector<1x256xf32>
    %586 = arith.truncf %585 : vector<1x256xf32> to vector<1x256xbf16>
    %c0_760 = arith.constant 0 : index
    %c0_761 = arith.constant 0 : index
    %587 = vector.load %arg10[%c0_760, %c0_761] : memref<256x256xbf16, #tpu.memory_space<vmem>>, vector<256x256xbf16>
    %cst_762 = arith.constant dense<0.000000e+00> : vector<1x256xf32>
    %588 = tpu.matmul %586, %587, %cst_762 {dimension_numbers = #tpu.dot_dimension_numbers<[1], [0], [0], [1], [0, 0, 1, 1], [], []>} : vector<1x256xbf16>, vector<256x256xbf16>, vector<1x256xf32> -> vector<1x256xf32>
    %c0_763 = arith.constant 0 : index
    %c0_764 = arith.constant 0 : index
    %589 = vector.load %arg11[%c0_763, %c0_764] : memref<1x256xf32, #tpu.memory_space<vmem>>, vector<1x256xf32>
    %590 = arith.addf %588, %589 : vector<1x256xf32>
    %c0_765 = arith.constant 0 : index
    %c0_766 = arith.constant 0 : index
    %c0_767 = arith.constant 0 : index
    %591 = vector.load %arg12[%c0_765, %c0_766, %c0_767] : memref<1x1x256xf32, #tpu.memory_space<vmem>>, vector<1x1x256xf32>
    %592 = vector.shape_cast %591 : vector<1x1x256xf32> to vector<1x256xf32>
    %593 = vector.shape_cast %590 : vector<1x256xf32> to vector<1x1x256xf32>
    tpu.vector_store %arg12[%c0_765, %c0_766, %c0_767], %593 {strides = array<i32>} : memref<1x1x256xf32, #tpu.memory_space<vmem>>, vector<1x1x256xf32>,
    return
  }
  func.func @transform_0(%arg0: i32) -> (i32, i32, i32, i32) {
    %c0_i32 = arith.constant 0 : i32
    %c0_i32_0 = arith.constant 0 : i32
    %c0_i32_1 = arith.constant 0 : i32
    %c0_i32_2 = arith.constant 0 : i32
    return %arg0, %c0_i32, %c0_i32_0, %c0_i32_1 : i32, i32, i32, i32
  }
  func.func @transform_1(%arg0: i32) -> (i32, i32) {
    %c0_i32 = arith.constant 0 : i32
    %c0_i32_0 = arith.constant 0 : i32
    %c0_i32_1 = arith.constant 0 : i32
    return %c0_i32, %c0_i32_0 : i32, i32
  }
  func.func @transform_2(%arg0: i32) -> (i32, i32) {
    %c0_i32 = arith.constant 0 : i32
    %c0_i32_0 = arith.constant 0 : i32
    %c0_i32_1 = arith.constant 0 : i32
    return %c0_i32, %c0_i32_0 : i32, i32
  }
  func.func @transform_3(%arg0: i32) -> (i32, i32) {
    %c0_i32 = arith.constant 0 : i32
    %c0_i32_0 = arith.constant 0 : i32
    %c0_i32_1 = arith.constant 0 : i32
    return %c0_i32, %c0_i32_0 : i32, i32
  }
  func.func @transform_4(%arg0: i32) -> (i32, i32) {
    %c0_i32 = arith.constant 0 : i32
    %c0_i32_0 = arith.constant 0 : i32
    %c0_i32_1 = arith.constant 0 : i32
    return %c0_i32, %c0_i32_0 : i32, i32
  }
  func.func @transform_5(%arg0: i32) -> (i32, i32) {
    %c0_i32 = arith.constant 0 : i32
    %c0_i32_0 = arith.constant 0 : i32
    %c0_i32_1 = arith.constant 0 : i32
    return %c0_i32, %c0_i32_0 : i32, i32
  }
  func.func @transform_6(%arg0: i32) -> (i32, i32) {
    %c0_i32 = arith.constant 0 : i32
    %c0_i32_0 = arith.constant 0 : i32
    %c0_i32_1 = arith.constant 0 : i32
    return %c0_i32, %c0_i32_0 : i32, i32
  }
  func.func @transform_7(%arg0: i32) -> (i32, i32) {
    %c0_i32 = arith.constant 0 : i32
    %c0_i32_0 = arith.constant 0 : i32
    %c0_i32_1 = arith.constant 0 : i32
    return %c0_i32, %c0_i32_0 : i32, i32
  }
  func.func @transform_8(%arg0: i32) -> (i32, i32) {
    %c0_i32 = arith.constant 0 : i32
    %c0_i32_0 = arith.constant 0 : i32
    %c0_i32_1 = arith.constant 0 : i32
    return %c0_i32, %c0_i32_0 : i32, i32
  }
  func.func @transform_9(%arg0: i32) -> (i32, i32) {
    %c0_i32 = arith.constant 0 : i32
    %c0_i32_0 = arith.constant 0 : i32
    %c0_i32_1 = arith.constant 0 : i32
    return %c0_i32, %c0_i32_0 : i32, i32
  }
  func.func @transform_10(%arg0: i32) -> (i32, i32) {
    %c0_i32 = arith.constant 0 : i32
    %c0_i32_0 = arith.constant 0 : i32
    %c0_i32_1 = arith.constant 0 : i32
    return %c0_i32, %c0_i32_0 : i32, i32
  }
  func.func @transform_11(%arg0: i32) -> (i32, i32, i32) {
    %c0_i32 = arith.constant 0 : i32
    %c0_i32_0 = arith.constant 0 : i32
    %c0_i32_1 = arith.constant 0 : i32
    return %arg0, %c0_i32, %c0_i32_0 : i32, i32, i32
  }
}

</mosaic_0001>

<bundles_post_ra>
// kernel: atari_feature_model.1
= control target key start
LH: loop header
LB: loop body
LE: loop exit
PB: predicated region body
PF: predicated region fallthrough
CT: control target
= control target key end

     0   :  { %s13908_s17 = smov 0   ;;  %s16199_s0 = inlined_call_operand.vmem [shape: bf16[2,9,9,64], index: 0, kind: input, shape index: {}]   ;;  %s16200_s1 = inlined_call_operand.vmem [shape: bf16[256,32], index: 1, kind: input, shape index: {}]   ;;  %s16201_s2 = inlined_call_operand.vmem [shape: f32[1,32], index: 2, kind: input, shape index: {}]   ;;  %s16202_s3 = inlined_call_operand.vmem [shape: bf16[512,64], index: 3, kind: input, shape index: {}]   ;;  %s16203_s4 = inlined_call_operand.vmem [shape: f32[1,64], index: 4, kind: input, shape index: {}]   ;;  %s16204_s5 = inlined_call_operand.vmem [shape: bf16[576,64], index: 5, kind: input, shape index: {}]   ;;  %s16205_s6 = inlined_call_operand.vmem [shape: f32[1,64], index: 6, kind: input, shape index: {}]   ;;  %s16206_s7 = inlined_call_operand.vmem [shape: bf16[64,256], index: 7, kind: input, shape index: {}]   ;;  %s16207_s8 = inlined_call_operand.vmem [shape: f32[1,256], index: 8, kind: input, shape index: {}]   ;;  %s16208_s9 = inlined_call_operand.vmem [shape: bf16[256,256], index: 9, kind: input, shape index: {}]   ;;  %s16209_s10 = inlined_call_operand.vmem [shape: f32[1,256], index: 10, kind: input, shape index: {}]   ;;  %s16210_s11 = inlined_call_operand.vmem [shape: f32[2,1,256], index: 11, kind: output, shape index: {}]  }
   0x1 LB: > { %s12380_s18 = sadd.s32 4294967295, %s13841_s17   ;;  %p12384_p0 = scmp.ge.s32.totalorder %s13841_s17, 1  ;;  %s13841_s17 = sphi %s13908_s17, %s21_s17  }
   0x2   : > { %p337_p1 = scmp.lt.s32.totalorder %s13841_s17, 3 }
   0x4   : > { %p338_p2 = pnand %p12384_p0, %p337_p1 }
   0x6   : > { %341 = sbr.rel (%p338_p2) target bundleno = 1592 (0x638), region = 64 }
   0xb   : > { %v13691_v0 = vld [vmem:[%s16200_s1 + $0x38] sm:$0xff]   ;;  %p376_p3 = scmp.lt.s32.totalorder %s12380_s18, 1  ;;  %v16211_v1 = vlaneseq  ;;  %v13692_v2 = vld [vmem:[%s16200_s1 + $0x30] sm:$0xff]   ;;  %v13693_v3 = vld [vmem:[%s16200_s1 + $0x28] sm:$0xff]   ;;  %vm388_vm0 = vcmask 516096   ;;  %v16242_v24 = vmov 0 }
   0xc   : > { %13377 = vmatprep.subr.bf16.mxu1 %v13691_v0  ;;  %vm16240_vm1 = vsmask.f32 256  ;;  %v13843_v5 = vmov 1966171168   ;;  %vm440_vm2 = vsmask.f32 1284 }
   0xd   : > { %s16338_s18 = smov (!%p376_p3, %s12380_s18), 1  ;;  %13378 = vmatpush3.bf16.msra.mxu1 %v13691_v0  ;;  %v13929_v4 = vshrl.u32 %v16211_v1, 7  ;;  %v404_v6 = vunpack.c.l.s4 %v13843_v5  ;;  %vm442_vm3 = vsmask.f32 2312  ;;  %vm444_vm4 = vsmask.f32 3340  ;;  %vm441_vm5 = vmor %vm16240_vm1, %vm440_vm2 }
   0xe   : > { %13379 = vmatprep.subr.bf16.mxu1 %v13692_v2  ;;  %s13677_s25 = smul.u32 72, %s16338_s18  ;;  %v13694_v7 = vld [vmem:[%s16200_s1 + $0x20] sm:$0xff]   ;;  %vm16239_vm6 = vsmask.f32 4368  ;;  %vm448_vm7 = vsmask.f32 5396  ;;  %vm443_vm9 = vmor %vm441_vm5, %vm442_vm3 }
   0xf   : > { %16241 = vst [vmem:[#allocation7_spill] sm:$0xff] %v13929_v4  ;;  %vm16238_vm8 = vsmask.f32 6424  ;;  %v405_v10 = vunpack.c.0.s8 %v404_v6  ;;  %vm445_vm10 = vmor %vm443_vm9, %vm444_vm4  ;;  %vm452_vm11 = vsmask.f32 7452  ;;  %v13977_v40 = vld [vmem:[%s16200_s1 + $0x18] sm:$0xff]  }
  0x10   : > { %s13937_s30 = scalar_lea.vmem %s16199_s0, %s13677_s25  ;;  %vm447_vm12 = vmor %vm445_vm10, %vm16239_vm6  ;;  %vm4985_vm2 = vcmask 1041409   ;;  %vm4988_vm4 = vcmask 1042434   ;;  %vm4991_vm5 = vcmask 1043459   ;;  %vm4997_vm9 = vcmask 1045509   ;;  %s12386_s26 = sshll.u32 %s16338_s18, 1 }
  0x11   : > { %13380 = vmatpush3.bf16.msra.mxu1 %v13692_v2  ;;  %v386_v8 = vld [vmem:[%s13937_s30] sm:$0x1]  ;;  %v12391_v12 = vld.sshfl [vmem:[%s13937_s30] sm:$0x10 pattern:$0x75316420]  ;;  %v13947_v13 = vsub.s32 %v405_v10, %v13929_v4  ;;  %vm449_vm13 = vmor %vm447_vm12, %vm448_vm7  ;;  %s384_s29 = scalar_lea.vmem %s16210_s11, %s12386_s26 }
  0x12   : > { %v12387_v9 = vld.sshfl [vmem:[%s13937_s30] sm:$0x11 pattern:$0x75316420]  ;;  %13381 = vmatprep.subr.bf16.mxu1 %v13693_v3  ;;  %389 = vst.msk [vmem:[#allocation2] sm:$0x1] %vm388_vm0, %v386_v8  ;;  %v488_v14 = vcombine.high %v12391_v12, %v12391_v12  ;;  %vm451_vm14 = vmor %vm449_vm13, %vm16238_vm8 }
  0x13   : > { %v402_v11 = vcombine.high %v12387_v9, %v12387_v9  ;;  %v12393_v15 = vld.sshfl [vmem:[%s13937_s30] sm:$0x12 pattern:$0x75316420]  ;;  %v12411_v16 = vld [vmem:[%s13937_s30 + $0x8] sm:$0x1]  ;;  %v409_v19 = vrot.slane %v12387_v9, %v13947_v13  ;;  %vm13962_vm15 = vmor %vm451_vm14, %vm452_vm11 }
  0x14   : > { %v527_v17 = vcombine.high %v12393_v15, %v12393_v15  ;;  %v12397_v18 = vld.sshfl [vmem:[%s13937_s30] sm:$0x2 pattern:$0x75316420]  ;;  %839 = vst.msk [vmem:[#allocation2 + $0x10] sm:$0x1] %vm388_vm0, %v12411_v16  ;;  %v495_v21 = vrot.slane %v488_v14, %v13947_v13  ;;  %v534_v22 = vrot.slane %v12393_v15, %v13947_v13 }
  0x15   : > { %13382 = vmatpush3.bf16.msra.mxu1 %v13693_v3  ;;  %v416_v20 = vrot.slane %v402_v11, %v13947_v13  ;;  %v12399_v23 = vld.sshfl [vmem:[%s13937_s30] sm:$0x22 pattern:$0x75316420]  ;;  %v16243_v24 = vsel %vm13962_vm15, 4294967295, %v16242_v24  ;;  %v606_v26 = vrot.slane %v12397_v18, %v13947_v13  ;;  %v455_v30 = vshrl.u32 %v409_v19, 16 }
  0x16   : > { %13383 = vmatprep.subr.bf16.mxu1 %v13694_v7  ;;  %16244 = vst [vmem:[#allocation8_spill] sm:$0xff] %v16243_v24  ;;  %v541_v25 = vrot.slane %v527_v17, %v13947_v13  ;;  %v639_v27 = vcombine.high %v12399_v23, %v12399_v23  ;;  %v646_v28 = vrot.slane %v12399_v23, %v13947_v13  ;;  %v12403_v29 = vld.sshfl [vmem:[%s13937_s30] sm:$0x20 pattern:$0x75316420]  ;;  %vm4994_vm7 = vcmask 1044484  }
  0x17   : > { %v460_v31 = vshll.u32 %v416_v20, 16  ;;  %514 = vst.msk [vmem:[#allocation2 + $0x4] sm:$0x1] %vm388_vm0, %v495_v21  ;;  %v542_v32 = vcombine.high %v534_v22, %v534_v22  ;;  %v714_v33 = vcombine.high %v12403_v29, %v12403_v29  ;;  %v607_v36 = vcombine.high %v606_v26, %v606_v26  ;;  %v12453_v15 = vld [vmem:[%s13937_s30 + $0x10] sm:$0x1] }
  0x18   : > { %v12406_v34 = vld.sshfl [vmem:[%s13937_s30 + $0x4] sm:$0x1 pattern:$0x75316420]  ;;  %v567_v35 = vshrl.u32 %v541_v25, 16  ;;  %v653_v37 = vrot.slane %v639_v27, %v13947_v13  ;;  %v654_v38 = vcombine.high %v646_v28, %v646_v28  ;;  %vm5000_vm10 = vcmask 1046534  }
  0x19   : > { %v12415_v39 = vld.sshfl [vmem:[%s13937_s30 + $0x8] sm:$0x11 pattern:$0x75316420]  ;;  %13384 = vmatpush3.bf16.msra.mxu1 %v13694_v7  ;;  %v462_v41 = vsel %vm13962_vm15, %v455_v30, %v460_v31  ;;  %v572_v42 = vshll.u32 %v542_v32, 16  ;;  %v721_v43 = vrot.slane %v714_v33, %v13947_v13  ;;  %v781_v44 = vrot.slane %v12406_v34, %v13947_v13 }
  0x1a   : > { %v12421_v45 = vld.sshfl [vmem:[%s13937_s30 + $0x8] sm:$0x10 pattern:$0x75316420]  ;;  %475 = vst.msk [vmem:[#allocation2 + $0x2] sm:$0x1] %vm388_vm0, %v462_v41  ;;  %v655_v46 = vcombine.high %v653_v37, %v653_v37  ;;  %v852_v48 = vcombine.high %v12415_v39, %v12415_v39  ;;  %v859_v49 = vrot.slane %v12415_v39, %v13947_v13  ;;  %13393 = vmatprep.subr.bf16.mxu1 %v13977_v40 }
  0x1b   : > { %626 = vst.msk [vmem:[#allocation2 + $0x8] sm:$0x1] %vm388_vm0, %v607_v36  ;;  %v681_v47 = vshrl.u32 %v654_v38, 16  ;;  %v574_v51 = vsel %vm13962_vm15, %v567_v35, %v572_v42  ;;  %v722_v52 = vcombine.high %v721_v43, %v721_v43  ;;  %v818_v53 = vshll.u32 %v781_v44, 16  ;;  %1274 = vst.msk [vmem:[#allocation2 + $0x20] sm:$0x1] %vm388_vm0, %v12453_v15 }
  0x1c   : > { %v12425_v50 = vld.sshfl [vmem:[%s13937_s30 + $0x8] sm:$0x12 pattern:$0x75316420]  ;;  %v923_v54 = vcombine.high %v12421_v45, %v12421_v45  ;;  %587 = vst.msk [vmem:[#allocation2 + $0x6] sm:$0x1] %vm388_vm0, %v574_v51  ;;  %v866_v57 = vrot.slane %v852_v48, %v13947_v13 }
  0x1d   : > { %v12431_v55 = vld.sshfl [vmem:[%s13937_s30 + $0x8] sm:$0x2 pattern:$0x75316420]  ;;  %v686_v56 = vshll.u32 %v655_v46, 16  ;;  %v890_v58 = vshrl.u32 %v859_v49, 16  ;;  %v962_v59 = vcombine.high %v12425_v50, %v12425_v50  ;;  %v969_v63 = vrot.slane %v12425_v50, %v13947_v13 }
  0x1e   : > { %v12435_v60 = vld.sshfl [vmem:[%s13937_s30 + $0x8] sm:$0x22 pattern:$0x75316420]  ;;  %742 = vst.msk [vmem:[#allocation2 + $0xc] sm:$0x1] %vm388_vm0, %v722_v52  ;;  %v930_v62 = vrot.slane %v923_v54, %v13947_v13  ;;  %v1041_v0 = vrot.slane %v12431_v55, %v13947_v13 }
  0x1f   : > { %v813_v61 = vshrl.u32 %v722_v52, 16  ;;  %v12441_v2 = vld.sshfl [vmem:[%s13937_s30 + $0x8] sm:$0x20 pattern:$0x75316420]  ;;  %v688_v3 = vsel %vm13962_vm15, %v681_v47, %v686_v56  ;;  %v895_v5 = vshll.u32 %v866_v57, 16  ;;  %v976_v6 = vrot.slane %v962_v59, %v13947_v13 }
  0x20   : > { %v1074_v7 = vcombine.high %v12435_v60, %v12435_v60  ;;  %v12448_v8 = vld.sshfl [vmem:[%s13937_s30 + $0xc] sm:$0x1 pattern:$0x75316420]  ;;  %701 = vst.msk [vmem:[#allocation2 + $0xa] sm:$0x1] %vm388_vm0, %v688_v3  ;;  %v977_v10 = vcombine.high %v969_v63, %v969_v63  ;;  %v1042_v11 = vcombine.high %v1041_v0, %v1041_v0  ;;  %v1081_v12 = vrot.slane %v12435_v60, %v13947_v13 }
  0x21   : > { %v820_v9 = vsel %vm13962_vm15, %v813_v61, %v818_v53  ;;  %949 = vst.msk [vmem:[#allocation2 + $0x14] sm:$0x1] %vm388_vm0, %v930_v62  ;;  %v12705_v14 = vld.sshfl [vmem:[#allocation2] sm:$0x1 pattern:$0x75316420]  ;;  %v897_v16 = vsel %vm13962_vm15, %v890_v58, %v895_v5  ;;  %v1149_v19 = vcombine.high %v12441_v2, %v12441_v2  ;;  %v1216_v23 = vrot.slane %v12448_v8, %v13947_v13 }
  0x22   : > { %833 = vst.msk [vmem:[#allocation2 + $0xe] sm:$0x1] %vm388_vm0, %v820_v9  ;;  %v1002_v17 = vshrl.u32 %v976_v6, 16  ;;  %v1088_v18 = vrot.slane %v1074_v7, %v13947_v13  ;;  %910 = vst.msk [vmem:[#allocation2 + $0x12] sm:$0x1] %vm388_vm0, %v897_v16  ;;  %v1007_v21 = vshll.u32 %v977_v10, 16  ;;  %v1089_v22 = vcombine.high %v1081_v12, %v1081_v12 }
  0x23   : > { %v12707_v20 = vld.sshfl [vmem:[#allocation2 + $0x4] sm:$0x1 pattern:$0x75316420]  ;;  %1061 = vst.msk [vmem:[#allocation2 + $0x18] sm:$0x1] %vm388_vm0, %v1042_v11  ;;  %v4037_v26 = vrot.slane %v12705_v14, %v13947_v13  ;;  %v1156_v28 = vrot.slane %v1149_v19, %v13947_v13 }
  0x24   : > { %v12706_v25 = vld.sshfl [vmem:[#allocation2 + $0x2] sm:$0x1 pattern:$0x75316420]  ;;  %v1090_v27 = vcombine.high %v1088_v18, %v1088_v18  ;;  %v4065_v31 = vrot.slane %v12707_v20, %v13947_v13  ;;  %v12495_v32 = vld [vmem:[%s13937_s30 + $0x18] sm:$0x1]  ;;  %v1009_v33 = vsel %vm13962_vm15, %v1002_v17, %v1007_v21 }
  0x25   : > { %v12709_v29 = vld.sshfl [vmem:[#allocation2 + $0x8] sm:$0x1 pattern:$0x75316420]  ;;  %v4051_v30 = vrot.slane %v12706_v25, %v13947_v13  ;;  %v1116_v34 = vshrl.u32 %v1089_v22, 16  ;;  %v1253_v35 = vshll.u32 %v1216_v23, 16  ;;  %v1157_v39 = vcombine.high %v1156_v28, %v1156_v28 }
  0x26   : > { %v12708_v36 = vld.sshfl [vmem:[#allocation2 + $0x6] sm:$0x1 pattern:$0x75316420]  ;;  %v4093_v37 = vrot.slane %v12709_v29, %v13947_v13  ;;  %1709 = vst.msk [vmem:[#allocation2 + $0x30] sm:$0x1] %vm388_vm0, %v12495_v32  ;;  %v14029_v43 = vunpack.c.l.b16 %v4037_v26  ;;  %v14034_v47 = vunpack.c.l.b16 %v4065_v31 }
  0x27   : > { %1022 = vst.msk [vmem:[#allocation2 + $0x16] sm:$0x1] %vm388_vm0, %v1009_v33  ;;  %v1121_v38 = vshll.u32 %v1090_v27, 16  ;;  %v4079_v42 = vrot.slane %v12708_v36, %v13947_v13  ;;  %v14032_v46 = vunpack.c.l.b16 %v4051_v30  ;;  %1177 = vst.msk [vmem:[#allocation2 + $0x1c] sm:$0x1] %vm388_vm0, %v1157_v39  ;;  %v1248_v50 = vshrl.u32 %v1157_v39, 16 }
  0x28   : > { %v12711_v41 = vld.sshfl [vmem:[#allocation2 + $0xc] sm:$0x1 pattern:$0x75316420]  ;;  %v14036_v48 = vunpack.c.l.b16 %v4093_v37  ;;  %v4984_v57 = vrot.slane %v14029_v43, 1  ;;  %v4987_v58 = vrot.slane %v14034_v47, 7 }
  0x29   : > { %v12713_v44 = vld.sshfl [vmem:[#allocation2 + $0x10] sm:$0x1 pattern:$0x75316420]  ;;  %v4121_v45 = vrot.slane %v12711_v41, %v13947_v13  ;;  %v1123_v49 = vsel %vm13962_vm15, %v1116_v34, %v1121_v38  ;;  %v14042_v53 = vunpack.c.l.b16 %v4079_v42  ;;  %v1255_v59 = vsel %vm13962_vm15, %v1248_v50, %v1253_v35 }
  0x2a   : > { %v12710_v51 = vld.sshfl [vmem:[#allocation2 + $0xa] sm:$0x1 pattern:$0x75316420]  ;;  %v4149_v52 = vrot.slane %v12713_v44, %v13947_v13  ;;  %1136 = vst.msk [vmem:[#allocation2 + $0x1a] sm:$0x1] %vm388_vm0, %v1123_v49  ;;  %v4986_v5 = vsel %vm4985_vm2, %v14032_v46, %v4984_v57 }
  0x2b   : > { %v12712_v54 = vld.sshfl [vmem:[#allocation2 + $0xe] sm:$0x1 pattern:$0x75316420]  ;;  %v4107_v55 = vrot.slane %v12710_v51, %v13947_v13  ;;  %v14046_v56 = vunpack.c.l.b16 %v4121_v45  ;;  %v4990_v63 = vrot.slane %v14042_v53, 6  ;;  %v4993_v6 = vrot.slane %v14036_v48, 5 }
  0x2c   : > { %v12714_v60 = vld.sshfl [vmem:[#allocation2 + $0x12] sm:$0x1 pattern:$0x75316420]  ;;  %v4135_v61 = vrot.slane %v12712_v54, %v13947_v13  ;;  %v14053_v62 = vunpack.c.l.b16 %v4149_v52  ;;  %1268 = vst.msk [vmem:[#allocation2 + $0x1e] sm:$0x1] %vm388_vm0, %v1255_v59  ;;  %v4989_v10 = vsel %vm4988_vm4, %v4987_v58, %v4986_v5 }
  0x2d   : > { %v12715_v0 = vld.sshfl [vmem:[#allocation2 + $0x14] sm:$0x1 pattern:$0x75316420]  ;;  %v4163_v2 = vrot.slane %v12714_v60, %v13947_v13  ;;  %v14058_v3 = vunpack.c.l.b16 %v4107_v55  ;;  %v4992_v15 = vsel %vm4991_vm5, %v4990_v63, %v4989_v10  ;;  %v4999_v23 = vrot.slane %v14046_v56, 3 }
  0x2e   : > { %v12717_v7 = vld.sshfl [vmem:[#allocation2 + $0x18] sm:$0x1 pattern:$0x75316420]  ;;  %v4177_v8 = vrot.slane %v12715_v0, %v13947_v13  ;;  %v14064_v9 = vunpack.c.l.b16 %v4135_v61  ;;  %v4995_v19 = vsel %vm4994_vm7, %v4993_v6, %v4992_v15  ;;  %vm5003_vm11 = vcmask 1047559  }
  0x2f   : > { %v12716_v11 = vld.sshfl [vmem:[#allocation2 + $0x16] sm:$0x1 pattern:$0x75316420]  ;;  %v4205_v12 = vrot.slane %v12717_v7, %v13947_v13  ;;  %v14068_v14 = vunpack.c.l.b16 %v4163_v2  ;;  %v4996_v16 = vrot.slane %v14058_v3, 4  ;;  %v5005_v31 = vrot.slane %v14053_v62, 1 }
  0x30   : > { %v4191_v17 = vrot.slane %v12716_v11, %v13947_v13  ;;  %v14073_v18 = vunpack.c.l.b16 %v4177_v8  ;;  %v12719_v20 = vld.sshfl [vmem:[#allocation2 + $0x1c] sm:$0x1 pattern:$0x75316420]  ;;  %v5002_v28 = vrot.slane %v14064_v9, 2  ;;  %vm16237_vm12 = vcmask 523264  }
  0x31   : > { %v14076_v21 = vunpack.c.l.b16 %v4205_v12  ;;  %v4998_v22 = vsel %vm4997_vm9, %v4996_v16, %v4995_v19  ;;  %v12718_v25 = vld.sshfl [vmem:[#allocation2 + $0x1a] sm:$0x1 pattern:$0x75316420]  ;;  %v4233_v26 = vrot.slane %v12719_v20, %v13947_v13  ;;  %v5006_v41 = vsel %vm4985_vm2, %v14068_v14, %v5005_v31  ;;  %v12537_v2 = vld [vmem:[%s13937_s30 + $0x20] sm:$0x1] }
  0x32   : > { %v14081_v27 = vunpack.c.l.b16 %v4191_v17  ;;  %v4219_v29 = vrot.slane %v12718_v25, %v13947_v13  ;;  %v5001_v30 = vsel %vm5000_vm10, %v4999_v23, %v4998_v22  ;;  %v5007_v32 = vrot.slane %v14073_v18, 7  ;;  %v12457_v55 = vld.sshfl [vmem:[%s13937_s30 + $0x10] sm:$0x11 pattern:$0x75316420] }
  0x33   : > { %v12720_v33 = vld.sshfl [vmem:[#allocation2 + $0x1e] sm:$0x1 pattern:$0x75316420]  ;;  %v14088_v34 = vunpack.c.l.b16 %v4233_v26  ;;  %v5004_v35 = vsel %vm5003_vm11, %v5002_v28, %v5001_v30  ;;  %v5011_v37 = vrot.slane %v14076_v21, 5  ;;  %v1287_v25 = vcombine.high %v12457_v55, %v12457_v55 }
  0x34   : > { %v5009_v36 = vrot.slane %v14081_v27, 6  ;;  %v4247_v38 = vrot.slane %v12720_v33, %v13947_v13  ;;  %v14094_v39 = vunpack.c.l.b16 %v4219_v29  ;;  %v5008_v42 = vsel %vm4988_vm4, %v5007_v32, %v5006_v41  ;;  %v12463_v57 = vld.sshfl [vmem:[%s13937_s30 + $0x10] sm:$0x10 pattern:$0x75316420] }
  0x35   : > { %v5015_v44 = vrot.slane %v14088_v34, 3  ;;  %v12467_v63 = vld.sshfl [vmem:[%s13937_s30 + $0x10] sm:$0x12 pattern:$0x75316420]  ;;  %v1294_v26 = vrot.slane %v12457_v55, %v13947_v13  ;;  %v1358_v28 = vcombine.high %v12463_v57, %v12463_v57  ;;  %vm8193_vm6 = vcmask 1040384  }
  0x36   : > { %v14102_v50 = vunpack.c.l.b16 %v4247_v38  ;;  %v5010_v51 = vsel %vm4991_vm5, %v5009_v36, %v5008_v42  ;;  %v5013_v52 = vrot.slane %v14094_v39, 4  ;;  %v12473_v0 = vld.sshfl [vmem:[%s13937_s30 + $0x10] sm:$0x2 pattern:$0x75316420]  ;;  %v1397_v31 = vcombine.high %v12467_v63, %v12467_v63 }
  0x37   : > { %v5012_v58 = vsel %vm4994_vm7, %v5011_v37, %v5010_v51  ;;  %2144 = vst.msk [vmem:[#allocation2 + $0x40] sm:$0x1] %vm388_vm0, %v12537_v2  ;;  %v12579_v10 = vld [vmem:[%s13937_s30 + $0x28] sm:$0x1]  ;;  %v12621_v30 = vld [vmem:[%s13937_s30 + $0x30] sm:$0x1]  ;;  %v1404_v32 = vrot.slane %v12467_v63, %v13947_v13  ;;  %v1476_v33 = vrot.slane %v12473_v0, %v13947_v13  ;;  %v1365_v42 = vrot.slane %v1358_v28, %v13947_v13 }
  0x38   : > { %v5014_v5 = vsel %vm4997_vm9, %v5013_v52, %v5012_v58  ;;  %v5017_v6 = vrot.slane %v14102_v50, 2  ;;  %2579 = vst.msk [vmem:[#allocation2 + $0x50] sm:$0x1] %vm388_vm0, %v12579_v10  ;;  %3014 = vst.msk [vmem:[#allocation2 + $0x60] sm:$0x1] %vm388_vm0, %v12621_v30  ;;  %v1325_v41 = vshrl.u32 %v1294_v26, 16  ;;  %v1411_v52 = vrot.slane %v1397_v31, %v13947_v13 }
  0x39   : > { %v5016_v11 = vsel %vm5000_vm10, %v5015_v44, %v5014_v5  ;;  %v12477_v29 = vld.sshfl [vmem:[%s13937_s30 + $0x10] sm:$0x22 pattern:$0x75316420]  ;;  %v12663_v38 = vld [vmem:[%s13937_s30 + $0x38] sm:$0x1]  ;;  %v1412_v55 = vcombine.high %v1404_v32, %v1404_v32  ;;  %v1477_v57 = vcombine.high %v1476_v33, %v1476_v33 }
  0x3a   : > { %v5018_v17 = vsel %vm5003_vm11, %v5017_v6, %v5016_v11  ;;  %v1509_v36 = vcombine.high %v12477_v29, %v12477_v29  ;;  %v12483_v37 = vld.sshfl [vmem:[%s13937_s30 + $0x10] sm:$0x20 pattern:$0x75316420]  ;;  %v1516_v44 = vrot.slane %v12477_v29, %v13947_v13  ;;  %3449 = vst.msk [vmem:[#allocation2 + $0x70] sm:$0x1] %vm388_vm0, %v12663_v38 }
  0x3b   : > { %v5103_v23 = vpack.c.b16 %v5018_v17, %v5004_v35  ;;  %v1301_v35 = vrot.slane %v1287_v25, %v13947_v13  ;;  %v12490_v51 = vld.sshfl [vmem:[%s13937_s30 + $0x14] sm:$0x1 pattern:$0x75316420]  ;;  %1384 = vst.msk [vmem:[#allocation2 + $0x24] sm:$0x1] %vm388_vm0, %v1365_v42  ;;  %v1584_v5 = vcombine.high %v12483_v37, %v12483_v37 }
  0x3c   : > { %v1523_v58 = vrot.slane %v1509_v36, %v13947_v13  ;;  %v12499_v63 = vld.sshfl [vmem:[%s13937_s30 + $0x18] sm:$0x11 pattern:$0x75316420]  ;;  %v1524_v2 = vcombine.high %v1516_v44, %v1516_v44  ;;  %v1651_v6 = vrot.slane %v12490_v51, %v13947_v13  ;;  %v1437_v11 = vshrl.u32 %v1411_v52, 16 }
  0x3d   : > { %13385 = vmatprep.mubr.msk.bf16.mxu1 %vm16237_vm12, %v5103_v23  ;;  %v1330_v0 = vshll.u32 %v1301_v35, 16  ;;  %v12505_v10 = vld.sshfl [vmem:[%s13937_s30 + $0x18] sm:$0x10 pattern:$0x75316420]  ;;  %v1442_v17 = vshll.u32 %v1412_v55, 16  ;;  %v1722_v25 = vcombine.high %v12499_v63, %v12499_v63  ;;  %v1591_v30 = vrot.slane %v1584_v5, %v13947_v13 }
  0x3e   : > { %1496 = vst.msk [vmem:[#allocation2 + $0x28] sm:$0x1] %vm388_vm0, %v1477_v57  ;;  %v1525_v23 = vcombine.high %v1523_v58, %v1523_v58  ;;  %v12509_v26 = vld.sshfl [vmem:[%s13937_s30 + $0x18] sm:$0x12 pattern:$0x75316420]  ;;  %v1729_v37 = vrot.slane %v12499_v63, %v13947_v13  ;;  %v1793_v42 = vcombine.high %v12505_v10, %v12505_v10 }
  0x3f   : > { %v1332_v28 = vsel %vm13962_vm15, %v1325_v41, %v1330_v0  ;;  %v1551_v29 = vshrl.u32 %v1524_v2, 16  ;;  %v1688_v31 = vshll.u32 %v1651_v6, 16  ;;  %v12515_v32 = vld.sshfl [vmem:[%s13937_s30 + $0x18] sm:$0x2 pattern:$0x75316420]  ;;  %v1444_v33 = vsel %vm13962_vm15, %v1437_v11, %v1442_v17 }
  0x40   : > { %1345 = vst.msk [vmem:[#allocation2 + $0x22] sm:$0x1] %vm388_vm0, %v1332_v28  ;;  %v1556_v36 = vshll.u32 %v1525_v23, 16  ;;  %v1736_v38 = vrot.slane %v1722_v25, %v13947_v13  ;;  %1457 = vst.msk [vmem:[#allocation2 + $0x26] sm:$0x1] %vm388_vm0, %v1444_v33  ;;  %v1592_v41 = vcombine.high %v1591_v30, %v1591_v30  ;;  %v1832_v44 = vcombine.high %v12509_v26, %v12509_v26 }
  0x41   : > { %v12519_v35 = vld.sshfl [vmem:[%s13937_s30 + $0x18] sm:$0x22 pattern:$0x75316420]  ;;  %v1839_v51 = vrot.slane %v12509_v26, %v13947_v13  ;;  %v1760_v57 = vshrl.u32 %v1729_v37, 16  ;;  %v1911_v0 = vrot.slane %v12515_v32, %v13947_v13  ;;  %v1800_v5 = vrot.slane %v1793_v42, %v13947_v13 }
  0x42   : > { %v12525_v52 = vld.sshfl [vmem:[%s13937_s30 + $0x18] sm:$0x20 pattern:$0x75316420]  ;;  %v1558_v55 = vsel %vm13962_vm15, %v1551_v29, %v1556_v36  ;;  %v1765_v58 = vshll.u32 %v1736_v38, 16  ;;  %v1683_v63 = vshrl.u32 %v1592_v41, 16  ;;  %v1846_v6 = vrot.slane %v1832_v44, %v13947_v13 }
  0x43   : > { %v12532_v2 = vld.sshfl [vmem:[%s13937_s30 + $0x1c] sm:$0x1 pattern:$0x75316420]  ;;  %1571 = vst.msk [vmem:[#allocation2 + $0x2a] sm:$0x1] %vm388_vm0, %v1558_v55  ;;  %v1847_v10 = vcombine.high %v1839_v51, %v1839_v51  ;;  %v1912_v23 = vcombine.high %v1911_v0, %v1911_v0  ;;  %v1944_v25 = vcombine.high %v12519_v35, %v12519_v35  ;;  %v1951_v26 = vrot.slane %v12519_v35, %v13947_v13 }
  0x44   : > { %1612 = vst.msk [vmem:[#allocation2 + $0x2c] sm:$0x1] %vm388_vm0, %v1592_v41  ;;  %v12721_v11 = vld.sshfl [vmem:[#allocation2 + $0x20] sm:$0x1 pattern:$0x75316420]  ;;  %v1767_v17 = vsel %vm13962_vm15, %v1760_v57, %v1765_v58  ;;  %v1690_v29 = vsel %vm13962_vm15, %v1683_v63, %v1688_v31  ;;  %v2019_v33 = vcombine.high %v12525_v52, %v12525_v52  ;;  %v2086_v35 = vrot.slane %v12532_v2, %v13947_v13 }
  0x45   : > { %v12723_v28 = vld.sshfl [vmem:[#allocation2 + $0x24] sm:$0x1 pattern:$0x75316420]  ;;  %1780 = vst.msk [vmem:[#allocation2 + $0x32] sm:$0x1] %vm388_vm0, %v1767_v17  ;;  %v1958_v37 = vrot.slane %v1944_v25, %v13947_v13  ;;  %v1959_v38 = vcombine.high %v1951_v26, %v1951_v26  ;;  %v4261_v31 = vrot.slane %v12721_v11, %v13947_v13 }
  0x46   : > { %1819 = vst.msk [vmem:[#allocation2 + $0x34] sm:$0x1] %vm388_vm0, %v1800_v5  ;;  %v1872_v30 = vshrl.u32 %v1846_v6, 16  ;;  %v1877_v32 = vshll.u32 %v1847_v10, 16  ;;  %1703 = vst.msk [vmem:[#allocation2 + $0x2e] sm:$0x1] %vm388_vm0, %v1690_v29  ;;  %v2026_v44 = vrot.slane %v2019_v33, %v13947_v13  ;;  %v4289_v52 = vrot.slane %v12723_v28, %v13947_v13 }
  0x47   : > { %v12725_v36 = vld.sshfl [vmem:[#allocation2 + $0x28] sm:$0x1 pattern:$0x75316420]  ;;  %1931 = vst.msk [vmem:[#allocation2 + $0x38] sm:$0x1] %vm388_vm0, %v1912_v23  ;;  %v1960_v57 = vcombine.high %v1958_v37, %v1958_v37  ;;  %v14195_v11 = vunpack.c.l.b16 %v4261_v31 }
  0x48   : > { %v12729_v41 = vld.sshfl [vmem:[#allocation2 + $0x30] sm:$0x1 pattern:$0x75316420]  ;;  %v1879_v42 = vsel %vm13962_vm15, %v1872_v30, %v1877_v32  ;;  %v4317_v55 = vrot.slane %v12725_v36, %v13947_v13  ;;  %v1986_v58 = vshrl.u32 %v1959_v38, 16  ;;  %v2123_v0 = vshll.u32 %v2086_v35, 16 }
  0x49   : > { %v12722_v51 = vld.sshfl [vmem:[#allocation2 + $0x22] sm:$0x1 pattern:$0x75316420]  ;;  %1892 = vst.msk [vmem:[#allocation2 + $0x36] sm:$0x1] %vm388_vm0, %v1879_v42  ;;  %v2027_v5 = vcombine.high %v2026_v44, %v2026_v44  ;;  %v4373_v10 = vrot.slane %v12729_v41, %v13947_v13  ;;  %v14199_v26 = vunpack.c.l.b16 %v4289_v52 }
  0x4a   : > { %v12724_v63 = vld.sshfl [vmem:[#allocation2 + $0x26] sm:$0x1 pattern:$0x75316420]  ;;  %v4275_v2 = vrot.slane %v12722_v51, %v13947_v13  ;;  %v1991_v17 = vshll.u32 %v1960_v57, 16  ;;  %v14201_v28 = vunpack.c.l.b16 %v4317_v55  ;;  %v5019_v41 = vrot.slane %v14195_v11, 1 }
  0x4b   : > { %v4303_v6 = vrot.slane %v12724_v63, %v13947_v13  ;;  %v12726_v23 = vld.sshfl [vmem:[#allocation2 + $0x2a] sm:$0x1 pattern:$0x75316420]  ;;  %2047 = vst.msk [vmem:[#allocation2 + $0x3c] sm:$0x1] %vm388_vm0, %v2027_v5  ;;  %v14207_v36 = vunpack.c.l.b16 %v4373_v10 }
  0x4c   : > { %v14197_v25 = vunpack.c.l.b16 %v4275_v2  ;;  %v2118_v29 = vshrl.u32 %v2027_v5, 16  ;;  %v12727_v30 = vld.sshfl [vmem:[#allocation2 + $0x2c] sm:$0x1 pattern:$0x75316420]  ;;  %v4331_v32 = vrot.slane %v12726_v23, %v13947_v13  ;;  %v1993_v37 = vsel %vm13962_vm15, %v1986_v58, %v1991_v17 }
  0x4d   : > { %v14205_v33 = vunpack.c.l.b16 %v4303_v6  ;;  %v12730_v38 = vld.sshfl [vmem:[#allocation2 + $0x32] sm:$0x1 pattern:$0x75316420]  ;;  %v4345_v35 = vrot.slane %v12727_v30, %v13947_v13  ;;  %v5021_v31 = vrot.slane %v14199_v26, 7 }
  0x4e   : > { %2006 = vst.msk [vmem:[#allocation2 + $0x3a] sm:$0x1] %vm388_vm0, %v1993_v37  ;;  %v2125_v42 = vsel %vm13962_vm15, %v2118_v29, %v2123_v0  ;;  %v12728_v44 = vld.sshfl [vmem:[#allocation2 + $0x2e] sm:$0x1 pattern:$0x75316420]  ;;  %v4387_v51 = vrot.slane %v12730_v38, %v13947_v13  ;;  %v14218_v52 = vunpack.c.l.b16 %v4331_v32  ;;  %v5020_v2 = vsel %vm4985_vm2, %v14197_v25, %v5019_v41 }
  0x4f   : > { %v5023_v55 = vrot.slane %v14205_v33, 6  ;;  %2138 = vst.msk [vmem:[#allocation2 + $0x3e] sm:$0x1] %vm388_vm0, %v2125_v42  ;;  %v4359_v58 = vrot.slane %v12728_v44, %v13947_v13  ;;  %v14223_v63 = vunpack.c.l.b16 %v4345_v35  ;;  %v5025_v0 = vrot.slane %v14201_v28, 5  ;;  %v387_v59 = vld [vmem:[%s13937_s30 + $0x8] sm:$0x1] }
  0x50   : > { %v12731_v57 = vld.sshfl [vmem:[#allocation2 + $0x34] sm:$0x1 pattern:$0x75316420]  ;;  %v14229_v10 = vunpack.c.l.b16 %v4387_v51  ;;  %v5022_v17 = vsel %vm4988_vm4, %v5021_v31, %v5020_v2  ;;  %v5027_v23 = vrot.slane %v14218_v52, 4  ;;  %v5033_v44 = vrot.slane %v14207_v36, 1 }
  0x51   : > { %v12732_v5 = vld.sshfl [vmem:[#allocation2 + $0x36] sm:$0x1 pattern:$0x75316420]  ;;  %v4401_v6 = vrot.slane %v12731_v57, %v13947_v13  ;;  %v14234_v32 = vunpack.c.l.b16 %v4359_v58  ;;  %v5024_v37 = vsel %vm4991_vm5, %v5023_v55, %v5022_v17  ;;  %v5029_v38 = vrot.slane %v14223_v63, 3 }
  0x52   : > { %v12733_v29 = vld.sshfl [vmem:[#allocation2 + $0x38] sm:$0x1 pattern:$0x75316420]  ;;  %v4415_v30 = vrot.slane %v12732_v5, %v13947_v13  ;;  %v5026_v42 = vsel %vm4994_vm7, %v5025_v0, %v5024_v37  ;;  %v5034_v0 = vsel %vm4985_vm2, %v14229_v10, %v5033_v44  ;;  %390 = vst.msk [vmem:[#allocation2 + $0x1] sm:$0x1] %vm388_vm0, %v387_v59 }
  0x53   : > { %v4429_v35 = vrot.slane %v12733_v29, %v13947_v13  ;;  %v14239_v41 = vunpack.c.l.b16 %v4401_v6  ;;  %v12541_v31 = vld.sshfl [vmem:[%s13937_s30 + $0x20] sm:$0x11 pattern:$0x75316420]  ;;  %v5028_v2 = vsel %vm4997_vm9, %v5027_v23, %v5026_v42  ;;  %v5031_v58 = vrot.slane %v14234_v32, 2 }
  0x54   : > { %v12735_v51 = vld.sshfl [vmem:[#allocation2 + $0x3c] sm:$0x1 pattern:$0x75316420]  ;;  %v14244_v57 = vunpack.c.l.b16 %v4415_v30  ;;  %v5030_v6 = vsel %vm5000_vm10, %v5029_v38, %v5028_v2  ;;  %v2157_v42 = vcombine.high %v12541_v31, %v12541_v31  ;;  %v12538_v54 = vld [vmem:[%s13937_s30 + $0x28] sm:$0x1] }
  0x55   : > { %v4457_v5 = vrot.slane %v12735_v51, %v13947_v13  ;;  %v14250_v17 = vunpack.c.l.b16 %v4429_v35  ;;  %v12734_v29 = vld.sshfl [vmem:[#allocation2 + $0x3a] sm:$0x1 pattern:$0x75316420]  ;;  %v5032_v37 = vsel %vm5003_vm11, %v5031_v58, %v5030_v6  ;;  %v5035_v30 = vrot.slane %v14239_v41, 7 }
  0x56   : > { %v5037_v23 = vrot.slane %v14244_v57, 6  ;;  %v12736_v1 = vld.sshfl [vmem:[#allocation2 + $0x3e] sm:$0x1 pattern:$0x75316420]  ;;  %v4443_v51 = vrot.slane %v12734_v29, %v13947_v13 }
  0x57   : > { %v14259_v35 = vunpack.c.l.b16 %v4457_v5  ;;  %v5039_v38 = vrot.slane %v14250_v17, 5  ;;  %v4471_v2 = vrot.slane %v12736_v1, %v13947_v13  ;;  %v5036_v58 = vsel %vm4988_vm4, %v5035_v30, %v5034_v0  ;;  %v12547_v16 = vld.sshfl [vmem:[%s13937_s30 + $0x20] sm:$0x10 pattern:$0x75316420] }
  0x58   : > { %v14267_v20 = vunpack.c.l.b16 %v4443_v51  ;;  %v5038_v19 = vsel %vm4991_vm5, %v5037_v23, %v5036_v58  ;;  %v12551_v7 = vld.sshfl [vmem:[%s13937_s30 + $0x20] sm:$0x12 pattern:$0x75316420]  ;;  %v2164_v23 = vrot.slane %v12541_v31, %v13947_v13  ;;  %v2171_v58 = vrot.slane %v2157_v42, %v13947_v13  ;;  %2145 = vst.msk [vmem:[#allocation2 + $0x41] sm:$0x1] %vm388_vm0, %v12538_v54 }
  0x59   : > { %v5043_v5 = vrot.slane %v14259_v35, 3  ;;  %v14274_v15 = vunpack.c.l.b16 %v4471_v2  ;;  %v5040_v1 = vsel %vm4994_vm7, %v5039_v38, %v5038_v19  ;;  %v12557_v22 = vld.sshfl [vmem:[%s13937_s30 + $0x20] sm:$0x2 pattern:$0x75316420]  ;;  %v13696_v19 = vld [vmem:[%s16200_s1 + $0x10] sm:$0xff]   ;;  %v2228_v6 = vcombine.high %v12547_v16, %v12547_v16 }
  0x5a   : > { %v5041_v51 = vrot.slane %v14267_v20, 4  ;;  %v12561_v44 = vld.sshfl [vmem:[%s13937_s30 + $0x20] sm:$0x22 pattern:$0x75316420]  ;;  %v2267_v38 = vcombine.high %v12551_v7, %v12551_v7  ;;  %v2274_v61 = vrot.slane %v12551_v7, %v13947_v13  ;;  %v2195_v31 = vshrl.u32 %v2164_v23, 16 }
  0x5b   : > { %v5045_v2 = vrot.slane %v14274_v15, 2  ;;  %v2200_v42 = vshll.u32 %v2171_v58, 16  ;;  %v2346_v0 = vrot.slane %v12557_v22, %v13947_v13  ;;  %v12574_v55 = vld.sshfl [vmem:[%s13937_s30 + $0x24] sm:$0x1 pattern:$0x75316420]  ;;  %v2386_v23 = vrot.slane %v12561_v44, %v13947_v13 }
  0x5c   : > { %v5042_v30 = vsel %vm4997_vm9, %v5041_v51, %v5040_v1  ;;  %v12567_v1 = vld.sshfl [vmem:[%s13937_s30 + $0x20] sm:$0x20 pattern:$0x75316420]  ;;  %v2281_v12 = vrot.slane %v2267_v38, %v13947_v13  ;;  %v2282_v60 = vcombine.high %v2274_v61, %v2274_v61  ;;  %v12412_v22 = vld [vmem:[%s13937_s30 + $0x10] sm:$0x1] }
  0x5d   : > { %v5044_v29 = vsel %vm5000_vm10, %v5043_v5, %v5042_v30  ;;  %v2235_v30 = vrot.slane %v2228_v6, %v13947_v13  ;;  %v12583_v16 = vld.sshfl [vmem:[%s13937_s30 + $0x28] sm:$0x11 pattern:$0x75316420]  ;;  %v2202_v7 = vsel %vm13962_vm15, %v2195_v31, %v2200_v42  ;;  %v2347_v8 = vcombine.high %v2346_v0, %v2346_v0  ;;  %840 = vst.msk [vmem:[#allocation2 + $0x11] sm:$0x1] %vm388_vm0, %v12412_v22 }
  0x5e   : > { %v5046_v51 = vsel %vm5003_vm11, %v5045_v2, %v5044_v29  ;;  %v2379_v29 = vcombine.high %v12561_v44, %v12561_v44  ;;  %v12589_v58 = vld.sshfl [vmem:[%s13937_s30 + $0x28] sm:$0x10 pattern:$0x75316420]  ;;  %2215 = vst.msk [vmem:[#allocation2 + $0x42] sm:$0x1] %vm388_vm0, %v2202_v7  ;;  %v2454_v6 = vcombine.high %v12567_v1, %v12567_v1  ;;  %v2521_v2 = vrot.slane %v12574_v55, %v13947_v13 }
  0x5f   : > { %v5104_v5 = vpack.c.b16 %v5046_v51, %v5032_v37  ;;  %2254 = vst.msk [vmem:[#allocation2 + $0x44] sm:$0x1] %vm388_vm0, %v2235_v30  ;;  %v2307_v61 = vshrl.u32 %v2281_v12, 16  ;;  %v2312_v37 = vshll.u32 %v2282_v60, 16  ;;  %v14320_v44 = vld [vmem:[%s16200_s1 + $0x8] sm:$0xff]   ;;  %v2394_v12 = vcombine.high %v2386_v23, %v2386_v23 }
  0x60   : > { %v12593_v0 = vld.sshfl [vmem:[%s13937_s30 + $0x28] sm:$0x12 pattern:$0x75316420]  ;;  %2366 = vst.msk [vmem:[#allocation2 + $0x48] sm:$0x1] %vm388_vm0, %v2347_v8  ;;  %v2393_v59 = vrot.slane %v2379_v29, %v13947_v13  ;;  %v2592_v60 = vcombine.high %v12583_v16, %v12583_v16  ;;  %v2599_v38 = vrot.slane %v12583_v16, %v13947_v13  ;;  %v2461_v51 = vrot.slane %v2454_v6, %v13947_v13 }
  0x61   : > { %13386 = vmatmul.mubr.msk.bf16.vlgmr.msra.gmra.mxu1 %vm16237_vm12, %v5104_v5  ;;  %v12599_v55 = vld.sshfl [vmem:[%s13937_s30 + $0x28] sm:$0x2 pattern:$0x75316420]  ;;  %v2314_v1 = vsel %vm13962_vm15, %v2307_v61, %v2312_v37  ;;  %v2558_v31 = vshll.u32 %v2521_v2, 16  ;;  %v2663_v42 = vcombine.high %v12589_v58, %v12589_v58  ;;  %v2421_v8 = vshrl.u32 %v2394_v12, 16 }
  0x62   : > { %13394 = vmatpush3.bf16.msra.mxu1 %v13977_v40  ;;  %v12603_v5 = vld.sshfl [vmem:[%s13937_s30 + $0x28] sm:$0x22 pattern:$0x75316420]  ;;  %2327 = vst.msk [vmem:[#allocation2 + $0x46] sm:$0x1] %vm388_vm0, %v2314_v1  ;;  %v2395_v40 = vcombine.high %v2393_v59, %v2393_v59  ;;  %v2606_v30 = vrot.slane %v2592_v60, %v13947_v13  ;;  %v2462_v16 = vcombine.high %v2461_v51, %v2461_v51 }
  0x63   : > { %13395 = vmatprep.subr.bf16.mxu1 %v13696_v19  ;;  %v2630_v7 = vshrl.u32 %v2599_v38, 16  ;;  %v2670_v29 = vrot.slane %v2663_v42, %v13947_v13  ;;  %v2702_v23 = vcombine.high %v12593_v0, %v12593_v0  ;;  %v2709_v22 = vrot.slane %v12593_v0, %v13947_v13  ;;  %v12609_v61 = vld.sshfl [vmem:[%s13937_s30 + $0x28] sm:$0x20 pattern:$0x75316420]  ;;  %v13698_v58 = vld [vmem:[%s16200_s1] sm:$0xff]  }
  0x64   : > { %v2426_v37 = vshll.u32 %v2395_v40, 16  ;;  %v2635_v6 = vshll.u32 %v2606_v30, 16  ;;  %v2781_v2 = vrot.slane %v12599_v55, %v13947_v13  ;;  %v2814_v59 = vcombine.high %v12603_v5, %v12603_v5  ;;  %v12616_v12 = vld.sshfl [vmem:[%s13937_s30 + $0x2c] sm:$0x1 pattern:$0x75316420] }
  0x65   : > { %2482 = vst.msk [vmem:[#allocation2 + $0x4c] sm:$0x1] %vm388_vm0, %v2462_v16  ;;  %v2553_v60 = vshrl.u32 %v2462_v16, 16  ;;  %2689 = vst.msk [vmem:[#allocation2 + $0x54] sm:$0x1] %vm388_vm0, %v2670_v29  ;;  %v2716_v0 = vrot.slane %v2702_v23, %v13947_v13  ;;  %v2717_v38 = vcombine.high %v2709_v22, %v2709_v22  ;;  %v2821_v1 = vrot.slane %v12603_v5, %v13947_v13 }
  0x66   : > { %13396 = vmatpush3.bf16.msra.mxu1 %v13696_v19  ;;  %v12737_v51 = vld.sshfl [vmem:[#allocation2 + $0x40] sm:$0x1 pattern:$0x75316420]  ;;  %v2428_v19 = vsel %vm13962_vm15, %v2421_v8, %v2426_v37  ;;  %v2637_v55 = vsel %vm13962_vm15, %v2630_v7, %v2635_v6  ;;  %v2782_v42 = vcombine.high %v2781_v2, %v2781_v2  ;;  %v2828_v40 = vrot.slane %v2814_v59, %v13947_v13  ;;  %v12454_v29 = vld [vmem:[%s13937_s30 + $0x18] sm:$0x1] }
  0x67   : > { %13397 = vmatprep.subr.bf16.mxu1 %v14320_v44  ;;  %v12738_v30 = vld.sshfl [vmem:[#allocation2 + $0x42] sm:$0x1 pattern:$0x75316420]  ;;  %2441 = vst.msk [vmem:[#allocation2 + $0x4a] sm:$0x1] %vm388_vm0, %v2428_v19  ;;  %v2560_v5 = vsel %vm13962_vm15, %v2553_v60, %v2558_v31  ;;  %v2829_v8 = vcombine.high %v2821_v1, %v2821_v1  ;;  %v2889_v31 = vcombine.high %v12609_v61, %v12609_v61 }
  0x68   : > { %v12745_v16 = vld.sshfl [vmem:[#allocation2 + $0x50] sm:$0x1 pattern:$0x75316420]  ;;  %2650 = vst.msk [vmem:[#allocation2 + $0x52] sm:$0x1] %vm388_vm0, %v2637_v55  ;;  %v2830_v6 = vcombine.high %v2828_v40, %v2828_v40  ;;  %v2956_v2 = vrot.slane %v12616_v12, %v13947_v13  ;;  %v4485_v60 = vrot.slane %v12737_v51, %v13947_v13  ;;  %v4499_v55 = vrot.slane %v12738_v30, %v13947_v13 }
  0x69   : > { %v2742_v23 = vshrl.u32 %v2716_v0, 16  ;;  %v2747_v22 = vshll.u32 %v2717_v38, 16  ;;  %v12739_v37 = vld.sshfl [vmem:[#allocation2 + $0x44] sm:$0x1 pattern:$0x75316420]  ;;  %v2896_v12 = vrot.slane %v2889_v31, %v13947_v13 }
  0x6a   : > { %v14360_v7 = vld [vmem:[%s16200_s1 + $0x58] sm:$0xff]   ;;  %1275 = vst.msk [vmem:[#allocation2 + $0x21] sm:$0x1] %vm388_vm0, %v12454_v29  ;;  %2573 = vst.msk [vmem:[#allocation2 + $0x4e] sm:$0x1] %vm388_vm0, %v2560_v5  ;;  %13398 = vmatpush3.bf16.msra.mxu1 %v14320_v44  ;;  %v2856_v1 = vshrl.u32 %v2829_v8, 16  ;;  %v4597_v29 = vrot.slane %v12745_v16, %v13947_v13  ;;  %v14379_v5 = vunpack.c.l.b16 %v4485_v60  ;;  %v14381_v30 = vunpack.c.l.b16 %v4499_v55 }
  0x6b   : > { %16245 = vst [vmem:[#allocation9_spill] sm:$0xff] %v14360_v7  ;;  %2801 = vst.msk [vmem:[#allocation2 + $0x58] sm:$0x1] %vm388_vm0, %v2782_v42  ;;  %v12496_v0 = vld [vmem:[%s13937_s30 + $0x20] sm:$0x1]  ;;  %v2749_v38 = vsel %vm13962_vm15, %v2742_v23, %v2747_v22  ;;  %v4513_v42 = vrot.slane %v12739_v37, %v13947_v13  ;;  %13399 = vmatprep.subr.bf16.mxu1 %v13698_v58  ;;  %v2861_v61 = vshll.u32 %v2830_v6, 16 }
  0x6c   : > { %v12741_v59 = vld.sshfl [vmem:[#allocation2 + $0x48] sm:$0x1 pattern:$0x75316420]  ;;  %1710 = vst.msk [vmem:[#allocation2 + $0x31] sm:$0x1] %vm388_vm0, %v12496_v0  ;;  %v2897_v8 = vcombine.high %v2896_v12, %v2896_v12  ;;  %v14396_v60 = vunpack.c.l.b16 %v4597_v29 }
  0x6d   : > { %v12740_v19 = vld.sshfl [vmem:[#allocation2 + $0x46] sm:$0x1 pattern:$0x75316420]  ;;  %2762 = vst.msk [vmem:[#allocation2 + $0x56] sm:$0x1] %vm388_vm0, %v2749_v38  ;;  %v4541_v40 = vrot.slane %v12741_v59, %v13947_v13  ;;  %v2863_v22 = vsel %vm13962_vm15, %v2856_v1, %v2861_v61  ;;  %v14388_v6 = vunpack.c.l.b16 %v4513_v42 }
  0x6e   : > { %v2993_v44 = vshll.u32 %v2956_v2, 16  ;;  %v4527_v51 = vrot.slane %v12740_v19, %v13947_v13  ;;  %16246 = vst [vmem:[#allocation10_spill] sm:$0xff] %v14379_v5  ;;  %v14384_v23 = vld.sshfl [vmem:[%s13937_s30 + $0x30] sm:$0x11 pattern:$0x75316420]  ;;  %13400 = vmatpush3.bf16.msra.mxu1 %v13698_v58 }
  0x6f   : > { %v12743_v37 = vld.sshfl [vmem:[#allocation2 + $0x4c] sm:$0x1 pattern:$0x75316420]  ;;  %2876 = vst.msk [vmem:[#allocation2 + $0x5a] sm:$0x1] %vm388_vm0, %v2863_v22  ;;  %v14394_v59 = vunpack.c.l.b16 %v4541_v40  ;;  %13409 = vmatprep.subr.bf16.mxu1 %v14360_v7  ;;  %v3027_v55 = vcombine.high %v14384_v23, %v14384_v23  ;;  %v3034_v4 = vrot.slane %v14384_v23, %v13947_v13 }
  0x70   : > { %v14390_v31 = vunpack.c.l.b16 %v4527_v51  ;;  %v12747_v2 = vld.sshfl [vmem:[#allocation2 + $0x54] sm:$0x1 pattern:$0x75316420]  ;;  %v4569_v16 = vrot.slane %v12743_v37, %v13947_v13  ;;  %16247 = vst [vmem:[#allocation11_spill] sm:$0xff] %v14396_v60  ;;  %v5047_v0 = vrot.slane %v14379_v5, 1 }
  0x71   : > { %2917 = vst.msk [vmem:[#allocation2 + $0x5c] sm:$0x1] %vm388_vm0, %v2897_v8  ;;  %v2988_v38 = vshrl.u32 %v2897_v8, 16  ;;  %v4625_v58 = vrot.slane %v12747_v2, %v13947_v13  ;;  %v5049_v19 = vrot.slane %v14388_v6, 7 }
  0x72   : > { %v12742_v1 = vld.sshfl [vmem:[#allocation2 + $0x4a] sm:$0x1 pattern:$0x75316420]  ;;  %v14406_v12 = vunpack.c.l.b16 %v4569_v16  ;;  %v5048_v51 = vsel %vm4985_vm2, %v14381_v30, %v5047_v0  ;;  %v5051_v40 = vrot.slane %v14390_v31, 6 }
  0x73   : > { %v12744_v42 = vld.sshfl [vmem:[#allocation2 + $0x4e] sm:$0x1 pattern:$0x75316420]  ;;  %v4555_v61 = vrot.slane %v12742_v1, %v13947_v13  ;;  %v2995_v29 = vsel %vm13962_vm15, %v2988_v38, %v2993_v44  ;;  %v14414_v37 = vunpack.c.l.b16 %v4625_v58  ;;  %v5050_v2 = vsel %vm4988_vm4, %v5049_v19, %v5048_v51 }
  0x74   : > { %v12746_v22 = vld.sshfl [vmem:[#allocation2 + $0x52] sm:$0x1 pattern:$0x75316420]  ;;  %v4583_v8 = vrot.slane %v12744_v42, %v13947_v13  ;;  %3008 = vst.msk [vmem:[#allocation2 + $0x5e] sm:$0x1] %vm388_vm0, %v2995_v29  ;;  %v5052_v49 = vsel %vm4991_vm5, %v5051_v40, %v5050_v2 }
  0x75   : > { %16248 = vst [vmem:[#allocation12_spill] sm:$0xff] %v14414_v37  ;;  %v12748_v16 = vld.sshfl [vmem:[#allocation2 + $0x56] sm:$0x1 pattern:$0x75316420]  ;;  %v4611_v1 = vrot.slane %v12746_v22, %v13947_v13  ;;  %v14420_v0 = vunpack.c.l.b16 %v4555_v61  ;;  %v5053_v44 = vrot.slane %v14394_v59, 5 }
  0x76   : > { %v12749_v38 = vld.sshfl [vmem:[#allocation2 + $0x58] sm:$0x1 pattern:$0x75316420]  ;;  %v4639_v58 = vrot.slane %v12748_v16, %v13947_v13  ;;  %v14426_v42 = vunpack.c.l.b16 %v4583_v8  ;;  %v5057_v19 = vrot.slane %v14406_v12, 3  ;;  %v5061_v51 = vrot.slane %v14396_v60, 1 }
  0x77   : > { %v4653_v29 = vrot.slane %v12749_v38, %v13947_v13  ;;  %v14431_v22 = vunpack.c.l.b16 %v4611_v1  ;;  %v5054_v61 = vsel %vm4994_vm7, %v5053_v44, %v5052_v49  ;;  %v5055_v40 = vrot.slane %v14420_v0, 4  ;;  %v12631_v2 = vld.sshfl [vmem:[%s13937_s30 + $0x30] sm:$0x10 pattern:$0x75316420] }
  0x78   : > { %16249 = vst [vmem:[#allocation13_spill] sm:$0xff] %v14426_v42  ;;  %v12750_v54 = vld.sshfl [vmem:[#allocation2 + $0x5a] sm:$0x1 pattern:$0x75316420]  ;;  %v14436_v45 = vunpack.c.l.b16 %v4639_v58  ;;  %v5059_v8 = vrot.slane %v14426_v42, 2 }
  0x79   : > { %16250 = vst [vmem:[#allocation14_spill] sm:$0xff] %v14431_v22  ;;  %v5063_v16 = vrot.slane %v14414_v37, 7  ;;  %v12751_v38 = vld.sshfl [vmem:[#allocation2 + $0x5c] sm:$0x1 pattern:$0x75316420]  ;;  %v4667_v1 = vrot.slane %v12750_v54, %v13947_v13  ;;  %v14443_v7 = vunpack.c.l.b16 %v4653_v29  ;;  %v5056_v49 = vsel %vm4997_vm9, %v5055_v40, %v5054_v61 }
  0x7a   : > { %16251 = vst [vmem:[#allocation15_spill] sm:$0xff] %v14436_v45  ;;  %v5062_v44 = vsel %vm4985_vm2, %v14431_v22, %v5061_v51  ;;  %v4681_v58 = vrot.slane %v12751_v38, %v13947_v13  ;;  %v5058_v60 = vsel %vm5000_vm10, %v5057_v19, %v5056_v49  ;;  %v5065_v42 = vrot.slane %v14436_v45, 6  ;;  %v12635_v23 = vld.sshfl [vmem:[%s13937_s30 + $0x30] sm:$0x12 pattern:$0x75316420] }
  0x7b   : > { %16252 = vst [vmem:[#allocation16_spill] sm:$0xff] %v14443_v7  ;;  %v5064_v37 = vsel %vm4988_vm4, %v5063_v16, %v5062_v44  ;;  %v14453_v5 = vunpack.c.l.b16 %v4667_v1  ;;  %v14456_v29 = vsel %vm5003_vm11, %v5059_v8, %v5058_v60  ;;  %v5067_v61 = vrot.slane %v14443_v7, 5  ;;  %v12641_v51 = vld.sshfl [vmem:[%s13937_s30 + $0x30] sm:$0x2 pattern:$0x75316420] }
  0x7c   : > { %v3041_v40 = vrot.slane %v3027_v55, %v13947_v13  ;;  %v12752_v54 = vld.sshfl [vmem:[#allocation2 + $0x5e] sm:$0x1 pattern:$0x75316420]  ;;  %v14461_v38 = vunpack.c.l.b16 %v4681_v58  ;;  %v5066_v19 = vsel %vm4991_vm5, %v5065_v42, %v5064_v37  ;;  %v3065_v16 = vshrl.u32 %v3034_v4, 16 }
  0x7d   : > { %16253 = vst [vmem:[#allocation17_spill] sm:$0xff] %v14453_v5  ;;  %v3098_v49 = vcombine.high %v12631_v2, %v12631_v2  ;;  %v4695_v1 = vrot.slane %v12752_v54, %v13947_v13  ;;  %v5068_v60 = vsel %vm4994_vm7, %v5067_v61, %v5066_v19  ;;  %v5069_v8 = vrot.slane %v14453_v5, 4  ;;  %v12645_v7 = vld.sshfl [vmem:[%s13937_s30 + $0x30] sm:$0x22 pattern:$0x75316420] }
  0x7e   : > { %16254 = vst [vmem:[#allocation18_spill] sm:$0xff] %v14461_v38  ;;  %v3070_v44 = vshll.u32 %v3041_v40, 16  ;;  %v5071_v55 = vrot.slane %v14461_v38, 3  ;;  %v3137_v58 = vcombine.high %v12635_v23, %v12635_v23  ;;  %v3144_v37 = vrot.slane %v12635_v23, %v13947_v13  ;;  %v12580_v19 = vld [vmem:[%s13937_s30 + $0x30] sm:$0x1] }
  0x7f   : > { %v3105_v45 = vrot.slane %v3098_v49, %v13947_v13  ;;  %v12651_v4 = vld.sshfl [vmem:[%s13937_s30 + $0x30] sm:$0x20 pattern:$0x75316420]  ;;  %v14472_v42 = vunpack.c.l.b16 %v4695_v1  ;;  %v5070_v2 = vsel %vm4997_vm9, %v5069_v8, %v5068_v60  ;;  %v3216_v40 = vrot.slane %v12641_v51, %v13947_v13  ;;  %2580 = vst.msk [vmem:[#allocation2 + $0x51] sm:$0x1] %vm388_vm0, %v12580_v19 }
  0x80   : > { %v3072_v61 = vsel %vm13962_vm15, %v3065_v16, %v3070_v44  ;;  %v12658_v54 = vld.sshfl [vmem:[%s13937_s30 + $0x34] sm:$0x1 pattern:$0x75316420]  ;;  %v5072_v38 = vsel %vm5000_vm10, %v5071_v55, %v5070_v2  ;;  %v3151_v23 = vrot.slane %v3137_v58, %v13947_v13  ;;  %v3152_v49 = vcombine.high %v3144_v37, %v3144_v37 }
  0x81   : > { %16255 = vst [vmem:[#allocation19_spill] sm:$0xff] %v14472_v42  ;;  %3085 = vst.msk [vmem:[#allocation2 + $0x62] sm:$0x1] %vm388_vm0, %v3072_v61  ;;  %v3249_v1 = vcombine.high %v12645_v7, %v12645_v7  ;;  %v5073_v16 = vrot.slane %v14472_v42, 2  ;;  %v3217_v51 = vcombine.high %v3216_v40, %v3216_v40  ;;  %v3256_v8 = vrot.slane %v12645_v7, %v13947_v13 }
  0x82   : > { %3124 = vst.msk [vmem:[#allocation2 + $0x64] sm:$0x1] %vm388_vm0, %v3105_v45  ;;  %v12667_v60 = vld.sshfl [vmem:[%s13937_s30 + $0x38] sm:$0x11 pattern:$0x75316420]  ;;  %v3324_v44 = vcombine.high %v12651_v4, %v12651_v4  ;;  %v3391_v58 = vrot.slane %v12658_v54, %v13947_v13 }
  0x83   : > { %v12673_v55 = vld.sshfl [vmem:[%s13937_s30 + $0x38] sm:$0x10 pattern:$0x75316420]  ;;  %v3177_v2 = vshrl.u32 %v3151_v23, 16  ;;  %v3182_v61 = vshll.u32 %v3152_v49, 16  ;;  %v3263_v45 = vrot.slane %v3249_v1, %v13947_v13  ;;  %v5074_v5 = vsel %vm5003_vm11, %v5073_v16, %v5072_v38 }
  0x84   : > { %v12677_v37 = vld.sshfl [vmem:[%s13937_s30 + $0x38] sm:$0x12 pattern:$0x75316420]  ;;  %3236 = vst.msk [vmem:[#allocation2 + $0x68] sm:$0x1] %vm388_vm0, %v3217_v51  ;;  %v3264_v19 = vcombine.high %v3256_v8, %v3256_v8  ;;  %v3331_v40 = vrot.slane %v3324_v44, %v13947_v13  ;;  %v3462_v42 = vcombine.high %v12667_v60, %v12667_v60  ;;  %v5105_v23 = vpack.c.b16 %v5074_v5, %v14456_v29 }
  0x85   : > { %v12683_v7 = vld.sshfl [vmem:[%s13937_s30 + $0x38] sm:$0x2 pattern:$0x75316420]  ;;  %v12622_v4 = vld [vmem:[%s13937_s30 + $0x38] sm:$0x1]  ;;  %v3184_v49 = vsel %vm13962_vm15, %v3177_v2, %v3182_v61  ;;  %v3265_v1 = vcombine.high %v3263_v45, %v3263_v45  ;;  %v3469_v51 = vrot.slane %v12667_v60, %v13947_v13  ;;  %v3533_v29 = vcombine.high %v12673_v55, %v12673_v55 }
  0x86   : > { %v3428_v54 = vshll.u32 %v3391_v58, 16  ;;  %v12687_v22 = vld.sshfl [vmem:[%s13937_s30 + $0x38] sm:$0x22 pattern:$0x75316420]  ;;  %v3291_v38 = vshrl.u32 %v3264_v19, 16  ;;  %v3332_v16 = vcombine.high %v3331_v40, %v3331_v40  ;;  %v3476_v8 = vrot.slane %v3462_v42, %v13947_v13  ;;  %13389 = vmatprep.mubr.msk.bf16.mxu1 %vm16237_vm12, %v5105_v23 }
  0x87   : > { %3015 = vst.msk [vmem:[#allocation2 + $0x61] sm:$0x1] %vm388_vm0, %v12622_v4  ;;  %3197 = vst.msk [vmem:[#allocation2 + $0x66] sm:$0x1] %vm388_vm0, %v3184_v49  ;;  %v3296_v5 = vshll.u32 %v3265_v1, 16  ;;  %v3572_v2 = vcombine.high %v12677_v37, %v12677_v37  ;;  %v3579_v61 = vrot.slane %v12677_v37, %v13947_v13  ;;  %v3500_v49 = vshrl.u32 %v3469_v51, 16 }
  0x88   : > { %v12693_v44 = vld.sshfl [vmem:[%s13937_s30 + $0x38] sm:$0x20 pattern:$0x75316420]  ;;  %3352 = vst.msk [vmem:[#allocation2 + $0x6c] sm:$0x1] %vm388_vm0, %v3332_v16  ;;  %v3651_v40 = vrot.slane %v12683_v7, %v13947_v13  ;;  %v3540_v60 = vrot.slane %v3533_v29, %v13947_v13  ;;  %v3691_v29 = vrot.slane %v12687_v22, %v13947_v13 }
  0x89   : > { %v12700_v45 = vld.sshfl [vmem:[%s13937_s30 + $0x3c] sm:$0x1 pattern:$0x75316420]  ;;  %v3423_v4 = vshrl.u32 %v3332_v16, 16  ;;  %v3505_v19 = vshll.u32 %v3476_v8, 16  ;;  %v3298_v42 = vsel %vm13962_vm15, %v3291_v38, %v3296_v5  ;;  %v3586_v23 = vrot.slane %v3572_v2, %v13947_v13 }
  0x8a   : > { %v12753_v58 = vld.sshfl [vmem:[#allocation2 + $0x60] sm:$0x1 pattern:$0x75316420]  ;;  %v3587_v55 = vcombine.high %v3579_v61, %v3579_v61  ;;  %3311 = vst.msk [vmem:[#allocation2 + $0x6a] sm:$0x1] %vm388_vm0, %v3298_v42  ;;  %v3652_v51 = vcombine.high %v3651_v40, %v3651_v40  ;;  %v3684_v8 = vcombine.high %v12687_v22, %v12687_v22  ;;  %v3759_v2 = vcombine.high %v12693_v44, %v12693_v44 }
  0x8b   : > { %v12754_v1 = vld.sshfl [vmem:[#allocation2 + $0x62] sm:$0x1 pattern:$0x75316420]  ;;  %v3430_v37 = vsel %vm13962_vm15, %v3423_v4, %v3428_v54  ;;  %v3507_v16 = vsel %vm13962_vm15, %v3500_v49, %v3505_v19  ;;  %3559 = vst.msk [vmem:[#allocation2 + $0x74] sm:$0x1] %vm388_vm0, %v3540_v60  ;;  %v3826_v4 = vrot.slane %v12700_v45, %v13947_v13  ;;  %v4709_v19 = vrot.slane %v12753_v58, %v13947_v13 }
  0x8c   : > { %v12755_v7 = vld.sshfl [vmem:[#allocation2 + $0x64] sm:$0x1 pattern:$0x75316420]  ;;  %3443 = vst.msk [vmem:[#allocation2 + $0x6e] sm:$0x1] %vm388_vm0, %v3430_v37  ;;  %v3698_v54 = vrot.slane %v3684_v8, %v13947_v13  ;;  %v4723_v40 = vrot.slane %v12754_v1, %v13947_v13  ;;  %v3699_v60 = vcombine.high %v3691_v29, %v3691_v29 }
  0x8d   : > { %3520 = vst.msk [vmem:[#allocation2 + $0x72] sm:$0x1] %vm388_vm0, %v3507_v16  ;;  %v3612_v38 = vshrl.u32 %v3586_v23, 16  ;;  %v3617_v5 = vshll.u32 %v3587_v55, 16  ;;  %3671 = vst.msk [vmem:[#allocation2 + $0x78] sm:$0x1] %vm388_vm0, %v3652_v51  ;;  %v3766_v23 = vrot.slane %v3759_v2, %v13947_v13  ;;  %v4737_v44 = vrot.slane %v12755_v7, %v13947_v13 }
  0x8e   : > { %v12757_v61 = vld.sshfl [vmem:[#allocation2 + $0x68] sm:$0x1 pattern:$0x75316420]  ;;  %v3700_v55 = vcombine.high %v3698_v54, %v3698_v54  ;;  %v3863_v37 = vshll.u32 %v3826_v4, 16  ;;  %v3726_v58 = vshrl.u32 %v3699_v60, 16  ;;  %v14540_v2 = vunpack.c.l.b16 %v4723_v40 }
  0x8f   : > { %v12761_v49 = vld.sshfl [vmem:[#allocation2 + $0x70] sm:$0x1 pattern:$0x75316420]  ;;  %v3619_v42 = vsel %vm13962_vm15, %v3612_v38, %v3617_v5  ;;  %v4765_v16 = vrot.slane %v12757_v61, %v13947_v13  ;;  %v3767_v51 = vcombine.high %v3766_v23, %v3766_v23  ;;  %v14537_v38 = vunpack.c.l.b16 %v4709_v19 }
  0x90   : > { %v12756_v22 = vld.sshfl [vmem:[#allocation2 + $0x66] sm:$0x1 pattern:$0x75316420]  ;;  %3632 = vst.msk [vmem:[#allocation2 + $0x76] sm:$0x1] %vm388_vm0, %v3619_v42  ;;  %v4821_v8 = vrot.slane %v12761_v49, %v13947_v13  ;;  %v14542_v7 = vunpack.c.l.b16 %v4737_v44 }
  0x91   : > { %v4751_v45 = vrot.slane %v12756_v22, %v13947_v13  ;;  %v12759_v1 = vld.sshfl [vmem:[#allocation2 + $0x6c] sm:$0x1 pattern:$0x75316420]  ;;  %16256 = vst [vmem:[#allocation20_spill] sm:$0xff] %v14537_v38  ;;  %v3731_v5 = vshll.u32 %v3700_v55, 16  ;;  %v14547_v61 = vunpack.c.l.b16 %v4765_v16 }
  0x92   : > { %v4793_v29 = vrot.slane %v12759_v1, %v13947_v13  ;;  %3787 = vst.msk [vmem:[#allocation2 + $0x7c] sm:$0x1] %vm388_vm0, %v3767_v51  ;;  %v3858_v54 = vshrl.u32 %v3767_v51, 16  ;;  %v14549_v60 = vunpack.c.l.b16 %v4821_v8  ;;  %v5075_v22 = vrot.slane %v14537_v38, 1 }
  0x93   : > { %v12758_v4 = vld.sshfl [vmem:[#allocation2 + $0x6a] sm:$0x1 pattern:$0x75316420]  ;;  %v14545_v42 = vunpack.c.l.b16 %v4751_v45  ;;  %16257 = vst [vmem:[#allocation21_spill] sm:$0xff] %v14547_v61  ;;  %v3733_v49 = vsel %vm13962_vm15, %v3726_v58, %v3731_v5  ;;  %v5077_v16 = vrot.slane %v14542_v7, 7 }
  0x94   : > { %16258 = vst [vmem:[#allocation22_spill] sm:$0xff] %v14549_v60  ;;  %v12760_v19 = vld.sshfl [vmem:[#allocation2 + $0x6e] sm:$0x1 pattern:$0x75316420]  ;;  %v4779_v23 = vrot.slane %v12758_v4, %v13947_v13  ;;  %v14554_v40 = vunpack.c.l.b16 %v4793_v29  ;;  %v3865_v44 = vsel %vm13962_vm15, %v3858_v54, %v3863_v37  ;;  %v5076_v5 = vsel %vm4985_vm2, %v14540_v2, %v5075_v22 }
  0x95   : > { %3746 = vst.msk [vmem:[#allocation2 + $0x7a] sm:$0x1] %vm388_vm0, %v3733_v49  ;;  %v12762_v55 = vld.sshfl [vmem:[#allocation2 + $0x72] sm:$0x1 pattern:$0x75316420]  ;;  %v4807_v45 = vrot.slane %v12760_v19, %v13947_v13  ;;  %v5078_v49 = vsel %vm4988_vm4, %v5077_v16, %v5076_v5 }
  0x96   : > { %16259 = vst [vmem:[#allocation23_spill] sm:$0xff] %v14554_v40  ;;  %v5079_v51 = vrot.slane %v14545_v42, 6  ;;  %3878 = vst.msk [vmem:[#allocation2 + $0x7e] sm:$0x1] %vm388_vm0, %v3865_v44  ;;  %v4835_v1 = vrot.slane %v12762_v55, %v13947_v13  ;;  %v14565_v8 = vunpack.c.l.b16 %v4779_v23  ;;  %v5081_v29 = vrot.slane %v14547_v61, 5 }
  0x97   : > { %v12763_v58 = vld.sshfl [vmem:[#allocation2 + $0x74] sm:$0x1 pattern:$0x75316420]  ;;  %v14571_v4 = vunpack.c.l.b16 %v4807_v45  ;;  %v5085_v19 = vrot.slane %v14554_v40, 3 }
  0x98   : > { %v12764_v37 = vld.sshfl [vmem:[#allocation2 + $0x76] sm:$0x1 pattern:$0x75316420]  ;;  %v4849_v54 = vrot.slane %v12763_v58, %v13947_v13  ;;  %v14576_v55 = vunpack.c.l.b16 %v4835_v1  ;;  %v5080_v23 = vsel %vm4991_vm5, %v5079_v51, %v5078_v49  ;;  %v5083_v22 = vrot.slane %v14565_v8, 4 }
  0x99   : > { %v12765_v44 = vld.sshfl [vmem:[#allocation2 + $0x78] sm:$0x1 pattern:$0x75316420]  ;;  %v4863_v24 = vrot.slane %v12764_v37, %v13947_v13  ;;  %v5082_v45 = vsel %vm4994_vm7, %v5081_v29, %v5080_v23  ;;  %v5087_v58 = vrot.slane %v14571_v4, 2  ;;  %v5089_v1 = vrot.slane %v14549_v60, 1 }
  0x9a   : > { %v4877_v38 = vrot.slane %v12765_v44, %v13947_v13  ;;  %v14581_v61 = vunpack.c.l.b16 %v4849_v54  ;;  %v12767_v16 = vld.sshfl [vmem:[#allocation2 + $0x7c] sm:$0x1 pattern:$0x75316420]  ;;  %v5084_v40 = vsel %vm4997_vm9, %v5083_v22, %v5082_v45  ;;  %v16260_v51 = vrot.slane %v14032_v46, 7 }
  0x9b   : > { %v14585_v5 = vunpack.c.l.b16 %v4863_v24  ;;  %v4905_v49 = vrot.slane %v12767_v16, %v13947_v13  ;;  %v5086_v29 = vsel %vm5000_vm10, %v5085_v19, %v5084_v40  ;;  %v5090_v22 = vsel %vm4985_vm2, %v14576_v55, %v5089_v1 }
  0x9c   : > { %v5210_v37 = vsel %vm4985_vm2, %v16260_v51, %v14029_v43  ;;  %v14594_v54 = vunpack.c.l.b16 %v4877_v38  ;;  %v5091_v44 = vrot.slane %v14581_v61, 7  ;;  %v12766_v24 = vld.sshfl [vmem:[#allocation2 + $0x7a] sm:$0x1 pattern:$0x75316420]  ;;  %v5088_v23 = vsel %vm5003_vm11, %v5087_v58, %v5086_v29 }
  0x9d   : > { %v5093_v45 = vrot.slane %v14585_v5, 6  ;;  %v16261_v46 = vrot.slane %v14034_v47, 6  ;;  %v12768_v16 = vld.sshfl [vmem:[#allocation2 + $0x7e] sm:$0x1 pattern:$0x75316420]  ;;  %v4891_v38 = vrot.slane %v12766_v24, %v13947_v13  ;;  %v14606_v51 = vunpack.c.l.b16 %v4905_v49 }
  0x9e   : > { %v5092_v40 = vsel %vm4988_vm4, %v5091_v44, %v5090_v22  ;;  %v5095_v19 = vrot.slane %v14594_v54, 5  ;;  %v4919_v58 = vrot.slane %v12768_v16, %v13947_v13  ;;  %v16262_v1 = vrot.slane %v14042_v53, 5  ;;  %v12664_v24 = vld [vmem:[%s13937_s30 + $0x40] sm:$0x1] }
  0x9f   : > { %v5212_v43 = vsel %vm4988_vm4, %v16261_v46, %v5210_v37  ;;  %v5094_v29 = vsel %vm4991_vm5, %v5093_v45, %v5092_v40  ;;  %v16263_v47 = vrot.slane %v14068_v14, 7  ;;  %v14620_v49 = vunpack.c.l.b16 %v4891_v38  ;;  %3450 = vst.msk [vmem:[#allocation2 + $0x71] sm:$0x1] %vm388_vm0, %v12664_v24 }
  0xa0   : > { %v5214_v60 = vsel %vm4991_vm5, %v16262_v1, %v5212_v43  ;;  %v5096_v44 = vsel %vm4994_vm7, %v5095_v19, %v5094_v29  ;;  %v5099_v22 = vrot.slane %v14606_v51, 3  ;;  %v16264_v46 = vrot.slane %v14036_v48, 4 }
  0xa1   : > { %v5224_v37 = vsel %vm4985_vm2, %v16263_v47, %v14053_v62  ;;  %v14628_v53 = vunpack.c.l.b16 %v4919_v58  ;;  %v16265_v43 = vrot.slane %v14058_v3, 3  ;;  %v16266_v62 = vrot.slane %v14073_v18, 6 }
  0xa2   : > { %v5216_v45 = vsel %vm4994_vm7, %v16264_v46, %v5214_v60  ;;  %v16267_v38 = vrot.slane %v14197_v25, 7  ;;  %v5097_v48 = vrot.slane %v14620_v49, 4  ;;  %v16268_v60 = vrot.slane %v14046_v56, 2 }
  0xa3   : > { %v5218_v14 = vsel %vm4997_vm9, %v16265_v43, %v5216_v45  ;;  %v5226_v16 = vsel %vm4988_vm4, %v16266_v62, %v5224_v37  ;;  %v16269_v58 = vrot.slane %v14081_v27, 5  ;;  %v16270_v29 = vrot.slane %v14199_v26, 6 }
  0xa4   : > { %v5238_v40 = vsel %vm4985_vm2, %v16267_v38, %v14195_v11  ;;  %v5220_v19 = vsel %vm5000_vm10, %v16268_v60, %v5218_v14  ;;  %v5101_v1 = vrot.slane %v14628_v53, 2  ;;  %v16271_v25 = vrot.slane %v14064_v9, 1 }
  0xa5   : > { %v5228_v3 = vsel %vm4991_vm5, %v16269_v58, %v5226_v16  ;;  %v5240_v18 = vsel %vm4988_vm4, %v16270_v29, %v5238_v40  ;;  %v16272_v47 = vrot.slane %v14076_v21, 4  ;;  %v16273_v37 = vrot.slane %v14205_v33, 5 }
  0xa6   : > { %v5222_v11 = vsel %vm5003_vm11, %v16271_v25, %v5220_v19  ;;  %v5098_v24 = vsel %vm4997_vm9, %v5097_v48, %v5096_v44  ;;  %v16274_v26 = vrot.slane %v14094_v39, 3  ;;  %v16275_v45 = vrot.slane %v14201_v28, 4  ;;  %v16288_v25 = vld [vmem:[#allocation10_spill] sm:$0xff] }
  0xa7   : > { %v5230_v56 = vsel %vm4994_vm7, %v16272_v47, %v5228_v3  ;;  %v5242_v27 = vsel %vm4991_vm5, %v16273_v37, %v5240_v18  ;;  %v16276_v43 = vrot.slane %v14229_v10, 7  ;;  %v5100_v14 = vsel %vm5000_vm10, %v5099_v22, %v5098_v24  ;;  %v16292_v24 = vld [vmem:[#allocation15_spill] sm:$0xff] }
  0xa8   : > { %v5232_v46 = vsel %vm4997_vm9, %v16274_v26, %v5230_v56  ;;  %v5244_v9 = vsel %vm4994_vm7, %v16275_v45, %v5242_v27  ;;  %v16277_v33 = vrot.slane %v14088_v34, 2  ;;  %v16278_v44 = vrot.slane %v14218_v52, 3  ;;  %v16291_v27 = vld [vmem:[#allocation12_spill] sm:$0xff] }
  0xa9   : > { %v5252_v21 = vsel %vm4985_vm2, %v16276_v43, %v14207_v36  ;;  %v16279_v16 = vrot.slane %v14239_v41, 6  ;;  %v5102_v38 = vsel %vm5003_vm11, %v5101_v1, %v5100_v14  ;;  %v16280_v10 = vrot.slane %v14102_v50, 1  ;;  %v16294_v45 = vld [vmem:[#allocation16_spill] sm:$0xff]  ;;  %v16295_v43 = vld [vmem:[#allocation17_spill] sm:$0xff] }
  0xaa   : > { %v5234_v62 = vsel %vm5000_vm10, %v16277_v33, %v5232_v46  ;;  %v5246_v39 = vsel %vm4997_vm9, %v16278_v44, %v5244_v9  ;;  %v16281_v22 = vrot.slane %v14223_v63, 2  ;;  %v16282_v40 = vrot.slane %v14244_v57, 5  ;;  %v16293_v46 = vld [vmem:[#allocation11_spill] sm:$0xff] }
  0xab   : > { %v5254_v28 = vsel %vm4988_vm4, %v16279_v16, %v5252_v21  ;;  %v5236_v36 = vsel %vm5003_vm11, %v16280_v10, %v5234_v62  ;;  %v5106_v48 = vpack.c.b16 %v5102_v38, %v5088_v23  ;;  %v16283_v41 = vrot.slane %v14234_v32, 1  ;;  %v16296_v62 = vld [vmem:[#allocation18_spill] sm:$0xff] }
  0xac   : > { %v5248_v34 = vsel %vm5000_vm10, %v16281_v22, %v5246_v39  ;;  %v5256_v52 = vsel %vm4991_vm5, %v16282_v40, %v5254_v28  ;;  %v5321_v60 = vpack.c.b16 %v5236_v36, %v5222_v11  ;;  %v16284_v58 = vrot.slane %v14250_v17, 4  ;;  %v16289_v11 = vld [vmem:[#allocation13_spill] sm:$0xff]  ;;  %v16297_v39 = vld [vmem:[#allocation19_spill] sm:$0xff] }
  0xad   : > { %v5250_v19 = vsel %vm5003_vm11, %v16283_v41, %v5248_v34  ;;  %v16285_v3 = vrot.slane %v14267_v20, 3  ;;  %v5265_v29 = vrot.slane %v14381_v30, 7  ;;  %v5267_v57 = vrot.slane %v14388_v6, 6  ;;  %13390 = vmatmul.mubr.msk.bf16.gmra.mxu1 %vm16237_vm12, %v5106_v48  ;;  %v13700_v22 = vld [vmem:[%s16200_s1 + $0x50] sm:$0xff]   ;;  %v16298_v48 = vld [vmem:[#allocation21_spill] sm:$0xff] }
  0xae   : > { %v5258_v50 = vsel %vm4994_vm7, %v16284_v58, %v5256_v52  ;;  %v5269_v18 = vrot.slane %v14390_v31, 5  ;;  %v16286_v32 = vrot.slane %v14259_v35, 2  ;;  %v5271_v17 = vrot.slane %v14394_v59, 4  ;;  %13401 = vmatprep.mubr.msk.bf16.mxu1 %vm16237_vm12, %v5321_v60  ;;  %v16290_v35 = vld [vmem:[#allocation14_spill] sm:$0xff] }
  0xaf   : > { %v5260_v63 = vsel %vm4997_vm9, %v16285_v3, %v5258_v50  ;;  %v5273_v1 = vrot.slane %v14420_v0, 3  ;;  %v5275_v20 = vrot.slane %v14406_v12, 2  ;;  %v16287_v30 = vrot.slane %v14274_v15, 1 }
  0xb0   : > { %v5262_v23 = vsel %vm5000_vm10, %v16286_v32, %v5260_v63  ;;  %v5266_v31 = vsel %vm4985_vm2, %v5265_v29, %v16288_v25  ;;  %v5277_v47 = vrot.slane %v16289_v11, 1  ;;  %v5279_v56 = vrot.slane %v16290_v35, 7  ;;  %v16300_v63 = vld [vmem:[#allocation23_spill] sm:$0xff]  ;;  %v16302_v11 = vld [vmem:[#allocation22_spill] sm:$0xff] }
  0xb1   : > { %v5264_v6 = vsel %vm5003_vm11, %v16287_v30, %v5262_v23  ;;  %v5268_v59 = vsel %vm4988_vm4, %v5267_v57, %v5266_v31  ;;  %v5281_v0 = vrot.slane %v16291_v27, 6  ;;  %v5283_v12 = vrot.slane %v16292_v24, 5  ;;  %v12392_v25 = vld.sshfl [vmem:[%s13937_s30 + $0x8] sm:$0x10 pattern:$0x75316420] }
  0xb2   : > { %v5322_v37 = vpack.c.b16 %v5264_v6, %v5250_v19  ;;  %v5270_v26 = vsel %vm4991_vm5, %v5269_v18, %v5268_v59  ;;  %v5280_v15 = vsel %vm4985_vm2, %v5279_v56, %v16293_v46  ;;  %v5285_v9 = vrot.slane %v16294_v45, 4  ;;  %v16301_v18 = vld [vmem:[#allocation9_spill] sm:$0xff] }
  0xb3   : > { %v5287_v21 = vrot.slane %v16295_v43, 3  ;;  %v5272_v14 = vsel %vm4994_vm7, %v5271_v17, %v5270_v26  ;;  %v5282_v33 = vsel %vm4988_vm4, %v5281_v0, %v5280_v15  ;;  %v5289_v44 = vrot.slane %v16296_v62, 2  ;;  %v12394_v35 = vld.sshfl [vmem:[%s13937_s30 + $0x8] sm:$0x12 pattern:$0x75316420] }
  0xb4   : > { %v5291_v16 = vrot.slane %v16297_v39, 1  ;;  %v5274_v28 = vsel %vm4997_vm9, %v5273_v1, %v5272_v14  ;;  %v5284_v38 = vsel %vm4991_vm5, %v5283_v12, %v5282_v33  ;;  %v5293_v10 = vrot.slane %v14540_v2, 7  ;;  %v16299_v2 = vld [vmem:[#allocation20_spill] sm:$0xff] }
  0xb5   : > { %v5295_v36 = vrot.slane %v14542_v7, 6  ;;  %v5276_v34 = vsel %vm5000_vm10, %v5275_v20, %v5274_v28  ;;  %v5286_v40 = vsel %vm4994_vm7, %v5285_v9, %v5284_v38  ;;  %v5297_v52 = vrot.slane %v14545_v42, 5  ;;  %13402 = vmatmul.mubr.msk.bf16.vlgmr.msra.gmra.mxu1 %vm16237_vm12, %v5322_v37  ;;  %v13701_v42 = vld [vmem:[%s16200_s1 + $0x48] sm:$0xff]   ;;  %v13702_v37 = vld [vmem:[%s16200_s1 + $0x40] sm:$0xff]  }
  0xb6   : > { %v5299_v60 = vrot.slane %v16298_v48, 4  ;;  %v5278_v41 = vsel %vm5003_vm11, %v5277_v47, %v5276_v34  ;;  %v5288_v19 = vsel %vm4997_vm9, %v5287_v21, %v5286_v40  ;;  %v5294_v7 = vsel %vm4985_vm2, %v5293_v10, %v16299_v2  ;;  %13410 = vmatpush3.bf16.msra.mxu1 %v16301_v18  ;;  %v12388_v1 = vld.sshfl [vmem:[%s13937_s30 + $0x8] sm:$0x11 pattern:$0x75316420] }
  0xb7   : > { %v5301_v58 = vrot.slane %v14565_v8, 3  ;;  %v5290_v50 = vsel %vm5000_vm10, %v5289_v44, %v5288_v19  ;;  %v5296_v3 = vsel %vm4988_vm4, %v5295_v36, %v5294_v7  ;;  %v5303_v29 = vrot.slane %v16300_v63, 2  ;;  %13411 = vmatprep.subr.bf16.mxu1 %v13700_v22  ;;  %v12398_v27 = vld.sshfl [vmem:[%s13937_s30 + $0x8] sm:$0x2 pattern:$0x75316420] }
  0xb8   : > { %v5305_v57 = vrot.slane %v14571_v4, 1  ;;  %v5292_v8 = vsel %vm5003_vm11, %v5291_v16, %v5290_v50  ;;  %v5298_v32 = vsel %vm4991_vm5, %v5297_v52, %v5296_v3  ;;  %v5307_v23 = vrot.slane %v14576_v55, 7  ;;  %v12400_v12 = vld.sshfl [vmem:[%s13937_s30 + $0x8] sm:$0x22 pattern:$0x75316420] }
  0xb9   : > { %v5309_v17 = vrot.slane %v14581_v61, 6  ;;  %v5323_v20 = vpack.c.b16 %v5292_v8, %v5278_v41  ;;  %v5300_v30 = vsel %vm4994_vm7, %v5299_v60, %v5298_v32  ;;  %v5311_v6 = vrot.slane %v14585_v5, 5  ;;  %v12404_v45 = vld.sshfl [vmem:[%s13937_s30 + $0x8] sm:$0x20 pattern:$0x75316420] }
  0xba   : > { %v5313_v4 = vrot.slane %v14594_v54, 4  ;;  %v5302_v31 = vsel %vm4997_vm9, %v5301_v58, %v5300_v30  ;;  %v5308_v47 = vsel %vm4985_vm2, %v5307_v23, %v16302_v11  ;;  %v5315_v55 = vrot.slane %v14620_v49, 3  ;;  %13412 = vmatpush3.bf16.msra.mxu1 %v13700_v22  ;;  %v12408_v33 = vld.sshfl [vmem:[%s13937_s30 + $0xc] sm:$0x1 pattern:$0x75316420] }
  0xbb   : > { %v5317_v61 = vrot.slane %v14606_v51, 2  ;;  %13405 = vmatprep.mubr.msk.bf16.mxu1 %vm16237_vm12, %v5323_v20  ;;  %v5304_v56 = vsel %vm5000_vm10, %v5303_v29, %v5302_v31  ;;  %v5310_v5 = vsel %vm4988_vm4, %v5309_v17, %v5308_v47  ;;  %v5319_v54 = vrot.slane %v14628_v53, 1  ;;  %13413 = vmatprep.subr.bf16.mxu1 %v13701_v42  ;;  %v12416_v28 = vld.sshfl [vmem:[%s13937_s30 + $0x10] sm:$0x11 pattern:$0x75316420] }
  0xbc   : > { %v424_v59 = vcombine.high %v12388_v1, %v12388_v1  ;;  %v5306_v51 = vsel %vm5003_vm11, %v5305_v57, %v5304_v56  ;;  %v5312_v49 = vsel %vm4991_vm5, %v5311_v6, %v5310_v5  ;;  %v431_v0 = vrot.slane %v12388_v1, %v13947_v13  ;;  %v12422_v34 = vld.sshfl [vmem:[%s13937_s30 + $0x10] sm:$0x10 pattern:$0x75316420]  ;;  %v14802_v19 = vld [vmem:[%s16200_s1 + $0x78] sm:$0xff]  }
  0xbd   : > { %v503_v24 = vcombine.high %v12392_v25, %v12392_v25  ;;  %v5314_v53 = vsel %vm4994_vm7, %v5313_v4, %v5312_v49  ;;  %v550_v46 = vcombine.high %v12394_v35, %v12394_v35  ;;  %v557_v15 = vrot.slane %v12394_v35, %v13947_v13  ;;  %v12432_v18 = vld.sshfl [vmem:[%s13937_s30 + $0x10] sm:$0x2 pattern:$0x75316420] }
  0xbe   : > { %v438_v26 = vrot.slane %v424_v59, %v13947_v13  ;;  %v5316_v9 = vsel %vm4997_vm9, %v5315_v55, %v5314_v53  ;;  %v464_v43 = vshrl.u32 %v431_v0, 16  ;;  %v621_v14 = vrot.slane %v12398_v27, %v13947_v13  ;;  %13414 = vmatpush3.bf16.msra.mxu1 %v13701_v42  ;;  %v12426_v42 = vld.sshfl [vmem:[%s13937_s30 + $0x10] sm:$0x12 pattern:$0x75316420] }
  0xbf   : > { %v510_v21 = vrot.slane %v503_v24, %v13947_v13  ;;  %v5318_v62 = vsel %vm5000_vm10, %v5317_v61, %v5316_v9  ;;  %v564_v39 = vrot.slane %v550_v46, %v13947_v13  ;;  %v565_v16 = vcombine.high %v557_v15, %v557_v15  ;;  %13415 = vmatprep.subr.bf16.mxu1 %v13702_v37  ;;  %v12436_v1 = vld.sshfl [vmem:[%s13937_s30 + $0x10] sm:$0x22 pattern:$0x75316420] }
  0xc0   : > { %v469_v44 = vshll.u32 %v438_v26, 16  ;;  %v5320_v38 = vsel %vm5003_vm11, %v5319_v54, %v5318_v62  ;;  %v622_v10 = vcombine.high %v621_v14, %v621_v14  ;;  %v663_v36 = vcombine.high %v12400_v12, %v12400_v12  ;;  %v12442_v25 = vld.sshfl [vmem:[%s13937_s30 + $0x10] sm:$0x20 pattern:$0x75316420] }
  0xc1   : > { %515 = vst.msk [vmem:[#allocation2 + $0x5] sm:$0x1] %vm388_vm0, %v510_v21  ;;  %v670_v22 = vrot.slane %v12400_v12, %v13947_v13  ;;  %v5324_v40 = vpack.c.b16 %v5320_v38, %v5306_v51  ;;  %v576_v60 = vshrl.u32 %v564_v39, 16  ;;  %v581_v41 = vshll.u32 %v565_v16, 16 }
  0xc2   : > { %v471_v48 = vsel %vm13962_vm15, %v464_v43, %v469_v44  ;;  %627 = vst.msk [vmem:[#allocation2 + $0x9] sm:$0x1] %vm388_vm0, %v622_v10  ;;  %v677_v2 = vrot.slane %v663_v36, %v13947_v13  ;;  %v730_v58 = vcombine.high %v12404_v45, %v12404_v45  ;;  %v811_v50 = vrot.slane %v12408_v33, %v13947_v13  ;;  %v12450_v61 = vld.sshfl [vmem:[%s13937_s30 + $0x14] sm:$0x1 pattern:$0x75316420] }
  0xc3   : > { %476 = vst.msk [vmem:[#allocation2 + $0x3] sm:$0x1] %vm388_vm0, %v471_v48  ;;  %v678_v7 = vcombine.high %v670_v22, %v670_v22  ;;  %13406 = vmatmul.mubr.msk.bf16.gmra.mxu1 %vm16237_vm12, %v5324_v40  ;;  %v583_v3 = vsel %vm13962_vm15, %v576_v60, %v581_v41  ;;  %v874_v63 = vcombine.high %v12416_v28, %v12416_v28  ;;  %v12793_v24 = vld.sshfl [vmem:[#allocation2 + $0x11] sm:$0x1 pattern:$0x75316420] }
  0xc4   : > { %v881_v29 = vrot.slane %v12416_v28, %v13947_v13  ;;  %v938_v57 = vcombine.high %v12422_v34, %v12422_v34  ;;  %13416 = vmatpush3.bf16.msra.mxu1 %v13702_v37  ;;  %588 = vst.msk [vmem:[#allocation2 + $0x7] sm:$0x1] %vm388_vm0, %v583_v3  ;;  %v679_v8 = vcombine.high %v677_v2, %v677_v2  ;;  %v827_v17 = vshll.u32 %v811_v50, 16 }
  0xc5   : > { %v690_v32 = vshrl.u32 %v678_v7, 16  ;;  %v737_v23 = vrot.slane %v730_v58, %v13947_v13  ;;  %v888_v20 = vrot.slane %v874_v63, %v13947_v13  ;;  %v985_v4 = vcombine.high %v12426_v42, %v12426_v42  ;;  %13425 = vmatprep.subr.bf16.mxu1 %v14802_v19  ;;  %v12785_v37 = vld.sshfl [vmem:[#allocation2 + $0x1] sm:$0x1 pattern:$0x75316420] }
  0xc6   : > { %v899_v30 = vshrl.u32 %v881_v29, 16  ;;  %v945_v6 = vrot.slane %v938_v57, %v13947_v13  ;;  %v695_v31 = vshll.u32 %v679_v8, 16  ;;  %v992_v47 = vrot.slane %v12426_v42, %v13947_v13 }
  0xc7   : > { %v738_v11 = vcombine.high %v737_v23, %v737_v23  ;;  %v1056_v55 = vrot.slane %v12432_v18, %v13947_v13  ;;  %v904_v35 = vshll.u32 %v888_v20, 16  ;;  %v999_v56 = vrot.slane %v985_v4, %v13947_v13  ;;  %v12458_v4 = vld.sshfl [vmem:[%s13937_s30 + $0x18] sm:$0x11 pattern:$0x75316420] }
  0xc8   : > { %950 = vst.msk [vmem:[#allocation2 + $0x15] sm:$0x1] %vm388_vm0, %v945_v6  ;;  %v1098_v5 = vcombine.high %v12436_v1, %v12436_v1  ;;  %v1105_v54 = vrot.slane %v12436_v1, %v13947_v13  ;;  %v697_v59 = vsel %vm13962_vm15, %v690_v32, %v695_v31  ;;  %v1000_v51 = vcombine.high %v992_v47, %v992_v47  ;;  %v12787_v0 = vld.sshfl [vmem:[#allocation2 + $0x5] sm:$0x1 pattern:$0x75316420] }
  0xc9   : > { %743 = vst.msk [vmem:[#allocation2 + $0xd] sm:$0x1] %vm388_vm0, %v738_v11  ;;  %v822_v27 = vshrl.u32 %v738_v11, 16  ;;  %v1057_v49 = vcombine.high %v1056_v55, %v1056_v55  ;;  %702 = vst.msk [vmem:[#allocation2 + $0xb] sm:$0x1] %vm388_vm0, %v697_v59  ;;  %v906_v12 = vsel %vm13962_vm15, %v899_v30, %v904_v35  ;;  %v1011_v53 = vshrl.u32 %v999_v56, 16 }
  0xca   : > { %v1112_v26 = vrot.slane %v1098_v5, %v13947_v13  ;;  %v1113_v46 = vcombine.high %v1105_v54, %v1105_v54  ;;  %v12786_v15 = vld.sshfl [vmem:[#allocation2 + $0x3] sm:$0x1 pattern:$0x75316420]  ;;  %911 = vst.msk [vmem:[#allocation2 + $0x13] sm:$0x1] %vm388_vm0, %v906_v12  ;;  %v1165_v43 = vcombine.high %v12442_v25, %v12442_v25  ;;  %v1246_v21 = vrot.slane %v12450_v61, %v13947_v13 }
  0xcb   : > { %v829_v45 = vsel %vm13962_vm15, %v822_v27, %v827_v17  ;;  %v1016_v9 = vshll.u32 %v1000_v51, 16  ;;  %1062 = vst.msk [vmem:[#allocation2 + $0x19] sm:$0x1] %vm388_vm0, %v1057_v49  ;;  %v5576_v39 = vrot.slane %v12785_v37, %v13947_v13  ;;  %v5590_v16 = vrot.slane %v12786_v15, %v13947_v13 }
  0xcc   : > { %v12789_v14 = vld.sshfl [vmem:[#allocation2 + $0x9] sm:$0x1 pattern:$0x75316420]  ;;  %834 = vst.msk [vmem:[#allocation2 + $0xf] sm:$0x1] %vm388_vm0, %v829_v45  ;;  %v1114_v33 = vcombine.high %v1112_v26, %v1112_v26  ;;  %v1172_v38 = vrot.slane %v1165_v43, %v13947_v13  ;;  %v5604_v36 = vrot.slane %v12787_v0, %v13947_v13  ;;  %v5688_v48 = vrot.slane %v12793_v24, %v13947_v13 }
  0xcd   : > { %v1125_v62 = vshrl.u32 %v1113_v46, 16  ;;  %v12788_v44 = vld.sshfl [vmem:[#allocation2 + $0x7] sm:$0x1 pattern:$0x75316420]  ;;  %v1018_v28 = vsel %vm13962_vm15, %v1011_v53, %v1016_v9  ;;  %v1262_v10 = vshll.u32 %v1246_v21, 16  ;;  %v5632_v40 = vrot.slane %v12789_v14, %v13947_v13 }
  0xce   : > { %1023 = vst.msk [vmem:[#allocation2 + $0x17] sm:$0x1] %vm388_vm0, %v1018_v28  ;;  %v1130_v22 = vshll.u32 %v1114_v33, 16  ;;  %v5618_v34 = vrot.slane %v12788_v44, %v13947_v13  ;;  %v1173_v60 = vcombine.high %v1172_v38, %v1172_v38  ;;  %v6459_v2 = vunpack.c.l.b16 %v5576_v39 }
  0xcf   : > { %v12795_v41 = vld.sshfl [vmem:[#allocation2 + $0x15] sm:$0x1 pattern:$0x75316420]  ;;  %v6460_v7 = vunpack.c.l.b16 %v5590_v16  ;;  %v6461_v58 = vunpack.c.l.b16 %v5604_v36  ;;  %v6463_v29 = vunpack.c.l.b16 %v5632_v40  ;;  %v6467_v32 = vunpack.c.l.b16 %v5688_v48 }
  0xd0   : > { %v1132_v50 = vsel %vm13962_vm15, %v1125_v62, %v1130_v22  ;;  %v12791_v42 = vld.sshfl [vmem:[#allocation2 + $0xd] sm:$0x1 pattern:$0x75316420]  ;;  %v5716_v3 = vrot.slane %v12795_v41, %v13947_v13  ;;  %v6462_v63 = vunpack.c.l.b16 %v5618_v34  ;;  %1178 = vst.msk [vmem:[#allocation2 + $0x1d] sm:$0x1] %vm388_vm0, %v1173_v60  ;;  %v1309_v9 = vcombine.high %v12458_v4, %v12458_v4 }
  0xd1   : > { %1137 = vst.msk [vmem:[#allocation2 + $0x1b] sm:$0x1] %vm388_vm0, %v1132_v50  ;;  %v1257_v57 = vshrl.u32 %v1173_v60, 16  ;;  %v5660_v8 = vrot.slane %v12791_v42, %v13947_v13  ;;  %v6523_v23 = vrot.slane %v6460_v7, 7  ;;  %v6525_v30 = vrot.slane %v6461_v58, 6 }
  0xd2   : > { %v12790_v18 = vld.sshfl [vmem:[#allocation2 + $0xb] sm:$0x1 pattern:$0x75316420]  ;;  %v6469_v20 = vunpack.c.l.b16 %v5716_v3  ;;  %v6527_v6 = vrot.slane %v6462_v63, 5  ;;  %v6529_v54 = vrot.slane %v6463_v29, 4  ;;  %v1316_v44 = vrot.slane %v12458_v4, %v13947_v13 }
  0xd3   : > { %v12794_v17 = vld.sshfl [vmem:[#allocation2 + $0x13] sm:$0x1 pattern:$0x75316420]  ;;  %v5646_v1 = vrot.slane %v12790_v18, %v13947_v13  ;;  %v1264_v25 = vsel %vm13962_vm15, %v1257_v57, %v1262_v10  ;;  %v6465_v47 = vunpack.c.l.b16 %v5660_v8  ;;  %v6524_v55 = vsel %vm4985_vm2, %v6523_v23, %v6459_v2 }
  0xd4   : > { %v12792_v31 = vld.sshfl [vmem:[#allocation2 + $0xf] sm:$0x1 pattern:$0x75316420]  ;;  %v5702_v11 = vrot.slane %v12794_v17, %v13947_v13  ;;  %1269 = vst.msk [vmem:[#allocation2 + $0x1f] sm:$0x1] %vm388_vm0, %v1264_v25  ;;  %v6526_v5 = vsel %vm4988_vm4, %v6525_v30, %v6524_v55  ;;  %v1323_v2 = vrot.slane %v1309_v9, %v13947_v13 }
  0xd5   : > { %v12797_v61 = vld.sshfl [vmem:[#allocation2 + $0x19] sm:$0x1 pattern:$0x75316420]  ;;  %v5674_v35 = vrot.slane %v12792_v31, %v13947_v13  ;;  %v6464_v56 = vunpack.c.l.b16 %v5646_v1  ;;  %v6528_v51 = vsel %vm4991_vm5, %v6527_v6, %v6526_v5  ;;  %v6533_v49 = vrot.slane %v6465_v47, 2 }
  0xd6   : > { %v12796_v37 = vld.sshfl [vmem:[#allocation2 + $0x17] sm:$0x1 pattern:$0x75316420]  ;;  %v5744_v59 = vrot.slane %v12797_v61, %v13947_v13  ;;  %v6468_v27 = vunpack.c.l.b16 %v5702_v11  ;;  %v6530_v12 = vsel %vm4994_vm7, %v6529_v54, %v6528_v51  ;;  %v6539_v45 = vrot.slane %v6469_v20, 6 }
  0xd7   : > { %v5730_v0 = vrot.slane %v12796_v37, %v13947_v13  ;;  %v6466_v24 = vunpack.c.l.b16 %v5674_v35  ;;  %v6531_v53 = vrot.slane %v6464_v56, 3  ;;  %v12464_v26 = vld.sshfl [vmem:[%s13937_s30 + $0x18] sm:$0x10 pattern:$0x75316420]  ;;  %v1334_v7 = vshrl.u32 %v1316_v44, 16 }
  0xd8   : > { %v6471_v46 = vunpack.c.l.b16 %v5744_v59  ;;  %v6537_v15 = vrot.slane %v6468_v27, 7  ;;  %v12468_v43 = vld.sshfl [vmem:[%s13937_s30 + $0x18] sm:$0x12 pattern:$0x75316420]  ;;  %v1373_v58 = vcombine.high %v12464_v26, %v12464_v26  ;;  %v1339_v8 = vshll.u32 %v1323_v2, 16 }
  0xd9   : > { %v12798_v21 = vld.sshfl [vmem:[#allocation2 + $0x1b] sm:$0x1 pattern:$0x75316420]  ;;  %v6470_v14 = vunpack.c.l.b16 %v5730_v0  ;;  %v6532_v33 = vsel %vm4997_vm9, %v6531_v53, %v6530_v12  ;;  %v6535_v62 = vrot.slane %v6466_v24, 1  ;;  %v1420_v63 = vcombine.high %v12468_v43, %v12468_v43 }
  0xda   : > { %v12799_v39 = vld.sshfl [vmem:[#allocation2 + $0x1d] sm:$0x1 pattern:$0x75316420]  ;;  %v5758_v16 = vrot.slane %v12798_v21, %v13947_v13  ;;  %v6534_v28 = vsel %vm5000_vm10, %v6533_v49, %v6532_v33  ;;  %v6538_v38 = vsel %vm4985_vm2, %v6537_v15, %v6467_v32  ;;  %v6543_v10 = vrot.slane %v6471_v46, 4 }
  0xdb   : > { %v5772_v36 = vrot.slane %v12799_v39, %v13947_v13  ;;  %v6536_v22 = vsel %vm5003_vm11, %v6535_v62, %v6534_v28  ;;  %v6540_v34 = vsel %vm4988_vm4, %v6539_v45, %v6538_v38  ;;  %v6541_v40 = vrot.slane %v6470_v14, 5  ;;  %v12474_v48 = vld.sshfl [vmem:[%s13937_s30 + $0x18] sm:$0x2 pattern:$0x75316420] }
  0xdc   : > { %v12800_v60 = vld.sshfl [vmem:[#allocation2 + $0x1f] sm:$0x1 pattern:$0x75316420]  ;;  %v6472_v41 = vunpack.c.l.b16 %v5758_v16  ;;  %v1380_v32 = vrot.slane %v1373_v58, %v13947_v13  ;;  %v1427_v20 = vrot.slane %v12468_v43, %v13947_v13  ;;  %v1434_v30 = vrot.slane %v1420_v63, %v13947_v13 }
  0xdd   : > { %v5786_v50 = vrot.slane %v12800_v60, %v13947_v13  ;;  %v6473_v42 = vunpack.c.l.b16 %v5772_v36  ;;  %v6542_v3 = vsel %vm4991_vm5, %v6541_v40, %v6540_v34  ;;  %v12478_v29 = vld.sshfl [vmem:[%s13937_s30 + $0x18] sm:$0x22 pattern:$0x75316420]  ;;  %v1341_v25 = vsel %vm13962_vm15, %v1334_v7, %v1339_v8 }
  0xde   : > { %v6544_v57 = vsel %vm4994_vm7, %v6543_v10, %v6542_v3  ;;  %v6545_v18 = vrot.slane %v6472_v41, 3  ;;  %v12484_v23 = vld.sshfl [vmem:[%s13937_s30 + $0x18] sm:$0x20 pattern:$0x75316420]  ;;  %v1491_v31 = vrot.slane %v12474_v48, %v13947_v13  ;;  %v1533_v11 = vcombine.high %v12478_v29, %v12478_v29 }
  0xdf   : > { %v6474_v17 = vunpack.c.l.b16 %v5786_v50  ;;  %v6547_v1 = vrot.slane %v6473_v42, 2  ;;  %v12492_v6 = vld.sshfl [vmem:[%s13937_s30 + $0x1c] sm:$0x1 pattern:$0x75316420]  ;;  %v1435_v35 = vcombine.high %v1427_v20, %v1427_v20  ;;  %v1446_v56 = vshrl.u32 %v1434_v30, 16 }
  0xe0   : > { %v6546_v4 = vsel %vm4997_vm9, %v6545_v18, %v6544_v57  ;;  %1385 = vst.msk [vmem:[#allocation2 + $0x25] sm:$0x1] %vm388_vm0, %v1380_v32  ;;  %v12500_v47 = vld.sshfl [vmem:[%s13937_s30 + $0x20] sm:$0x11 pattern:$0x75316420]  ;;  %v1492_v5 = vcombine.high %v1491_v31, %v1491_v31  ;;  %v1540_v54 = vrot.slane %v12478_v29, %v13947_v13  ;;  %v1547_v37 = vrot.slane %v1533_v11, %v13947_v13 }
  0xe1   : > { %v6548_v55 = vsel %vm5000_vm10, %v6547_v1, %v6546_v4  ;;  %v6549_v61 = vrot.slane %v6474_v17, 1  ;;  %1346 = vst.msk [vmem:[#allocation2 + $0x23] sm:$0x1] %vm388_vm0, %v1341_v25  ;;  %v1600_v59 = vcombine.high %v12484_v23, %v12484_v23  ;;  %v1451_v49 = vshll.u32 %v1435_v35, 16 }
  0xe2   : > { %v12506_v27 = vld.sshfl [vmem:[%s13937_s30 + $0x20] sm:$0x10 pattern:$0x75316420]  ;;  %v1681_v0 = vrot.slane %v12492_v6, %v13947_v13  ;;  %v1744_v24 = vcombine.high %v12500_v47, %v12500_v47  ;;  %1497 = vst.msk [vmem:[#allocation2 + $0x29] sm:$0x1] %vm388_vm0, %v1492_v5  ;;  %v1548_v26 = vcombine.high %v1540_v54, %v1540_v54  ;;  %v1549_v46 = vcombine.high %v1547_v37, %v1547_v37 }
  0xe3   : > { %v6550_v51 = vsel %vm5003_vm11, %v6549_v61, %v6548_v55  ;;  %v12510_v12 = vld.sshfl [vmem:[%s13937_s30 + $0x20] sm:$0x12 pattern:$0x75316420]  ;;  %v1607_v15 = vrot.slane %v1600_v59, %v13947_v13  ;;  %v1453_v9 = vsel %vm13962_vm15, %v1446_v56, %v1451_v49  ;;  %v1751_v21 = vrot.slane %v12500_v47, %v13947_v13 }
  0xe4   : > { %v6635_v53 = vpack.c.b16 %v6550_v51, %v6536_v22  ;;  %v12516_v45 = vld.sshfl [vmem:[%s13937_s30 + $0x20] sm:$0x2 pattern:$0x75316420]  ;;  %v1697_v43 = vshll.u32 %v1681_v0, 16  ;;  %v1758_v14 = vrot.slane %v1744_v24, %v13947_v13  ;;  %v1560_v62 = vshrl.u32 %v1548_v26, 16 }
  0xe5   : > { %v12520_v33 = vld.sshfl [vmem:[%s13937_s30 + $0x20] sm:$0x22 pattern:$0x75316420]  ;;  %1458 = vst.msk [vmem:[#allocation2 + $0x27] sm:$0x1] %vm388_vm0, %v1453_v9  ;;  %v1608_v39 = vcombine.high %v1607_v15, %v1607_v15  ;;  %v1808_v16 = vcombine.high %v12506_v27, %v12506_v27  ;;  %v1855_v36 = vcombine.high %v12510_v12, %v12510_v12  ;;  %v1862_v22 = vrot.slane %v12510_v12, %v13947_v13 }
  0xe6   : > { %13417 = vmatprep.mubr.msk.bf16.mxu1 %vm16237_vm12, %v6635_v53  ;;  %v1565_v44 = vshll.u32 %v1549_v46, 16  ;;  %v12526_v28 = vld.sshfl [vmem:[%s13937_s30 + $0x20] sm:$0x20 pattern:$0x75316420]  ;;  %v1769_v38 = vshrl.u32 %v1751_v21, 16  ;;  %v1926_v41 = vrot.slane %v12516_v45, %v13947_v13  ;;  %v1968_v42 = vcombine.high %v12520_v33, %v12520_v33 }
  0xe7   : > { %v1774_v10 = vshll.u32 %v1758_v14, 16  ;;  %v12534_v34 = vld.sshfl [vmem:[%s13937_s30 + $0x24] sm:$0x1 pattern:$0x75316420]  ;;  %v1692_v48 = vshrl.u32 %v1608_v39, 16  ;;  %v1815_v60 = vrot.slane %v1808_v16, %v13947_v13  ;;  %v1869_v58 = vrot.slane %v1855_v36, %v13947_v13 }
  0xe8   : > { %v1567_v40 = vsel %vm13962_vm15, %v1560_v62, %v1565_v44  ;;  %1613 = vst.msk [vmem:[#allocation2 + $0x2d] sm:$0x1] %vm388_vm0, %v1608_v39  ;;  %v12801_v2 = vld.sshfl [vmem:[#allocation2 + $0x21] sm:$0x1 pattern:$0x75316420]  ;;  %v1870_v50 = vcombine.high %v1862_v22, %v1862_v22  ;;  %v1927_v29 = vcombine.high %v1926_v41, %v1926_v41  ;;  %v1975_v57 = vrot.slane %v12520_v33, %v13947_v13 }
  0xe9   : > { %1572 = vst.msk [vmem:[#allocation2 + $0x2b] sm:$0x1] %vm388_vm0, %v1567_v40  ;;  %v1776_v7 = vsel %vm13962_vm15, %v1769_v38, %v1774_v10  ;;  %v12802_v3 = vld.sshfl [vmem:[#allocation2 + $0x23] sm:$0x1 pattern:$0x75316420]  ;;  %v1699_v63 = vsel %vm13962_vm15, %v1692_v48, %v1697_v43  ;;  %v2035_v18 = vcombine.high %v12526_v28, %v12526_v28  ;;  %v1982_v17 = vrot.slane %v1968_v42, %v13947_v13 }
  0xea   : > { %1781 = vst.msk [vmem:[#allocation2 + $0x33] sm:$0x1] %vm388_vm0, %v1776_v7  ;;  %1820 = vst.msk [vmem:[#allocation2 + $0x35] sm:$0x1] %vm388_vm0, %v1815_v60  ;;  %v1881_v32 = vshrl.u32 %v1869_v58, 16  ;;  %v1886_v23 = vshll.u32 %v1870_v50, 16  ;;  %v2116_v1 = vrot.slane %v12534_v34, %v13947_v13  ;;  %v1983_v30 = vcombine.high %v1975_v57, %v1975_v57 }
  0xeb   : > { %v12803_v8 = vld.sshfl [vmem:[#allocation2 + $0x25] sm:$0x1 pattern:$0x75316420]  ;;  %1704 = vst.msk [vmem:[#allocation2 + $0x2f] sm:$0x1] %vm388_vm0, %v1699_v63  ;;  %v2042_v6 = vrot.slane %v2035_v18, %v13947_v13  ;;  %v5800_v25 = vrot.slane %v12801_v2, %v13947_v13  ;;  %v5814_v31 = vrot.slane %v12802_v3, %v13947_v13  ;;  %v1984_v47 = vcombine.high %v1982_v17, %v1982_v17 }
  0xec   : > { %v12805_v20 = vld.sshfl [vmem:[#allocation2 + $0x29] sm:$0x1 pattern:$0x75316420]  ;;  %1932 = vst.msk [vmem:[#allocation2 + $0x39] sm:$0x1] %vm388_vm0, %v1927_v29  ;;  %v1888_v11 = vsel %vm13962_vm15, %v1881_v32, %v1886_v23  ;;  %v5828_v35 = vrot.slane %v12803_v8, %v13947_v13 }
  0xed   : > { %v12809_v4 = vld.sshfl [vmem:[#allocation2 + $0x31] sm:$0x1 pattern:$0x75316420]  ;;  %v2132_v55 = vshll.u32 %v2116_v1, 16  ;;  %v1995_v56 = vshrl.u32 %v1983_v30, 16  ;;  %v2043_v5 = vcombine.high %v2042_v6, %v2042_v6  ;;  %v5856_v37 = vrot.slane %v12805_v20, %v13947_v13 }
  0xee   : > { %v12804_v61 = vld.sshfl [vmem:[#allocation2 + $0x27] sm:$0x1 pattern:$0x75316420]  ;;  %1893 = vst.msk [vmem:[#allocation2 + $0x37] sm:$0x1] %vm388_vm0, %v1888_v11  ;;  %v5912_v51 = vrot.slane %v12809_v4, %v13947_v13  ;;  %v6475_v49 = vunpack.c.l.b16 %v5800_v25  ;;  %v6476_v0 = vunpack.c.l.b16 %v5814_v31  ;;  %v6477_v26 = vunpack.c.l.b16 %v5828_v35 }
  0xef   : > { %v5842_v54 = vrot.slane %v12804_v61, %v13947_v13  ;;  %v2000_v59 = vshll.u32 %v1984_v47, 16  ;;  %v12807_v27 = vld.sshfl [vmem:[#allocation2 + $0x2d] sm:$0x1 pattern:$0x75316420]  ;;  %v2127_v24 = vshrl.u32 %v2043_v5, 16  ;;  %v6479_v43 = vunpack.c.l.b16 %v5856_v37 }
  0xf0   : > { %2048 = vst.msk [vmem:[#allocation2 + $0x3d] sm:$0x1] %vm388_vm0, %v2043_v5  ;;  %v12806_v12 = vld.sshfl [vmem:[#allocation2 + $0x2b] sm:$0x1 pattern:$0x75316420]  ;;  %v5884_v53 = vrot.slane %v12807_v27, %v13947_v13  ;;  %v6483_v21 = vunpack.c.l.b16 %v5912_v51 }
  0xf1   : > { %v6478_v46 = vunpack.c.l.b16 %v5842_v54  ;;  %v2002_v15 = vsel %vm13962_vm15, %v1995_v56, %v2000_v59  ;;  %v12810_v45 = vld.sshfl [vmem:[#allocation2 + $0x33] sm:$0x1 pattern:$0x75316420]  ;;  %v5870_v9 = vrot.slane %v12806_v12, %v13947_v13  ;;  %v2134_v14 = vsel %vm13962_vm15, %v2127_v24, %v2132_v55 }
  0xf2   : > { %2007 = vst.msk [vmem:[#allocation2 + $0x3b] sm:$0x1] %vm388_vm0, %v2002_v15  ;;  %v12808_v33 = vld.sshfl [vmem:[#allocation2 + $0x2f] sm:$0x1 pattern:$0x75316420]  ;;  %v5926_v62 = vrot.slane %v12810_v45, %v13947_v13  ;;  %v6481_v44 = vunpack.c.l.b16 %v5884_v53 }
  0xf3   : > { %v6551_v39 = vrot.slane %v6476_v0, 7  ;;  %2139 = vst.msk [vmem:[#allocation2 + $0x3f] sm:$0x1] %vm388_vm0, %v2134_v14  ;;  %v5898_v28 = vrot.slane %v12808_v33, %v13947_v13  ;;  %v6480_v38 = vunpack.c.l.b16 %v5870_v9  ;;  %v6553_v10 = vrot.slane %v6477_v26, 6 }
  0xf4   : > { %v12811_v16 = vld.sshfl [vmem:[#allocation2 + $0x35] sm:$0x1 pattern:$0x75316420]  ;;  %v6555_v36 = vrot.slane %v6478_v46, 5  ;;  %v6484_v40 = vunpack.c.l.b16 %v5926_v62  ;;  %v6557_v60 = vrot.slane %v6479_v43, 4 }
  0xf5   : > { %v12813_v22 = vld.sshfl [vmem:[#allocation2 + $0x39] sm:$0x1 pattern:$0x75316420]  ;;  %v5940_v34 = vrot.slane %v12811_v16, %v13947_v13  ;;  %v6552_v48 = vsel %vm4985_vm2, %v6551_v39, %v6475_v49  ;;  %v6482_v7 = vunpack.c.l.b16 %v5898_v28  ;;  %v6559_v50 = vrot.slane %v6480_v38, 3 }
  0xf6   : > { %v12812_v41 = vld.sshfl [vmem:[#allocation2 + $0x37] sm:$0x1 pattern:$0x75316420]  ;;  %v5968_v2 = vrot.slane %v12813_v22, %v13947_v13  ;;  %v6554_v58 = vsel %vm4988_vm4, %v6553_v10, %v6552_v48  ;;  %v6561_v29 = vrot.slane %v6481_v44, 2  ;;  %v6565_v17 = vrot.slane %v6484_v40, 7 }
  0xf7   : > { %v5954_v42 = vrot.slane %v12812_v41, %v13947_v13  ;;  %v6485_v3 = vunpack.c.l.b16 %v5940_v34  ;;  %v6556_v63 = vsel %vm4991_vm5, %v6555_v36, %v6554_v58  ;;  %v12542_v57 = vld.sshfl [vmem:[%s13937_s30 + $0x28] sm:$0x11 pattern:$0x75316420]  ;;  %v6563_v23 = vrot.slane %v6482_v7, 1 }
  0xf8   : > { %v12815_v18 = vld.sshfl [vmem:[#allocation2 + $0x3d] sm:$0x1 pattern:$0x75316420]  ;;  %v6487_v8 = vunpack.c.l.b16 %v5968_v2  ;;  %v6558_v32 = vsel %vm4994_vm7, %v6557_v60, %v6556_v63  ;;  %v6566_v47 = vsel %vm4985_vm2, %v6565_v17, %v6483_v21  ;;  %v2179_v61 = vcombine.high %v12542_v57, %v12542_v57 }
  0xf9   : > { %v12548_v1 = vld.sshfl [vmem:[%s13937_s30 + $0x28] sm:$0x10 pattern:$0x75316420]  ;;  %v5996_v20 = vrot.slane %v12815_v18, %v13947_v13  ;;  %v6486_v30 = vunpack.c.l.b16 %v5954_v42  ;;  %v6560_v6 = vsel %vm4997_vm9, %v6559_v50, %v6558_v32  ;;  %v6567_v4 = vrot.slane %v6485_v3, 6  ;;  %v13704_v42 = vld [vmem:[%s16200_s1 + $0x70] sm:$0xff]  }
  0xfa   : > { %v12552_v25 = vld.sshfl [vmem:[%s13937_s30 + $0x28] sm:$0x12 pattern:$0x75316420]  ;;  %v6562_v11 = vsel %vm5000_vm10, %v6561_v29, %v6560_v6  ;;  %v6571_v55 = vrot.slane %v6487_v8, 4  ;;  %v2186_v51 = vrot.slane %v12542_v57, %v13947_v13  ;;  %v2193_v49 = vrot.slane %v2179_v61, %v13947_v13 }
  0xfb   : > { %v12814_v31 = vld.sshfl [vmem:[#allocation2 + $0x3b] sm:$0x1 pattern:$0x75316420]  ;;  %v6489_v5 = vunpack.c.l.b16 %v5996_v20  ;;  %v6564_v54 = vsel %vm5003_vm11, %v6563_v23, %v6562_v11  ;;  %v6568_v37 = vsel %vm4988_vm4, %v6567_v4, %v6566_v47  ;;  %v6569_v27 = vrot.slane %v6486_v30, 5  ;;  %v13705_v61 = vld [vmem:[%s16200_s1 + $0x68] sm:$0xff]  }
  0xfc   : > { %v12816_v35 = vld.sshfl [vmem:[#allocation2 + $0x3f] sm:$0x1 pattern:$0x75316420]  ;;  %v5982_v56 = vrot.slane %v12814_v31, %v13947_v13  ;;  %v2243_v12 = vcombine.high %v12548_v1, %v12548_v1  ;;  %v2290_v53 = vcombine.high %v12552_v25, %v12552_v25  ;;  %v2204_v45 = vshrl.u32 %v2186_v51, 16 }
  0xfd   : > { %v6010_v59 = vrot.slane %v12816_v35, %v13947_v13  ;;  %v6575_v24 = vrot.slane %v6489_v5, 2  ;;  %v12558_v26 = vld.sshfl [vmem:[%s13937_s30 + $0x28] sm:$0x2 pattern:$0x75316420]  ;;  %v6570_v15 = vsel %vm4991_vm5, %v6569_v27, %v6568_v37  ;;  %v2209_v9 = vshll.u32 %v2193_v49, 16 }
  0xfe   : > { %v6488_v0 = vunpack.c.l.b16 %v5982_v56  ;;  %v12562_v43 = vld.sshfl [vmem:[%s13937_s30 + $0x28] sm:$0x22 pattern:$0x75316420]  ;;  %v6572_v21 = vsel %vm4994_vm7, %v6571_v55, %v6570_v15  ;;  %v2250_v33 = vrot.slane %v2243_v12, %v13947_v13  ;;  %v2297_v62 = vrot.slane %v12552_v25, %v13947_v13 }
  0xff   : > { %v6490_v46 = vunpack.c.l.b16 %v6010_v59  ;;  %v12568_v44 = vld.sshfl [vmem:[%s13937_s30 + $0x28] sm:$0x20 pattern:$0x75316420]  ;;  %v2211_v16 = vsel %vm13962_vm15, %v2204_v45, %v2209_v9  ;;  %v2304_v28 = vrot.slane %v2290_v53, %v13947_v13  ;;  %v2361_v38 = vrot.slane %v12558_v26, %v13947_v13 }
 0x100   : > { %v6573_v14 = vrot.slane %v6488_v0, 3  ;;  %v12576_v10 = vld.sshfl [vmem:[%s13937_s30 + $0x2c] sm:$0x1 pattern:$0x75316420]  ;;  %v2305_v22 = vcombine.high %v2297_v62, %v2297_v62  ;;  %v2403_v34 = vcombine.high %v12562_v43, %v12562_v43  ;;  %v2410_v40 = vrot.slane %v12562_v43, %v13947_v13 }
 0x101   : > { %v6577_v39 = vrot.slane %v6490_v46, 1  ;;  %2216 = vst.msk [vmem:[#allocation2 + $0x43] sm:$0x1] %vm388_vm0, %v2211_v16  ;;  %2255 = vst.msk [vmem:[#allocation2 + $0x45] sm:$0x1] %vm388_vm0, %v2250_v33  ;;  %v2316_v41 = vshrl.u32 %v2304_v28, 16  ;;  %v2362_v2 = vcombine.high %v2361_v38, %v2361_v38  ;;  %v2470_v7 = vcombine.high %v12568_v44, %v12568_v44 }
 0x102   : > { %v6574_v36 = vsel %vm4997_vm9, %v6573_v14, %v6572_v21  ;;  %v12584_v48 = vld.sshfl [vmem:[%s13937_s30 + $0x30] sm:$0x11 pattern:$0x75316420]  ;;  %v2321_v3 = vshll.u32 %v2305_v22, 16  ;;  %v2417_v63 = vrot.slane %v2403_v34, %v13947_v13  ;;  %v2418_v29 = vcombine.high %v2410_v40, %v2410_v40  ;;  %v13706_v21 = vld [vmem:[%s16200_s1 + $0x60] sm:$0xff]  }
 0x103   : > { %v6576_v60 = vsel %vm5000_vm10, %v6575_v24, %v6574_v36  ;;  %v12590_v58 = vld.sshfl [vmem:[%s13937_s30 + $0x30] sm:$0x10 pattern:$0x75316420]  ;;  %2367 = vst.msk [vmem:[#allocation2 + $0x49] sm:$0x1] %vm388_vm0, %v2362_v2  ;;  %v2477_v8 = vrot.slane %v2470_v7, %v13947_v13  ;;  %v2551_v32 = vrot.slane %v12576_v10, %v13947_v13  ;;  %v2614_v23 = vcombine.high %v12584_v48, %v12584_v48 }
 0x104   : > { %v6578_v50 = vsel %vm5003_vm11, %v6577_v39, %v6576_v60  ;;  %v12594_v57 = vld.sshfl [vmem:[%s13937_s30 + $0x30] sm:$0x12 pattern:$0x75316420]  ;;  %v2323_v1 = vsel %vm13962_vm15, %v2316_v41, %v2321_v3  ;;  %v2419_v20 = vcombine.high %v2417_v63, %v2417_v63  ;;  %v2430_v30 = vshrl.u32 %v2418_v29, 16 }
 0x105   : > { %v6636_v18 = vpack.c.b16 %v6578_v50, %v6564_v54  ;;  %v12600_v17 = vld.sshfl [vmem:[%s13937_s30 + $0x30] sm:$0x2 pattern:$0x75316420]  ;;  %v2621_v6 = vrot.slane %v12584_v48, %v13947_v13  ;;  %2328 = vst.msk [vmem:[#allocation2 + $0x47] sm:$0x1] %vm388_vm0, %v2323_v1  ;;  %v2478_v25 = vcombine.high %v2477_v8, %v2477_v8  ;;  %v2628_v11 = vrot.slane %v2614_v23, %v13947_v13 }
 0x106   : > { %v12604_v4 = vld.sshfl [vmem:[%s13937_s30 + $0x30] sm:$0x22 pattern:$0x75316420]  ;;  %v2567_v31 = vshll.u32 %v2551_v32, 16  ;;  %v2678_v47 = vcombine.high %v12590_v58, %v12590_v58  ;;  %v2435_v35 = vshll.u32 %v2419_v20, 16  ;;  %v2725_v5 = vcombine.high %v12594_v57, %v12594_v57 }
 0x107   : > { %13418 = vmatmul.mubr.msk.bf16.vlgmr.msra.gmra.mxu1 %vm16237_vm12, %v6636_v18  ;;  %v12610_v55 = vld.sshfl [vmem:[%s13937_s30 + $0x30] sm:$0x20 pattern:$0x75316420]  ;;  %v2639_v56 = vshrl.u32 %v2621_v6, 16  ;;  %v2732_v54 = vrot.slane %v12594_v57, %v13947_v13  ;;  %v2562_v59 = vshrl.u32 %v2478_v25, 16  ;;  %v2796_v49 = vrot.slane %v12600_v17, %v13947_v13 }
 0x108   : > { %13426 = vmatpush3.bf16.msra.mxu1 %v14802_v19  ;;  %v12618_v37 = vld.sshfl [vmem:[%s13937_s30 + $0x34] sm:$0x1 pattern:$0x75316420]  ;;  %2483 = vst.msk [vmem:[#allocation2 + $0x4d] sm:$0x1] %vm388_vm0, %v2478_v25  ;;  %v2685_v51 = vrot.slane %v2678_v47, %v13947_v13  ;;  %v2437_v24 = vsel %vm13962_vm15, %v2430_v30, %v2435_v35  ;;  %v2739_v19 = vrot.slane %v2725_v5, %v13947_v13 }
 0x109   : > { %13427 = vmatprep.subr.bf16.mxu1 %v13704_v42  ;;  %v2644_v27 = vshll.u32 %v2628_v11, 16  ;;  %v12817_v0 = vld.sshfl [vmem:[#allocation2 + $0x41] sm:$0x1 pattern:$0x75316420]  ;;  %v2740_v12 = vcombine.high %v2732_v54, %v2732_v54  ;;  %v2838_v53 = vcombine.high %v12604_v4, %v12604_v4  ;;  %v2569_v46 = vsel %vm13962_vm15, %v2562_v59, %v2567_v31 }
 0x10a   : > { %v12818_v26 = vld.sshfl [vmem:[#allocation2 + $0x43] sm:$0x1 pattern:$0x75316420]  ;;  %2442 = vst.msk [vmem:[#allocation2 + $0x4b] sm:$0x1] %vm388_vm0, %v2437_v24  ;;  %v2797_v45 = vcombine.high %v2796_v49, %v2796_v49  ;;  %v2845_v9 = vrot.slane %v12604_v4, %v13947_v13  ;;  %v2905_v44 = vcombine.high %v12610_v55, %v12610_v55  ;;  %v2986_v28 = vrot.slane %v12618_v37, %v13947_v13 }
 0x10b   : > { %v2646_v15 = vsel %vm13962_vm15, %v2639_v56, %v2644_v27  ;;  %2690 = vst.msk [vmem:[#allocation2 + $0x55] sm:$0x1] %vm388_vm0, %v2685_v51  ;;  %v12819_v43 = vld.sshfl [vmem:[#allocation2 + $0x45] sm:$0x1 pattern:$0x75316420]  ;;  %v2852_v62 = vrot.slane %v2838_v53, %v13947_v13  ;;  %v6024_v10 = vrot.slane %v12817_v0, %v13947_v13  ;;  %v6038_v36 = vrot.slane %v12818_v26, %v13947_v13 }
 0x10c   : > { %13428 = vmatpush3.bf16.msra.mxu1 %v13704_v42  ;;  %2574 = vst.msk [vmem:[#allocation2 + $0x4f] sm:$0x1] %vm388_vm0, %v2569_v46  ;;  %2651 = vst.msk [vmem:[#allocation2 + $0x53] sm:$0x1] %vm388_vm0, %v2646_v15  ;;  %v2751_v14 = vshrl.u32 %v2739_v19, 16  ;;  %v2756_v33 = vshll.u32 %v2740_v12, 16  ;;  %v2853_v16 = vcombine.high %v2845_v9, %v2845_v9  ;;  %v2912_v40 = vrot.slane %v2905_v44, %v13947_v13 }
 0x10d   : > { %v12821_v39 = vld.sshfl [vmem:[#allocation2 + $0x49] sm:$0x1 pattern:$0x75316420]  ;;  %2802 = vst.msk [vmem:[#allocation2 + $0x59] sm:$0x1] %vm388_vm0, %v2797_v45  ;;  %13429 = vmatprep.subr.bf16.mxu1 %v13705_v61  ;;  %v2854_v34 = vcombine.high %v2852_v62, %v2852_v62  ;;  %v6052_v60 = vrot.slane %v12819_v43, %v13947_v13  ;;  %v15050_v29 = vunpack.c.l.b16 %v6024_v10  ;;  %v15053_v18 = vunpack.c.l.b16 %v6038_v36 }
 0x10e   : > { %v12825_v38 = vld.sshfl [vmem:[#allocation2 + $0x51] sm:$0x1 pattern:$0x75316420]  ;;  %v2758_v22 = vsel %vm13962_vm15, %v2751_v14, %v2756_v33  ;;  %v2865_v41 = vshrl.u32 %v2853_v16, 16  ;;  %v3002_v2 = vshll.u32 %v2986_v28, 16  ;;  %v6080_v58 = vrot.slane %v12821_v39, %v13947_v13 }
 0x10f   : > { %v12820_v48 = vld.sshfl [vmem:[#allocation2 + $0x47] sm:$0x1 pattern:$0x75316420]  ;;  %2763 = vst.msk [vmem:[#allocation2 + $0x57] sm:$0x1] %vm388_vm0, %v2758_v22  ;;  %v2913_v42 = vcombine.high %v2912_v40, %v2912_v40  ;;  %v6136_v63 = vrot.slane %v12825_v38, %v13947_v13  ;;  %v15055_v8 = vunpack.c.l.b16 %v6052_v60 }
 0x110   : > { %v6066_v7 = vrot.slane %v12820_v48, %v13947_v13  ;;  %v2870_v50 = vshll.u32 %v2854_v34, 16  ;;  %v12823_v3 = vld.sshfl [vmem:[#allocation2 + $0x4d] sm:$0x1 pattern:$0x75316420]  ;;  %13430 = vmatpush3.bf16.msra.mxu1 %v13705_v61  ;;  %v15065_v30 = vunpack.c.l.b16 %v6080_v58  ;;  %v6579_v11 = vrot.slane %v15053_v18, 7 }
 0x111   : > { %v6108_v57 = vrot.slane %v12823_v3, %v13947_v13  ;;  %v15060_v23 = vld.sshfl [vmem:[%s13937_s30 + $0x38] sm:$0x11 pattern:$0x75316420]  ;;  %13431 = vmatprep.subr.bf16.mxu1 %v13706_v21  ;;  %2918 = vst.msk [vmem:[#allocation2 + $0x5d] sm:$0x1] %vm388_vm0, %v2913_v42  ;;  %v15067_v6 = vunpack.c.l.b16 %v6136_v63 }
 0x112   : > { %v15057_v32 = vunpack.c.l.b16 %v6066_v7  ;;  %v2872_v17 = vsel %vm13962_vm15, %v2865_v41, %v2870_v50  ;;  %v2997_v1 = vshrl.u32 %v2913_v42, 16  ;;  %v12822_v20 = vld.sshfl [vmem:[#allocation2 + $0x4b] sm:$0x1 pattern:$0x75316420]  ;;  %v6581_v47 = vrot.slane %v15055_v8, 6 }
 0x113   : > { %2877 = vst.msk [vmem:[#allocation2 + $0x5b] sm:$0x1] %vm388_vm0, %v2872_v17  ;;  %v12824_v4 = vld.sshfl [vmem:[#allocation2 + $0x4f] sm:$0x1 pattern:$0x75316420]  ;;  %v6094_v25 = vrot.slane %v12822_v20, %v13947_v13  ;;  %v15071_v31 = vunpack.c.l.b16 %v6108_v57  ;;  %v6580_v27 = vsel %vm4985_vm2, %v6579_v11, %v15050_v29  ;;  %v3049_v12 = vcombine.high %v15060_v23, %v15060_v23 }
 0x114   : > { %v3004_v55 = vsel %vm13962_vm15, %v2997_v1, %v3002_v2  ;;  %v12826_v61 = vld.sshfl [vmem:[#allocation2 + $0x53] sm:$0x1 pattern:$0x75316420]  ;;  %v6122_v35 = vrot.slane %v12824_v4, %v13947_v13  ;;  %v6583_v56 = vrot.slane %v15057_v32, 5  ;;  %v6585_v5 = vrot.slane %v15065_v30, 4  ;;  %13432 = vmatpush3.bf16.msra.mxu1 %v13706_v21 }
 0x115   : > { %3009 = vst.msk [vmem:[#allocation2 + $0x5f] sm:$0x1] %vm388_vm0, %v3004_v55  ;;  %v12827_v54 = vld.sshfl [vmem:[#allocation2 + $0x55] sm:$0x1 pattern:$0x75316420]  ;;  %v6150_v37 = vrot.slane %v12826_v61, %v13947_v13  ;;  %v15082_v59 = vunpack.c.l.b16 %v6094_v25  ;;  %v6582_v19 = vsel %vm4988_vm4, %v6581_v47, %v6580_v27  ;;  %v3056_v16 = vrot.slane %v15060_v23, %v13947_v13 }
 0x116   : > { %v6589_v51 = vrot.slane %v15071_v31, 2  ;;  %v12828_v49 = vld.sshfl [vmem:[#allocation2 + $0x57] sm:$0x1 pattern:$0x75316420]  ;;  %v6164_v0 = vrot.slane %v12827_v54, %v13947_v13  ;;  %v15088_v24 = vunpack.c.l.b16 %v6122_v35  ;;  %v6584_v15 = vsel %vm4991_vm5, %v6583_v56, %v6582_v19 }
 0x117   : > { %v12829_v53 = vld.sshfl [vmem:[#allocation2 + $0x59] sm:$0x1 pattern:$0x75316420]  ;;  %v6178_v26 = vrot.slane %v12828_v49, %v13947_v13  ;;  %v15094_v46 = vunpack.c.l.b16 %v6150_v37  ;;  %v6587_v45 = vrot.slane %v15082_v59, 3  ;;  %v6586_v21 = vsel %vm4994_vm7, %v6585_v5, %v6584_v15 }
 0x118   : > { %v6192_v9 = vrot.slane %v12829_v53, %v13947_v13  ;;  %v15099_v43 = vunpack.c.l.b16 %v6164_v0  ;;  %v6591_v14 = vrot.slane %v15088_v24, 1  ;;  %v12831_v33 = vld.sshfl [vmem:[#allocation2 + $0x5d] sm:$0x1 pattern:$0x75316420]  ;;  %v3063_v63 = vrot.slane %v3049_v12, %v13947_v13 }
 0x119   : > { %v15103_v62 = vunpack.c.l.b16 %v6178_v26  ;;  %v6588_v44 = vsel %vm4997_vm9, %v6587_v45, %v6586_v21  ;;  %v6593_v39 = vrot.slane %v15094_v46, 7  ;;  %v12632_v28 = vld.sshfl [vmem:[%s13937_s30 + $0x38] sm:$0x10 pattern:$0x75316420]  ;;  %v6220_v10 = vrot.slane %v12831_v33, %v13947_v13 }
 0x11a   : > { %v12830_v38 = vld.sshfl [vmem:[#allocation2 + $0x5b] sm:$0x1 pattern:$0x75316420]  ;;  %v15111_v36 = vunpack.c.l.b16 %v6192_v9  ;;  %v6590_v22 = vsel %vm5000_vm10, %v6589_v51, %v6588_v44  ;;  %v6595_v34 = vrot.slane %v15099_v43, 6  ;;  %v3074_v1 = vshrl.u32 %v3056_v16, 16 }
 0x11b   : > { %v12636_v40 = vld.sshfl [vmem:[%s13937_s30 + $0x38] sm:$0x12 pattern:$0x75316420]  ;;  %v6206_v48 = vrot.slane %v12830_v38, %v13947_v13  ;;  %v6592_v60 = vsel %vm5003_vm11, %v6591_v14, %v6590_v22  ;;  %v6594_v41 = vsel %vm4985_vm2, %v6593_v39, %v15067_v6  ;;  %v6597_v2 = vrot.slane %v15103_v62, 5 }
 0x11c   : > { %v12642_v7 = vld.sshfl [vmem:[%s13937_s30 + $0x38] sm:$0x2 pattern:$0x75316420]  ;;  %v15122_v50 = vunpack.c.l.b16 %v6220_v10  ;;  %v6596_v42 = vsel %vm4988_vm4, %v6595_v34, %v6594_v41  ;;  %v6599_v3 = vrot.slane %v15111_v36, 4  ;;  %v3079_v11 = vshll.u32 %v3063_v63, 16 }
 0x11d   : > { %v12832_v58 = vld.sshfl [vmem:[#allocation2 + $0x5f] sm:$0x1 pattern:$0x75316420]  ;;  %v15128_v23 = vunpack.c.l.b16 %v6206_v48  ;;  %v6598_v17 = vsel %vm4991_vm5, %v6597_v2, %v6596_v42  ;;  %v3113_v47 = vcombine.high %v12632_v28, %v12632_v28  ;;  %v3160_v56 = vcombine.high %v12636_v40, %v12636_v40 }
 0x11e   : > { %v6234_v57 = vrot.slane %v12832_v58, %v13947_v13  ;;  %v12646_v20 = vld.sshfl [vmem:[%s13937_s30 + $0x38] sm:$0x22 pattern:$0x75316420]  ;;  %v6600_v4 = vsel %vm4994_vm7, %v6599_v3, %v6598_v17  ;;  %v6603_v25 = vrot.slane %v15122_v50, 2  ;;  %v3167_v5 = vrot.slane %v12636_v40, %v13947_v13 }
 0x11f   : > { %v12652_v55 = vld.sshfl [vmem:[%s13937_s30 + $0x38] sm:$0x20 pattern:$0x75316420]  ;;  %v6601_v35 = vrot.slane %v15128_v23, 3  ;;  %v3081_v37 = vsel %vm13962_vm15, %v3074_v1, %v3079_v11  ;;  %v3120_v27 = vrot.slane %v3113_v47, %v13947_v13  ;;  %v3231_v51 = vrot.slane %v12642_v7, %v13947_v13 }
 0x120   : > { %v15135_v61 = vunpack.c.l.b16 %v6234_v57  ;;  %v12660_v54 = vld.sshfl [vmem:[%s13937_s30 + $0x3c] sm:$0x1 pattern:$0x75316420]  ;;  %v3273_v49 = vcombine.high %v12646_v20, %v12646_v20  ;;  %3086 = vst.msk [vmem:[#allocation2 + $0x63] sm:$0x1] %vm388_vm0, %v3081_v37  ;;  %v3174_v53 = vrot.slane %v3160_v56, %v13947_v13  ;;  %v3175_v26 = vcombine.high %v3167_v5, %v3167_v5 }
 0x121   : > { %v12668_v0 = vld.sshfl [vmem:[%s13937_s30 + $0x40] sm:$0x11 pattern:$0x75316420]  ;;  %v6602_v19 = vsel %vm4997_vm9, %v6601_v35, %v6600_v4  ;;  %3125 = vst.msk [vmem:[#allocation2 + $0x65] sm:$0x1] %vm388_vm0, %v3120_v27  ;;  %v3232_v9 = vcombine.high %v3231_v51, %v3231_v51  ;;  %v3280_v21 = vrot.slane %v12646_v20, %v13947_v13  ;;  %v3340_v28 = vcombine.high %v12652_v55, %v12652_v55 }
 0x122   : > { %v6605_v12 = vrot.slane %v15135_v61, 1  ;;  %v12674_v15 = vld.sshfl [vmem:[%s13937_s30 + $0x40] sm:$0x10 pattern:$0x75316420]  ;;  %v6604_v45 = vsel %vm5000_vm10, %v6603_v25, %v6602_v19  ;;  %v3287_v14 = vrot.slane %v3273_v49, %v13947_v13  ;;  %v3186_v39 = vshrl.u32 %v3174_v53, 16 }
 0x123   : > { %v12678_v33 = vld.sshfl [vmem:[%s13937_s30 + $0x40] sm:$0x12 pattern:$0x75316420]  ;;  %v3191_v16 = vshll.u32 %v3175_v26, 16  ;;  %v3288_v22 = vcombine.high %v3280_v21, %v3280_v21  ;;  %v3421_v40 = vrot.slane %v12660_v54, %v13947_v13  ;;  %v3347_v2 = vrot.slane %v3340_v28, %v13947_v13 }
 0x124   : > { %v6606_v44 = vsel %vm5003_vm11, %v6605_v12, %v6604_v45  ;;  %v12684_v38 = vld.sshfl [vmem:[%s13937_s30 + $0x40] sm:$0x2 pattern:$0x75316420]  ;;  %3237 = vst.msk [vmem:[#allocation2 + $0x69] sm:$0x1] %vm388_vm0, %v3232_v9  ;;  %v3289_v34 = vcombine.high %v3287_v14, %v3287_v14  ;;  %v3484_v7 = vcombine.high %v12668_v0, %v12668_v0  ;;  %v3491_v58 = vrot.slane %v12668_v0, %v13947_v13 }
 0x125   : > { %v6637_v10 = vpack.c.b16 %v6606_v44, %v6592_v60  ;;  %v12688_v48 = vld.sshfl [vmem:[%s13937_s30 + $0x40] sm:$0x22 pattern:$0x75316420]  ;;  %v3193_v41 = vsel %vm13962_vm15, %v3186_v39, %v3191_v16  ;;  %v3300_v60 = vshrl.u32 %v3288_v22, 16  ;;  %v3437_v63 = vshll.u32 %v3421_v40, 16 }
 0x126   : > { %v12694_v42 = vld.sshfl [vmem:[%s13937_s30 + $0x40] sm:$0x20 pattern:$0x75316420]  ;;  %3198 = vst.msk [vmem:[#allocation2 + $0x67] sm:$0x1] %vm388_vm0, %v3193_v41  ;;  %v3548_v57 = vcombine.high %v12674_v15, %v12674_v15  ;;  %v3348_v17 = vcombine.high %v3347_v2, %v3347_v2  ;;  %v3498_v1 = vrot.slane %v3484_v7, %v13947_v13  ;;  %v3595_v4 = vcombine.high %v12678_v33, %v12678_v33 }
 0x127   : > { %13421 = vmatprep.mubr.msk.bf16.mxu1 %vm16237_vm12, %v6637_v10  ;;  %v3305_v3 = vshll.u32 %v3289_v34, 16  ;;  %v3509_v20 = vshrl.u32 %v3491_v58, 16  ;;  %v12702_v25 = vld.sshfl [vmem:[%s13937_s30 + $0x44] sm:$0x1 pattern:$0x75316420]  ;;  %v3602_v55 = vrot.slane %v12678_v33, %v13947_v13  ;;  %v3666_v35 = vrot.slane %v12684_v38, %v13947_v13 }
 0x128   : > { %v3555_v47 = vrot.slane %v3548_v57, %v13947_v13  ;;  %v12833_v56 = vld.sshfl [vmem:[#allocation2 + $0x61] sm:$0x1 pattern:$0x75316420]  ;;  %3353 = vst.msk [vmem:[#allocation2 + $0x6d] sm:$0x1] %vm388_vm0, %v3348_v17  ;;  %v3609_v37 = vrot.slane %v3595_v4, %v13947_v13  ;;  %v3708_v27 = vcombine.high %v12688_v48, %v12688_v48  ;;  %v3715_v19 = vrot.slane %v12688_v48, %v13947_v13 }
 0x129   : > { %v3307_v11 = vsel %vm13962_vm15, %v3300_v60, %v3305_v3  ;;  %v3432_v5 = vshrl.u32 %v3348_v17, 16  ;;  %v3514_v54 = vshll.u32 %v3498_v1, 16  ;;  %v12834_v51 = vld.sshfl [vmem:[#allocation2 + $0x63] sm:$0x1 pattern:$0x75316420]  ;;  %v3610_v49 = vcombine.high %v3602_v55, %v3602_v55 }
 0x12a   : > { %3312 = vst.msk [vmem:[#allocation2 + $0x6b] sm:$0x1] %vm388_vm0, %v3307_v11  ;;  %3560 = vst.msk [vmem:[#allocation2 + $0x75] sm:$0x1] %vm388_vm0, %v3555_v47  ;;  %v3667_v0 = vcombine.high %v3666_v35, %v3666_v35  ;;  %v3775_v12 = vcombine.high %v12694_v42, %v12694_v42  ;;  %v3621_v45 = vshrl.u32 %v3609_v37, 16  ;;  %v3722_v9 = vrot.slane %v3708_v27, %v13947_v13 }
 0x12b   : > { %v12835_v53 = vld.sshfl [vmem:[#allocation2 + $0x65] sm:$0x1 pattern:$0x75316420]  ;;  %v3439_v26 = vsel %vm13962_vm15, %v3432_v5, %v3437_v63  ;;  %v3516_v15 = vsel %vm13962_vm15, %v3509_v20, %v3514_v54  ;;  %v3626_v14 = vshll.u32 %v3610_v49, 16  ;;  %v3723_v33 = vcombine.high %v3715_v19, %v3715_v19 }
 0x12c   : > { %v12841_v21 = vld.sshfl [vmem:[#allocation2 + $0x71] sm:$0x1 pattern:$0x75316420]  ;;  %3444 = vst.msk [vmem:[#allocation2 + $0x6f] sm:$0x1] %vm388_vm0, %v3439_v26  ;;  %v3782_v44 = vrot.slane %v3775_v12, %v13947_v13  ;;  %v3856_v39 = vrot.slane %v12702_v25, %v13947_v13  ;;  %v3724_v28 = vcombine.high %v3722_v9, %v3722_v9  ;;  %v6248_v10 = vrot.slane %v12833_v56, %v13947_v13 }
 0x12d   : > { %3521 = vst.msk [vmem:[#allocation2 + $0x73] sm:$0x1] %vm388_vm0, %v3516_v15  ;;  %3672 = vst.msk [vmem:[#allocation2 + $0x79] sm:$0x1] %vm388_vm0, %v3667_v0  ;;  %v6262_v22 = vrot.slane %v12834_v51, %v13947_v13  ;;  %v6276_v34 = vrot.slane %v12835_v53, %v13947_v13  ;;  %v3628_v40 = vsel %vm13962_vm15, %v3621_v45, %v3626_v14  ;;  %v3735_v48 = vshrl.u32 %v3723_v33, 16 }
 0x12e   : > { %v12837_v16 = vld.sshfl [vmem:[#allocation2 + $0x69] sm:$0x1 pattern:$0x75316420]  ;;  %v3783_v41 = vcombine.high %v3782_v44, %v3782_v44  ;;  %v3872_v2 = vshll.u32 %v3856_v39, 16  ;;  %v3740_v7 = vshll.u32 %v3724_v28, 16  ;;  %v6360_v60 = vrot.slane %v12841_v21, %v13947_v13 }
 0x12f   : > { %v12836_v38 = vld.sshfl [vmem:[#allocation2 + $0x67] sm:$0x1 pattern:$0x75316420]  ;;  %3633 = vst.msk [vmem:[#allocation2 + $0x77] sm:$0x1] %vm388_vm0, %v3628_v40  ;;  %v6304_v42 = vrot.slane %v12837_v16, %v13947_v13  ;;  %v15199_v57 = vunpack.c.l.b16 %v6248_v10  ;;  %v15201_v17 = vunpack.c.l.b16 %v6262_v22  ;;  %v15203_v1 = vunpack.c.l.b16 %v6276_v34 }
 0x130   : > { %v6290_v58 = vrot.slane %v12836_v38, %v13947_v13  ;;  %3788 = vst.msk [vmem:[#allocation2 + $0x7d] sm:$0x1] %vm388_vm0, %v3783_v41  ;;  %v3867_v3 = vshrl.u32 %v3783_v41, 16  ;;  %v3742_v20 = vsel %vm13962_vm15, %v3735_v48, %v3740_v7  ;;  %v15216_v5 = vunpack.c.l.b16 %v6360_v60 }
 0x131   : > { %v12838_v63 = vld.sshfl [vmem:[#allocation2 + $0x6b] sm:$0x1 pattern:$0x75316420]  ;;  %v15210_v47 = vunpack.c.l.b16 %v6304_v42  ;;  %3747 = vst.msk [vmem:[#allocation2 + $0x7b] sm:$0x1] %vm388_vm0, %v3742_v20 }
 0x132   : > { %v12839_v4 = vld.sshfl [vmem:[#allocation2 + $0x6d] sm:$0x1 pattern:$0x75316420]  ;;  %v6318_v25 = vrot.slane %v12838_v63, %v13947_v13  ;;  %v15208_v11 = vunpack.c.l.b16 %v6290_v58  ;;  %v3874_v55 = vsel %vm13962_vm15, %v3867_v3, %v3872_v2  ;;  %v6607_v54 = vrot.slane %v15201_v17, 7 }
 0x133   : > { %v12843_v35 = vld.sshfl [vmem:[#allocation2 + $0x75] sm:$0x1 pattern:$0x75316420]  ;;  %v6332_v56 = vrot.slane %v12839_v4, %v13947_v13  ;;  %3879 = vst.msk [vmem:[#allocation2 + $0x7f] sm:$0x1] %vm388_vm0, %v3874_v55 }
 0x134   : > { %v12840_v37 = vld.sshfl [vmem:[#allocation2 + $0x6f] sm:$0x1 pattern:$0x75316420]  ;;  %v6388_v27 = vrot.slane %v12843_v35, %v13947_v13  ;;  %v15221_v51 = vunpack.c.l.b16 %v6318_v25  ;;  %v6609_v49 = vrot.slane %v15203_v1, 6  ;;  %v6611_v0 = vrot.slane %v15208_v11, 5 }
 0x135   : > { %v12842_v52 = vld.sshfl [vmem:[#allocation2 + $0x73] sm:$0x1 pattern:$0x75316420]  ;;  %v6346_v19 = vrot.slane %v12840_v37, %v13947_v13  ;;  %v15226_v12 = vunpack.c.l.b16 %v6332_v56  ;;  %v6608_v53 = vsel %vm4985_vm2, %v6607_v54, %v15199_v57  ;;  %v6613_v26 = vrot.slane %v15210_v47, 4 }
 0x136   : > { %v15231_v15 = vld.sshfl [vmem:[#allocation2 + $0x1] sm:$0x1 pattern:$0x75316420]  ;;  %v6374_v9 = vrot.slane %v12842_v52, %v13947_v13  ;;  %v15234_v21 = vunpack.c.l.b16 %v6388_v27  ;;  %v6610_v14 = vsel %vm4988_vm4, %v6609_v49, %v6608_v53  ;;  %v6615_v33 = vrot.slane %v15221_v51, 3 }
 0x137   : > { %v12845_v45 = vld.sshfl [vmem:[#allocation2 + $0x79] sm:$0x1 pattern:$0x75316420]  ;;  %v15239_v16 = vunpack.c.l.b16 %v6346_v19  ;;  %v6612_v28 = vsel %vm4991_vm5, %v6611_v0, %v6610_v14  ;;  %v6617_v38 = vrot.slane %v15226_v12, 2  ;;  %v6897_v54 = vrot.slane %v15231_v15, %v13947_v13 }
 0x138   : > { %v12844_v44 = vld.sshfl [vmem:[#allocation2 + $0x77] sm:$0x1 pattern:$0x75316420]  ;;  %v6416_v39 = vrot.slane %v12845_v45, %v13947_v13  ;;  %v15246_v40 = vunpack.c.l.b16 %v6374_v9  ;;  %v6614_v48 = vsel %vm4994_vm7, %v6613_v26, %v6612_v28  ;;  %v6623_v41 = vrot.slane %v15234_v21, 6 }
 0x139   : > { %v15243_v10 = vld.sshfl [vmem:[#allocation2 + $0x3] sm:$0x1 pattern:$0x75316420]  ;;  %v6402_v34 = vrot.slane %v12844_v44, %v13947_v13  ;;  %v6616_v42 = vsel %vm4997_vm9, %v6615_v33, %v6614_v48  ;;  %v6619_v60 = vrot.slane %v15239_v16, 1  ;;  %vm13845_vm0 = vmmov 0  }
 0x13a   : > { %v12847_v22 = vld.sshfl [vmem:[#allocation2 + $0x7d] sm:$0x1 pattern:$0x75316420]  ;;  %16304 = vst [vmem:[#allocation10_spill] sm:$0xff] %v15246_v40  ;;  %v15251_v58 = vunpack.c.l.b16 %v6416_v39  ;;  %v6618_v25 = vsel %vm5000_vm10, %v6617_v38, %v6616_v42  ;;  %v6621_v55 = vrot.slane %v15246_v40, 7  ;;  %v6911_v39 = vrot.slane %v15243_v10, %v13947_v13 }
 0x13b   : > { %v12859_v2 = vld.sshfl [vmem:[#allocation2 + $0x5] sm:$0x1 pattern:$0x75316420]  ;;  %v6444_v7 = vrot.slane %v12847_v22, %v13947_v13  ;;  %v15255_v4 = vunpack.c.l.b16 %v6402_v34  ;;  %v6620_v0 = vsel %vm5003_vm11, %v6619_v60, %v6618_v25 }
 0x13c   : > { %16305 = vst [vmem:[#allocation13_spill] sm:$0xff] %v15251_v58  ;;  %v12860_v3 = vld.sshfl [vmem:[#allocation2 + $0x7] sm:$0x1 pattern:$0x75316420]  ;;  %v6627_v52 = vrot.slane %v15251_v58, 4  ;;  %v6622_v9 = vsel %vm4985_vm2, %v6621_v55, %v15216_v5 }
 0x13d   : > { %v12861_v63 = vld.sshfl [vmem:[#allocation2 + $0x9] sm:$0x1 pattern:$0x75316420]  ;;  %16306 = vst [vmem:[#allocation14_spill] sm:$0xff] %v15255_v4  ;;  %v15262_v49 = vunpack.c.l.b16 %v6444_v7  ;;  %v6625_v14 = vrot.slane %v15255_v4, 5  ;;  %v6624_v38 = vsel %vm4988_vm4, %v6623_v41, %v6622_v9  ;;  %v6925_v7 = vrot.slane %v12859_v2, %v13947_v13 }
 0x13e   : > { %v12846_v20 = vld.sshfl [vmem:[#allocation2 + $0x7b] sm:$0x1 pattern:$0x75316420]  ;;  %v6939_v25 = vrot.slane %v12860_v3, %v13947_v13  ;;  %v6953_v55 = vrot.slane %v12861_v63, %v13947_v13 }
 0x13f   : > { %v12862_v35 = vld.sshfl [vmem:[#allocation2 + $0xb] sm:$0x1 pattern:$0x75316420]  ;;  %v6430_v27 = vrot.slane %v12846_v20, %v13947_v13  ;;  %16307 = vst [vmem:[#allocation12_spill] sm:$0xff] %v15262_v49  ;;  %v6631_v22 = vrot.slane %v15262_v49, 2  ;;  %v6626_v60 = vsel %vm4991_vm5, %v6625_v14, %v6624_v38  ;;  %v7782_v49 = vunpack.c.l.b16 %v6925_v7 }
 0x140   : > { %v12863_v56 = vld.sshfl [vmem:[#allocation2 + $0xd] sm:$0x1 pattern:$0x75316420]  ;;  %v6628_v10 = vsel %vm4994_vm7, %v6627_v52, %v6626_v60  ;;  %v6967_v41 = vrot.slane %v12862_v35, %v13947_v13 }
 0x141   : > { %v12848_v37 = vld.sshfl [vmem:[#allocation2 + $0x7f] sm:$0x1 pattern:$0x75316420]  ;;  %v15272_v28 = vunpack.c.l.b16 %v6430_v27  ;;  %v6981_v27 = vrot.slane %v12863_v56, %v13947_v13 }
 0x142   : > { %v12864_v19 = vld.sshfl [vmem:[#allocation2 + $0xf] sm:$0x1 pattern:$0x75316420]  ;;  %v6458_v45 = vrot.slane %v12848_v37, %v13947_v13 }
 0x143   : > { %v12865_v53 = vld.sshfl [vmem:[#allocation2 + $0x11] sm:$0x1 pattern:$0x75316420]  ;;  %16308 = vst [vmem:[#allocation15_spill] sm:$0xff] %v15272_v28  ;;  %v6629_v37 = vrot.slane %v15272_v28, 3  ;;  %v6995_v2 = vrot.slane %v12864_v19, %v13947_v13  ;;  %v7785_v28 = vunpack.c.l.b16 %v6967_v41 }
 0x144   : > { %v12866_v26 = vld.sshfl [vmem:[#allocation2 + $0x13] sm:$0x1 pattern:$0x75316420]  ;;  %v15277_v42 = vunpack.c.l.b16 %v6458_v45  ;;  %v7009_v45 = vrot.slane %v12865_v53, %v13947_v13 }
 0x145   : > { %v12867_v15 = vld.sshfl [vmem:[#allocation2 + $0x15] sm:$0x1 pattern:$0x75316420]  ;;  %v7023_v14 = vrot.slane %v12866_v26, %v13947_v13  ;;  %v6630_v3 = vsel %vm4997_vm9, %v6629_v37, %v6628_v10  ;;  %v7781_v26 = vunpack.c.l.b16 %v6911_v39  ;;  %v7783_v37 = vunpack.c.l.b16 %v6939_v25 }
 0x146   : > { %v12868_v33 = vld.sshfl [vmem:[#allocation2 + $0x17] sm:$0x1 pattern:$0x75316420]  ;;  %16309 = vst [vmem:[#allocation11_spill] sm:$0xff] %v15277_v42  ;;  %v6633_v9 = vrot.slane %v15277_v42, 1  ;;  %v7037_v63 = vrot.slane %v12867_v15, %v13947_v13  ;;  %v6632_v35 = vsel %vm5000_vm10, %v6631_v22, %v6630_v3  ;;  %v7780_v42 = vunpack.c.l.b16 %v6897_v54 }
 0x147   : > { %v12869_v44 = vld.sshfl [vmem:[#allocation2 + $0x19] sm:$0x1 pattern:$0x75316420]  ;;  %v7051_v52 = vrot.slane %v12868_v33, %v13947_v13  ;;  %v7784_v15 = vunpack.c.l.b16 %v6953_v55  ;;  %v7786_v33 = vunpack.c.l.b16 %v6981_v27  ;;  %v7787_v58 = vunpack.c.l.b16 %v6995_v2 }
 0x148   : > { %v12870_v34 = vld.sshfl [vmem:[#allocation2 + $0x1b] sm:$0x1 pattern:$0x75316420]  ;;  %v7065_v38 = vrot.slane %v12869_v44, %v13947_v13  ;;  %v6634_v53 = vsel %vm5003_vm11, %v6633_v9, %v6632_v35  ;;  %v7788_v44 = vunpack.c.l.b16 %v7009_v45  ;;  %v7789_v40 = vunpack.c.l.b16 %v7023_v14 }
 0x149   : > { %v12871_v48 = vld.sshfl [vmem:[#allocation2 + $0x1d] sm:$0x1 pattern:$0x75316420]  ;;  %v7079_v56 = vrot.slane %v12870_v34, %v13947_v13  ;;  %v6638_v10 = vpack.c.b16 %v6634_v53, %v6620_v0  ;;  %v7790_v22 = vunpack.c.l.b16 %v7037_v63  ;;  %v7791_v34 = vunpack.c.l.b16 %v7051_v52 }
 0x14a   : > { %v12872_v20 = vld.sshfl [vmem:[#allocation2 + $0x1f] sm:$0x1 pattern:$0x75316420]  ;;  %v7093_v60 = vrot.slane %v12871_v48, %v13947_v13  ;;  %v7792_v48 = vunpack.c.l.b16 %v7065_v38  ;;  %v7844_v9 = vrot.slane %v7780_v42, 1  ;;  %v7846_v54 = vrot.slane %v7782_v49, 7 }
 0x14b   : > { %v7107_v19 = vrot.slane %v12872_v20, %v13947_v13  ;;  %13422 = vmatmul.mubr.msk.bf16.gmra.mxu1 %vm16237_vm12, %v6638_v10  ;;  %v7793_v3 = vunpack.c.l.b16 %v7079_v56  ;;  %v12873_v39 = vld.sshfl [vmem:[#allocation2 + $0x21] sm:$0x1 pattern:$0x75316420]  ;;  %v7848_v0 = vrot.slane %v7783_v37, 6  ;;  %v7850_v25 = vrot.slane %v7784_v15, 5 }
 0x14c   : > { %v7794_v20 = vunpack.c.l.b16 %v7093_v60  ;;  %v12874_v7 = vld.sshfl [vmem:[#allocation2 + $0x23] sm:$0x1 pattern:$0x75316420]  ;;  %v7852_v55 = vrot.slane %v7785_v28, 4  ;;  %v7854_v41 = vrot.slane %v7786_v33, 3  ;;  %v7845_v45 = vsel %vm4985_vm2, %v7781_v26, %v7844_v9 }
 0x14d   : > { %v7795_v4 = vunpack.c.l.b16 %v7107_v19  ;;  %v12875_v27 = vld.sshfl [vmem:[#allocation2 + $0x25] sm:$0x1 pattern:$0x75316420]  ;;  %v7856_v14 = vrot.slane %v7787_v58, 2  ;;  %v7858_v35 = vrot.slane %v7788_v44, 1  ;;  %v7847_v56 = vsel %vm4988_vm4, %v7846_v54, %v7845_v45 }
 0x14e   : > { %v12876_v2 = vld.sshfl [vmem:[#allocation2 + $0x27] sm:$0x1 pattern:$0x75316420]  ;;  %v7860_v63 = vrot.slane %v7790_v22, 7  ;;  %v7862_v60 = vrot.slane %v7791_v34, 6  ;;  %v7849_v10 = vsel %vm4991_vm5, %v7848_v0, %v7847_v56  ;;  %v7149_v45 = vrot.slane %v12875_v27, %v13947_v13 }
 0x14f   : > { %v12877_v52 = vld.sshfl [vmem:[#allocation2 + $0x29] sm:$0x1 pattern:$0x75316420]  ;;  %v7864_v42 = vrot.slane %v7792_v48, 5  ;;  %v7866_v49 = vrot.slane %v7793_v3, 4  ;;  %v7859_v28 = vsel %vm4985_vm2, %v7789_v40, %v7858_v35  ;;  %v7851_v44 = vsel %vm4994_vm7, %v7850_v25, %v7849_v10 }
 0x150   : > { %v12878_v38 = vld.sshfl [vmem:[#allocation2 + $0x2b] sm:$0x1 pattern:$0x75316420]  ;;  %v7868_v37 = vrot.slane %v7794_v20, 3  ;;  %v7870_v15 = vrot.slane %v7795_v4, 2  ;;  %v7861_v22 = vsel %vm4988_vm4, %v7860_v63, %v7859_v28  ;;  %v7121_v48 = vrot.slane %v12873_v39, %v13947_v13 }
 0x151   : > { %v12879_v19 = vld.sshfl [vmem:[#allocation2 + $0x2d] sm:$0x1 pattern:$0x75316420]  ;;  %v7135_v3 = vrot.slane %v12874_v7, %v13947_v13  ;;  %v7853_v0 = vsel %vm4997_vm9, %v7852_v55, %v7851_v44  ;;  %v7863_v40 = vsel %vm4991_vm5, %v7862_v60, %v7861_v22  ;;  %v7163_v35 = vrot.slane %v12876_v2, %v13947_v13 }
 0x152   : > { %v12880_v53 = vld.sshfl [vmem:[#allocation2 + $0x2f] sm:$0x1 pattern:$0x75316420]  ;;  %v7855_v25 = vsel %vm5000_vm10, %v7854_v41, %v7853_v0  ;;  %v7865_v63 = vsel %vm4994_vm7, %v7864_v42, %v7863_v40  ;;  %v7177_v56 = vrot.slane %v12877_v52, %v13947_v13  ;;  %v7191_v39 = vrot.slane %v12878_v38, %v13947_v13 }
 0x153   : > { %v12881_v33 = vld.sshfl [vmem:[#allocation2 + $0x31] sm:$0x1 pattern:$0x75316420]  ;;  %v7857_v7 = vsel %vm5003_vm11, %v7856_v14, %v7855_v25  ;;  %v7867_v55 = vsel %vm4997_vm9, %v7866_v49, %v7865_v63  ;;  %v7205_v60 = vrot.slane %v12879_v19, %v13947_v13  ;;  %v7219_v10 = vrot.slane %v12880_v53, %v13947_v13 }
 0x154   : > { %v12882_v26 = vld.sshfl [vmem:[#allocation2 + $0x33] sm:$0x1 pattern:$0x75316420]  ;;  %v7869_v27 = vsel %vm5000_vm10, %v7868_v37, %v7867_v55  ;;  %v7233_v2 = vrot.slane %v12881_v33, %v13947_v13  ;;  %v7796_v37 = vunpack.c.l.b16 %v7121_v48  ;;  %v7797_v44 = vunpack.c.l.b16 %v7135_v3 }
 0x155   : > { %v12883_v58 = vld.sshfl [vmem:[#allocation2 + $0x35] sm:$0x1 pattern:$0x75316420]  ;;  %v7247_v41 = vrot.slane %v12882_v26, %v13947_v13  ;;  %v7871_v52 = vsel %vm5003_vm11, %v7870_v15, %v7869_v27  ;;  %v7798_v33 = vunpack.c.l.b16 %v7149_v45  ;;  %v7799_v22 = vunpack.c.l.b16 %v7163_v35 }
 0x156   : > { %v12884_v9 = vld.sshfl [vmem:[#allocation2 + $0x37] sm:$0x1 pattern:$0x75316420]  ;;  %v7261_v42 = vrot.slane %v12883_v58, %v13947_v13  ;;  %v7956_v28 = vpack.c.b16 %v7871_v52, %v7857_v7  ;;  %v7800_v26 = vunpack.c.l.b16 %v7177_v56  ;;  %v7801_v58 = vunpack.c.l.b16 %v7191_v39 }
 0x157   : > { %v12885_v54 = vld.sshfl [vmem:[#allocation2 + $0x39] sm:$0x1 pattern:$0x75316420]  ;;  %v7275_v38 = vrot.slane %v12884_v9, %v13947_v13  ;;  %v7802_v15 = vunpack.c.l.b16 %v7205_v60  ;;  %v7803_v0 = vunpack.c.l.b16 %v7219_v10  ;;  %v7804_v9 = vunpack.c.l.b16 %v7233_v2 }
 0x158   : > { %v12886_v34 = vld.sshfl [vmem:[#allocation2 + $0x3b] sm:$0x1 pattern:$0x75316420]  ;;  %v7289_v14 = vrot.slane %v12885_v54, %v13947_v13  ;;  %13433 = vmatprep.mubr.msk.bf16.mxu1 %vm16237_vm12, %v7956_v28  ;;  %v7805_v40 = vunpack.c.l.b16 %v7247_v41  ;;  %v7806_v54 = vunpack.c.l.b16 %v7261_v42  ;;  %v7872_v55 = vrot.slane %v7796_v37, 1 }
 0x159   : > { %v12887_v20 = vld.sshfl [vmem:[#allocation2 + $0x3d] sm:$0x1 pattern:$0x75316420]  ;;  %v7303_v49 = vrot.slane %v12886_v34, %v13947_v13  ;;  %v7807_v25 = vunpack.c.l.b16 %v7275_v38  ;;  %v7876_v48 = vrot.slane %v7799_v22, 6  ;;  %v7878_v3 = vrot.slane %v7800_v26, 5 }
 0x15a   : > { %v12888_v4 = vld.sshfl [vmem:[#allocation2 + $0x3f] sm:$0x1 pattern:$0x75316420]  ;;  %v7317_v19 = vrot.slane %v12887_v20, %v13947_v13  ;;  %v7808_v34 = vunpack.c.l.b16 %v7289_v14  ;;  %v7880_v45 = vrot.slane %v7801_v58, 4  ;;  %v7873_v35 = vsel %vm4985_vm2, %v7797_v44, %v7872_v55 }
 0x15b   : > { %v7331_v53 = vrot.slane %v12888_v4, %v13947_v13  ;;  %v7809_v63 = vunpack.c.l.b16 %v7303_v49  ;;  %v7874_v4 = vrot.slane %v7798_v33, 7  ;;  %v7882_v56 = vrot.slane %v7802_v15, 3 }
 0x15c   : > { %v7810_v7 = vunpack.c.l.b16 %v7317_v19  ;;  %v7884_v27 = vrot.slane %v7803_v0, 2  ;;  %v7886_v39 = vrot.slane %v7804_v9, 1  ;;  %v7888_v10 = vrot.slane %v7806_v54, 7 }
 0x15d   : > { %v7811_v20 = vunpack.c.l.b16 %v7331_v53  ;;  %v7875_v60 = vsel %vm4988_vm4, %v7874_v4, %v7873_v35  ;;  %v7890_v2 = vrot.slane %v7807_v25, 6  ;;  %v7892_v41 = vrot.slane %v7808_v34, 5 }
 0x15e   : > { %v7877_v42 = vsel %vm4991_vm5, %v7876_v48, %v7875_v60  ;;  %v7887_v52 = vsel %vm4985_vm2, %v7805_v40, %v7886_v39  ;;  %v7894_v38 = vrot.slane %v7809_v63, 4  ;;  %v7896_v14 = vrot.slane %v7810_v7, 3 }
 0x15f   : > { %v7879_v49 = vsel %vm4994_vm7, %v7878_v3, %v7877_v42  ;;  %v7889_v28 = vsel %vm4988_vm4, %v7888_v10, %v7887_v52  ;;  %v7898_v19 = vrot.slane %v7811_v20, 2  ;;  %v7900_v53 = vrot.slane %v15050_v29, 1  ;;  %v16312_v52 = vld [vmem:[#allocation13_spill] sm:$0xff] }
 0x160   : > { %v7881_v37 = vsel %vm4997_vm9, %v7880_v45, %v7879_v49  ;;  %v7891_v44 = vsel %vm4991_vm5, %v7890_v2, %v7889_v28  ;;  %v7902_v33 = vrot.slane %v15055_v8, 7  ;;  %v7904_v22 = vrot.slane %v15057_v32, 6  ;;  %v16310_v2 = vld [vmem:[#allocation14_spill] sm:$0xff]  ;;  %v16313_v49 = vld [vmem:[#allocation15_spill] sm:$0xff] }
 0x161   : > { %v7883_v26 = vsel %vm5000_vm10, %v7882_v56, %v7881_v37  ;;  %v7893_v58 = vsel %vm4994_vm7, %v7892_v41, %v7891_v44  ;;  %v7901_v15 = vsel %vm4985_vm2, %v15053_v18, %v7900_v53  ;;  %v7906_v0 = vrot.slane %v15065_v30, 5  ;;  %v16311_v41 = vld [vmem:[#allocation10_spill] sm:$0xff]  ;;  %v16314_v53 = vld [vmem:[#allocation12_spill] sm:$0xff]  ;;  %v16315_v44 = vld [vmem:[#allocation11_spill] sm:$0xff] }
 0x162   : > { %v7885_v9 = vsel %vm5003_vm11, %v7884_v27, %v7883_v26  ;;  %v7895_v29 = vsel %vm4997_vm9, %v7894_v38, %v7893_v58  ;;  %v7903_v40 = vsel %vm4988_vm4, %v7902_v33, %v7901_v15  ;;  %v7908_v54 = vrot.slane %v15082_v59, 4 }
 0x163   : > { %v7897_v8 = vsel %vm5000_vm10, %v7896_v14, %v7895_v29  ;;  %v7905_v32 = vsel %vm4991_vm5, %v7904_v22, %v7903_v40  ;;  %v7910_v25 = vrot.slane %v15071_v31, 3  ;;  %v7912_v34 = vrot.slane %v15088_v24, 2  ;;  %v13387_v29 = vpop.f32.mrf.mxu1 }
 0x164   : > { %v7899_v18 = vsel %vm5003_vm11, %v7898_v19, %v7897_v8  ;;  %v7907_v30 = vsel %vm4994_vm7, %v7906_v0, %v7905_v32  ;;  %v7914_v63 = vrot.slane %v15067_v6, 1  ;;  %v7916_v7 = vrot.slane %v15099_v43, 7 }
 0x165   : > { %v7957_v20 = vpack.c.b16 %v7899_v18, %v7885_v9  ;;  %v7909_v55 = vsel %vm4997_vm9, %v7908_v54, %v7907_v30  ;;  %v7918_v59 = vrot.slane %v15103_v62, 6  ;;  %v7920_v4 = vrot.slane %v15111_v36, 5  ;;  %v5178_v40 = vpop.f32.mrf.mxu1  ;;  %v13708_v18 = vld [vmem:[%s16202_s3 + $0x18] sm:$0xff]  }
 0x166   : > { %v7911_v48 = vsel %vm5000_vm10, %v7910_v25, %v7909_v55  ;;  %v7915_v31 = vsel %vm4985_vm2, %v15094_v46, %v7914_v63  ;;  %v7922_v24 = vrot.slane %v15128_v23, 4  ;;  %v7924_v3 = vrot.slane %v15122_v50, 3 }
 0x167   : > { %13434 = vmatmul.mubr.msk.bf16.vlgmr.msra.gmra.mxu1 %vm16237_vm12, %v7957_v20  ;;  %v7913_v6 = vsel %vm5003_vm11, %v7912_v34, %v7911_v48  ;;  %v7917_v43 = vsel %vm4988_vm4, %v7916_v7, %v7915_v31  ;;  %v7926_v45 = vrot.slane %v15135_v61, 2  ;;  %v7928_v62 = vrot.slane %v15199_v57, 1  ;;  %v13388_v54 = vpop.f32.mrf.mxu1  ;;  %v13707_v34 = vld [vmem:[%s16202_s3 + $0x8] sm:$0xff]   ;;  %v13709_v7 = vld [vmem:[%s16202_s3] sm:$0xff]   ;;  %v13710_v20 = vld [vmem:[%s16202_s3 + $0x10] sm:$0xff]  }
 0x168   : > { %v7919_v36 = vsel %vm4991_vm5, %v7918_v59, %v7917_v43  ;;  %v7930_v35 = vrot.slane %v15203_v1, 7  ;;  %v7932_v46 = vrot.slane %v15208_v11, 6  ;;  %v7934_v23 = vrot.slane %v15210_v47, 5 }
 0x169   : > { %v7921_v50 = vsel %vm4994_vm7, %v7920_v4, %v7919_v36  ;;  %v7929_v56 = vsel %vm4985_vm2, %v15201_v17, %v7928_v62  ;;  %v7936_v27 = vrot.slane %v15221_v51, 4  ;;  %v7938_v39 = vrot.slane %v15226_v12, 3  ;;  %v5181_v8 = vpop.f32.mrf.mxu1 }
 0x16a   : > { %v7923_v61 = vsel %vm4997_vm9, %v7922_v24, %v7921_v50  ;;  %v7931_v57 = vsel %vm4988_vm4, %v7930_v35, %v7929_v56  ;;  %v7940_v60 = vrot.slane %v15239_v16, 2  ;;  %v7942_v1 = vrot.slane %v15216_v5, 1 }
 0x16b   : > { %v7925_v11 = vsel %vm5000_vm10, %v7924_v3, %v7923_v61  ;;  %v7933_v47 = vsel %vm4991_vm5, %v7932_v46, %v7931_v57  ;;  %v7944_v10 = vrot.slane %v15234_v21, 7  ;;  %v7946_v17 = vrot.slane %v16310_v2, 6 }
 0x16c   : > { %v7927_v51 = vsel %vm5003_vm11, %v7926_v45, %v7925_v11  ;;  %v7935_v12 = vsel %vm4994_vm7, %v7934_v23, %v7933_v47  ;;  %v7943_v42 = vsel %vm4985_vm2, %v16311_v41, %v7942_v1  ;;  %v7948_v38 = vrot.slane %v16312_v52, 5 }
 0x16d   : > { %v7958_v16 = vpack.c.b16 %v7927_v51, %v7913_v6  ;;  %v7937_v5 = vsel %vm4997_vm9, %v7936_v27, %v7935_v12  ;;  %v7945_v14 = vsel %vm4988_vm4, %v7944_v10, %v7943_v42  ;;  %v7950_v28 = vrot.slane %v16313_v49, 4  ;;  %v13391_v32 = vpop.f32.mrf.mxu1 }
 0x16e   : > { %v7939_v21 = vsel %vm5000_vm10, %v7938_v39, %v7937_v5  ;;  %v7947_v19 = vsel %vm4991_vm5, %v7946_v17, %v7945_v14  ;;  %v7952_v37 = vrot.slane %v16314_v53, 3  ;;  %v7954_v33 = vrot.slane %v16315_v44, 2 }
 0x16f   : > { %13437 = vmatprep.mubr.msk.bf16.mxu1 %vm16237_vm12, %v7958_v16  ;;  %v7949_v22 = vsel %vm4994_vm7, %v7948_v38, %v7947_v19  ;;  %v7941_v26 = vsel %vm5003_vm11, %v7940_v60, %v7939_v21  ;;  %v15408_v25 = vpop.f32.mrf.mxu1  ;;  %v13844_v63 = vmov 0.0   ;;  %v15439_v60 = vld [vmem:[%s16201_s2] ss:$0 sm:$0xff] }
 0x170   : > { %v7951_v58 = vsel %vm4997_vm9, %v7950_v28, %v7949_v22  ;;  %13449 = vmatprep.subr.bf16.mxu1 %v13844_v63  ;;  %13441 = vmatprep.subr.bf16.mxu0 %v13844_v63 }
 0x171   : > { %v7953_v15 = vsel %vm5000_vm10, %v7952_v37, %v7951_v58  ;;  %v15416_v30 = vpop.f32.mrf.mxu1  ;;  %13450 = vmatpush3.bf16.msra.mxu1 %v13707_v34  ;;  %13442 = vmatpush3.bf16.msra.mxu0 %v13708_v18 }
 0x172   : > { %v7955_v0 = vsel %vm5003_vm11, %v7954_v33, %v7953_v15  ;;  %13451 = vmatprep.subr.bf16.mxu1 %v13844_v63  ;;  %13443 = vmatprep.subr.bf16.mxu0 %v13844_v63 }
 0x173   : > { %v7959_v9 = vpack.c.b16 %v7955_v0, %v7941_v26  ;;  %13445 = vmatprep.mubr.msk.bf16.mxu0 %vm13845_vm0, %v13844_v63  ;;  %v15432_v55 = vpop.f32.mrf.mxu1 }
 0x175   : > { %13438 = vmatmul.mubr.msk.bf16.gmra.mxu1 %vm16237_vm12, %v7959_v9  ;;  %13444 = vmatpush3.bf16.msra.mxu0 %v13710_v20  ;;  %v13403_v59 = vpop.f32.mrf.mxu1  ;;  %vm8112_vm12 = vcmask 257024  }
 0x176   : > { %13453 = vmatprep.mubr.msk.bf16.mxu1 %vm13845_vm0, %v13844_v63  ;;  %13452 = vmatpush3.bf16.msra.mxu1 %v13709_v7  ;;  %v5404_v27 = vadd.f32 %v13403_v59, %v13387_v29 }
 0x177   : > { %13457 = vmatprep.subr.bf16.mxu0 %v13844_v63  ;;  %13465 = vmatprep.subr.bf16.mxu1 %v13844_v63  ;;  %v5395_v4 = vpop.f32.mrf.mxu1 }
 0x178   : > { %v5396_v39 = vadd.f32 %v5395_v4, %v5178_v40 }
 0x179   : > { %v13404_v48 = vpop.f32.mrf.mxu1 }
 0x17a   : > { %v5407_v1 = vadd.f32 %v13404_v48, %v13388_v54 }
 0x17b   : > { %v5398_v31 = vpop.f32.mrf.mxu1 }
 0x17c   : > { %v5399_v12 = vadd.f32 %v5398_v31, %v5181_v8 }
 0x183   : > { %v13407_v24 = vpop.f32.mrf.mxu1 }
 0x184   : > { %v5420_v21 = vadd.f32 %v13407_v24, %v13391_v32 }
 0x185   : > { %v5411_v3 = vpop.f32.mrf.mxu1 }
 0x186   : > { %v5412_v15 = vadd.f32 %v5411_v3, %v15408_v25 }
 0x187   : > { %v13408_v6 = vpop.f32.mrf.mxu1 }
 0x188   : > { %v5423_v40 = vadd.f32 %v13408_v6, %v15416_v30 }
 0x189   : > { %v5414_v43 = vpop.f32.mrf.mxu1 }
 0x18a   : > { %v5415_v18 = vadd.f32 %v5414_v43, %v15432_v55 }
 0x1c7   : > { %v13419_v45 = vpop.f32.mrf.mxu1 }
 0x1c8   : > { %v6742_v61 = vadd.f32 %v13419_v45, %v5404_v27 }
 0x1c9   : > { %v6709_v62 = vpop.f32.mrf.mxu1 }
 0x1ca   : > { %v6740_v11 = vadd.f32 %v6709_v62, %v5396_v39 }
 0x1cb   : > { %v13420_v36 = vpop.f32.mrf.mxu1 }
 0x1cc   : > { %v6743_v2 = vadd.f32 %v13420_v36, %v5407_v1 }
 0x1cd   : > { %v6712_v35 = vpop.f32.mrf.mxu1 }
 0x1ce   : > { %v6741_v52 = vadd.f32 %v6712_v35, %v5399_v12 }
 0x20b   : > { %v13423_v46 = vpop.f32.mrf.mxu1 }
 0x20c   : > { %v6746_v58 = vadd.f32 %v13423_v46, %v5420_v21 }
 0x20d   : > { %v6725_v23 = vpop.f32.mrf.mxu1 }
 0x20e   : > { %v6744_v7 = vadd.f32 %v6725_v23, %v5412_v15 }
 0x20f   : > { %v13424_v50 = vpop.f32.mrf.mxu1 }
 0x210   : > { %v6747_v20 = vadd.f32 %v13424_v50, %v5423_v40 }
 0x211   : > { %v6728_v56 = vpop.f32.mrf.mxu1 }
 0x212   : > { %v6745_v59 = vadd.f32 %v6728_v56, %v5415_v18 }
 0x227   : > { %v13435_v57 = vpop.f32.mrf.mxu1 }
 0x228   : > { %v8063_v47 = vadd.f32 %v13435_v57, %v6742_v61 }
 0x229   : > { %v8030_v10 = vpop.f32.mrf.mxu1 }
 0x22a   : > { %v8078_v17 = vadd.f32 %v15439_v60, %v8063_v47  ;;  %v8061_v51 = vadd.f32 %v8030_v10, %v6740_v11 }
 0x22b   : > { %v13436_v41 = vpop.f32.mrf.mxu1 }
 0x22c   : > { %v8064_v42 = vadd.f32 %v13436_v41, %v6743_v2  ;;  %v8076_v38 = vadd.f32 %v15439_v60, %v8061_v51  ;;  %v8094_v5 = vmul.f32 0.01, %v8078_v17  ;;  %vm8086_vm13 = vcmp.ge.f32.partialorder %v8078_v17, 0.0 }
 0x22d   : > { %v8033_v16 = vpop.f32.mrf.mxu1 }
 0x22e   : > { %v8079_v14 = vadd.f32 %v15439_v60, %v8064_v42  ;;  %v8062_v49 = vadd.f32 %v8033_v16, %v6741_v52  ;;  %v8092_v19 = vmul.f32 0.01, %v8076_v38  ;;  %v8102_v37 = vsel %vm8086_vm13, %v8078_v17, %v8094_v5  ;;  %vm8195_vm13 = vmor %vm8193_vm6, %vm4988_vm4 }
 0x22f   : > { %vm8084_vm15 = vcmp.ge.f32.partialorder %v8076_v38, 0.0 }
 0x230   : > { %vm8087_vm14 = vcmp.ge.f32.partialorder %v8079_v14, 0.0  ;;  %v8095_v28 = vmul.f32 0.01, %v8079_v14  ;;  %v8077_v53 = vadd.f32 %v15439_v60, %v8062_v49  ;;  %v8100_v0 = vsel %vm8084_vm15, %v8076_v38, %v8092_v19 }
 0x232   : > { %v8103_v44 = vsel %vm8087_vm14, %v8079_v14, %v8095_v28  ;;  %vm8085_vm8 = vcmp.ge.f32.partialorder %v8077_v53, 0.0  ;;  %v8093_v26 = vmul.f32 0.01, %v8077_v53  ;;  %vm8148_vm14 = vcmask 254976  }
 0x233   : > { %v8109_v33 = vpack.c.bf16 %v8103_v44, %v8102_v37  ;;  %v13249_v22 = vpack.c.bf16 %v8103_v44, %v8103_v44 }
 0x234   : > { %v8101_v9 = vsel %vm8085_vm8, %v8077_v53, %v8093_v26  ;;  %vm15457_vm8 = vmor %vm8195_vm13, %vm4994_vm7 }
 0x235   : > { %8121 = vst.msk [vmem:[#allocation3 + $0x8] sm:$0xf] %vm8112_vm12, %v8109_v33  ;;  %8127 = vst.msk [vmem:[#allocation3 + $0xc] sm:$0xf] %vm8112_vm12, %v13249_v22  ;;  %v13439_v29 = vpop.f32.mrf.mxu1  ;;  %v8108_v54 = vpack.c.bf16 %v8101_v9, %v8100_v0  ;;  %v13248_v8 = vpack.c.bf16 %v8101_v9, %v8101_v9 }
 0x236   : > { %v8067_v32 = vadd.f32 %v13439_v29, %v6746_v58  ;;  %vm15471_vm15 = vmor %vm15457_vm8, %vm5000_vm10 }
 0x237   : > { %v8046_v34 = vpop.f32.mrf.mxu1  ;;  %8113 = vst.msk [vmem:[#allocation3] sm:$0xf] %vm8112_vm12, %v8108_v54  ;;  %8119 = vst.msk [vmem:[#allocation3 + $0x4] sm:$0xf] %vm8112_vm12, %v13248_v8 }
 0x238   : > { %v15454_v4 = vadd.f32 %v15439_v60, %v8067_v32  ;;  %v8065_v30 = vadd.f32 %v8046_v34, %v6744_v7 }
 0x239   : > { %v13440_v25 = vpop.f32.mrf.mxu1 }
 0x23a   : > { %v8068_v48 = vadd.f32 %v13440_v25, %v6747_v20  ;;  %vm8090_vm6 = vcmp.ge.f32.partialorder %v15454_v4, 0.0  ;;  %v8080_v46 = vadd.f32 %v15439_v60, %v8065_v30  ;;  %v8098_v39 = vmul.f32 0.01, %v15454_v4 }
 0x23b   : > { %v8049_v55 = vpop.f32.mrf.mxu1 }
 0x23c   : > { %v8146_v24 = vld [vmem:[#allocation3 + $0x8] sm:$0x3]  ;;  %v8147_v3 = vld [vmem:[#allocation3 + $0xc] sm:$0x3]  ;;  %v8066_v43 = vadd.f32 %v8049_v55, %v6745_v59  ;;  %v8083_v23 = vadd.f32 %v15439_v60, %v8068_v48  ;;  %vm8088_vm13 = vcmp.ge.f32.partialorder %v8080_v46, 0.0  ;;  %v8106_v58 = vsel %vm8090_vm6, %v15454_v4, %v8098_v39 }
 0x23d   : > { %v8274_v6 = vld [vmem:[#allocation3 + $0x8] sm:$0x3]  ;;  %8151 = vst.msk [vmem:[#allocation4 + $0x4] sm:$0x3] %vm8148_vm14, %v8146_v24  ;;  %8152 = vst.msk [vmem:[#allocation4 + $0x6] sm:$0x3] %vm8148_vm14, %v8147_v3 }
 0x23e   : > { %v12936_v45 = vld.sshfl [vmem:[#allocation3 + $0x8] sm:$0x12 pattern:$0x76325410]  ;;  %v8275_v62 = vld [vmem:[#allocation3 + $0xc] sm:$0x3]  ;;  %v8081_v47 = vadd.f32 %v15439_v60, %v8066_v43 }
 0x23f   : > { %8279 = vst.msk [vmem:[#allocation4 + $0x18] sm:$0x3] %vm8148_vm14, %v8274_v6  ;;  %v12937_v36 = vld.sshfl [vmem:[#allocation3 + $0xc] sm:$0x12 pattern:$0x76325410]  ;;  %v8184_v35 = vcombine.high %v12936_v45, %v12936_v45 }
 0x240   : > { %8280 = vst.msk [vmem:[#allocation4 + $0x1a] sm:$0x3] %vm8148_vm14, %v8275_v62  ;;  %v8192_v50 = vcombine.high %v12937_v36, %v12937_v36  ;;  %v12944_v27 = vld.sshfl [vmem:[#allocation3 + $0x8] sm:$0x30 pattern:$0x76325410] }
 0x241   : > { %v12940_v61 = vrot.slane %v12936_v45, 9  ;;  %v8210_v57 = vrot.slane %v8184_v35, 7  ;;  %v12945_v1 = vld.sshfl [vmem:[#allocation3 + $0xc] sm:$0x30 pattern:$0x76325410]  ;;  %v8256_v11 = vcombine.high %v12944_v27, %v12944_v27 }
 0x242   : > { %v12941_v10 = vrot.slane %v12937_v36, 9  ;;  %v8214_v2 = vrot.slane %v8192_v50, 7  ;;  %v8264_v17 = vcombine.high %v12945_v1, %v12945_v1  ;;  %v8144_v51 = vld [vmem:[#allocation3] sm:$0x3]  ;;  %v8145_v12 = vld [vmem:[#allocation3 + $0x4] sm:$0x3] }
 0x243   : > { %v8211_v41 = vsel %vm15471_vm15, %v12940_v61, %v8210_v57  ;;  %8272 = vst.msk [vmem:[#allocation4 + $0x14] sm:$0x3] %vm8148_vm14, %v8256_v11  ;;  %8393 = vst.msk [vmem:[#allocation4 + $0x28] sm:$0x3] %vm8148_vm14, %v8256_v11  ;;  %vm8091_vm8 = vcmp.ge.f32.partialorder %v8083_v23, 0.0  ;;  %vm8089_vm1 = vcmp.ge.f32.partialorder %v8081_v47, 0.0 }
 0x244   : > { %8149 = vst.msk [vmem:[#allocation4] sm:$0x3] %vm8148_vm14, %v8144_v51  ;;  %8150 = vst.msk [vmem:[#allocation4 + $0x2] sm:$0x3] %vm8148_vm14, %v8145_v12  ;;  %v8215_v60 = vsel %vm15471_vm15, %v12941_v10, %v8214_v2  ;;  %v8096_v16 = vmul.f32 0.01, %v8080_v46 }
 0x245   : > { %v12934_v42 = vld.sshfl [vmem:[#allocation3] sm:$0x12 pattern:$0x76325410]  ;;  %8223 = vst.msk [vmem:[#allocation4 + $0xc] sm:$0x3] %vm8148_vm14, %v8211_v41 }
 0x246   : > { %8273 = vst.msk [vmem:[#allocation4 + $0x16] sm:$0x3] %vm8148_vm14, %v8264_v17  ;;  %8344 = vst.msk [vmem:[#allocation4 + $0x20] sm:$0x3] %vm8148_vm14, %v8211_v41  ;;  %v8168_v38 = vcombine.high %v12934_v42, %v12934_v42  ;;  %v12938_v14 = vrot.slane %v12934_v42, 9  ;;  %v8104_v9 = vsel %vm8088_vm13, %v8080_v46, %v8096_v16 }
 0x247   : > { %8394 = vst.msk [vmem:[#allocation4 + $0x2a] sm:$0x3] %vm8148_vm14, %v8264_v17  ;;  %v12935_v52 = vld.sshfl [vmem:[#allocation3 + $0x4] sm:$0x12 pattern:$0x76325410] }
 0x248   : > { %8224 = vst.msk [vmem:[#allocation4 + $0xe] sm:$0x3] %vm8148_vm14, %v8215_v60  ;;  %8345 = vst.msk [vmem:[#allocation4 + $0x22] sm:$0x3] %vm8148_vm14, %v8215_v60  ;;  %v8176_v5 = vcombine.high %v12935_v52, %v12935_v52  ;;  %v8202_v28 = vrot.slane %v8168_v38, 7  ;;  %v12939_v21 = vrot.slane %v12935_v52, 9 }
 0x249   : > { %v12942_v49 = vld.sshfl [vmem:[#allocation3] sm:$0x30 pattern:$0x76325410]  ;;  %v8099_v33 = vmul.f32 0.01, %v8083_v23 }
 0x24a   : > { %v12943_v19 = vld.sshfl [vmem:[#allocation3 + $0x4] sm:$0x30 pattern:$0x76325410]  ;;  %v8240_v53 = vcombine.high %v12942_v49, %v12942_v49  ;;  %v8206_v37 = vrot.slane %v8176_v5, 7  ;;  %v8203_v26 = vsel %vm15471_vm15, %v12938_v14, %v8202_v28 }
 0x24b   : > { %v8248_v44 = vcombine.high %v12943_v19, %v12943_v19  ;;  %v8097_v22 = vmul.f32 0.01, %v8081_v47  ;;  %v12973_v15 = vld.sshfl [vmem:[#allocation4 + $0x18] sm:$0x1 pattern:$0x76325410]  ;;  %v8107_v29 = vsel %vm8091_vm8, %v8083_v23, %v8099_v33 }
 0x24c   : > { %8270 = vst.msk [vmem:[#allocation4 + $0x10] sm:$0x3] %vm8148_vm14, %v8240_v53  ;;  %v8207_v0 = vsel %vm15471_vm15, %v12939_v21, %v8206_v37  ;;  %8221 = vst.msk [vmem:[#allocation4 + $0x8] sm:$0x3] %vm8148_vm14, %v8203_v26  ;;  %v8111_v8 = vpack.c.bf16 %v8107_v29, %v8106_v58  ;;  %v13251_v32 = vpack.c.bf16 %v8107_v29, %v8107_v29  ;;  %v8612_v25 = vunpack.c.l.b16 %v12973_v15 }
 0x24d   : > { %8271 = vst.msk [vmem:[#allocation4 + $0x12] sm:$0x3] %vm8148_vm14, %v8248_v44  ;;  %v8105_v40 = vsel %vm8089_vm1, %v8081_v47, %v8097_v22  ;;  %v15504_v54 = vld.sshfl [vmem:[#allocation4 + $0x18] sm:$0x2 pattern:$0x76325410] }
 0x24e   : > { %8222 = vst.msk [vmem:[#allocation4 + $0xa] sm:$0x3] %vm8148_vm14, %v8207_v0  ;;  %v8110_v34 = vpack.c.bf16 %v8105_v40, %v8104_v9  ;;  %v13250_v18 = vpack.c.bf16 %v8105_v40, %v8105_v40  ;;  %v12970_v7 = vld.sshfl [vmem:[#allocation4] sm:$0x1 pattern:$0x76325410]  ;;  %v8850_v48 = vunpack.c.l.b16 %v15504_v54 }
 0x24f   : > { %v15507_v20 = vld.sshfl [vmem:[#allocation4 + $0x20] sm:$0x1 pattern:$0x76325410]  ;;  %8137 = vst.msk [vmem:[#allocation3 + $0x18] sm:$0xf] %vm8112_vm12, %v8111_v8  ;;  %v8609_v59 = vunpack.c.l.b16 %v12970_v7 }
 0x250   : > { %8143 = vst.msk [vmem:[#allocation3 + $0x1c] sm:$0xf] %vm8112_vm12, %v13251_v32  ;;  %8129 = vst.msk [vmem:[#allocation3 + $0x10] sm:$0xf] %vm8112_vm12, %v8110_v34  ;;  %v8613_v4 = vunpack.c.l.b16 %v15507_v20  ;;  %v15517_v3 = vrot.slane %v8612_v25, 6  ;;  %v15519_v45 = vrot.slane %v8612_v25, 5 }
 0x251   : > { %8135 = vst.msk [vmem:[#allocation3 + $0x14] sm:$0xf] %vm8112_vm12, %v13250_v18  ;;  %v12985_v30 = vld.sshfl [vmem:[#allocation4] sm:$0x2 pattern:$0x76325410] }
 0x252   : > { %v8847_v31 = vunpack.c.l.b16 %v12985_v30  ;;  %v15515_v24 = vld.sshfl [vmem:[#allocation4 + $0x28] sm:$0x1 pattern:$0x76325410]  ;;  %v8618_v43 = vrot.slane %v8609_v59, 1  ;;  %v15523_v35 = vrot.slane %v8613_v4, 5 }
 0x253   : > { %v12972_v55 = vld.sshfl [vmem:[#allocation4 + $0x10] sm:$0x1 pattern:$0x76325410]  ;;  %v15527_v23 = vrot.slane %v8850_v48, 7  ;;  %v8614_v2 = vunpack.c.l.b16 %v15515_v24  ;;  %vm8646_vm1 = vcmask 261120  }
 0x254   : > { %v12971_v6 = vld.sshfl [vmem:[#allocation4 + $0x8] sm:$0x1 pattern:$0x76325410]  ;;  %v8611_v36 = vunpack.c.l.b16 %v12972_v55  ;;  %v8856_v39 = vrot.slane %v8847_v31, 2  ;;  %v15531_v61 = vrot.slane %v8847_v31, 3 }
 0x255   : > { %v8610_v62 = vunpack.c.l.b16 %v12971_v6  ;;  %v12986_v46 = vld.sshfl [vmem:[#allocation4 + $0x8] sm:$0x2 pattern:$0x76325410]  ;;  %vm16324_vm12 = vsmask.f32 4368 }
 0x256   : > { %v15529_v50 = vld.sshfl [vmem:[#allocation4 + $0x20] sm:$0x2 pattern:$0x76325410]  ;;  %v8848_v27 = vunpack.c.l.b16 %v12986_v46  ;;  %v8399_v57 = vld [vmem:[#allocation3 + $0x18] sm:$0x3] }
 0x257   : > { %v8400_v1 = vld [vmem:[#allocation3 + $0x1c] sm:$0x3]  ;;  %v8276_v11 = vld [vmem:[#allocation3 + $0x10] sm:$0x3]  ;;  %8404 = vst.msk [vmem:[#allocation4 + $0x34] sm:$0x3] %vm8148_vm14, %v8399_v57  ;;  %v8851_v60 = vunpack.c.l.b16 %v15529_v50  ;;  %v8619_v16 = vsel %vm4985_vm2, %v8610_v62, %v8618_v43 }
 0x258   : > { %8405 = vst.msk [vmem:[#allocation4 + $0x36] sm:$0x3] %vm8148_vm14, %v8400_v1  ;;  %v12960_v47 = vld.sshfl [vmem:[#allocation3 + $0x18] sm:$0x12 pattern:$0x76325410] }
 0x259   : > { %v8277_v10 = vld [vmem:[#allocation3 + $0x14] sm:$0x3]  ;;  %8281 = vst.msk [vmem:[#allocation4 + $0x1c] sm:$0x3] %vm8148_vm14, %v8276_v11  ;;  %v8437_v12 = vcombine.high %v12960_v47, %v12960_v47  ;;  %v8620_v41 = vrot.slane %v8611_v36, 7  ;;  %v8691_v42 = vrot.slane %v8610_v62, 7 }
 0x25a   : > { %v12987_v17 = vld.sshfl [vmem:[#allocation4 + $0x10] sm:$0x2 pattern:$0x76325410]  ;;  %8282 = vst.msk [vmem:[#allocation4 + $0x1e] sm:$0x3] %vm8148_vm14, %v8277_v10 }
 0x25b   : > { %v12961_v51 = vld.sshfl [vmem:[#allocation3 + $0x1c] sm:$0x12 pattern:$0x76325410]  ;;  %v8693_v5 = vrot.slane %v8611_v36, 6  ;;  %v8857_v14 = vrot.slane %v8848_v27, 1  ;;  %v8692_v53 = vsel %vm4985_vm2, %v8691_v42, %v8609_v59  ;;  %v8621_v9 = vsel %vm4988_vm4, %v8620_v41, %v8619_v16 }
 0x25c   : > { %v8445_v52 = vcombine.high %v12961_v51, %v12961_v51  ;;  %v12968_v38 = vld.sshfl [vmem:[#allocation3 + $0x18] sm:$0x30 pattern:$0x76325410]  ;;  %v12964_v49 = vrot.slane %v12960_v47, 9  ;;  %v8456_v28 = vrot.slane %v8437_v12, 7  ;;  %v8849_v29 = vunpack.c.l.b16 %v12987_v17 }
 0x25d   : > { %v12969_v21 = vld.sshfl [vmem:[#allocation3 + $0x1c] sm:$0x30 pattern:$0x76325410]  ;;  %v8502_v19 = vcombine.high %v12968_v38, %v12968_v38  ;;  %v12965_v37 = vrot.slane %v12961_v51, 9  ;;  %v8858_v26 = vsel %vm4985_vm2, %v8857_v14, %v8856_v39  ;;  %v8694_v18 = vsel %vm4988_vm4, %v8693_v5, %v8692_v53 }
 0x25e   : > { %v8460_v44 = vrot.slane %v8445_v52, 7  ;;  %v8510_v33 = vcombine.high %v12969_v21, %v12969_v21  ;;  %v12948_v22 = vld.sshfl [vmem:[#allocation3 + $0x10] sm:$0x12 pattern:$0x76325410]  ;;  %v8457_v58 = vsel %vm15471_vm15, %v12964_v49, %v8456_v28  ;;  %v8859_v31 = vsel %vm4988_vm4, %v8849_v29, %v8858_v26 }
 0x25f   : > { %8518 = vst.msk [vmem:[#allocation4 + $0x44] sm:$0x3] %vm8148_vm14, %v8502_v19  ;;  %v12949_v15 = vld.sshfl [vmem:[#allocation3 + $0x14] sm:$0x12 pattern:$0x76325410]  ;;  %v8314_v0 = vcombine.high %v12948_v22, %v12948_v22  ;;  %v8623_v36 = vsel %vm4991_vm5, %v15517_v3, %v8621_v9  ;;  %v8696_v57 = vsel %vm4991_vm5, %v15519_v45, %v8694_v18  ;;  %v8861_v45 = vsel %vm4991_vm5, %v15527_v23, %v8859_v31 }
 0x260   : > { %v8461_v40 = vsel %vm15471_vm15, %v12965_v37, %v8460_v44  ;;  %8469 = vst.msk [vmem:[#allocation4 + $0x3c] sm:$0x3] %vm8148_vm14, %v8457_v58  ;;  %8519 = vst.msk [vmem:[#allocation4 + $0x46] sm:$0x3] %vm8148_vm14, %v8510_v33  ;;  %v8322_v8 = vcombine.high %v12949_v15, %v12949_v15  ;;  %v12952_v32 = vrot.slane %v12948_v22, 9  ;;  %v12953_v25 = vrot.slane %v12949_v15, 9 }
 0x261   : > { %v12956_v34 = vld.sshfl [vmem:[#allocation3 + $0x10] sm:$0x30 pattern:$0x76325410]  ;;  %8470 = vst.msk [vmem:[#allocation4 + $0x3e] sm:$0x3] %vm8148_vm14, %v8461_v40  ;;  %v8625_v10 = vsel %vm4994_vm7, %v15523_v35, %v8623_v36 }
 0x262   : > { %v8333_v7 = vrot.slane %v8314_v0, 7  ;;  %v12957_v59 = vld.sshfl [vmem:[#allocation3 + $0x14] sm:$0x30 pattern:$0x76325410]  ;;  %v8379_v30 = vcombine.high %v12956_v34, %v12956_v34  ;;  %v8337_v55 = vrot.slane %v8322_v8, 7 }
 0x263   : > { %v8387_v6 = vcombine.high %v12957_v59, %v12957_v59  ;;  %v8397_v43 = vld [vmem:[#allocation3 + $0x10] sm:$0x3]  ;;  %v8398_v62 = vld [vmem:[#allocation3 + $0x14] sm:$0x3]  ;;  %v9025_v46 = vrot.slane %v8848_v27, 2  ;;  %v8697_v1 = vrot.slane %v8613_v4, 4 }
 0x264   : > { %v8334_v39 = vsel %vm15471_vm15, %v12952_v32, %v8333_v7  ;;  %8395 = vst.msk [vmem:[#allocation4 + $0x2c] sm:$0x3] %vm8148_vm14, %v8379_v30  ;;  %8402 = vst.msk [vmem:[#allocation4 + $0x30] sm:$0x3] %vm8148_vm14, %v8397_v43  ;;  %v9027_v3 = vrot.slane %v8849_v29, 1  ;;  %v8338_v27 = vsel %vm15471_vm15, %v12953_v25, %v8337_v55  ;;  %v8626_v17 = vrot.slane %v8614_v2, 4 }
 0x265   : > { %8403 = vst.msk [vmem:[#allocation4 + $0x32] sm:$0x3] %vm8148_vm14, %v8398_v62  ;;  %8516 = vst.msk [vmem:[#allocation4 + $0x40] sm:$0x3] %vm8148_vm14, %v8379_v30  ;;  %v9026_v20 = vsel %vm4985_vm2, %v9025_v46, %v15531_v61  ;;  %v8862_v51 = vrot.slane %v8851_v60, 6  ;;  %v8698_v41 = vsel %vm4994_vm7, %v8697_v1, %v8696_v57  ;;  %v8699_v61 = vrot.slane %v8614_v2, 3 }
 0x266   : > { %v12990_v11 = vld.sshfl [vmem:[#allocation4 + $0x28] sm:$0x2 pattern:$0x76325410]  ;;  %8346 = vst.msk [vmem:[#allocation4 + $0x24] sm:$0x3] %vm8148_vm14, %v8334_v39  ;;  %v9028_v12 = vsel %vm4988_vm4, %v9027_v3, %v9026_v20  ;;  %v8627_v28 = vsel %vm4997_vm9, %v8626_v17, %v8625_v10 }
 0x267   : > { %8396 = vst.msk [vmem:[#allocation4 + $0x2e] sm:$0x3] %vm8148_vm14, %v8387_v6  ;;  %8517 = vst.msk [vmem:[#allocation4 + $0x42] sm:$0x3] %vm8148_vm14, %v8387_v6  ;;  %v8852_v47 = vunpack.c.l.b16 %v12990_v11  ;;  %v8863_v16 = vsel %vm4994_vm7, %v8862_v51, %v8861_v45  ;;  %v9029_v35 = vsel %vm4991_vm5, %v8850_v48, %v9028_v12  ;;  %v9030_v5 = vrot.slane %v8851_v60, 7  ;;  %v13712_v45 = vld [vmem:[%s16202_s3 + $0x38] sm:$0xff]  }
 0x268   : > { %8467 = vst.msk [vmem:[#allocation4 + $0x38] sm:$0x3] %vm8148_vm14, %v8334_v39  ;;  %v13009_v4 = vld.sshfl [vmem:[#allocation4 + $0x2] sm:$0x1 pattern:$0x76325410]  ;;  %v8700_v53 = vsel %vm4997_vm9, %v8699_v61, %v8698_v41 }
 0x269   : > { %8347 = vst.msk [vmem:[#allocation4 + $0x26] sm:$0x3] %vm8148_vm14, %v8338_v27  ;;  %8468 = vst.msk [vmem:[#allocation4 + $0x3a] sm:$0x3] %vm8148_vm14, %v8338_v27  ;;  %v9184_v52 = vunpack.c.l.b16 %v13009_v4  ;;  %v8864_v21 = vrot.slane %v8852_v47, 5  ;;  %v9032_v37 = vrot.slane %v8852_v47, 6  ;;  %v9031_v33 = vsel %vm4994_vm7, %v9030_v5, %v9029_v35 }
 0x26a   : > { %v13010_v23 = vld.sshfl [vmem:[#allocation4 + $0xa] sm:$0x1 pattern:$0x76325410]  ;;  %v13714_v35 = vld [vmem:[%s16202_s3 + $0x30] sm:$0xff]  }
 0x26b   : > { %v13011_v42 = vld.sshfl [vmem:[#allocation4 + $0x12] sm:$0x1 pattern:$0x76325410]  ;;  %v9185_v38 = vunpack.c.l.b16 %v13010_v23  ;;  %v8865_v60 = vsel %vm4997_vm9, %v8864_v21, %v8863_v16  ;;  %v9360_v26 = vrot.slane %v9184_v52, 1  ;;  %v13711_v47 = vld [vmem:[%s16202_s3 + $0x28] sm:$0xff]  }
 0x26c   : > { %v13012_v14 = vld.sshfl [vmem:[#allocation4 + $0x1a] sm:$0x1 pattern:$0x76325410]  ;;  %v9186_v49 = vunpack.c.l.b16 %v13011_v42  ;;  %v9033_v42 = vsel %vm4997_vm9, %v9032_v37, %v9031_v33  ;;  %v13713_v16 = vld [vmem:[%s16202_s3 + $0x20] sm:$0xff]  }
 0x26d   : > { %v15594_v24 = vld.sshfl [vmem:[#allocation4 + $0x22] sm:$0x1 pattern:$0x76325410]  ;;  %v9187_v2 = vunpack.c.l.b16 %v13012_v14  ;;  %v9193_v19 = vrot.slane %v9185_v38, 7  ;;  %v9361_v34 = vsel %vm4985_vm2, %v9185_v38, %v9360_v26 }
 0x26e   : > { %v15597_v44 = vld.sshfl [vmem:[#allocation4 + $0x2a] sm:$0x1 pattern:$0x76325410]  ;;  %v9188_v54 = vunpack.c.l.b16 %v15594_v24  ;;  %v9195_v48 = vrot.slane %v9186_v49, 6  ;;  %v9362_v29 = vrot.slane %v9186_v49, 7 }
 0x26f   : > { %v12976_v50 = vld.sshfl [vmem:[#allocation4 + $0x30] sm:$0x1 pattern:$0x76325410]  ;;  %v9194_v22 = vsel %vm4985_vm2, %v9193_v19, %v9184_v52  ;;  %v9197_v9 = vrot.slane %v9187_v2, 5  ;;  %v9364_v18 = vrot.slane %v9187_v2, 6  ;;  %v9189_v31 = vunpack.c.l.b16 %v15597_v44 }
 0x270   : > { %v12977_v58 = vld.sshfl [vmem:[#allocation4 + $0x38] sm:$0x1 pattern:$0x76325410]  ;;  %v8615_v15 = vunpack.c.l.b16 %v12976_v50  ;;  %v9196_v0 = vsel %vm4988_vm4, %v9195_v48, %v9194_v22  ;;  %v9199_v32 = vrot.slane %v9188_v54, 4  ;;  %v9363_v10 = vsel %vm4988_vm4, %v9362_v29, %v9361_v34 }
 0x271   : > { %v12978_v40 = vld.sshfl [vmem:[#allocation4 + $0x40] sm:$0x1 pattern:$0x76325410]  ;;  %v8616_v8 = vunpack.c.l.b16 %v12977_v58  ;;  %v9198_v36 = vsel %vm4991_vm5, %v9197_v9, %v9196_v0  ;;  %v9201_v38 = vrot.slane %v9189_v31, 3  ;;  %v9366_v19 = vrot.slane %v9188_v54, 5 }
 0x272   : > { %v8617_v7 = vunpack.c.l.b16 %v12978_v40  ;;  %v8628_v25 = vrot.slane %v8615_v15, 3  ;;  %v8701_v59 = vrot.slane %v8615_v15, 2  ;;  %v12991_v30 = vld.sshfl [vmem:[#allocation4 + $0x30] sm:$0x2 pattern:$0x76325410]  ;;  %v9200_v41 = vsel %vm4994_vm7, %v9199_v32, %v9198_v36 }
 0x273   : > { %v8630_v55 = vrot.slane %v8616_v8, 2  ;;  %v8703_v6 = vrot.slane %v8616_v8, 1  ;;  %v12992_v43 = vld.sshfl [vmem:[#allocation4 + $0x38] sm:$0x2 pattern:$0x76325410]  ;;  %v8853_v62 = vunpack.c.l.b16 %v12991_v30  ;;  %v9202_v2 = vsel %vm4997_vm9, %v9201_v38, %v9200_v41 }
 0x274   : > { %v8629_v46 = vsel %vm5000_vm10, %v8628_v25, %v8627_v28  ;;  %v8632_v39 = vrot.slane %v8617_v7, 1  ;;  %v8702_v57 = vsel %vm5000_vm10, %v8701_v59, %v8700_v53  ;;  %v12993_v1 = vld.sshfl [vmem:[#allocation4 + $0x40] sm:$0x2 pattern:$0x76325410]  ;;  %v8854_v11 = vunpack.c.l.b16 %v12992_v43  ;;  %v13715_v8 = vld [vmem:[%s16202_s3 + $0x48] sm:$0xff]  }
 0x275   : > { %v8631_v3 = vsel %vm5003_vm11, %v8630_v55, %v8629_v46  ;;  %v8704_v27 = vsel %vm5003_vm11, %v8703_v6, %v8702_v57  ;;  %v8855_v20 = vunpack.c.l.b16 %v12993_v1  ;;  %v13015_v4 = vld.sshfl [vmem:[#allocation4 + $0x32] sm:$0x1 pattern:$0x76325410]  ;;  %v8866_v61 = vrot.slane %v8853_v62, 4  ;;  %v13716_v32 = vld [vmem:[%s16202_s3 + $0x58] sm:$0xff]  }
 0x276   : > { %v8633_v17 = vpack.c.b16 %v8632_v39, %v8631_v3  ;;  %v8705_v51 = vpack.c.b16 %v8617_v7, %v8704_v27  ;;  %v8868_v12 = vrot.slane %v8854_v11, 3  ;;  %v13016_v23 = vld.sshfl [vmem:[#allocation4 + $0x3a] sm:$0x1 pattern:$0x76325410]  ;;  %v9036_v52 = vrot.slane %v8854_v11, 4 }
 0x277   : > { %v9034_v5 = vrot.slane %v8853_v62, 5  ;;  %v9190_v14 = vunpack.c.l.b16 %v13015_v4  ;;  %v9191_v49 = vunpack.c.l.b16 %v13016_v23  ;;  %v9365_v28 = vsel %vm4991_vm5, %v9364_v18, %v9363_v10  ;;  %v13033_v53 = vld.sshfl [vmem:[#allocation4 + $0x2] sm:$0x2 pattern:$0x76325410]  ;;  %v13718_v43 = vld [vmem:[%s16202_s3 + $0x50] sm:$0xff]  }
 0x278   : > { %13446 = vmatmul.mubr.msk.bf16.vlgmr.msra.gmra.mxu0 %vm8646_vm1, %v8633_v17  ;;  %13454 = vmatmul.mubr.msk.bf16.vlgmr.msra.gmra.mxu1 %vm8646_vm1, %v8705_v51  ;;  %v8867_v21 = vsel %vm5000_vm10, %v8866_v61, %v8865_v60  ;;  %v8870_v24 = vrot.slane %v8855_v20, 2  ;;  %v9368_v50 = vrot.slane %v9189_v31, 4  ;;  %v15640_v54 = vld.sshfl [vmem:[#allocation4 + $0x42] sm:$0x1 pattern:$0x76325410]  ;;  %v9367_v22 = vsel %vm4994_vm7, %v9366_v19, %v9365_v28 }
 0x279   : > { %13458 = vmatpush3.bf16.msra.mxu0 %v13711_v47  ;;  %13466 = vmatpush3.bf16.msra.mxu1 %v13712_v45  ;;  %v8869_v37 = vsel %vm5003_vm11, %v8868_v12, %v8867_v21  ;;  %v9035_v44 = vsel %vm5000_vm10, %v9034_v5, %v9033_v42  ;;  %v9205_v48 = vrot.slane %v9191_v49, 1  ;;  %v9203_v33 = vrot.slane %v9190_v14, 2  ;;  %v13034_v9 = vld.sshfl [vmem:[#allocation4 + $0xa] sm:$0x2 pattern:$0x76325410] }
 0x27a   : > { %13459 = vmatprep.subr.bf16.mxu0 %v13844_v63  ;;  %13467 = vmatprep.subr.bf16.mxu1 %v13844_v63  ;;  %v9037_v60 = vsel %vm5003_vm11, %v9036_v52, %v9035_v44  ;;  %v9370_v26 = vrot.slane %v9190_v14, 3  ;;  %v9038_v58 = vrot.slane %v8855_v20, 3  ;;  %v9369_v15 = vsel %vm4997_vm9, %v9368_v50, %v9367_v22  ;;  %v13035_v18 = vld.sshfl [vmem:[#allocation4 + $0x12] sm:$0x2 pattern:$0x76325410] }
 0x27b   : > { %13461 = vmatprep.mubr.msk.bf16.mxu0 %vm13845_vm0, %v13844_v63  ;;  %13469 = vmatprep.mubr.msk.bf16.mxu1 %vm13845_vm0, %v13844_v63  ;;  %v9372_v0 = vrot.slane %v9191_v49, 2  ;;  %v9519_v29 = vunpack.c.l.b16 %v13033_v53  ;;  %v8871_v40 = vpack.c.b16 %v8870_v24, %v8869_v37  ;;  %v9204_v34 = vsel %vm5000_vm10, %v9203_v33, %v9202_v2  ;;  %v13036_v31 = vld.sshfl [vmem:[#allocation4 + $0x1a] sm:$0x2 pattern:$0x76325410]  ;;  %v13717_v6 = vld [vmem:[%s16202_s3 + $0x40] sm:$0xff]  }
 0x27c   : > { %v9520_v7 = vunpack.c.l.b16 %v13034_v9  ;;  %v9039_v25 = vpack.c.b16 %v9038_v58, %v9037_v60  ;;  %v9192_v59 = vunpack.c.l.b16 %v15640_v54  ;;  %v9206_v30 = vsel %vm5003_vm11, %v9205_v48, %v9204_v34  ;;  %v13037_v36 = vld.sshfl [vmem:[#allocation4 + $0x22] sm:$0x2 pattern:$0x76325410]  ;;  %v13719_v24 = vld [vmem:[%s16202_s3 + $0x68] sm:$0xff]   ;;  %v13720_v2 = vld [vmem:[%s16202_s3 + $0x78] sm:$0xff]  }
 0x27d   : > { %13460 = vmatpush3.bf16.msra.mxu0 %v13713_v16  ;;  %13468 = vmatpush3.bf16.msra.mxu1 %v13714_v35  ;;  %v9521_v55 = vunpack.c.l.b16 %v13035_v18  ;;  %v9371_v62 = vsel %vm5000_vm10, %v9370_v26, %v9369_v15  ;;  %v9522_v46 = vunpack.c.l.b16 %v13036_v31  ;;  %v9528_v39 = vrot.slane %v9519_v29, 2  ;;  %v13038_v11 = vld.sshfl [vmem:[#allocation4 + $0x2a] sm:$0x2 pattern:$0x76325410]  ;;  %v13722_v9 = vld [vmem:[%s16202_s3 + $0x70] sm:$0xff]  }
 0x27e   : > { %13473 = vmatprep.subr.bf16.mxu0 %v13844_v63  ;;  %13481 = vmatprep.subr.bf16.mxu1 %v13844_v63  ;;  %v9529_v57 = vrot.slane %v9520_v7, 1  ;;  %v9373_v1 = vsel %vm5003_vm11, %v9372_v0, %v9371_v62  ;;  %v9523_v3 = vunpack.c.l.b16 %v13037_v36  ;;  %v9696_v27 = vrot.slane %v9519_v29, 3  ;;  %v13039_v45 = vld.sshfl [vmem:[#allocation4 + $0x32] sm:$0x2 pattern:$0x76325410] }
 0x27f   : > { %v9697_v47 = vrot.slane %v9520_v7, 2  ;;  %v9524_v20 = vunpack.c.l.b16 %v13038_v11  ;;  %v9532_v10 = vrot.slane %v9522_v46, 7  ;;  %v9699_v17 = vrot.slane %v9521_v55, 1  ;;  %v13721_v0 = vld [vmem:[%s16202_s3 + $0x60] sm:$0xff]   ;;  %v13724_v11 = vld [vmem:[%s16202_s3 + $0x98] sm:$0xff]  }
 0x280   : > { %13462 = vmatmul.mubr.msk.bf16.vlgmr.msra.gmra.mxu0 %vm8646_vm1, %v8871_v40  ;;  %13470 = vmatmul.mubr.msk.bf16.vlgmr.msra.gmra.mxu1 %vm8646_vm1, %v9039_v25  ;;  %v9530_v4 = vsel %vm4985_vm2, %v9529_v57, %v9528_v39  ;;  %v13040_v51 = vld.sshfl [vmem:[#allocation4 + $0x3a] sm:$0x2 pattern:$0x76325410]  ;;  %v9525_v12 = vunpack.c.l.b16 %v13039_v45  ;;  %v9534_v41 = vrot.slane %v9523_v3, 6  ;;  %v9374_v5 = vrot.slane %v9192_v59, 1 }
 0x281   : > { %13474 = vmatpush3.bf16.msra.mxu0 %v13715_v8  ;;  %13482 = vmatpush3.bf16.msra.mxu1 %v13716_v32  ;;  %v9531_v23 = vsel %vm4988_vm4, %v9521_v55, %v9530_v4  ;;  %v9698_v61 = vsel %vm4985_vm2, %v9697_v47, %v9696_v27  ;;  %v13041_v42 = vld.sshfl [vmem:[#allocation4 + $0x42] sm:$0x2 pattern:$0x76325410]  ;;  %v9526_v52 = vunpack.c.l.b16 %v13040_v51  ;;  %v9536_v16 = vrot.slane %v9524_v20, 5 }
 0x282   : > { %13475 = vmatprep.subr.bf16.mxu0 %v13844_v63  ;;  %13483 = vmatprep.subr.bf16.mxu1 %v13844_v63  ;;  %v9533_v38 = vsel %vm4991_vm5, %v9532_v10, %v9531_v23  ;;  %v9700_v35 = vsel %vm4988_vm4, %v9699_v17, %v9698_v61  ;;  %v9527_v14 = vunpack.c.l.b16 %v13041_v42  ;;  %v13057_v21 = vld.sshfl [vmem:[#allocation4 + $0x4] sm:$0x1 pattern:$0x76325410]  ;;  %v9538_v53 = vrot.slane %v9525_v12, 4 }
 0x283   : > { %13477 = vmatprep.mubr.msk.bf16.mxu0 %vm13845_vm0, %v13844_v63  ;;  %13485 = vmatprep.mubr.msk.bf16.mxu1 %vm13845_vm0, %v13844_v63  ;;  %v9535_v49 = vsel %vm4994_vm7, %v9534_v41, %v9533_v38  ;;  %v9701_v28 = vsel %vm4991_vm5, %v9522_v46, %v9700_v35  ;;  %v9540_v37 = vrot.slane %v9526_v52, 3  ;;  %v9702_v44 = vrot.slane %v9523_v3, 7  ;;  %v13058_v58 = vld.sshfl [vmem:[#allocation4 + $0xc] sm:$0x1 pattern:$0x76325410] }
 0x284   : > { %v9537_v19 = vsel %vm4997_vm9, %v9536_v16, %v9535_v49  ;;  %v9207_v48 = vpack.c.b16 %v9192_v59, %v9206_v30  ;;  %v9375_v50 = vpack.c.b16 %v9374_v5, %v9373_v1  ;;  %v9704_v60 = vrot.slane %v9524_v20, 6  ;;  %v13059_v8 = vld.sshfl [vmem:[#allocation4 + $0x14] sm:$0x1 pattern:$0x76325410]  ;;  %v13723_v46 = vld [vmem:[%s16202_s3 + $0x88] sm:$0xff]  }
 0x285   : > { %13476 = vmatpush3.bf16.msra.mxu0 %v13717_v6  ;;  %13484 = vmatpush3.bf16.msra.mxu1 %v13718_v43  ;;  %v9708_v54 = vrot.slane %v9526_v52, 4  ;;  %v9539_v33 = vsel %vm5000_vm10, %v9538_v53, %v9537_v19  ;;  %v9703_v22 = vsel %vm4994_vm7, %v9702_v44, %v9701_v28  ;;  %v9706_v26 = vrot.slane %v9525_v12, 5  ;;  %v13060_v25 = vld.sshfl [vmem:[#allocation4 + $0x1c] sm:$0x1 pattern:$0x76325410] }
 0x286   : > { %13489 = vmatprep.subr.bf16.mxu0 %v13844_v63  ;;  %13497 = vmatprep.subr.bf16.mxu1 %v13844_v63  ;;  %v9856_v15 = vunpack.c.l.b16 %v13057_v21  ;;  %v9541_v29 = vsel %vm5003_vm11, %v9540_v37, %v9539_v33  ;;  %v9705_v40 = vsel %vm4997_vm9, %v9704_v60, %v9703_v22  ;;  %v9857_v32 = vunpack.c.l.b16 %v13058_v58  ;;  %v13061_v31 = vld.sshfl [vmem:[#allocation4 + $0x24] sm:$0x1 pattern:$0x76325410]  ;;  %v13727_v58 = vld [vmem:[%s16202_s3 + $0xa8] sm:$0xff]  }
 0x287   : > { %v9542_v34 = vrot.slane %v9527_v14, 2  ;;  %v9707_v18 = vsel %vm5000_vm10, %v9706_v26, %v9705_v40  ;;  %v9710_v7 = vrot.slane %v9527_v14, 3  ;;  %v9858_v59 = vunpack.c.l.b16 %v13059_v8  ;;  %v13062_v39 = vld.sshfl [vmem:[#allocation4 + $0x2c] sm:$0x1 pattern:$0x76325410] }
 0x288   : > { %13478 = vmatmul.mubr.msk.bf16.vlgmr.msra.gmra.mxu0 %vm8646_vm1, %v9207_v48  ;;  %13486 = vmatmul.mubr.msk.bf16.vlgmr.msra.gmra.mxu1 %vm8646_vm1, %v9375_v50  ;;  %v9709_v30 = vsel %vm5003_vm11, %v9708_v54, %v9707_v18  ;;  %v9859_v55 = vunpack.c.l.b16 %v13060_v25  ;;  %v9865_v6 = vrot.slane %v9857_v32, 7  ;;  %v10032_v43 = vrot.slane %v9856_v15, 1  ;;  %v13063_v3 = vld.sshfl [vmem:[#allocation4 + $0x34] sm:$0x1 pattern:$0x76325410] }
 0x289   : > { %13490 = vmatpush3.bf16.msra.mxu0 %v13719_v24  ;;  %13498 = vmatpush3.bf16.msra.mxu1 %v13720_v2  ;;  %v9543_v62 = vpack.c.b16 %v9542_v34, %v9541_v29  ;;  %v9711_v36 = vpack.c.b16 %v9710_v7, %v9709_v30  ;;  %v9860_v57 = vunpack.c.l.b16 %v13061_v31  ;;  %v9867_v1 = vrot.slane %v9858_v59, 6  ;;  %v13064_v4 = vld.sshfl [vmem:[#allocation4 + $0x3c] sm:$0x1 pattern:$0x76325410]  ;;  %v13725_v21 = vld [vmem:[%s16202_s3 + $0x80] sm:$0xff]  }
 0x28a   : > { %13491 = vmatprep.subr.bf16.mxu0 %v13844_v63  ;;  %13499 = vmatprep.subr.bf16.mxu1 %v13844_v63  ;;  %v9861_v27 = vunpack.c.l.b16 %v13062_v39  ;;  %v9866_v47 = vsel %vm4985_vm2, %v9865_v6, %v9856_v15  ;;  %v9869_v45 = vrot.slane %v9859_v55, 5  ;;  %v10033_v20 = vsel %vm4985_vm2, %v9857_v32, %v10032_v43  ;;  %v13065_v23 = vld.sshfl [vmem:[#allocation4 + $0x44] sm:$0x1 pattern:$0x76325410]  ;;  %v13726_v24 = vld [vmem:[%s16202_s3 + $0x90] sm:$0xff]  }
 0x28b   : > { %13493 = vmatprep.mubr.msk.bf16.mxu0 %vm13845_vm0, %v13844_v63  ;;  %13501 = vmatprep.mubr.msk.bf16.mxu1 %vm13845_vm0, %v13844_v63  ;;  %v9862_v10 = vunpack.c.l.b16 %v13063_v3  ;;  %v9868_v17 = vsel %vm4988_vm4, %v9867_v1, %v9866_v47  ;;  %v9871_v51 = vrot.slane %v9860_v57, 4  ;;  %v10036_v12 = vrot.slane %v9859_v55, 6  ;;  %v13081_v5 = vld.sshfl [vmem:[#allocation4 + $0x4] sm:$0x2 pattern:$0x76325410] }
 0x28c   : > { %v9863_v41 = vunpack.c.l.b16 %v13064_v4  ;;  %v9870_v61 = vsel %vm4991_vm5, %v9869_v45, %v9868_v17  ;;  %v9873_v42 = vrot.slane %v9861_v27, 3  ;;  %v10034_v52 = vrot.slane %v9858_v59, 7  ;;  %v13082_v60 = vld.sshfl [vmem:[#allocation4 + $0xc] sm:$0x2 pattern:$0x76325410] }
 0x28d   : > { %13492 = vmatpush3.bf16.msra.mxu0 %v13721_v0  ;;  %13500 = vmatpush3.bf16.msra.mxu1 %v13722_v9  ;;  %v9864_v38 = vunpack.c.l.b16 %v13065_v23  ;;  %v9872_v16 = vsel %vm4994_vm7, %v9871_v51, %v9870_v61  ;;  %v9875_v35 = vrot.slane %v9862_v10, 2  ;;  %v10038_v28 = vrot.slane %v9860_v57, 5  ;;  %v13728_v15 = vld [vmem:[%s16202_s3 + $0xb8] sm:$0xff]   ;;  %v13730_v4 = vld [vmem:[%s16202_s3 + $0xb0] sm:$0xff]  }
 0x28e   : > { %13505 = vmatprep.subr.bf16.mxu0 %v13844_v63  ;;  %13513 = vmatprep.subr.bf16.mxu1 %v13844_v63  ;;  %v9874_v14 = vsel %vm4997_vm9, %v9873_v42, %v9872_v16  ;;  %v10035_v49 = vsel %vm4988_vm4, %v10034_v52, %v10033_v20  ;;  %v9877_v19 = vrot.slane %v9863_v41, 1  ;;  %v10040_v37 = vrot.slane %v9861_v27, 4  ;;  %v13083_v0 = vld.sshfl [vmem:[#allocation4 + $0x14] sm:$0x2 pattern:$0x76325410] }
 0x28f   : > { %v9876_v2 = vsel %vm5000_vm10, %v9875_v35, %v9874_v14  ;;  %v10037_v53 = vsel %vm4991_vm5, %v10036_v12, %v10035_v49  ;;  %v10042_v48 = vrot.slane %v9862_v10, 3  ;;  %v10044_v50 = vrot.slane %v9863_v41, 2  ;;  %v13084_v40 = vld.sshfl [vmem:[#allocation4 + $0x1c] sm:$0x2 pattern:$0x76325410] }
 0x290   : > { %13494 = vmatmul.mubr.msk.bf16.vlgmr.msra.gmra.mxu0 %vm8646_vm1, %v9543_v62  ;;  %13502 = vmatmul.mubr.msk.bf16.vlgmr.msra.gmra.mxu1 %vm8646_vm1, %v9711_v36  ;;  %v10039_v44 = vsel %vm4994_vm7, %v10038_v28, %v10037_v53  ;;  %v10191_v54 = vunpack.c.l.b16 %v13081_v5  ;;  %v9878_v33 = vsel %vm5003_vm11, %v9877_v19, %v9876_v2  ;;  %v10046_v26 = vrot.slane %v9864_v38, 1  ;;  %v13085_v7 = vld.sshfl [vmem:[#allocation4 + $0x24] sm:$0x2 pattern:$0x76325410] }
 0x291   : > { %13506 = vmatpush3.bf16.msra.mxu0 %v13723_v46  ;;  %13514 = vmatpush3.bf16.msra.mxu1 %v13724_v11  ;;  %v10041_v22 = vsel %vm4997_vm9, %v10040_v37, %v10039_v44  ;;  %v10192_v9 = vunpack.c.l.b16 %v13082_v60  ;;  %v10193_v8 = vunpack.c.l.b16 %v13083_v0  ;;  %v10194_v25 = vunpack.c.l.b16 %v13084_v40  ;;  %v13086_v6 = vld.sshfl [vmem:[#allocation4 + $0x2c] sm:$0x2 pattern:$0x76325410]  ;;  %v13729_v11 = vld [vmem:[%s16202_s3 + $0xa0] sm:$0xff]  }
 0x292   : > { %13507 = vmatprep.subr.bf16.mxu0 %v13844_v63  ;;  %13515 = vmatprep.subr.bf16.mxu1 %v13844_v63  ;;  %v10043_v29 = vsel %vm5000_vm10, %v10042_v48, %v10041_v22  ;;  %v10200_v32 = vrot.slane %v10191_v54, 2  ;;  %v10368_v34 = vrot.slane %v10191_v54, 3  ;;  %v9879_v31 = vpack.c.b16 %v9864_v38, %v9878_v33  ;;  %v13087_v36 = vld.sshfl [vmem:[#allocation4 + $0x34] sm:$0x2 pattern:$0x76325410] }
 0x293   : > { %13509 = vmatprep.mubr.msk.bf16.mxu0 %vm13845_vm0, %v13844_v63  ;;  %13517 = vmatprep.mubr.msk.bf16.mxu1 %vm13845_vm0, %v13844_v63  ;;  %v10045_v18 = vsel %vm5003_vm11, %v10044_v50, %v10043_v29  ;;  %v10201_v59 = vrot.slane %v10192_v9, 1  ;;  %v10369_v30 = vrot.slane %v10192_v9, 2  ;;  %v10195_v43 = vunpack.c.l.b16 %v13085_v7  ;;  %v13088_v3 = vld.sshfl [vmem:[#allocation4 + $0x3c] sm:$0x2 pattern:$0x76325410] }
 0x294   : > { %v10047_v55 = vpack.c.b16 %v10046_v26, %v10045_v18  ;;  %v10371_v62 = vrot.slane %v10193_v8, 1  ;;  %v10196_v46 = vunpack.c.l.b16 %v13086_v6  ;;  %v10204_v57 = vrot.slane %v10194_v25, 7  ;;  %v13089_v10 = vld.sshfl [vmem:[#allocation4 + $0x44] sm:$0x2 pattern:$0x76325410] }
 0x295   : > { %13508 = vmatpush3.bf16.msra.mxu0 %v13725_v21  ;;  %13516 = vmatpush3.bf16.msra.mxu1 %v13726_v24  ;;  %v10202_v39 = vsel %vm4985_vm2, %v10201_v59, %v10200_v32  ;;  %v10370_v1 = vsel %vm4985_vm2, %v10369_v30, %v10368_v34  ;;  %v10197_v27 = vunpack.c.l.b16 %v13087_v36  ;;  %v10206_v45 = vrot.slane %v10195_v43, 6  ;;  %v13105_v38 = vld.sshfl [vmem:[#allocation4 + $0x6] sm:$0x1 pattern:$0x76325410]  ;;  %v13731_v44 = vld [vmem:[%s16202_s3 + $0xc8] sm:$0xff]  }
 0x296   : > { %13521 = vmatprep.subr.bf16.mxu0 %v13844_v63  ;;  %13529 = vmatprep.subr.bf16.mxu1 %v13844_v63  ;;  %v10203_v47 = vsel %vm4988_vm4, %v10193_v8, %v10202_v39  ;;  %v10372_v20 = vsel %vm4988_vm4, %v10371_v62, %v10370_v1  ;;  %v10198_v17 = vunpack.c.l.b16 %v13088_v3  ;;  %v10208_v12 = vrot.slane %v10196_v46, 5  ;;  %v13106_v2 = vld.sshfl [vmem:[#allocation4 + $0xe] sm:$0x1 pattern:$0x76325410]  ;;  %v13732_v33 = vld [vmem:[%s16202_s3 + $0xd8] sm:$0xff]  }
 0x297   : > { %v10205_v51 = vsel %vm4991_vm5, %v10204_v57, %v10203_v47  ;;  %v10373_v23 = vsel %vm4991_vm5, %v10194_v25, %v10372_v20  ;;  %v10199_v41 = vunpack.c.l.b16 %v13089_v10  ;;  %v10210_v42 = vrot.slane %v10197_v27, 4  ;;  %v13107_v48 = vld.sshfl [vmem:[#allocation4 + $0x16] sm:$0x1 pattern:$0x76325410]  ;;  %v13733_v0 = vld [vmem:[%s16202_s3 + $0xc0] sm:$0xff]  }
 0x298   : > { %13510 = vmatmul.mubr.msk.bf16.vlgmr.msra.gmra.mxu0 %vm8646_vm1, %v9879_v31  ;;  %13518 = vmatmul.mubr.msk.bf16.vlgmr.msra.gmra.mxu1 %vm8646_vm1, %v10047_v55  ;;  %v10207_v61 = vsel %vm4994_vm7, %v10206_v45, %v10205_v51  ;;  %v10374_v52 = vrot.slane %v10195_v43, 7  ;;  %v10212_v35 = vrot.slane %v10198_v17, 3  ;;  %v10376_v5 = vrot.slane %v10196_v46, 6  ;;  %v13734_v39 = vld [vmem:[%s16202_s3 + $0xd0] sm:$0xff]  }
 0x299   : > { %13522 = vmatpush3.bf16.msra.mxu0 %v13727_v58  ;;  %13530 = vmatpush3.bf16.msra.mxu1 %v13728_v15  ;;  %v10209_v16 = vsel %vm4997_vm9, %v10208_v12, %v10207_v61  ;;  %v10378_v14 = vrot.slane %v10197_v27, 5  ;;  %v10214_v28 = vrot.slane %v10199_v41, 2  ;;  %v10380_v24 = vrot.slane %v10198_v17, 4 }
 0x29a   : > { %13523 = vmatprep.subr.bf16.mxu0 %v13844_v63  ;;  %13531 = vmatprep.subr.bf16.mxu1 %v13844_v63  ;;  %v10211_v49 = vsel %vm5000_vm10, %v10210_v42, %v10209_v16  ;;  %v10375_v21 = vsel %vm4994_vm7, %v10374_v52, %v10373_v23  ;;  %v10382_v37 = vrot.slane %v10199_v41, 3  ;;  %v10528_v50 = vunpack.c.l.b16 %v13105_v38  ;;  %v13108_v22 = vld.sshfl [vmem:[#allocation4 + $0x1e] sm:$0x1 pattern:$0x76325410] }
 0x29b   : > { %13525 = vmatprep.mubr.msk.bf16.mxu0 %vm13845_vm0, %v13844_v63  ;;  %13533 = vmatprep.mubr.msk.bf16.mxu1 %vm13845_vm0, %v13844_v63  ;;  %v10213_v19 = vsel %vm5003_vm11, %v10212_v35, %v10211_v49  ;;  %v10377_v53 = vsel %vm4997_vm9, %v10376_v5, %v10375_v21  ;;  %v10529_v26 = vunpack.c.l.b16 %v13106_v2  ;;  %v10530_v58 = vunpack.c.l.b16 %v13107_v48  ;;  %v13109_v9 = vld.sshfl [vmem:[#allocation4 + $0x26] sm:$0x1 pattern:$0x76325410]  ;;  %v13735_v49 = vld [vmem:[%s16202_s3 + $0xe8] sm:$0xff]  }
 0x29c   : > { %v10215_v60 = vpack.c.b16 %v10214_v28, %v10213_v19  ;;  %v10379_v54 = vsel %vm5000_vm10, %v10378_v14, %v10377_v53  ;;  %v10531_v29 = vunpack.c.l.b16 %v13108_v22  ;;  %v10704_v40 = vrot.slane %v10528_v50, 1  ;;  %v13110_v32 = vld.sshfl [vmem:[#allocation4 + $0x2e] sm:$0x1 pattern:$0x76325410]  ;;  %v13736_v53 = vld [vmem:[%s16202_s3 + $0xf8] sm:$0xff]  }
 0x29d   : > { %13524 = vmatpush3.bf16.msra.mxu0 %v13729_v11  ;;  %13532 = vmatpush3.bf16.msra.mxu1 %v13730_v4  ;;  %v10381_v15 = vsel %vm5003_vm11, %v10380_v24, %v10379_v54  ;;  %v10532_v34 = vunpack.c.l.b16 %v13109_v9  ;;  %v10537_v18 = vrot.slane %v10529_v26, 7  ;;  %v10539_v7 = vrot.slane %v10530_v58, 6  ;;  %v13111_v25 = vld.sshfl [vmem:[#allocation4 + $0x36] sm:$0x1 pattern:$0x76325410] }
 0x29e   : > { %13537 = vmatprep.subr.bf16.mxu0 %v13844_v63  ;;  %13545 = vmatprep.subr.bf16.mxu1 %v13844_v63  ;;  %v10383_v8 = vpack.c.b16 %v10382_v37, %v10381_v15  ;;  %v10533_v59 = vunpack.c.l.b16 %v13110_v32  ;;  %v10541_v30 = vrot.slane %v10531_v29, 5  ;;  %v10705_v31 = vsel %vm4985_vm2, %v10529_v26, %v10704_v40  ;;  %v13112_v6 = vld.sshfl [vmem:[#allocation4 + $0x3e] sm:$0x1 pattern:$0x76325410] }
 0x29f   : > { %v10706_v55 = vrot.slane %v10530_v58, 7  ;;  %v10534_v43 = vunpack.c.l.b16 %v13111_v25  ;;  %v10538_v62 = vsel %vm4985_vm2, %v10537_v18, %v10528_v50  ;;  %v10543_v36 = vrot.slane %v10532_v34, 4  ;;  %v13113_v57 = vld.sshfl [vmem:[#allocation4 + $0x46] sm:$0x1 pattern:$0x76325410] }
 0x2a0   : > { %13526 = vmatmul.mubr.msk.bf16.vlgmr.msra.gmra.mxu0 %vm8646_vm1, %v10215_v60  ;;  %13534 = vmatmul.mubr.msk.bf16.vlgmr.msra.gmra.mxu1 %vm8646_vm1, %v10383_v8  ;;  %v10708_v46 = vrot.slane %v10531_v29, 6  ;;  %v10535_v1 = vunpack.c.l.b16 %v13112_v6  ;;  %v10540_v11 = vsel %vm4988_vm4, %v10539_v7, %v10538_v62  ;;  %v10545_v27 = vrot.slane %v10533_v59, 3  ;;  %v13129_v45 = vld.sshfl [vmem:[#allocation4 + $0x6] sm:$0x2 pattern:$0x76325410] }
 0x2a1   : > { %13538 = vmatpush3.bf16.msra.mxu0 %v13731_v44  ;;  %13541 = vmatprep.mubr.msk.bf16.mxu0 %vm13845_vm0, %v13844_v63  ;;  %v10542_v3 = vsel %vm4991_vm5, %v10541_v30, %v10540_v11  ;;  %v10707_v47 = vsel %vm4988_vm4, %v10706_v55, %v10705_v31  ;;  %v10536_v20 = vunpack.c.l.b16 %v13113_v57  ;;  %v10547_v10 = vrot.slane %v10534_v43, 2  ;;  %v13130_v38 = vld.sshfl [vmem:[#allocation4 + $0xe] sm:$0x2 pattern:$0x76325410]  ;;  %v13737_v50 = vld [vmem:[%s16202_s3 + $0xe0] sm:$0xff]  }
 0x2a2   : > { %13539 = vmatprep.subr.bf16.mxu0 %v13844_v63  ;;  %13546 = vmatpush3.bf16.msra.mxu1 %v13732_v33  ;;  %v10544_v4 = vsel %vm4994_vm7, %v10543_v36, %v10542_v3  ;;  %v10710_v17 = vrot.slane %v10532_v34, 5  ;;  %v10549_v12 = vrot.slane %v10535_v1, 1  ;;  %v10709_v23 = vsel %vm4991_vm5, %v10708_v46, %v10707_v47  ;;  %v13131_v28 = vld.sshfl [vmem:[#allocation4 + $0x16] sm:$0x2 pattern:$0x76325410] }
 0x2a3   : > { %13549 = vmatprep.mubr.msk.bf16.mxu1 %vm13845_vm0, %v13844_v63  ;;  %13547 = vmatprep.subr.bf16.mxu1 %v13844_v63  ;;  %v10546_v51 = vsel %vm4997_vm9, %v10545_v27, %v10544_v4  ;;  %v10712_v41 = vrot.slane %v10533_v59, 4  ;;  %v10714_v52 = vrot.slane %v10534_v43, 3  ;;  %v10863_v16 = vunpack.c.l.b16 %v13129_v45  ;;  %v13132_v37 = vld.sshfl [vmem:[#allocation4 + $0x1e] sm:$0x2 pattern:$0x76325410] }
 0x2a4   : > { %v10548_v61 = vsel %vm5000_vm10, %v10547_v10, %v10546_v51  ;;  %v10711_v42 = vsel %vm4994_vm7, %v10710_v17, %v10709_v23  ;;  %v10716_v14 = vrot.slane %v10535_v1, 2  ;;  %v10864_v21 = vunpack.c.l.b16 %v13130_v38  ;;  %v13133_v60 = vld.sshfl [vmem:[#allocation4 + $0x26] sm:$0x2 pattern:$0x76325410]  ;;  %v13738_v31 = vld [vmem:[%s16202_s3 + $0xf0] sm:$0xff]  }
 0x2a5   : > { %13540 = vmatpush3.bf16.msra.mxu0 %v13733_v0  ;;  %v10550_v35 = vsel %vm5003_vm11, %v10549_v12, %v10548_v61  ;;  %v10713_v5 = vsel %vm4997_vm9, %v10712_v41, %v10711_v42  ;;  %v10718_v19 = vrot.slane %v10536_v20, 1  ;;  %v10865_v44 = vunpack.c.l.b16 %v13131_v28  ;;  %v13134_v58 = vld.sshfl [vmem:[#allocation4 + $0x2e] sm:$0x2 pattern:$0x76325410]  ;;  %v13739_v38 = vld [vmem:[%s16204_s5 + $0x18] sm:$0xff]  }
 0x2a6   : > { %13553 = vmatprep.subr.bf16.mxu0 %v13844_v63  ;;  %13548 = vmatpush3.bf16.msra.mxu1 %v13734_v39  ;;  %v10551_v24 = vpack.c.b16 %v10536_v20, %v10550_v35  ;;  %v10715_v2 = vsel %vm5000_vm10, %v10714_v52, %v10713_v5  ;;  %v10866_v54 = vunpack.c.l.b16 %v13132_v37  ;;  %v10872_v33 = vrot.slane %v10863_v16, 2  ;;  %v13135_v29 = vld.sshfl [vmem:[#allocation4 + $0x36] sm:$0x2 pattern:$0x76325410]  ;;  %v13745_v28 = vld [vmem:[%s16204_s5] sm:$0xff]  }
 0x2a7   : > { %13561 = vmatprep.subr.bf16.mxu1 %v13844_v63  ;;  %v10717_v48 = vsel %vm5003_vm11, %v10716_v14, %v10715_v2  ;;  %v10873_v22 = vrot.slane %v10864_v21, 1  ;;  %v10867_v15 = vunpack.c.l.b16 %v13133_v60  ;;  %v11040_v0 = vrot.slane %v10863_v16, 3  ;;  %v13136_v18 = vld.sshfl [vmem:[#allocation4 + $0x3e] sm:$0x2 pattern:$0x76325410] }
 0x2a8   : > { %13542 = vmatmul.mubr.msk.bf16.vlgmr.msra.gmra.mxu0 %vm8646_vm1, %v10551_v24  ;;  %v10719_v26 = vpack.c.b16 %v10718_v19, %v10717_v48  ;;  %v11041_v9 = vrot.slane %v10864_v21, 2  ;;  %v10868_v40 = vunpack.c.l.b16 %v13134_v58  ;;  %v10876_v32 = vrot.slane %v10866_v54, 7  ;;  %v13137_v55 = vld.sshfl [vmem:[#allocation4 + $0x46] sm:$0x2 pattern:$0x76325410] }
 0x2a9   : > { %13554 = vmatpush3.bf16.msra.mxu0 %v13735_v49  ;;  %13557 = vmatprep.mubr.msk.bf16.mxu0 %vm13845_vm0, %v13844_v63  ;;  %v10874_v8 = vsel %vm4985_vm2, %v10873_v22, %v10872_v33  ;;  %v11043_v34 = vrot.slane %v10865_v44, 1  ;;  %v10869_v7 = vunpack.c.l.b16 %v13135_v29  ;;  %v10878_v59 = vrot.slane %v10867_v15, 6  ;;  %v13740_v16 = vld [vmem:[%s16204_s5 + $0x38] sm:$0xff]   ;;  %v13741_v35 = vld [vmem:[%s16204_s5 + $0x10] sm:$0xff]   ;;  %v13743_v14 = vld [vmem:[%s16204_s5 + $0x8] sm:$0xff]  }
 0x2aa   : > { %13550 = vmatmul.mubr.msk.bf16.vlgmr.msra.gmra.mxu1 %vm8646_vm1, %v10719_v26  ;;  %13555 = vmatprep.subr.bf16.mxu0 %v13844_v63  ;;  %v10875_v25 = vsel %vm4988_vm4, %v10865_v44, %v10874_v8  ;;  %v11042_v30 = vsel %vm4985_vm2, %v11041_v9, %v11040_v0  ;;  %v10870_v6 = vunpack.c.l.b16 %v13136_v18  ;;  %v10880_v62 = vrot.slane %v10868_v40, 5  ;;  %v13742_v5 = vld [vmem:[%s16204_s5 + $0x30] sm:$0xff]   ;;  %v13744_v49 = vld [vmem:[%s16204_s5 + $0x28] sm:$0xff]   ;;  %v13746_v21 = vld [vmem:[%s16204_s5 + $0x20] sm:$0xff]  }
 0x2ab   : > { %13562 = vmatpush3.bf16.msra.mxu1 %v13736_v53  ;;  %13565 = vmatprep.mubr.msk.bf16.mxu1 %vm13845_vm0, %v13844_v63  ;;  %v10877_v43 = vsel %vm4991_vm5, %v10876_v32, %v10875_v25  ;;  %v11044_v36 = vsel %vm4988_vm4, %v11043_v34, %v11042_v30  ;;  %v10871_v46 = vunpack.c.l.b16 %v13137_v55  ;;  %v10882_v57 = vrot.slane %v10869_v7, 4 }
 0x2ac   : > { %13563 = vmatprep.subr.bf16.mxu1 %v13844_v63  ;;  %v10879_v39 = vsel %vm4994_vm7, %v10878_v59, %v10877_v43  ;;  %v10884_v11 = vrot.slane %v10870_v6, 3  ;;  %v11046_v3 = vrot.slane %v10867_v15, 7  ;;  %v11045_v45 = vsel %vm4991_vm5, %v10866_v54, %v11044_v36 }
 0x2ad   : > { %13556 = vmatpush3.bf16.msra.mxu0 %v13737_v50  ;;  %v10881_v1 = vsel %vm4997_vm9, %v10880_v62, %v10879_v39  ;;  %v10886_v47 = vrot.slane %v10871_v46, 2  ;;  %v11048_v20 = vrot.slane %v10868_v40, 6  ;;  %v11050_v17 = vrot.slane %v10869_v7, 5 }
 0x2ae   : > { %v10883_v27 = vsel %vm5000_vm10, %v10882_v57, %v10881_v1  ;;  %13569 = vmatprep.subr.bf16.mxu0 %v13844_v63  ;;  %v11047_v10 = vsel %vm4994_vm7, %v11046_v3, %v11045_v45  ;;  %v11052_v23 = vrot.slane %v10870_v6, 4  ;;  %v11054_v61 = vrot.slane %v10871_v46, 3 }
 0x2af   : > { %13564 = vmatpush3.bf16.msra.mxu1 %v13738_v31  ;;  %v10885_v4 = vsel %vm5003_vm11, %v10884_v11, %v10883_v27  ;;  %v11049_v12 = vsel %vm4997_vm9, %v11048_v20, %v11047_v10  ;;  %vm11130_vm4 = vcmask 517120   ;;  %vm11131_vm5 = vsmask.f32 1280 }
 0x2b0   : > { %v10887_v51 = vpack.c.b16 %v10886_v47, %v10885_v4  ;;  %13581 = vmatprep.subr.bf16.mxu1 %v13844_v63  ;;  %v11051_v41 = vsel %vm5000_vm10, %v11050_v17, %v11049_v12  ;;  %vm15897_vm9 = vmand %vm11130_vm4, %vm11131_vm5  ;;  %vm16323_vm10 = vsmask.f32 256  ;;  %vm16325_vm6 = vsmask.f32 6424 }
 0x2b1   : > { %v11053_v42 = vsel %vm5003_vm11, %v11052_v23, %v11051_v41  ;;  %vm11145_vm11 = vmor %vm16323_vm10, %vm442_vm3  ;;  %vm16326_vm3 = vcmask 523264  }
 0x2b2   : > { %13558 = vmatmul.mubr.msk.bf16.vlgmr.msra.gmra.mxu0 %vm8646_vm1, %v10887_v51  ;;  %v11055_v52 = vpack.c.b16 %v11054_v61, %v11053_v42  ;;  %vm11146_vm14 = vmor %vm11145_vm11, %vm16324_vm12 }
 0x2b3   : > { %13577 = vmatprep.mubr.msk.bf16.mxu0 %vm13845_vm0, %v13844_v63  ;;  %13570 = vmatpush3.bf16.msra.mxu0 %v13740_v16  ;;  %vm11147_vm13 = vmor %vm11146_vm14, %vm16325_vm6 }
 0x2b4   : > { %13566 = vmatmul.mubr.msk.bf16.vlgmr.msra.gmra.mxu1 %vm8646_vm1, %v11055_v52  ;;  %13571 = vmatprep.subr.bf16.mxu0 %v13844_v63  ;;  %vm16328_vm8 = vmmov %vm16326_vm3 }
 0x2b5   : > { %13589 = vmatprep.mubr.msk.bf16.mxu1 %vm13845_vm0, %v13844_v63  ;;  %13582 = vmatpush3.bf16.msra.mxu1 %v13739_v38  ;;  %vm16329_vm1 = vmmov %vm16326_vm3 }
 0x2b6   : > { %13583 = vmatprep.subr.bf16.mxu1 %v13844_v63  ;;  %vm16331_vm4 = vmmov %vm16329_vm1 }
 0x2b7   : > { %13572 = vmatpush3.bf16.msra.mxu0 %v13742_v5  ;;  %vm16332_vm5 = vmmov %vm16329_vm1 }
 0x2b8   : > { %13573 = vmatprep.subr.bf16.mxu0 %v13844_v63 }
 0x2b9   : > { %13584 = vmatpush3.bf16.msra.mxu1 %v13741_v35 }
 0x2ba   : > { %13585 = vmatprep.subr.bf16.mxu1 %v13844_v63 }
 0x2bb   : > { %13574 = vmatpush3.bf16.msra.mxu0 %v13744_v49 }
 0x2bc   : > { %13575 = vmatprep.subr.bf16.mxu0 %v13844_v63 }
 0x2bd   : > { %13586 = vmatpush3.bf16.msra.mxu1 %v13743_v14 }
 0x2be   : > { %13587 = vmatprep.subr.bf16.mxu1 %v13844_v63 }
 0x2bf   : > { %13576 = vmatpush3.bf16.msra.mxu0 %v13746_v21 }
 0x2c0   : > { %13593 = vmatprep.subr.bf16.mxu0 %v13844_v63 }
 0x2c1   : > { %13588 = vmatpush3.bf16.msra.mxu1 %v13745_v28 }
 0x2c2   : > { %13605 = vmatprep.subr.bf16.mxu1 %v13844_v63 }
 0x338   : > { %v8684_v24 = vpop.f32.mrf.mxu0  ;;  %v8755_v2 = vpop.f32.mrf.mxu1 }
 0x339   : > { %v8756_v25 = vadd.f32 %v8755_v2, %v8684_v24 }
 0x33a   : > { %v13447_v19 = vpop.f32.mrf.mxu0  ;;  %v13455_v53 = vpop.f32.mrf.mxu1 }
 0x33c   : > { %v8687_v37 = vpop.f32.mrf.mxu0  ;;  %v8758_v44 = vpop.f32.mrf.mxu1 }
 0x33d   : > { %v8759_v43 = vadd.f32 %v8758_v44, %v8687_v37 }
 0x33e   : > { %v13448_v48 = vpop.f32.mrf.mxu0  ;;  %v13456_v50 = vpop.f32.mrf.mxu1 }
 0x340   : > { %v8921_v60 = vpop.f32.mrf.mxu0  ;;  %v9089_v54 = vpop.f32.mrf.mxu1 }
 0x341   : > { %v8928_v31 = vadd.f32 %v8921_v60, %v8756_v25 }
 0x342   : > { %v13463_v33 = vpop.f32.mrf.mxu0  ;;  %v13471_v22 = vpop.f32.mrf.mxu1 }
 0x343   : > { %v9096_v46 = vadd.f32 %v9089_v54, %v8928_v31 }
 0x344   : > { %v8924_v26 = vpop.f32.mrf.mxu0  ;;  %v9092_v58 = vpop.f32.mrf.mxu1 }
 0x345   : > { %v8929_v39 = vadd.f32 %v8924_v26, %v8759_v43  ;;  %v13846_v43 = vmov 1983009808  }
 0x346   : > { %v13464_v15 = vpop.f32.mrf.mxu0  ;;  %v13472_v0 = vpop.f32.mrf.mxu1 }
 0x347   : > { %v9097_v47 = vadd.f32 %v9092_v58, %v8929_v39 }
 0x348   : > { %v9257_v9 = vpop.f32.mrf.mxu0  ;;  %v9425_v29 = vpop.f32.mrf.mxu1 }
 0x349   : > { %v9264_v11 = vadd.f32 %v9257_v9, %v9096_v46 }
 0x34a   : > { %v13479_v40 = vpop.f32.mrf.mxu0  ;;  %v13487_v8 = vpop.f32.mrf.mxu1 }
 0x34b   : > { %v9432_v4 = vadd.f32 %v9425_v29, %v9264_v11 }
 0x34c   : > { %v9260_v32 = vpop.f32.mrf.mxu0  ;;  %v9428_v34 = vpop.f32.mrf.mxu1 }
 0x34d   : > { %v9265_v10 = vadd.f32 %v9260_v32, %v9097_v47 }
 0x34e   : > { %v13480_v18 = vpop.f32.mrf.mxu0  ;;  %v13488_v7 = vpop.f32.mrf.mxu1 }
 0x34f   : > { %v9433_v61 = vadd.f32 %v9428_v34, %v9265_v10 }
 0x350   : > { %v9593_v59 = vpop.f32.mrf.mxu0  ;;  %v9761_v30 = vpop.f32.mrf.mxu1 }
 0x351   : > { %v9600_v12 = vadd.f32 %v9593_v59, %v9432_v4  ;;  %v13153_v59 = vld [vmem:[%s16203_s4] ss:$0 sm:$0xff] }
 0x352   : > { %v13495_v55 = vpop.f32.mrf.mxu0  ;;  %v13503_v6 = vpop.f32.mrf.mxu1 }
 0x353   : > { %v9768_v52 = vadd.f32 %v9761_v30, %v9600_v12 }
 0x354   : > { %v9596_v62 = vpop.f32.mrf.mxu0  ;;  %v9764_v36 = vpop.f32.mrf.mxu1 }
 0x355   : > { %v9601_v38 = vadd.f32 %v9596_v62, %v9433_v61  ;;  %v11138_v62 = vunpack.c.l.s4 %v13846_v43 }
 0x356   : > { %v13496_v57 = vpop.f32.mrf.mxu0  ;;  %v13504_v1 = vpop.f32.mrf.mxu1 }
 0x357   : > { %v9769_v28 = vadd.f32 %v9764_v36, %v9601_v38  ;;  %v11139_v1 = vunpack.c.0.s8 %v11138_v62  ;;  %v13758_v62 = vld [vmem:[%s16204_s5 + $0x90] sm:$0xff]  }
 0x358   : > { %v9929_v3 = vpop.f32.mrf.mxu0  ;;  %v10097_v27 = vpop.f32.mrf.mxu1 }
 0x359   : > { %v9936_v5 = vadd.f32 %v9929_v3, %v9768_v52 }
 0x35a   : > { %v13511_v45 = vpop.f32.mrf.mxu0  ;;  %v13519_v20 = vpop.f32.mrf.mxu1 }
 0x35b   : > { %v10104_v2 = vadd.f32 %v10097_v27, %v9936_v5  ;;  %v16320_v45 = vld [vmem:[#allocation7_spill] sm:$0xff] }
 0x35c   : > { %v9932_v17 = vpop.f32.mrf.mxu0  ;;  %v10100_v51 = vpop.f32.mrf.mxu1  ;;  %v15895_v20 = vsub.s32 %v11139_v1, %v16320_v45  ;;  %v13762_v1 = vld [vmem:[%s16204_s5 + $0x80] sm:$0xff]  }
 0x35d   : > { %v9937_v19 = vadd.f32 %v9932_v17, %v9769_v28  ;;  %v13766_v17 = vld [vmem:[%s16204_s5 + $0xd0] sm:$0xff]  }
 0x35e   : > { %v13512_v23 = vpop.f32.mrf.mxu0  ;;  %v13520_v41 = vpop.f32.mrf.mxu1 }
 0x35f   : > { %v10105_v48 = vadd.f32 %v10100_v51, %v9937_v19  ;;  %v11133_v51 = vld [vmem:[#allocation5] sm:$0x3] }
 0x360   : > { %v10265_v42 = vpop.f32.mrf.mxu0  ;;  %v10433_v16 = vpop.f32.mrf.mxu1 }
 0x361   : > { %v10272_v37 = vadd.f32 %v10265_v42, %v10104_v2 }
 0x362   : > { %v13527_v35 = vpop.f32.mrf.mxu0  ;;  %v13535_v14 = vpop.f32.mrf.mxu1 }
 0x363   : > { %v10440_v54 = vadd.f32 %v10433_v16, %v10272_v37  ;;  %v11180_v14 = vld [vmem:[#allocation5 + $0x4] sm:$0x3]  ;;  %v11163_v37 = vld [vmem:[#allocation5 + $0x2] sm:$0x3] }
 0x364   : > { %v10268_v49 = vpop.f32.mrf.mxu0  ;;  %v10436_v21 = vpop.f32.mrf.mxu1 }
 0x365   : > { %v10273_v33 = vadd.f32 %v10268_v49, %v10105_v48 }
 0x366   : > { %v13528_v24 = vpop.f32.mrf.mxu0  ;;  %v13536_v53 = vpop.f32.mrf.mxu1 }
 0x367   : > { %v10441_v9 = vadd.f32 %v10436_v21, %v10273_v33  ;;  %v11186_v24 = vld [vmem:[#allocation6] sm:$0x3]  ;;  %v13747_v33 = vld [vmem:[%s16204_s5 + $0x78] sm:$0xff]  }
 0x368   : > { %v10601_v44 = vpop.f32.mrf.mxu0 }
 0x369   : > { %v10608_v58 = vadd.f32 %v10601_v44, %v10440_v54 }
 0x36a   : > { %v10769_v50 = vpop.f32.mrf.mxu1  ;;  %v13543_v60 = vpop.f32.mrf.mxu0 }
 0x36b   : > { %v10776_v40 = vadd.f32 %v10769_v50, %v10608_v58  ;;  %v11192_v60 = vld [vmem:[#allocation6 + $0x4] sm:$0x3] }
 0x36c   : > { %v13551_v22 = vpop.f32.mrf.mxu1  ;;  %v10604_v26 = vpop.f32.mrf.mxu0 }
 0x36d   : > { %v10609_v8 = vadd.f32 %v10604_v26, %v10441_v9  ;;  %v11189_v26 = vld [vmem:[#allocation6 + $0x2] sm:$0x3]  ;;  %v13748_v9 = vld [vmem:[%s16204_s5 + $0x58] sm:$0xff]  }
 0x36e   : > { %v10772_v15 = vpop.f32.mrf.mxu1  ;;  %v13544_v0 = vpop.f32.mrf.mxu0 }
 0x36f   : > { %v10777_v7 = vadd.f32 %v10772_v15, %v10609_v8 }
 0x370   : > { %v13552_v29 = vpop.f32.mrf.mxu1 }
 0x371   : > { %v13749_v29 = vld [vmem:[%s16204_s5 + $0x70] sm:$0xff]  }
 0x372   : > { %v10937_v32 = vpop.f32.mrf.mxu0 }
 0x373   : > { %v10944_v34 = vadd.f32 %v10937_v32, %v10776_v40  ;;  %v13750_v32 = vld [vmem:[%s16204_s5 + $0x50] sm:$0xff]  }
 0x374   : > { %v13559_v18 = vpop.f32.mrf.mxu0  ;;  %v11105_v25 = vpop.f32.mrf.mxu1 }
 0x375   : > { %v11112_v30 = vadd.f32 %v11105_v25, %v10944_v34  ;;  %v13751_v34 = vld [vmem:[%s16204_s5 + $0x68] sm:$0xff]   ;;  %v13754_v25 = vld [vmem:[%s16204_s5 + $0x40] sm:$0xff]  }
 0x376   : > { %v10940_v31 = vpop.f32.mrf.mxu0  ;;  %v13567_v55 = vpop.f32.mrf.mxu1  ;;  %v13752_v18 = vld [vmem:[%s16204_s5 + $0x48] sm:$0xff]  }
 0x377   : > { %v10945_v6 = vadd.f32 %v10940_v31, %v10777_v7  ;;  %v11121_v36 = vadd.f32 %v13153_v59, %v11112_v30  ;;  %v13753_v7 = vld [vmem:[%s16204_s5 + $0x60] sm:$0xff]   ;;  %v13756_v55 = vld [vmem:[%s16204_s5 + $0x98] sm:$0xff]  }
 0x378   : > { %v13560_v46 = vpop.f32.mrf.mxu0  ;;  %v11108_v39 = vpop.f32.mrf.mxu1 }
 0x379   : > { %v11113_v57 = vadd.f32 %v11108_v39, %v10945_v6  ;;  %v11125_v3 = vmul.f32 0.01, %v11121_v36  ;;  %vm11123_vm2 = vcmp.ge.f32.partialorder %v11121_v36, 0.0  ;;  %v13757_v6 = vld [vmem:[%s16204_s5 + $0xb0] sm:$0xff]   ;;  %v13760_v46 = vld [vmem:[%s16204_s5 + $0x88] sm:$0xff]   ;;  %v13761_v39 = vld [vmem:[%s16204_s5 + $0xa0] sm:$0xff]  }
 0x37a   : > { %v13568_v11 = vpop.f32.mrf.mxu1 }
 0x37b   : > { %v11122_v27 = vadd.f32 %v13153_v59, %v11113_v57  ;;  %v11127_v4 = vsel %vm11123_vm2, %v11121_v36, %v11125_v3  ;;  %v13755_v59 = vld [vmem:[%s16204_s5 + $0xb8] sm:$0xff]   ;;  %v13759_v36 = vld [vmem:[%s16204_s5 + $0xa8] sm:$0xff]   ;;  %vm16330_vm2 = vmmov %vm16329_vm1 }
 0x37c   : > { %v13763_v11 = vld [vmem:[%s16204_s5 + $0xf8] sm:$0xff]  }
 0x37d   : > { %vm11124_vm7 = vcmp.ge.f32.partialorder %v11122_v27, 0.0  ;;  %v11126_v47 = vmul.f32 0.01, %v11122_v27 }
 0x37f   : > { %v11128_v10 = vsel %vm11124_vm7, %v11122_v27, %v11126_v47  ;;  %v13764_v47 = vld [vmem:[%s16204_s5 + $0xd8] sm:$0xff]   ;;  %vm16333_vm7 = vmmov %vm16329_vm1 }
 0x380   : > { %v11129_v12 = vpack.c.bf16 %v11128_v10, %v11127_v4  ;;  %v13155_v23 = vpack.c.bf16 %v11128_v10, %v11128_v10  ;;  %v13765_v4 = vld [vmem:[%s16204_s5 + $0xf0] sm:$0xff]  }
 0x382   : > { %v11134_v41 = vsel %vm15897_vm9, %v11129_v12, %v11133_v51  ;;  %v11143_v61 = vrot.slane %v11129_v12, %v15895_v20  ;;  %v11173_v42 = vrot.slane %v13155_v23, %v15895_v20  ;;  %v13767_v51 = vld [vmem:[%s16204_s5 + $0xe8] sm:$0xff]  }
 0x383   : > { %11135 = vst [vmem:[#allocation5] sm:$0x3] %v11134_v41  ;;  %v13768_v23 = vld [vmem:[%s16204_s5 + $0xc8] sm:$0xff]   ;;  %v13769_v41 = vld [vmem:[%s16204_s5 + $0xe0] sm:$0xff]  }
 0x384   : > { %v11144_v52 = vcombine.high %v11143_v61, %v11143_v61  ;;  %v11149_v38 = vshrl.u32 %v11143_v61, 16  ;;  %v11176_v5 = vrot.slane %v11173_v42, 7  ;;  %v13770_v42 = vld [vmem:[%s16204_s5 + $0xc0] sm:$0xff]  }
 0x386   : > { %v11154_v16 = vshrl.u32 %v11144_v52, 16  ;;  %v13156_v35 = vrot.slane %v11144_v52, 9  ;;  %v11157_v28 = vshll.u32 %v11144_v52, 16  ;;  %v13154_v19 = vrot.slane %v11149_v38, 9  ;;  %v13771_v38 = vld [vmem:[%s16204_s5 + $0x118] sm:$0xff]  }
 0x388   : > { %v11156_v49 = vrot.slane %v11154_v16, 7  ;;  %v11177_v21 = vsel %vm15471_vm15, %v13156_v35, %v11176_v5  ;;  %vm16327_vm15 = vmmov %vm16326_vm3  ;;  %v13773_v16 = vld [vmem:[%s16204_s5 + $0x108] sm:$0xff]   ;;  %v13774_v35 = vld [vmem:[%s16204_s5 + $0x100] sm:$0xff]  }
 0x389   : > { %v11181_v2 = vsel %vm15897_vm9, %v11177_v21, %v11180_v14  ;;  %v13780_v21 = vld [vmem:[%s16206_s7 + $0x24] ss:$8 sps:$4 sm:$0xff]  }
 0x38a   : > { %v11159_v53 = vor.u32 %v11157_v28, %v11156_v49  ;;  %11182 = vst [vmem:[#allocation5 + $0x4] sm:$0x3] %v11181_v2  ;;  %v11183_v44 = vld [vmem:[#allocation5] sm:$0x3]  ;;  %v13775_v49 = vld [vmem:[%s16206_s7 + $0x30] ss:$8 sps:$4 sm:$0xff]  }
 0x38b   : > { %v11187_v48 = vsel %vm15897_vm9, %v11183_v44, %v11186_v24  ;;  %v13777_v28 = vld [vmem:[%s16206_s7 + $0x34] ss:$8 sps:$4 sm:$0xff]   ;;  %v13781_v24 = vld [vmem:[%s16206_s7 + $0x10] ss:$8 sps:$4 sm:$0xff]  }
 0x38c   : > { %v11160_v50 = vsel %vm11147_vm13, %v13154_v19, %v11159_v53  ;;  %11188 = vst [vmem:[#allocation6] sm:$0x3] %v11187_v48  ;;  %v13783_v2 = vld [vmem:[%s16206_s7 + $0x14] ss:$8 sps:$4 sm:$0xff]   ;;  %v13786_v19 = vld [vmem:[%s16206_s7 + $0x4] ss:$8 sps:$4 sm:$0xff]  }
 0x38d   : > { %v11164_v56 = vsel %vm15897_vm9, %v11160_v50, %v11163_v37  ;;  %v13847_v53 = vmov 0   ;;  %v13787_v37 = vld [vmem:[%s16208_s9 + $0x70] ss:$8 sps:$4 sm:$0xff]   ;;  %v13789_v44 = vld [vmem:[%s16208_s9 + $0x74] ss:$8 sps:$4 sm:$0xff]  }
 0x38e   : > { %11165 = vst [vmem:[#allocation5 + $0x2] sm:$0x3] %v11164_v56  ;;  %v13784_v48 = vld [vmem:[%s16206_s7] ss:$8 sps:$4 sm:$0xff]   ;;  %v13792_v50 = vld [vmem:[%s16208_s9 + $0x64] ss:$8 sps:$4 sm:$0xff]  }
 0x38f   : > { %v13790_v56 = vld [vmem:[%s16208_s9 + $0x60] ss:$8 sps:$4 sm:$0xff]  }
 0x391   : > { %v11185_v54 = vld [vmem:[#allocation5 + $0x4] sm:$0x3] }
 0x392   : > { %v11193_v22 = vsel %vm15897_vm9, %v11185_v54, %v11192_v60  ;;  %v13795_v60 = vld [vmem:[%s16208_s9 + $0x54] ss:$8 sps:$4 sm:$0xff]   ;;  %v13793_v54 = vld [vmem:[%s16208_s9 + $0x50] ss:$8 sps:$4 sm:$0xff]  }
 0x393   : > { %11194 = vst [vmem:[#allocation6 + $0x4] sm:$0x3] %v11193_v22  ;;  %v11195_v58 = vld [vmem:[#allocation6] sm:$0x1]  ;;  %v13796_v22 = vld [vmem:[%s16208_s9 + $0x40] ss:$8 sps:$4 sm:$0xff]  }
 0x394   : > { %v11219_v15 = vrot.slane %v11195_v58, %v15895_v20  ;;  %13590 = vmatmul.mubr.msk.bf16.vlgmr.msra.gmra.mxu1 %vm16326_vm3, %v11195_v58  ;;  %v13167_v31 = vld.sshfl [vmem:[#allocation6] sm:$0x2 pattern:$0x76325410]  ;;  %v13799_v58 = vld [vmem:[%s16208_s9 + $0x30] ss:$8 sps:$4 sm:$0xff]  }
 0x395   : > { %v11184_v0 = vld [vmem:[#allocation5 + $0x2] sm:$0x3]  ;;  %13606 = vmatpush3.bf16.msra.mxu1 %v13747_v33  ;;  %13613 = vmatprep.mubr.msk.bf16.mxu1 %vm13845_vm0, %v13844_v63  ;;  %v11374_v43 = vrot.slane %v13167_v31, 1  ;;  %v13798_v33 = vld [vmem:[%s16208_s9 + $0x44] ss:$8 sps:$4 sm:$0xff]  }
 0x396   : > { %v11190_v40 = vsel %vm15897_vm9, %v11184_v0, %v11189_v26  ;;  %v11221_v8 = vshrl.u32 %v11219_v15, 16  ;;  %13607 = vmatprep.subr.bf16.mxu1 %v13844_v63  ;;  %v13801_v26 = vld [vmem:[%s16208_s9 + $0x34] ss:$8 sps:$4 sm:$0xff]   ;;  %v13804_v15 = vld [vmem:[%s16208_s9 + $0x24] ss:$8 sps:$4 sm:$0xff]  }
 0x397   : > { %11191 = vst [vmem:[#allocation6 + $0x2] sm:$0x3] %v11190_v40  ;;  %v13802_v0 = vld [vmem:[%s16208_s9 + $0x20] ss:$8 sps:$4 sm:$0xff]   ;;  %v13810_v40 = vld [vmem:[%s16208_s9 + $0x4] ss:$8 sps:$4 sm:$0xff]  }
 0x398   : > { %13578 = vmatmul.mubr.msk.bf16.vlgmr.msra.gmra.mxu0 %vm16327_vm15, %v11221_v8  ;;  %v13808_v8 = vld [vmem:[%s16208_s9] ss:$8 sps:$4 sm:$0xff]  }
 0x399   : > { %13594 = vmatpush3.bf16.msra.mxu0 %v13748_v9  ;;  %13608 = vmatpush3.bf16.msra.mxu1 %v13749_v29  ;;  %v13807_v9 = vld [vmem:[%s16208_s9 + $0x14] ss:$8 sps:$4 sm:$0xff]   ;;  %v13805_v29 = vld [vmem:[%s16208_s9 + $0x10] ss:$8 sps:$4 sm:$0xff]   ;;  %v13820_v31 = vld [vmem:[%s16208_s9 + $0xc0] ss:$8 sps:$4 sm:$0xff]  }
 0x39a   : > { %13595 = vmatprep.subr.bf16.mxu0 %v13844_v63  ;;  %13609 = vmatprep.subr.bf16.mxu1 %v13844_v63  ;;  %v11695_v12 = vld [vmem:[#allocation6 + $0x4] sm:$0x1]  ;;  %v13199_v5 = vld.sshfl [vmem:[#allocation6 + $0x4] sm:$0x2 pattern:$0x76325410] }
 0x39b   : > { %13601 = vmatprep.mubr.msk.bf16.mxu0 %vm13845_vm0, %v13844_v63  ;;  %v11787_v61 = vrot.slane %v11695_v12, %v15895_v20  ;;  %v11876_v14 = vrot.slane %v13199_v5, 1 }
 0x39d   : > { %13596 = vmatpush3.bf16.msra.mxu0 %v13750_v32  ;;  %13610 = vmatpush3.bf16.msra.mxu1 %v13751_v34  ;;  %v11789_v52 = vshrl.u32 %v11787_v61, 16  ;;  %v13813_v32 = vld [vmem:[%s16208_s9 + $0xf4] ss:$8 sps:$4 sm:$0xff]   ;;  %v13811_v34 = vld [vmem:[%s16208_s9 + $0xf0] ss:$8 sps:$4 sm:$0xff]  }
 0x39e   : > { %13597 = vmatprep.subr.bf16.mxu0 %v13844_v63  ;;  %13611 = vmatprep.subr.bf16.mxu1 %v13844_v63  ;;  %v11444_v30 = vld [vmem:[#allocation6 + $0x2] sm:$0x1]  ;;  %v13183_v57 = vld.sshfl [vmem:[#allocation6 + $0x2] sm:$0x2 pattern:$0x76325410] }
 0x39f   : > { %v11536_v3 = vrot.slane %v11444_v30, %v15895_v20  ;;  %v11625_v27 = vrot.slane %v13183_v57, 1  ;;  %v13772_v20 = vld [vmem:[%s16204_s5 + $0x110] sm:$0xff]  }
 0x3a1   : > { %13598 = vmatpush3.bf16.msra.mxu0 %v13752_v18  ;;  %13612 = vmatpush3.bf16.msra.mxu1 %v13753_v7  ;;  %v11538_v10 = vshrl.u32 %v11536_v3, 16  ;;  %v13816_v18 = vld [vmem:[%s16208_s9 + $0xe4] ss:$8 sps:$4 sm:$0xff]   ;;  %v13814_v7 = vld [vmem:[%s16208_s9 + $0xe0] ss:$8 sps:$4 sm:$0xff]  }
 0x3a2   : > { %13599 = vmatprep.subr.bf16.mxu0 %v13844_v63  ;;  %13629 = vmatprep.subr.bf16.mxu1 %v13844_v63 }
 0x3a4   : > { %13614 = vmatmul.mubr.msk.bf16.vlgmr.msra.gmra.mxu1 %vm16328_vm8, %v11444_v30  ;;  %v13822_v30 = vld [vmem:[%s16208_s9 + $0xc4] ss:$8 sps:$4 sm:$0xff]  }
 0x3a5   : > { %13600 = vmatpush3.bf16.msra.mxu0 %v13754_v25  ;;  %13630 = vmatpush3.bf16.msra.mxu1 %v13755_v59  ;;  %v13819_v25 = vld [vmem:[%s16208_s9 + $0xd4] ss:$8 sps:$4 sm:$0xff]   ;;  %v13817_v59 = vld [vmem:[%s16208_s9 + $0xd0] ss:$8 sps:$4 sm:$0xff]  }
 0x3a6   : > { %13617 = vmatprep.subr.bf16.mxu0 %v13844_v63  ;;  %13631 = vmatprep.subr.bf16.mxu1 %v13844_v63 }
 0x3a7   : > { %13637 = vmatprep.mubr.msk.bf16.mxu1 %vm13845_vm0, %v13844_v63 }
 0x3a8   : > { %13602 = vmatmul.mubr.msk.bf16.vlgmr.msra.gmra.mxu0 %vm16329_vm1, %v11374_v43  ;;  %v13828_v43 = vld [vmem:[%s16208_s9 + $0xa4] ss:$8 sps:$4 sm:$0xff]  }
 0x3a9   : > { %13618 = vmatpush3.bf16.msra.mxu0 %v13756_v55  ;;  %13632 = vmatpush3.bf16.msra.mxu1 %v13757_v6  ;;  %v13825_v55 = vld [vmem:[%s16208_s9 + $0xb4] ss:$8 sps:$4 sm:$0xff]   ;;  %v13823_v6 = vld [vmem:[%s16208_s9 + $0xb0] ss:$8 sps:$4 sm:$0xff]  }
 0x3aa   : > { %13619 = vmatprep.subr.bf16.mxu0 %v13844_v63  ;;  %13633 = vmatprep.subr.bf16.mxu1 %v13844_v63 }
 0x3ab   : > { %13625 = vmatprep.mubr.msk.bf16.mxu0 %vm13845_vm0, %v13844_v63 }
 0x3ad   : > { %13620 = vmatpush3.bf16.msra.mxu0 %v13758_v62  ;;  %13634 = vmatpush3.bf16.msra.mxu1 %v13759_v36  ;;  %v13826_v36 = vld [vmem:[%s16208_s9 + $0xa0] ss:$8 sps:$4 sm:$0xff]  }
 0x3ae   : > { %13621 = vmatprep.subr.bf16.mxu0 %v13844_v63  ;;  %13635 = vmatprep.subr.bf16.mxu1 %v13844_v63 }
 0x3b1   : > { %13622 = vmatpush3.bf16.msra.mxu0 %v13760_v46  ;;  %13636 = vmatpush3.bf16.msra.mxu1 %v13761_v39 }
 0x3b2   : > { %13623 = vmatprep.subr.bf16.mxu0 %v13844_v63  ;;  %13653 = vmatprep.subr.bf16.mxu1 %v13844_v63 }
 0x3b4   : > { %13638 = vmatmul.mubr.msk.bf16.vlgmr.msra.gmra.mxu1 %vm16330_vm2, %v11625_v27 }
 0x3b5   : > { %13624 = vmatpush3.bf16.msra.mxu0 %v13762_v1  ;;  %13654 = vmatpush3.bf16.msra.mxu1 %v13763_v11 }
 0x3b6   : > { %13641 = vmatprep.subr.bf16.mxu0 %v13844_v63  ;;  %13655 = vmatprep.subr.bf16.mxu1 %v13844_v63 }
 0x3b7   : > { %13661 = vmatprep.mubr.msk.bf16.mxu1 %vm13845_vm0, %v13844_v63 }
 0x3b8   : > { %13626 = vmatmul.mubr.msk.bf16.vlgmr.msra.gmra.mxu0 %vm16331_vm4, %v11538_v10 }
 0x3b9   : > { %13642 = vmatpush3.bf16.msra.mxu0 %v13764_v47  ;;  %13656 = vmatpush3.bf16.msra.mxu1 %v13765_v4 }
 0x3ba   : > { %13643 = vmatprep.subr.bf16.mxu0 %v13844_v63  ;;  %13657 = vmatprep.subr.bf16.mxu1 %v13844_v63 }
 0x3bb   : > { %13649 = vmatprep.mubr.msk.bf16.mxu0 %vm13845_vm0, %v13844_v63 }
 0x3bd   : > { %13644 = vmatpush3.bf16.msra.mxu0 %v13766_v17  ;;  %13658 = vmatpush3.bf16.msra.mxu1 %v13767_v51 }
 0x3be   : > { %13645 = vmatprep.subr.bf16.mxu0 %v13844_v63  ;;  %13659 = vmatprep.subr.bf16.mxu1 %v13844_v63 }
 0x3c1   : > { %13646 = vmatpush3.bf16.msra.mxu0 %v13768_v23  ;;  %13660 = vmatpush3.bf16.msra.mxu1 %v13769_v41 }
 0x3c2   : > { %13647 = vmatprep.subr.bf16.mxu0 %v13844_v63  ;;  %12022 = vmatprep.subr.bf16.mxu1 %v13777_v28 }
 0x3c4   : > { %13662 = vmatmul.mubr.msk.bf16.vlgmr.msra.gmra.mxu1 %vm16332_vm5, %v11789_v52 }
 0x3c5   : > { %13648 = vmatpush3.bf16.msra.mxu0 %v13770_v42  ;;  %12023 = vmatpush1.bf16.msra.mxu1 %v13775_v49 }
 0x3c6   : > { %13665 = vmatprep.subr.bf16.mxu0 %v13844_v63  ;;  %12024 = vmatprep.subr.bf16.mxu1 %v13780_v21 }
 0x3c7   : > { %12046 = vmatprep.mubr.bf16.mxu1 %v13847_v53 }
 0x3c8   : > { %13650 = vmatmul.mubr.msk.bf16.vlgmr.msra.gmra.mxu0 %vm16333_vm7, %v11695_v12 }
 0x3c9   : > { %13666 = vmatpush3.bf16.msra.mxu0 %v13771_v38  ;;  %13673 = vmatprep.mubr.msk.bf16.mxu0 %vm13845_vm0, %v13844_v63  ;;  %vm16334_vm0 = vmmov %vm16329_vm1 }
 0x3ca   : > { %13667 = vmatprep.subr.bf16.mxu0 %v13844_v63  ;;  %vm16335_vm10 = vmmov %vm16334_vm0 }
 0x3cd   : > { %13668 = vmatpush3.bf16.msra.mxu0 %v13772_v20 }
 0x3ce   : > { %13669 = vmatprep.subr.bf16.mxu0 %v13844_v63 }
 0x3d1   : > { %13670 = vmatpush3.bf16.msra.mxu0 %v13773_v16 }
 0x3d2   : > { %13671 = vmatprep.subr.bf16.mxu0 %v13844_v63  ;;  %v13778_v63 = vld [vmem:[%s16206_s7 + $0x20] ss:$8 sps:$4 sm:$0xff]  }
 0x3d3   : > { %12025 = vmatpush1.bf16.msra.mxu1 %v13778_v63 }
 0x3d4   : > { %12026 = vmatprep.subr.bf16.mxu1 %v13783_v2 }
 0x3d5   : > { %13672 = vmatpush3.bf16.msra.mxu0 %v13774_v35 }
 0x3d6   : > { %12263 = vmatprep.subr.bf16.mxu0 %v13789_v44 }
 0x3d7   : > { %12027 = vmatpush1.bf16.msra.mxu1 %v13781_v24 }
 0x3d8   : > { %13674 = vmatmul.mubr.msk.bf16.vlgmr.msra.gmra.mxu0 %vm16334_vm0, %v11876_v14  ;;  %12028 = vmatprep.subr.bf16.mxu1 %v13786_v19 }
 0x3d9   : > { %12264 = vmatpush1.bf16.msra.mxu0 %v13787_v37 }
 0x3da   : > { %12265 = vmatprep.subr.bf16.mxu0 %v13792_v50 }
 0x3db   : > { %12029 = vmatpush1.bf16.msra.mxu1 %v13784_v48 }
 0x3dd   : > { %12266 = vmatpush1.bf16.msra.mxu0 %v13790_v56 }
 0x3de   : > { %12267 = vmatprep.subr.bf16.mxu0 %v13795_v60 }
 0x3e1   : > { %12268 = vmatpush1.bf16.msra.mxu0 %v13793_v54 }
 0x3e2   : > { %12269 = vmatprep.subr.bf16.mxu0 %v13798_v33  ;;  %v11945_v33 = vld [vmem:[%s16205_s6] sm:$0x1] }
 0x3e5   : > { %12270 = vmatpush1.bf16.msra.mxu0 %v13796_v22 }
 0x3e6   : > { %12271 = vmatprep.subr.bf16.mxu0 %v13801_v26 }
 0x3e9   : > { %12272 = vmatpush1.bf16.msra.mxu0 %v13799_v58 }
 0x3ea   : > { %12273 = vmatprep.subr.bf16.mxu0 %v13804_v15 }
 0x3ed   : > { %12274 = vmatpush1.bf16.msra.mxu0 %v13802_v0 }
 0x3ee   : > { %12275 = vmatprep.subr.bf16.mxu0 %v13807_v9 }
 0x3f1   : > { %12276 = vmatpush1.bf16.msra.mxu0 %v13805_v29 }
 0x3f2   : > { %12277 = vmatprep.subr.bf16.mxu0 %v13810_v40 }
 0x3f5   : > { %12278 = vmatpush1.bf16.msra.mxu0 %v13808_v8  ;;  %v13829_v8 = vld [vmem:[%s16208_s9 + $0x90] ss:$8 sps:$4 sm:$0xff]  }
 0x3f6   : > { %12279 = vmatprep.subr.bf16.mxu0 %v13813_v32  ;;  %v13831_v32 = vld [vmem:[%s16208_s9 + $0x94] ss:$8 sps:$4 sm:$0xff]  }
 0x3f9   : > { %12280 = vmatpush2.bf16.msra.mxu0 %v13811_v34  ;;  %v13834_v34 = vld [vmem:[%s16208_s9 + $0x84] ss:$8 sps:$4 sm:$0xff]  }
 0x3fa   : > { %12281 = vmatprep.subr.bf16.mxu0 %v13816_v18  ;;  %v13832_v18 = vld [vmem:[%s16208_s9 + $0x80] ss:$8 sps:$4 sm:$0xff]  }
 0x3fd   : > { %12282 = vmatpush2.bf16.msra.mxu0 %v13814_v7  ;;  %v12003_v7 = vsub.s32 0, %v16320_v45 }
 0x3fe   : > { %12283 = vmatprep.subr.bf16.mxu0 %v13819_v25  ;;  %v11959_v25 = vld [vmem:[%s16207_s8] sm:$0x3] }
 0x401   : > { %12284 = vmatpush2.bf16.msra.mxu0 %v13817_v59  ;;  %v12007_v59 = vsub.s32 1, %v16320_v45 }
 0x402   : > { %12285 = vmatprep.subr.bf16.mxu0 %v13822_v30  ;;  %v12004_v30 = vrot.slane %v11959_v25, %v12003_v7 }
 0x405   : > { %12286 = vmatpush2.bf16.msra.mxu0 %v13820_v31  ;;  %v12008_v31 = vrot.slane %v11959_v25, %v12007_v59 }
 0x406   : > { %12287 = vmatprep.subr.bf16.mxu0 %v13825_v55 }
 0x409   : > { %12288 = vmatpush2.bf16.msra.mxu0 %v13823_v6 }
 0x40a   : > { %12289 = vmatprep.subr.bf16.mxu0 %v13828_v43 }
 0x40d   : > { %12290 = vmatpush2.bf16.msra.mxu0 %v13826_v36 }
 0x40e   : > { %12291 = vmatprep.subr.bf16.mxu0 %v13831_v32 }
 0x411   : > { %12292 = vmatpush2.bf16.msra.mxu0 %v13829_v8 }
 0x412   : > { %12293 = vmatprep.subr.bf16.mxu0 %v13834_v34 }
 0x415   : > { %12294 = vmatpush2.bf16.msra.mxu0 %v13832_v18 }
 0x454   : > { %v11351_v62 = vpop.f32.mrf.mxu1 }
 0x456   : > { %v13591_v46 = vpop.f32.mrf.mxu1 }
 0x458   : > { %v11284_v39 = vpop.f32.mrf.mxu0  ;;  %v11354_v57 = vpop.f32.mrf.mxu1 }
 0x459   : > { %v11352_v49 = vadd.f32 %v11351_v62, %v11284_v39 }
 0x45a   : > { %v13579_v1 = vpop.f32.mrf.mxu0  ;;  %v13592_v11 = vpop.f32.mrf.mxu1 }
 0x45c   : > { %v11287_v3 = vpop.f32.mrf.mxu0 }
 0x45d   : > { %v12091_v3 = vld [vmem:[%s16209_s10] sm:$0x3] }
 0x45e   : > { %v13580_v27 = vpop.f32.mrf.mxu0  ;;  %v12256_v45 = vrot.slane %v12091_v3, %v12003_v7 }
 0x45f   : > { %v12260_v27 = vrot.slane %v12091_v3, %v12007_v59 }
 0x464   : > { %v11514_v47 = vpop.f32.mrf.mxu1 }
 0x466   : > { %v13615_v4 = vpop.f32.mrf.mxu1 }
 0x468   : > { %v11436_v10 = vpop.f32.mrf.mxu0  ;;  %v11517_v17 = vpop.f32.mrf.mxu1 }
 0x469   : > { %v11442_v21 = vadd.f32 %v11436_v10, %v11352_v49 }
 0x46a   : > { %v13603_v51 = vpop.f32.mrf.mxu0  ;;  %v13616_v12 = vpop.f32.mrf.mxu1 }
 0x46b   : > { %v11520_v53 = vadd.f32 %v11514_v47, %v11442_v21 }
 0x46c   : > { %v11439_v23 = vpop.f32.mrf.mxu0 }
 0x46e   : > { %v13604_v41 = vpop.f32.mrf.mxu0 }
 0x474   : > { %v11687_v61 = vpop.f32.mrf.mxu1 }
 0x476   : > { %v13639_v42 = vpop.f32.mrf.mxu1 }
 0x478   : > { %v11601_v52 = vpop.f32.mrf.mxu0  ;;  %v11690_v38 = vpop.f32.mrf.mxu1 }
 0x479   : > { %v11607_v44 = vadd.f32 %v11601_v52, %v11520_v53 }
 0x47a   : > { %v13627_v20 = vpop.f32.mrf.mxu0  ;;  %v13640_v16 = vpop.f32.mrf.mxu1 }
 0x47b   : > { %v11693_v50 = vadd.f32 %v11687_v61, %v11607_v44  ;;  %v16336_v61 = vlaneseq }
 0x47c   : > { %v11604_v35 = vpop.f32.mrf.mxu0 }
 0x47d   : > { %vm12324_vm11 = vcmp.lt.s32.totalorder %v16336_v61, 256 }
 0x47e   : > { %v13628_v5 = vpop.f32.mrf.mxu0 }
 0x484   : > { %v11852_v14 = vpop.f32.mrf.mxu1 }
 0x486   : > { %v13663_v28 = vpop.f32.mrf.mxu1 }
 0x488   : > { %v11765_v63 = vpop.f32.mrf.mxu0  ;;  %v11855_v24 = vpop.f32.mrf.mxu1 }
 0x489   : > { %v11771_v56 = vadd.f32 %v11765_v63, %v11693_v50 }
 0x48a   : > { %v13651_v2 = vpop.f32.mrf.mxu0  ;;  %v13664_v19 = vpop.f32.mrf.mxu1 }
 0x48b   : > { %v11858_v60 = vadd.f32 %v11852_v14, %v11771_v56 }
 0x48c   : > { %v11768_v37 = vpop.f32.mrf.mxu0 }
 0x48e   : > { %v13652_v48 = vpop.f32.mrf.mxu0 }
 0x498   : > { %v11938_v54 = vpop.f32.mrf.mxu0 }
 0x499   : > { %v11944_v22 = vadd.f32 %v11938_v54, %v11858_v60 }
 0x49a   : > { %v13675_v26 = vpop.f32.mrf.mxu0 }
 0x49b   : > { %v11946_v58 = vadd.f32 %v11945_v33, %v11944_v22 }
 0x49c   : > { %v11941_v15 = vpop.f32.mrf.mxu0 }
 0x49d   : > { %vm11947_vm9 = vcmp.ge.f32.partialorder %v11946_v58, 0.0  ;;  %v11948_v0 = vmul.f32 0.01, %v11946_v58 }
 0x49e   : > { %v13676_v9 = vpop.f32.mrf.mxu0 }
 0x49f   : > { %v11949_v29 = vsel %vm11947_vm9, %v11946_v58, %v11948_v0 }
 0x4a0   : > { %v11950_v40 = vpack.c.bf16 %v11949_v29, %v11949_v29 }
 0x4a2   : > { %13213 = vmatmul.mubr.msk.bf16.vlgmr.msra.gmra.mxu1 %vm16335_vm10, %v11950_v40 }
 0x562   : > { %v12048_v55 = vpop.f32.mrf.mxu1 }
 0x563   : > { %v12049_v6 = vadd.f32 %v12048_v55, %v12004_v30 }
 0x564   : > { %v12050_v43 = vpop.f32.mrf.mxu1 }
 0x565   : > { %v12051_v62 = vadd.f32 %v12050_v43, %v12008_v31  ;;  %v12055_v36 = vmax.f32 %v12049_v6, 0.0 }
 0x566   : > { %v12052_v46 = vpop.f32.mrf.mxu1 }
 0x567   : > { %v12056_v39 = vmax.f32 %v12051_v62, 0.0  ;;  %v12057_v11 = vpack.c.bf16 %v12055_v36, %v12055_v36 }
 0x568   : > { %v12053_v57 = vpop.f32.mrf.mxu1 }
 0x569   : > { %v12058_v1 = vpack.c.bf16 %v12056_v39, %v12056_v39 }
 0x56b   : > { %12295 = vmatprep.mubr.bf16.mxu0 %v12058_v1 }
 0x56c   : > { %12296 = vmatmul.mubr.bf16.vlgmr.msra.gmra.mxu0 %v12057_v11 }
 0x62c   : > { %v12297_v47 = vpop.f32.mrf.mxu0 }
 0x62d   : > { %v12298_v10 = vadd.f32 %v12297_v47, %v12256_v45 }
 0x62e   : > { %v12299_v4 = vpop.f32.mrf.mxu0 }
 0x62f   : > { %v12300_v17 = vadd.f32 %v12299_v4, %v12260_v27 }
 0x630   : > { %v12301_v51 = vpop.f32.mrf.mxu0 }
 0x631   : > { %v12306_v12 = vcombine.low %v12298_v10, %v12300_v17 }
 0x632   : > { %v12302_v23 = vpop.f32.mrf.mxu0 }
 0x633   : > { %v12313_v41 = vrot.slane %v12306_v12, %v13947_v13 }
 0x635   : > { %v12320_v42 = vrot.slane %v12313_v41, %v13947_v13 }
 0x637   : > { %12326 = vst.msk [vmem:[%s384_s29] sm:$0x3] %vm12324_vm11, %v12320_v42 }
 0x638 PF: > { %s21_s17 = sadd.s32 1, %s13841_s17  }
 0x639   : > { %p18_p4 = scmp.ge.s32.totalorder %s21_s17, 4  }
 0x63b   :  { %20 = sbr.rel (!%p18_p4) target bundleno = 1 (0x1), region = 187 }

</bundles_post_ra>
